<compile_context>
chip_gen: v5e
topology: v5e:2x2
jax: 0.10.0
libtpu: 0.0.40
codegen_flags: <defaults>
</compile_context>

<pallas_src>
import numpy as np
import jax
import jax.numpy as jnp
from jax import lax
from jax.experimental import pallas as pl
from jax.experimental.pallas import tpu as pltpu


# ----------------------------------------------------------------------------
# Conv tap bookkeeping (host-side, numpy): flat offsets + validity masks for a
# 'same' 3-D cross-correlation on a row-major flattened (H, W, D) volume.
# ----------------------------------------------------------------------------
def _conv_taps(H, W, D, half):
    kk = 2 * half + 1
    xs = np.arange(H)[:, None, None]
    ys = np.arange(W)[None, :, None]
    zs = np.arange(D)[None, None, :]
    masks, offsets = [], []
    for dx in range(kk):
        for dy in range(kk):
            for dz in range(kk):
                ox, oy, oz = dx - half, dy - half, dz - half
                valid = ((xs + ox >= 0) & (xs + ox < H) &
                         (ys + oy >= 0) & (ys + oy < W) &
                         (zs + oz >= 0) & (zs + oz < D))
                masks.append(valid.reshape(-1))
                offsets.append(ox * W * D + oy * D + oz)
    return np.asarray(masks, np.float32), tuple(offsets)


# ----------------------------------------------------------------------------
# Fused Pallas kernel: per batch element b
#   hT (S, 2IK)        = x^T (S, 2IGin) @ Ppk^T          (packed complex SO(3))
#   acc (2OG, S)      += [ Dpk_t @ shift_t(hT)^T ] * mask_t   for each conv tap
#   out_real / out_imag = top / bottom halves of acc
# The spatial shift is a roll along the *sublane* (major) axis of hT; tap
# validity masks (which only depend on the spatial position, not on the
# contracted channel) are applied to the lane-dense matmul output.
# ----------------------------------------------------------------------------
def _make_fused_kernel(offsets, n_out):
    n_taps = len(offsets)

    def kernel(x_ref, p_ref, d_ref, m_ref, or_ref, oi_ref):
        # x_ref : (1, 2*I*Gin, S) bf16   rows = [real (i,g) block ; imag block]
        # p_ref : (2*I*K, 2*I*Gin) bf16  packed SO(3) contraction matrix
        # d_ref : (T, 2*O*Gout, 2*I*K) bf16  packed per-tap combine matrices
        # m_ref : (T, S) f32             per-tap validity masks
        # or_ref/oi_ref : (1, O*Gout, S) f32
        x = x_ref[0]                                              # (2IG, S)
        # hT[s, j] = sum_c Ppk[j, c] * x[c, s]   -> (S, 2IK), f32 accumulate
        hT = lax.dot_general(x, p_ref[...], (((0,), (1,)), ((), ())),
                             preferred_element_type=jnp.float32)
        hTb = hT.astype(jnp.bfloat16)
        S = hTb.shape[0]
        acc = jnp.zeros((2 * n_out, S), jnp.float32)
        for t in range(n_taps):
            off = offsets[t]
            # shifted[s, :] = H[(s + off) mod S, :]; wrap-around positions are
            # zeroed by mask_t below (mask covers all 3 boundary directions).
            sh = jnp.roll(hTb, -off, axis=0) if off else hTb      # (S, 2IK)
            y = lax.dot_general(d_ref[t], sh, (((1,), (1,)), ((), ())),
                                preferred_element_type=jnp.float32)  # (2OG, S)
            acc = acc + y * m_ref[pl.ds(t, 1), :]
        or_ref[0] = acc[:n_out, :]
        oi_ref[0] = acc[n_out:, :]

    return kernel


def fused_forward(xt, Ppk, Dpk, masks, offsets, n_out):
    """xt: (B, 2*I*Gin, S) bf16; returns (out_r, out_i) each (B, O*Gout, S) f32."""
    B, two_ig, S = xt.shape
    two_ik = Ppk.shape[0]
    T = Dpk.shape[0]
    kernel = _make_fused_kernel(offsets, n_out)
    out_r, out_i = pl.pallas_call(
        kernel,
        out_shape=(jax.ShapeDtypeStruct((B, n_out, S), jnp.float32),
                   jax.ShapeDtypeStruct((B, n_out, S), jnp.float32)),
        grid_spec=pltpu.PrefetchScalarGridSpec(
            num_scalar_prefetch=0,
            grid=(B,),
            in_specs=(
                pl.BlockSpec((1, two_ig, S), lambda b: (b, 0, 0)),
                pl.BlockSpec((two_ik, two_ig), lambda b: (0, 0)),
                pl.BlockSpec((T, 2 * n_out, two_ik), lambda b: (0, 0, 0)),
                pl.BlockSpec((T, S), lambda b: (0, 0)),
            ),
            out_specs=(
                pl.BlockSpec((1, n_out, S), lambda b: (b, 0, 0)),
                pl.BlockSpec((1, n_out, S), lambda b: (b, 0, 0)),
            )),
        compiler_params=pltpu.CompilerParams(
            dimension_semantics=("parallel",),
            vmem_limit_bytes=48 * 1024 * 1024),
    )(xt, Ppk, Dpk, masks)
    return out_r, out_i


# ----------------------------------------------------------------------------
# Module-like wrapper with deterministic synthetic parameters/buffers
# ----------------------------------------------------------------------------
class PrototypePallas:
    # TODO(synk): Wigner-D / spherical-Bessel / Lebedev helper functions are not
    # provided with the module; the precomputed buffers (cache, kernel_*, W_*,
    # T_*, so3 weights) are synthesized deterministically with the exact shapes
    # the real __init__ would produce.
    def __init__(self, in_channel=1, out_channel=1, kernel_size=5,
                 sph_bessel_root=3, sph_harm_index=3, wigner_index=3,
                 n_so3_in=208, n_so3_out=112, seed=0):
        self.in_channel = in_channel
        self.out_channel = out_channel
        self.half = (kernel_size - 1) // 2
        kk = 2 * self.half + 1
        self.T = kk ** 3

        l_per_v = np.concatenate(
            [np.full(2 * l + 1, l) for l in range(sph_harm_index + 1)])
        l_per_v = np.tile(l_per_v, sph_bessel_root)                       # (V,)
        b_per_g = np.concatenate(
            [np.full((2 * b + 1) ** 2, b) for b in range(wigner_index + 1)])  # (K,)
        V = int(l_per_v.shape[0])
        K = int(b_per_g.shape[0])
        self.V, self.K = V, K
        self.G_in, self.G_out = n_so3_in, n_so3_out

        ks = jax.random.split(jax.random.PRNGKey(seed), 9)
        self.input_so3_weight = jax.random.uniform(
            ks[0], (n_so3_in,), jnp.float32, 0.5, 1.5)
        self.cache = 0.1 * jax.random.normal(ks[1], (K, n_so3_in, 2), jnp.float32)
        self.kernel_real = 0.1 * jax.random.normal(ks[2], (V, kk, kk, kk), jnp.float32)
        self.kernel_imag = 0.1 * jax.random.normal(ks[3], (V, kk, kk, kk), jnp.float32)
        self.W_real = 0.1 * jax.random.normal(ks[4], (K, K, n_so3_out), jnp.float32)
        self.W_imag = 0.1 * jax.random.normal(ks[5], (K, K, n_so3_out), jnp.float32)
        self.T_real = 0.1 * jax.random.normal(ks[6], (V, V, n_so3_out), jnp.float32)
        self.T_imag = 0.1 * jax.random.normal(ks[7], (V, V, n_so3_out), jnp.float32)

        w = jax.random.normal(ks[8], (in_channel, out_channel, K, V), jnp.float32)
        w = w * jnp.sqrt(2.0 * jnp.asarray(l_per_v, jnp.float32) + 1.0).reshape(1, 1, 1, -1)
        w = w * jnp.sqrt(2.0 * jnp.asarray(b_per_g, jnp.float32) + 1.0).reshape(1, 1, -1, 1)
        w = w / np.sqrt(in_channel)
        self.weights = w

        # Parameter-only precompute, hoisted out of the forward pass.
        self.Ppk, self.Dpk = self._pack_params()
        self._fwd = jax.jit(self._forward)

    def _pack_params(self):
        hp = lax.Precision.HIGHEST
        I, O = self.in_channel, self.out_channel
        K, V, Gout, T = self.K, self.V, self.G_out, self.T

        # Packed SO(3) contraction matrix:  [Hr; Hi] = Ppk @ [Xr; Xi]
        cr = self.cache[:, :, 0] * self.input_so3_weight[None, :]    # (K, Gin)
        ci = self.cache[:, :, 1] * self.input_so3_weight[None, :]
        eye_i = jnp.eye(I, dtype=jnp.float32)
        bd = lambda a: jnp.kron(eye_i, a)                            # block-diag over i
        Ppk = jnp.concatenate(
            [jnp.concatenate([bd(cr), bd(ci)], axis=1),
             jnp.concatenate([-bd(ci), bd(cr)], axis=1)], axis=0)     # (2IK, 2IGin)

        # C = weights (x) W (x) T  (complex), then fold the conv kernel per tap:
        #   D_t[o,g,i,K] = sum_V C[i,o,K,V,g] * ker[V,t]   (complex)
        Cr = (jnp.einsum('iokv,kKg,vVg->ioKVg', self.weights, self.W_real, self.T_real, precision=hp)
              - jnp.einsum('iokv,kKg,vVg->ioKVg', self.weights, self.W_imag, self.T_imag, precision=hp))
        Ci = (jnp.einsum('iokv,kKg,vVg->ioKVg', self.weights, self.W_real, self.T_imag, precision=hp)
              + jnp.einsum('iokv,kKg,vVg->ioKVg', self.weights, self.W_imag, self.T_real, precision=hp))
        kr = self.kernel_real.reshape(V, T)
        ki = self.kernel_imag.reshape(V, T)
        Dr = (jnp.einsum('ioKVg,Vt->togiK', Cr, kr, precision=hp)
              - jnp.einsum('ioKVg,Vt->togiK', Ci, ki, precision=hp))
        Di = (jnp.einsum('ioKVg,Vt->togiK', Cr, ki, precision=hp)
              + jnp.einsum('ioKVg,Vt->togiK', Ci, kr, precision=hp))
        Dr = Dr.reshape(T, O * Gout, I * K)
        Di = Di.reshape(T, O * Gout, I * K)
        # Packed per-tap combine:  [Or; Oi] += [[Dr, -Di], [Di, Dr]] @ [Hr; Hi]
        Dpk = jnp.concatenate(
            [jnp.concatenate([Dr, -Di], axis=2),
             jnp.concatenate([Di, Dr], axis=2)], axis=1)              # (T, 2OG, 2IK)
        return Ppk.astype(jnp.bfloat16), Dpk.astype(jnp.bfloat16)

    def _forward(self, x):
        B, I, Gin, H, Wd, D, _ = x.shape
        S = H * Wd * D
        n_out = self.out_channel * self.G_out
        masks_np, offsets = _conv_taps(H, Wd, D, self.half)
        masks = jnp.asarray(masks_np, jnp.float32)                    # (T, S)
        # (B, I, Gin, H, W, D, 2) -> (B, [c, i, g], S)  -- the single wrapper
        # transpose/cast; everything downstream stays in this layout.
        xt = jnp.moveaxis(x, -1, 1).reshape(B, 2 * I * Gin, S).astype(jnp.bfloat16)
        out_r, out_i = fused_forward(xt, self.Ppk, self.Dpk, masks, offsets, n_out)
        out_r = out_r.reshape(B, self.out_channel, self.G_out, H, Wd, D)
        out_i = out_i.reshape(B, self.out_channel, self.G_out, H, Wd, D)
        return jnp.stack([out_r, out_i], axis=-1)

    def __call__(self, batch_images):
        return self._fwd(batch_images)


# ----------------------------------------------------------------------------
# Pure-JAX reference (mirrors Prototype.standard_forward literally)
# ----------------------------------------------------------------------------
def reference_forward(x, cache, so3_w, ker_r, ker_i, W_r, W_i, T_r, T_i,
                      weights, half):
    B, I, Gin, H, Wd, D, _ = x.shape
    K = cache.shape[0]
    V = ker_r.shape[0]
    kk = 2 * half + 1
    hp = lax.Precision.HIGHEST
    x_r, x_i = x[..., 0], x[..., 1]
    cr = cache[:, :, 0] * so3_w[None, :]
    ci = cache[:, :, 1] * so3_w[None, :]
    ein = lambda a, b: jnp.einsum('bighwd,kg->bikhwd', a, b, precision=hp)
    H_r = ein(x_r, cr) + ein(x_i, ci)
    H_i = -ein(x_r, ci) + ein(x_i, cr)

    def conv3d(inp, ker):
        return lax.conv_general_dilated(
            inp.reshape(-1, 1, H, Wd, D), ker.reshape(V, 1, kk, kk, kk),
            window_strides=(1, 1, 1), padding='SAME',
            dimension_numbers=('NCDHW', 'OIDHW', 'NCDHW'), precision=hp)

    Hr_f = H_r.reshape(-1, H, Wd, D)
    Hi_f = H_i.reshape(-1, H, Wd, D)
    G_r = (conv3d(Hr_f, ker_r) - conv3d(Hi_f, ker_i)).reshape(B, I, K, V, H, Wd, D)
    G_i = (conv3d(Hr_f, ker_i) + conv3d(Hi_f, ker_r)).reshape(B, I, K, V, H, Wd, D)

    def comb(Wx, Ty):
        o = jnp.einsum('iokv,kKg->ioKvg', weights, Wx, precision=hp)
        return jnp.einsum('ioKvg,vVg->ioKVg', o, Ty, precision=hp)

    e = lambda C, G: jnp.einsum('ioKVg,biKVhwd->boghwd', C, G, precision=hp)
    out_real = (e(comb(W_r, T_r), G_r) - e(comb(W_i, T_i), G_r)
                - e(comb(W_i, T_r), G_i) - e(comb(W_r, T_i), G_i))
    out_imag = (e(comb(W_r, T_r), G_i) + e(comb(W_r, T_i), G_r)
                + e(comb(W_i, T_r), G_r) - e(comb(W_i, T_i), G_i))
    return jnp.stack([out_real, out_imag], axis=-1)


if __name__ == "__main__":
    # Small, shape-consistent configuration:
    #   V = sph_bessel_root * (sph_harm_index+1)^2 = 2*4 = 8
    #   K = sum_b (2b+1)^2, b<=wigner_index        = 10
    B, I, O = 2, 1, 2
    H = W = D = 8
    model = PrototypePallas(in_channel=I, out_channel=O, kernel_size=3,
                            sph_bessel_root=2, sph_harm_index=1, wigner_index=1,
                            n_so3_in=16, n_so3_out=8, seed=0)

    x = jax.random.normal(jax.random.PRNGKey(0),
                          (B, I, model.G_in, H, W, D, 2), jnp.float32)

    out = jax.block_until_ready(model(x))
    assert out.shape == (B, O, model.G_out, H, W, D, 2), out.shape

    ref = jax.block_until_ready(
        reference_forward(x, model.cache, model.input_so3_weight,
                          model.kernel_real, model.kernel_imag,
                          model.W_real, model.W_imag,
                          model.T_real, model.T_imag,
                          model.weights, model.half))
    err = float(jnp.max(jnp.abs(out - ref)))
    scale = float(jnp.max(jnp.abs(ref))) + 1e-6
    if err > 3e-2 * scale:
        raise AssertionError(f"mismatch: max|diff|={err}, max|ref|={scale}")
    print("KERNEL_OK")
</pallas_src>

<mosaic_0001>
module attributes {stable_mosaic.version = 11 : i64} {
  func.func @kernel(%arg0: i32, %arg1: memref<1x32x512xbf16, #tpu.memory_space<vmem>>, %arg2: memref<20x32xbf16, #tpu.memory_space<vmem>>, %arg3: memref<27x32x20xbf16, #tpu.memory_space<vmem>>, %arg4: memref<27x512xf32, #tpu.memory_space<vmem>>, %arg5: memref<1x16x512xf32, #tpu.memory_space<vmem>>, %arg6: memref<1x16x512xf32, #tpu.memory_space<vmem>>) attributes {dimension_semantics = [#tpu.dimension_semantics<parallel>], iteration_bounds = array<i64: 2>, scalar_prefetch = 0 : i64, scratch_operands = 0 : i64, tpu.core_type = #tpu.core_type<tc>, window_params = [{transform_indices = @transform_0, window_bounds = array<i64: 1, 32, 512>}, {pipeline_mode = #tpu.pipeline_mode<synchronous>, transform_indices = @transform_1, window_bounds = array<i64: 20, 32>}, {pipeline_mode = #tpu.pipeline_mode<synchronous>, transform_indices = @transform_2, window_bounds = array<i64: 27, 32, 20>}, {pipeline_mode = #tpu.pipeline_mode<synchronous>, transform_indices = @transform_3, window_bounds = array<i64: 27, 512>}, {transform_indices = @transform_4, window_bounds = array<i64: 1, 16, 512>}, {transform_indices = @transform_5, window_bounds = array<i64: 1, 16, 512>}]} {
    %c0 = arith.constant 0 : index
    %c0_0 = arith.constant 0 : index
    %c0_1 = arith.constant 0 : index
    %0 = vector.load %arg1[%c0, %c0_0, %c0_1] : memref<1x32x512xbf16, #tpu.memory_space<vmem>>, vector<1x32x512xbf16>
    %1 = vector.shape_cast %0 : vector<1x32x512xbf16> to vector<32x512xbf16>
    %c0_2 = arith.constant 0 : index
    %c0_3 = arith.constant 0 : index
    %2 = vector.load %arg2[%c0_2, %c0_3] : memref<20x32xbf16, #tpu.memory_space<vmem>>, vector<20x32xbf16>
    %cst = arith.constant dense<0.000000e+00> : vector<512x20xf32>
    %3 = tpu.matmul %1, %2, %cst {dimension_numbers = #tpu.dot_dimension_numbers<[0], [1], [1], [0], [0, 1, 1, 0], [], []>} : vector<32x512xbf16>, vector<20x32xbf16>, vector<512x20xf32> -> vector<512x20xf32>
    %4 = arith.truncf %3 : vector<512x20xf32> to vector<512x20xbf16>
    %cst_4 = arith.constant 0.000000e+00 : f32
    %5 = vector.broadcast %cst_4 : f32 to vector<32x512xf32>
    %6 = vector.extract_strided_slice %4 {offsets = [439, 0], sizes = [73, 20], strides = [1, 1]} : vector<512x20xbf16> to vector<73x20xbf16>
    %7 = vector.extract_strided_slice %4 {offsets = [0, 0], sizes = [439, 20], strides = [1, 1]} : vector<512x20xbf16> to vector<439x20xbf16>
    %8 = tpu.concatenate %6, %7 in 0 : vector<73x20xbf16>, vector<439x20xbf16> -> vector<512x20xbf16>
    %c0_5 = arith.constant 0 : index
    %c0_6 = arith.constant 0 : index
    %c0_7 = arith.constant 0 : index
    %9 = vector.load %arg3[%c0_5, %c0_6, %c0_7] : memref<27x32x20xbf16, #tpu.memory_space<vmem>>, vector<1x32x20xbf16>
    %10 = vector.shape_cast %9 : vector<1x32x20xbf16> to vector<32x20xbf16>
    %cst_8 = arith.constant dense<0.000000e+00> : vector<32x512xf32>
    %11 = tpu.matmul %10, %8, %cst_8 {dimension_numbers = #tpu.dot_dimension_numbers<[1], [1], [0], [0], [0, 0, 1, 0], [], []>} : vector<32x20xbf16>, vector<512x20xbf16>, vector<32x512xf32> -> vector<32x512xf32>
    %c0_9 = arith.constant 0 : index
    %c0_10 = arith.constant 0 : index
    %12 = vector.load %arg4[%c0_9, %c0_10] : memref<27x512xf32, #tpu.memory_space<vmem>>, vector<1x512xf32>
    %13 = vector.broadcast %12 : vector<1x512xf32> to vector<32x512xf32>
    %14 = arith.mulf %11, %13 : vector<32x512xf32>
    %15 = arith.addf %5, %14 : vector<32x512xf32>
    %16 = vector.extract_strided_slice %4 {offsets = [440, 0], sizes = [72, 20], strides = [1, 1]} : vector<512x20xbf16> to vector<72x20xbf16>
    %17 = vector.extract_strided_slice %4 {offsets = [0, 0], sizes = [440, 20], strides = [1, 1]} : vector<512x20xbf16> to vector<440x20xbf16>
    %18 = tpu.concatenate %16, %17 in 0 : vector<72x20xbf16>, vector<440x20xbf16> -> vector<512x20xbf16>
    %c1 = arith.constant 1 : index
    %c0_11 = arith.constant 0 : index
    %c0_12 = arith.constant 0 : index
    %19 = vector.load %arg3[%c1, %c0_11, %c0_12] : memref<27x32x20xbf16, #tpu.memory_space<vmem>>, vector<1x32x20xbf16>
    %20 = vector.shape_cast %19 : vector<1x32x20xbf16> to vector<32x20xbf16>
    %cst_13 = arith.constant dense<0.000000e+00> : vector<32x512xf32>
    %21 = tpu.matmul %20, %18, %cst_13 {dimension_numbers = #tpu.dot_dimension_numbers<[1], [1], [0], [0], [0, 0, 1, 0], [], []>} : vector<32x20xbf16>, vector<512x20xbf16>, vector<32x512xf32> -> vector<32x512xf32>
    %c1_14 = arith.constant 1 : index
    %c0_15 = arith.constant 0 : index
    %22 = vector.load %arg4[%c1_14, %c0_15] : memref<27x512xf32, #tpu.memory_space<vmem>>, vector<1x512xf32>
    %23 = vector.broadcast %22 : vector<1x512xf32> to vector<32x512xf32>
    %24 = arith.mulf %21, %23 : vector<32x512xf32>
    %25 = arith.addf %15, %24 : vector<32x512xf32>
    %26 = vector.extract_strided_slice %4 {offsets = [441, 0], sizes = [71, 20], strides = [1, 1]} : vector<512x20xbf16> to vector<71x20xbf16>
    %27 = vector.extract_strided_slice %4 {offsets = [0, 0], sizes = [441, 20], strides = [1, 1]} : vector<512x20xbf16> to vector<441x20xbf16>
    %28 = tpu.concatenate %26, %27 in 0 : vector<71x20xbf16>, vector<441x20xbf16> -> vector<512x20xbf16>
    %c2 = arith.constant 2 : index
    %c0_16 = arith.constant 0 : index
    %c0_17 = arith.constant 0 : index
    %29 = vector.load %arg3[%c2, %c0_16, %c0_17] : memref<27x32x20xbf16, #tpu.memory_space<vmem>>, vector<1x32x20xbf16>
    %30 = vector.shape_cast %29 : vector<1x32x20xbf16> to vector<32x20xbf16>
    %cst_18 = arith.constant dense<0.000000e+00> : vector<32x512xf32>
    %31 = tpu.matmul %30, %28, %cst_18 {dimension_numbers = #tpu.dot_dimension_numbers<[1], [1], [0], [0], [0, 0, 1, 0], [], []>} : vector<32x20xbf16>, vector<512x20xbf16>, vector<32x512xf32> -> vector<32x512xf32>
    %c2_19 = arith.constant 2 : index
    %c0_20 = arith.constant 0 : index
    %32 = vector.load %arg4[%c2_19, %c0_20] : memref<27x512xf32, #tpu.memory_space<vmem>>, vector<1x512xf32>
    %33 = vector.broadcast %32 : vector<1x512xf32> to vector<32x512xf32>
    %34 = arith.mulf %31, %33 : vector<32x512xf32>
    %35 = arith.addf %25, %34 : vector<32x512xf32>
    %36 = vector.extract_strided_slice %4 {offsets = [447, 0], sizes = [65, 20], strides = [1, 1]} : vector<512x20xbf16> to vector<65x20xbf16>
    %37 = vector.extract_strided_slice %4 {offsets = [0, 0], sizes = [447, 20], strides = [1, 1]} : vector<512x20xbf16> to vector<447x20xbf16>
    %38 = tpu.concatenate %36, %37 in 0 : vector<65x20xbf16>, vector<447x20xbf16> -> vector<512x20xbf16>
    %c3 = arith.constant 3 : index
    %c0_21 = arith.constant 0 : index
    %c0_22 = arith.constant 0 : index
    %39 = vector.load %arg3[%c3, %c0_21, %c0_22] : memref<27x32x20xbf16, #tpu.memory_space<vmem>>, vector<1x32x20xbf16>
    %40 = vector.shape_cast %39 : vector<1x32x20xbf16> to vector<32x20xbf16>
    %cst_23 = arith.constant dense<0.000000e+00> : vector<32x512xf32>
    %41 = tpu.matmul %40, %38, %cst_23 {dimension_numbers = #tpu.dot_dimension_numbers<[1], [1], [0], [0], [0, 0, 1, 0], [], []>} : vector<32x20xbf16>, vector<512x20xbf16>, vector<32x512xf32> -> vector<32x512xf32>
    %c3_24 = arith.constant 3 : index
    %c0_25 = arith.constant 0 : index
    %42 = vector.load %arg4[%c3_24, %c0_25] : memref<27x512xf32, #tpu.memory_space<vmem>>, vector<1x512xf32>
    %43 = vector.broadcast %42 : vector<1x512xf32> to vector<32x512xf32>
    %44 = arith.mulf %41, %43 : vector<32x512xf32>
    %45 = arith.addf %35, %44 : vector<32x512xf32>
    %46 = vector.extract_strided_slice %4 {offsets = [448, 0], sizes = [64, 20], strides = [1, 1]} : vector<512x20xbf16> to vector<64x20xbf16>
    %47 = vector.extract_strided_slice %4 {offsets = [0, 0], sizes = [448, 20], strides = [1, 1]} : vector<512x20xbf16> to vector<448x20xbf16>
    %48 = tpu.concatenate %46, %47 in 0 : vector<64x20xbf16>, vector<448x20xbf16> -> vector<512x20xbf16>
    %c4 = arith.constant 4 : index
    %c0_26 = arith.constant 0 : index
    %c0_27 = arith.constant 0 : index
    %49 = vector.load %arg3[%c4, %c0_26, %c0_27] : memref<27x32x20xbf16, #tpu.memory_space<vmem>>, vector<1x32x20xbf16>
    %50 = vector.shape_cast %49 : vector<1x32x20xbf16> to vector<32x20xbf16>
    %cst_28 = arith.constant dense<0.000000e+00> : vector<32x512xf32>
    %51 = tpu.matmul %50, %48, %cst_28 {dimension_numbers = #tpu.dot_dimension_numbers<[1], [1], [0], [0], [0, 0, 1, 0], [], []>} : vector<32x20xbf16>, vector<512x20xbf16>, vector<32x512xf32> -> vector<32x512xf32>
    %c4_29 = arith.constant 4 : index
    %c0_30 = arith.constant 0 : index
    %52 = vector.load %arg4[%c4_29, %c0_30] : memref<27x512xf32, #tpu.memory_space<vmem>>, vector<1x512xf32>
    %53 = vector.broadcast %52 : vector<1x512xf32> to vector<32x512xf32>
    %54 = arith.mulf %51, %53 : vector<32x512xf32>
    %55 = arith.addf %45, %54 : vector<32x512xf32>
    %56 = vector.extract_strided_slice %4 {offsets = [449, 0], sizes = [63, 20], strides = [1, 1]} : vector<512x20xbf16> to vector<63x20xbf16>
    %57 = vector.extract_strided_slice %4 {offsets = [0, 0], sizes = [449, 20], strides = [1, 1]} : vector<512x20xbf16> to vector<449x20xbf16>
    %58 = tpu.concatenate %56, %57 in 0 : vector<63x20xbf16>, vector<449x20xbf16> -> vector<512x20xbf16>
    %c5 = arith.constant 5 : index
    %c0_31 = arith.constant 0 : index
    %c0_32 = arith.constant 0 : index
    %59 = vector.load %arg3[%c5, %c0_31, %c0_32] : memref<27x32x20xbf16, #tpu.memory_space<vmem>>, vector<1x32x20xbf16>
    %60 = vector.shape_cast %59 : vector<1x32x20xbf16> to vector<32x20xbf16>
    %cst_33 = arith.constant dense<0.000000e+00> : vector<32x512xf32>
    %61 = tpu.matmul %60, %58, %cst_33 {dimension_numbers = #tpu.dot_dimension_numbers<[1], [1], [0], [0], [0, 0, 1, 0], [], []>} : vector<32x20xbf16>, vector<512x20xbf16>, vector<32x512xf32> -> vector<32x512xf32>
    %c5_34 = arith.constant 5 : index
    %c0_35 = arith.constant 0 : index
    %62 = vector.load %arg4[%c5_34, %c0_35] : memref<27x512xf32, #tpu.memory_space<vmem>>, vector<1x512xf32>
    %63 = vector.broadcast %62 : vector<1x512xf32> to vector<32x512xf32>
    %64 = arith.mulf %61, %63 : vector<32x512xf32>
    %65 = arith.addf %55, %64 : vector<32x512xf32>
    %66 = vector.extract_strided_slice %4 {offsets = [455, 0], sizes = [57, 20], strides = [1, 1]} : vector<512x20xbf16> to vector<57x20xbf16>
    %67 = vector.extract_strided_slice %4 {offsets = [0, 0], sizes = [455, 20], strides = [1, 1]} : vector<512x20xbf16> to vector<455x20xbf16>
    %68 = tpu.concatenate %66, %67 in 0 : vector<57x20xbf16>, vector<455x20xbf16> -> vector<512x20xbf16>
    %c6 = arith.constant 6 : index
    %c0_36 = arith.constant 0 : index
    %c0_37 = arith.constant 0 : index
    %69 = vector.load %arg3[%c6, %c0_36, %c0_37] : memref<27x32x20xbf16, #tpu.memory_space<vmem>>, vector<1x32x20xbf16>
    %70 = vector.shape_cast %69 : vector<1x32x20xbf16> to vector<32x20xbf16>
    %cst_38 = arith.constant dense<0.000000e+00> : vector<32x512xf32>
    %71 = tpu.matmul %70, %68, %cst_38 {dimension_numbers = #tpu.dot_dimension_numbers<[1], [1], [0], [0], [0, 0, 1, 0], [], []>} : vector<32x20xbf16>, vector<512x20xbf16>, vector<32x512xf32> -> vector<32x512xf32>
    %c6_39 = arith.constant 6 : index
    %c0_40 = arith.constant 0 : index
    %72 = vector.load %arg4[%c6_39, %c0_40] : memref<27x512xf32, #tpu.memory_space<vmem>>, vector<1x512xf32>
    %73 = vector.broadcast %72 : vector<1x512xf32> to vector<32x512xf32>
    %74 = arith.mulf %71, %73 : vector<32x512xf32>
    %75 = arith.addf %65, %74 : vector<32x512xf32>
    %76 = vector.extract_strided_slice %4 {offsets = [456, 0], sizes = [56, 20], strides = [1, 1]} : vector<512x20xbf16> to vector<56x20xbf16>
    %77 = vector.extract_strided_slice %4 {offsets = [0, 0], sizes = [456, 20], strides = [1, 1]} : vector<512x20xbf16> to vector<456x20xbf16>
    %78 = tpu.concatenate %76, %77 in 0 : vector<56x20xbf16>, vector<456x20xbf16> -> vector<512x20xbf16>
    %c7 = arith.constant 7 : index
    %c0_41 = arith.constant 0 : index
    %c0_42 = arith.constant 0 : index
    %79 = vector.load %arg3[%c7, %c0_41, %c0_42] : memref<27x32x20xbf16, #tpu.memory_space<vmem>>, vector<1x32x20xbf16>
    %80 = vector.shape_cast %79 : vector<1x32x20xbf16> to vector<32x20xbf16>
    %cst_43 = arith.constant dense<0.000000e+00> : vector<32x512xf32>
    %81 = tpu.matmul %80, %78, %cst_43 {dimension_numbers = #tpu.dot_dimension_numbers<[1], [1], [0], [0], [0, 0, 1, 0], [], []>} : vector<32x20xbf16>, vector<512x20xbf16>, vector<32x512xf32> -> vector<32x512xf32>
    %c7_44 = arith.constant 7 : index
    %c0_45 = arith.constant 0 : index
    %82 = vector.load %arg4[%c7_44, %c0_45] : memref<27x512xf32, #tpu.memory_space<vmem>>, vector<1x512xf32>
    %83 = vector.broadcast %82 : vector<1x512xf32> to vector<32x512xf32>
    %84 = arith.mulf %81, %83 : vector<32x512xf32>
    %85 = arith.addf %75, %84 : vector<32x512xf32>
    %86 = vector.extract_strided_slice %4 {offsets = [457, 0], sizes = [55, 20], strides = [1, 1]} : vector<512x20xbf16> to vector<55x20xbf16>
    %87 = vector.extract_strided_slice %4 {offsets = [0, 0], sizes = [457, 20], strides = [1, 1]} : vector<512x20xbf16> to vector<457x20xbf16>
    %88 = tpu.concatenate %86, %87 in 0 : vector<55x20xbf16>, vector<457x20xbf16> -> vector<512x20xbf16>
    %c8 = arith.constant 8 : index
    %c0_46 = arith.constant 0 : index
    %c0_47 = arith.constant 0 : index
    %89 = vector.load %arg3[%c8, %c0_46, %c0_47] : memref<27x32x20xbf16, #tpu.memory_space<vmem>>, vector<1x32x20xbf16>
    %90 = vector.shape_cast %89 : vector<1x32x20xbf16> to vector<32x20xbf16>
    %cst_48 = arith.constant dense<0.000000e+00> : vector<32x512xf32>
    %91 = tpu.matmul %90, %88, %cst_48 {dimension_numbers = #tpu.dot_dimension_numbers<[1], [1], [0], [0], [0, 0, 1, 0], [], []>} : vector<32x20xbf16>, vector<512x20xbf16>, vector<32x512xf32> -> vector<32x512xf32>
    %c8_49 = arith.constant 8 : index
    %c0_50 = arith.constant 0 : index
    %92 = vector.load %arg4[%c8_49, %c0_50] : memref<27x512xf32, #tpu.memory_space<vmem>>, vector<1x512xf32>
    %93 = vector.broadcast %92 : vector<1x512xf32> to vector<32x512xf32>
    %94 = arith.mulf %91, %93 : vector<32x512xf32>
    %95 = arith.addf %85, %94 : vector<32x512xf32>
    %96 = vector.extract_strided_slice %4 {offsets = [503, 0], sizes = [9, 20], strides = [1, 1]} : vector<512x20xbf16> to vector<9x20xbf16>
    %97 = vector.extract_strided_slice %4 {offsets = [0, 0], sizes = [503, 20], strides = [1, 1]} : vector<512x20xbf16> to vector<503x20xbf16>
    %98 = tpu.concatenate %96, %97 in 0 : vector<9x20xbf16>, vector<503x20xbf16> -> vector<512x20xbf16>
    %c9 = arith.constant 9 : index
    %c0_51 = arith.constant 0 : index
    %c0_52 = arith.constant 0 : index
    %99 = vector.load %arg3[%c9, %c0_51, %c0_52] : memref<27x32x20xbf16, #tpu.memory_space<vmem>>, vector<1x32x20xbf16>
    %100 = vector.shape_cast %99 : vector<1x32x20xbf16> to vector<32x20xbf16>
    %cst_53 = arith.constant dense<0.000000e+00> : vector<32x512xf32>
    %101 = tpu.matmul %100, %98, %cst_53 {dimension_numbers = #tpu.dot_dimension_numbers<[1], [1], [0], [0], [0, 0, 1, 0], [], []>} : vector<32x20xbf16>, vector<512x20xbf16>, vector<32x512xf32> -> vector<32x512xf32>
    %c9_54 = arith.constant 9 : index
    %c0_55 = arith.constant 0 : index
    %102 = vector.load %arg4[%c9_54, %c0_55] : memref<27x512xf32, #tpu.memory_space<vmem>>, vector<1x512xf32>
    %103 = vector.broadcast %102 : vector<1x512xf32> to vector<32x512xf32>
    %104 = arith.mulf %101, %103 : vector<32x512xf32>
    %105 = arith.addf %95, %104 : vector<32x512xf32>
    %106 = vector.extract_strided_slice %4 {offsets = [504, 0], sizes = [8, 20], strides = [1, 1]} : vector<512x20xbf16> to vector<8x20xbf16>
    %107 = vector.extract_strided_slice %4 {offsets = [0, 0], sizes = [504, 20], strides = [1, 1]} : vector<512x20xbf16> to vector<504x20xbf16>
    %108 = tpu.concatenate %106, %107 in 0 : vector<8x20xbf16>, vector<504x20xbf16> -> vector<512x20xbf16>
    %c10 = arith.constant 10 : index
    %c0_56 = arith.constant 0 : index
    %c0_57 = arith.constant 0 : index
    %109 = vector.load %arg3[%c10, %c0_56, %c0_57] : memref<27x32x20xbf16, #tpu.memory_space<vmem>>, vector<1x32x20xbf16>
    %110 = vector.shape_cast %109 : vector<1x32x20xbf16> to vector<32x20xbf16>
    %cst_58 = arith.constant dense<0.000000e+00> : vector<32x512xf32>
    %111 = tpu.matmul %110, %108, %cst_58 {dimension_numbers = #tpu.dot_dimension_numbers<[1], [1], [0], [0], [0, 0, 1, 0], [], []>} : vector<32x20xbf16>, vector<512x20xbf16>, vector<32x512xf32> -> vector<32x512xf32>
    %c10_59 = arith.constant 10 : index
    %c0_60 = arith.constant 0 : index
    %112 = vector.load %arg4[%c10_59, %c0_60] : memref<27x512xf32, #tpu.memory_space<vmem>>, vector<1x512xf32>
    %113 = vector.broadcast %112 : vector<1x512xf32> to vector<32x512xf32>
    %114 = arith.mulf %111, %113 : vector<32x512xf32>
    %115 = arith.addf %105, %114 : vector<32x512xf32>
    %116 = vector.extract_strided_slice %4 {offsets = [505, 0], sizes = [7, 20], strides = [1, 1]} : vector<512x20xbf16> to vector<7x20xbf16>
    %117 = vector.extract_strided_slice %4 {offsets = [0, 0], sizes = [505, 20], strides = [1, 1]} : vector<512x20xbf16> to vector<505x20xbf16>
    %118 = tpu.concatenate %116, %117 in 0 : vector<7x20xbf16>, vector<505x20xbf16> -> vector<512x20xbf16>
    %c11 = arith.constant 11 : index
    %c0_61 = arith.constant 0 : index
    %c0_62 = arith.constant 0 : index
    %119 = vector.load %arg3[%c11, %c0_61, %c0_62] : memref<27x32x20xbf16, #tpu.memory_space<vmem>>, vector<1x32x20xbf16>
    %120 = vector.shape_cast %119 : vector<1x32x20xbf16> to vector<32x20xbf16>
    %cst_63 = arith.constant dense<0.000000e+00> : vector<32x512xf32>
    %121 = tpu.matmul %120, %118, %cst_63 {dimension_numbers = #tpu.dot_dimension_numbers<[1], [1], [0], [0], [0, 0, 1, 0], [], []>} : vector<32x20xbf16>, vector<512x20xbf16>, vector<32x512xf32> -> vector<32x512xf32>
    %c11_64 = arith.constant 11 : index
    %c0_65 = arith.constant 0 : index
    %122 = vector.load %arg4[%c11_64, %c0_65] : memref<27x512xf32, #tpu.memory_space<vmem>>, vector<1x512xf32>
    %123 = vector.broadcast %122 : vector<1x512xf32> to vector<32x512xf32>
    %124 = arith.mulf %121, %123 : vector<32x512xf32>
    %125 = arith.addf %115, %124 : vector<32x512xf32>
    %126 = vector.extract_strided_slice %4 {offsets = [511, 0], sizes = [1, 20], strides = [1, 1]} : vector<512x20xbf16> to vector<1x20xbf16>
    %127 = vector.extract_strided_slice %4 {offsets = [0, 0], sizes = [511, 20], strides = [1, 1]} : vector<512x20xbf16> to vector<511x20xbf16>
    %128 = tpu.concatenate %126, %127 in 0 : vector<1x20xbf16>, vector<511x20xbf16> -> vector<512x20xbf16>
    %c12 = arith.constant 12 : index
    %c0_66 = arith.constant 0 : index
    %c0_67 = arith.constant 0 : index
    %129 = vector.load %arg3[%c12, %c0_66, %c0_67] : memref<27x32x20xbf16, #tpu.memory_space<vmem>>, vector<1x32x20xbf16>
    %130 = vector.shape_cast %129 : vector<1x32x20xbf16> to vector<32x20xbf16>
    %cst_68 = arith.constant dense<0.000000e+00> : vector<32x512xf32>
    %131 = tpu.matmul %130, %128, %cst_68 {dimension_numbers = #tpu.dot_dimension_numbers<[1], [1], [0], [0], [0, 0, 1, 0], [], []>} : vector<32x20xbf16>, vector<512x20xbf16>, vector<32x512xf32> -> vector<32x512xf32>
    %c12_69 = arith.constant 12 : index
    %c0_70 = arith.constant 0 : index
    %132 = vector.load %arg4[%c12_69, %c0_70] : memref<27x512xf32, #tpu.memory_space<vmem>>, vector<1x512xf32>
    %133 = vector.broadcast %132 : vector<1x512xf32> to vector<32x512xf32>
    %134 = arith.mulf %131, %133 : vector<32x512xf32>
    %135 = arith.addf %125, %134 : vector<32x512xf32>
    %c13 = arith.constant 13 : index
    %c0_71 = arith.constant 0 : index
    %c0_72 = arith.constant 0 : index
    %136 = vector.load %arg3[%c13, %c0_71, %c0_72] : memref<27x32x20xbf16, #tpu.memory_space<vmem>>, vector<1x32x20xbf16>
    %137 = vector.shape_cast %136 : vector<1x32x20xbf16> to vector<32x20xbf16>
    %cst_73 = arith.constant dense<0.000000e+00> : vector<32x512xf32>
    %138 = tpu.matmul %137, %4, %cst_73 {dimension_numbers = #tpu.dot_dimension_numbers<[1], [1], [0], [0], [0, 0, 1, 0], [], []>} : vector<32x20xbf16>, vector<512x20xbf16>, vector<32x512xf32> -> vector<32x512xf32>
    %c13_74 = arith.constant 13 : index
    %c0_75 = arith.constant 0 : index
    %139 = vector.load %arg4[%c13_74, %c0_75] : memref<27x512xf32, #tpu.memory_space<vmem>>, vector<1x512xf32>
    %140 = vector.broadcast %139 : vector<1x512xf32> to vector<32x512xf32>
    %141 = arith.mulf %138, %140 : vector<32x512xf32>
    %142 = arith.addf %135, %141 : vector<32x512xf32>
    %143 = vector.extract_strided_slice %4 {offsets = [1, 0], sizes = [511, 20], strides = [1, 1]} : vector<512x20xbf16> to vector<511x20xbf16>
    %144 = vector.extract_strided_slice %4 {offsets = [0, 0], sizes = [1, 20], strides = [1, 1]} : vector<512x20xbf16> to vector<1x20xbf16>
    %145 = tpu.concatenate %143, %144 in 0 : vector<511x20xbf16>, vector<1x20xbf16> -> vector<512x20xbf16>
    %c14 = arith.constant 14 : index
    %c0_76 = arith.constant 0 : index
    %c0_77 = arith.constant 0 : index
    %146 = vector.load %arg3[%c14, %c0_76, %c0_77] : memref<27x32x20xbf16, #tpu.memory_space<vmem>>, vector<1x32x20xbf16>
    %147 = vector.shape_cast %146 : vector<1x32x20xbf16> to vector<32x20xbf16>
    %cst_78 = arith.constant dense<0.000000e+00> : vector<32x512xf32>
    %148 = tpu.matmul %147, %145, %cst_78 {dimension_numbers = #tpu.dot_dimension_numbers<[1], [1], [0], [0], [0, 0, 1, 0], [], []>} : vector<32x20xbf16>, vector<512x20xbf16>, vector<32x512xf32> -> vector<32x512xf32>
    %c14_79 = arith.constant 14 : index
    %c0_80 = arith.constant 0 : index
    %149 = vector.load %arg4[%c14_79, %c0_80] : memref<27x512xf32, #tpu.memory_space<vmem>>, vector<1x512xf32>
    %150 = vector.broadcast %149 : vector<1x512xf32> to vector<32x512xf32>
    %151 = arith.mulf %148, %150 : vector<32x512xf32>
    %152 = arith.addf %142, %151 : vector<32x512xf32>
    %153 = vector.extract_strided_slice %4 {offsets = [7, 0], sizes = [505, 20], strides = [1, 1]} : vector<512x20xbf16> to vector<505x20xbf16>
    %154 = vector.extract_strided_slice %4 {offsets = [0, 0], sizes = [7, 20], strides = [1, 1]} : vector<512x20xbf16> to vector<7x20xbf16>
    %155 = tpu.concatenate %153, %154 in 0 : vector<505x20xbf16>, vector<7x20xbf16> -> vector<512x20xbf16>
    %c15 = arith.constant 15 : index
    %c0_81 = arith.constant 0 : index
    %c0_82 = arith.constant 0 : index
    %156 = vector.load %arg3[%c15, %c0_81, %c0_82] : memref<27x32x20xbf16, #tpu.memory_space<vmem>>, vector<1x32x20xbf16>
    %157 = vector.shape_cast %156 : vector<1x32x20xbf16> to vector<32x20xbf16>
    %cst_83 = arith.constant dense<0.000000e+00> : vector<32x512xf32>
    %158 = tpu.matmul %157, %155, %cst_83 {dimension_numbers = #tpu.dot_dimension_numbers<[1], [1], [0], [0], [0, 0, 1, 0], [], []>} : vector<32x20xbf16>, vector<512x20xbf16>, vector<32x512xf32> -> vector<32x512xf32>
    %c15_84 = arith.constant 15 : index
    %c0_85 = arith.constant 0 : index
    %159 = vector.load %arg4[%c15_84, %c0_85] : memref<27x512xf32, #tpu.memory_space<vmem>>, vector<1x512xf32>
    %160 = vector.broadcast %159 : vector<1x512xf32> to vector<32x512xf32>
    %161 = arith.mulf %158, %160 : vector<32x512xf32>
    %162 = arith.addf %152, %161 : vector<32x512xf32>
    %163 = vector.extract_strided_slice %4 {offsets = [8, 0], sizes = [504, 20], strides = [1, 1]} : vector<512x20xbf16> to vector<504x20xbf16>
    %164 = vector.extract_strided_slice %4 {offsets = [0, 0], sizes = [8, 20], strides = [1, 1]} : vector<512x20xbf16> to vector<8x20xbf16>
    %165 = tpu.concatenate %163, %164 in 0 : vector<504x20xbf16>, vector<8x20xbf16> -> vector<512x20xbf16>
    %c16 = arith.constant 16 : index
    %c0_86 = arith.constant 0 : index
    %c0_87 = arith.constant 0 : index
    %166 = vector.load %arg3[%c16, %c0_86, %c0_87] : memref<27x32x20xbf16, #tpu.memory_space<vmem>>, vector<1x32x20xbf16>
    %167 = vector.shape_cast %166 : vector<1x32x20xbf16> to vector<32x20xbf16>
    %cst_88 = arith.constant dense<0.000000e+00> : vector<32x512xf32>
    %168 = tpu.matmul %167, %165, %cst_88 {dimension_numbers = #tpu.dot_dimension_numbers<[1], [1], [0], [0], [0, 0, 1, 0], [], []>} : vector<32x20xbf16>, vector<512x20xbf16>, vector<32x512xf32> -> vector<32x512xf32>
    %c16_89 = arith.constant 16 : index
    %c0_90 = arith.constant 0 : index
    %169 = vector.load %arg4[%c16_89, %c0_90] : memref<27x512xf32, #tpu.memory_space<vmem>>, vector<1x512xf32>
    %170 = vector.broadcast %169 : vector<1x512xf32> to vector<32x512xf32>
    %171 = arith.mulf %168, %170 : vector<32x512xf32>
    %172 = arith.addf %162, %171 : vector<32x512xf32>
    %173 = vector.extract_strided_slice %4 {offsets = [9, 0], sizes = [503, 20], strides = [1, 1]} : vector<512x20xbf16> to vector<503x20xbf16>
    %174 = vector.extract_strided_slice %4 {offsets = [0, 0], sizes = [9, 20], strides = [1, 1]} : vector<512x20xbf16> to vector<9x20xbf16>
    %175 = tpu.concatenate %173, %174 in 0 : vector<503x20xbf16>, vector<9x20xbf16> -> vector<512x20xbf16>
    %c17 = arith.constant 17 : index
    %c0_91 = arith.constant 0 : index
    %c0_92 = arith.constant 0 : index
    %176 = vector.load %arg3[%c17, %c0_91, %c0_92] : memref<27x32x20xbf16, #tpu.memory_space<vmem>>, vector<1x32x20xbf16>
    %177 = vector.shape_cast %176 : vector<1x32x20xbf16> to vector<32x20xbf16>
    %cst_93 = arith.constant dense<0.000000e+00> : vector<32x512xf32>
    %178 = tpu.matmul %177, %175, %cst_93 {dimension_numbers = #tpu.dot_dimension_numbers<[1], [1], [0], [0], [0, 0, 1, 0], [], []>} : vector<32x20xbf16>, vector<512x20xbf16>, vector<32x512xf32> -> vector<32x512xf32>
    %c17_94 = arith.constant 17 : index
    %c0_95 = arith.constant 0 : index
    %179 = vector.load %arg4[%c17_94, %c0_95] : memref<27x512xf32, #tpu.memory_space<vmem>>, vector<1x512xf32>
    %180 = vector.broadcast %179 : vector<1x512xf32> to vector<32x512xf32>
    %181 = arith.mulf %178, %180 : vector<32x512xf32>
    %182 = arith.addf %172, %181 : vector<32x512xf32>
    %183 = vector.extract_strided_slice %4 {offsets = [55, 0], sizes = [457, 20], strides = [1, 1]} : vector<512x20xbf16> to vector<457x20xbf16>
    %184 = vector.extract_strided_slice %4 {offsets = [0, 0], sizes = [55, 20], strides = [1, 1]} : vector<512x20xbf16> to vector<55x20xbf16>
    %185 = tpu.concatenate %183, %184 in 0 : vector<457x20xbf16>, vector<55x20xbf16> -> vector<512x20xbf16>
    %c18 = arith.constant 18 : index
    %c0_96 = arith.constant 0 : index
    %c0_97 = arith.constant 0 : index
    %186 = vector.load %arg3[%c18, %c0_96, %c0_97] : memref<27x32x20xbf16, #tpu.memory_space<vmem>>, vector<1x32x20xbf16>
    %187 = vector.shape_cast %186 : vector<1x32x20xbf16> to vector<32x20xbf16>
    %cst_98 = arith.constant dense<0.000000e+00> : vector<32x512xf32>
    %188 = tpu.matmul %187, %185, %cst_98 {dimension_numbers = #tpu.dot_dimension_numbers<[1], [1], [0], [0], [0, 0, 1, 0], [], []>} : vector<32x20xbf16>, vector<512x20xbf16>, vector<32x512xf32> -> vector<32x512xf32>
    %c18_99 = arith.constant 18 : index
    %c0_100 = arith.constant 0 : index
    %189 = vector.load %arg4[%c18_99, %c0_100] : memref<27x512xf32, #tpu.memory_space<vmem>>, vector<1x512xf32>
    %190 = vector.broadcast %189 : vector<1x512xf32> to vector<32x512xf32>
    %191 = arith.mulf %188, %190 : vector<32x512xf32>
    %192 = arith.addf %182, %191 : vector<32x512xf32>
    %193 = vector.extract_strided_slice %4 {offsets = [56, 0], sizes = [456, 20], strides = [1, 1]} : vector<512x20xbf16> to vector<456x20xbf16>
    %194 = vector.extract_strided_slice %4 {offsets = [0, 0], sizes = [56, 20], strides = [1, 1]} : vector<512x20xbf16> to vector<56x20xbf16>
    %195 = tpu.concatenate %193, %194 in 0 : vector<456x20xbf16>, vector<56x20xbf16> -> vector<512x20xbf16>
    %c19 = arith.constant 19 : index
    %c0_101 = arith.constant 0 : index
    %c0_102 = arith.constant 0 : index
    %196 = vector.load %arg3[%c19, %c0_101, %c0_102] : memref<27x32x20xbf16, #tpu.memory_space<vmem>>, vector<1x32x20xbf16>
    %197 = vector.shape_cast %196 : vector<1x32x20xbf16> to vector<32x20xbf16>
    %cst_103 = arith.constant dense<0.000000e+00> : vector<32x512xf32>
    %198 = tpu.matmul %197, %195, %cst_103 {dimension_numbers = #tpu.dot_dimension_numbers<[1], [1], [0], [0], [0, 0, 1, 0], [], []>} : vector<32x20xbf16>, vector<512x20xbf16>, vector<32x512xf32> -> vector<32x512xf32>
    %c19_104 = arith.constant 19 : index
    %c0_105 = arith.constant 0 : index
    %199 = vector.load %arg4[%c19_104, %c0_105] : memref<27x512xf32, #tpu.memory_space<vmem>>, vector<1x512xf32>
    %200 = vector.broadcast %199 : vector<1x512xf32> to vector<32x512xf32>
    %201 = arith.mulf %198, %200 : vector<32x512xf32>
    %202 = arith.addf %192, %201 : vector<32x512xf32>
    %203 = vector.extract_strided_slice %4 {offsets = [57, 0], sizes = [455, 20], strides = [1, 1]} : vector<512x20xbf16> to vector<455x20xbf16>
    %204 = vector.extract_strided_slice %4 {offsets = [0, 0], sizes = [57, 20], strides = [1, 1]} : vector<512x20xbf16> to vector<57x20xbf16>
    %205 = tpu.concatenate %203, %204 in 0 : vector<455x20xbf16>, vector<57x20xbf16> -> vector<512x20xbf16>
    %c20 = arith.constant 20 : index
    %c0_106 = arith.constant 0 : index
    %c0_107 = arith.constant 0 : index
    %206 = vector.load %arg3[%c20, %c0_106, %c0_107] : memref<27x32x20xbf16, #tpu.memory_space<vmem>>, vector<1x32x20xbf16>
    %207 = vector.shape_cast %206 : vector<1x32x20xbf16> to vector<32x20xbf16>
    %cst_108 = arith.constant dense<0.000000e+00> : vector<32x512xf32>
    %208 = tpu.matmul %207, %205, %cst_108 {dimension_numbers = #tpu.dot_dimension_numbers<[1], [1], [0], [0], [0, 0, 1, 0], [], []>} : vector<32x20xbf16>, vector<512x20xbf16>, vector<32x512xf32> -> vector<32x512xf32>
    %c20_109 = arith.constant 20 : index
    %c0_110 = arith.constant 0 : index
    %209 = vector.load %arg4[%c20_109, %c0_110] : memref<27x512xf32, #tpu.memory_space<vmem>>, vector<1x512xf32>
    %210 = vector.broadcast %209 : vector<1x512xf32> to vector<32x512xf32>
    %211 = arith.mulf %208, %210 : vector<32x512xf32>
    %212 = arith.addf %202, %211 : vector<32x512xf32>
    %213 = vector.extract_strided_slice %4 {offsets = [63, 0], sizes = [449, 20], strides = [1, 1]} : vector<512x20xbf16> to vector<449x20xbf16>
    %214 = vector.extract_strided_slice %4 {offsets = [0, 0], sizes = [63, 20], strides = [1, 1]} : vector<512x20xbf16> to vector<63x20xbf16>
    %215 = tpu.concatenate %213, %214 in 0 : vector<449x20xbf16>, vector<63x20xbf16> -> vector<512x20xbf16>
    %c21 = arith.constant 21 : index
    %c0_111 = arith.constant 0 : index
    %c0_112 = arith.constant 0 : index
    %216 = vector.load %arg3[%c21, %c0_111, %c0_112] : memref<27x32x20xbf16, #tpu.memory_space<vmem>>, vector<1x32x20xbf16>
    %217 = vector.shape_cast %216 : vector<1x32x20xbf16> to vector<32x20xbf16>
    %cst_113 = arith.constant dense<0.000000e+00> : vector<32x512xf32>
    %218 = tpu.matmul %217, %215, %cst_113 {dimension_numbers = #tpu.dot_dimension_numbers<[1], [1], [0], [0], [0, 0, 1, 0], [], []>} : vector<32x20xbf16>, vector<512x20xbf16>, vector<32x512xf32> -> vector<32x512xf32>
    %c21_114 = arith.constant 21 : index
    %c0_115 = arith.constant 0 : index
    %219 = vector.load %arg4[%c21_114, %c0_115] : memref<27x512xf32, #tpu.memory_space<vmem>>, vector<1x512xf32>
    %220 = vector.broadcast %219 : vector<1x512xf32> to vector<32x512xf32>
    %221 = arith.mulf %218, %220 : vector<32x512xf32>
    %222 = arith.addf %212, %221 : vector<32x512xf32>
    %223 = vector.extract_strided_slice %4 {offsets = [64, 0], sizes = [448, 20], strides = [1, 1]} : vector<512x20xbf16> to vector<448x20xbf16>
    %224 = vector.extract_strided_slice %4 {offsets = [0, 0], sizes = [64, 20], strides = [1, 1]} : vector<512x20xbf16> to vector<64x20xbf16>
    %225 = tpu.concatenate %223, %224 in 0 : vector<448x20xbf16>, vector<64x20xbf16> -> vector<512x20xbf16>
    %c22 = arith.constant 22 : index
    %c0_116 = arith.constant 0 : index
    %c0_117 = arith.constant 0 : index
    %226 = vector.load %arg3[%c22, %c0_116, %c0_117] : memref<27x32x20xbf16, #tpu.memory_space<vmem>>, vector<1x32x20xbf16>
    %227 = vector.shape_cast %226 : vector<1x32x20xbf16> to vector<32x20xbf16>
    %cst_118 = arith.constant dense<0.000000e+00> : vector<32x512xf32>
    %228 = tpu.matmul %227, %225, %cst_118 {dimension_numbers = #tpu.dot_dimension_numbers<[1], [1], [0], [0], [0, 0, 1, 0], [], []>} : vector<32x20xbf16>, vector<512x20xbf16>, vector<32x512xf32> -> vector<32x512xf32>
    %c22_119 = arith.constant 22 : index
    %c0_120 = arith.constant 0 : index
    %229 = vector.load %arg4[%c22_119, %c0_120] : memref<27x512xf32, #tpu.memory_space<vmem>>, vector<1x512xf32>
    %230 = vector.broadcast %229 : vector<1x512xf32> to vector<32x512xf32>
    %231 = arith.mulf %228, %230 : vector<32x512xf32>
    %232 = arith.addf %222, %231 : vector<32x512xf32>
    %233 = vector.extract_strided_slice %4 {offsets = [65, 0], sizes = [447, 20], strides = [1, 1]} : vector<512x20xbf16> to vector<447x20xbf16>
    %234 = vector.extract_strided_slice %4 {offsets = [0, 0], sizes = [65, 20], strides = [1, 1]} : vector<512x20xbf16> to vector<65x20xbf16>
    %235 = tpu.concatenate %233, %234 in 0 : vector<447x20xbf16>, vector<65x20xbf16> -> vector<512x20xbf16>
    %c23 = arith.constant 23 : index
    %c0_121 = arith.constant 0 : index
    %c0_122 = arith.constant 0 : index
    %236 = vector.load %arg3[%c23, %c0_121, %c0_122] : memref<27x32x20xbf16, #tpu.memory_space<vmem>>, vector<1x32x20xbf16>
    %237 = vector.shape_cast %236 : vector<1x32x20xbf16> to vector<32x20xbf16>
    %cst_123 = arith.constant dense<0.000000e+00> : vector<32x512xf32>
    %238 = tpu.matmul %237, %235, %cst_123 {dimension_numbers = #tpu.dot_dimension_numbers<[1], [1], [0], [0], [0, 0, 1, 0], [], []>} : vector<32x20xbf16>, vector<512x20xbf16>, vector<32x512xf32> -> vector<32x512xf32>
    %c23_124 = arith.constant 23 : index
    %c0_125 = arith.constant 0 : index
    %239 = vector.load %arg4[%c23_124, %c0_125] : memref<27x512xf32, #tpu.memory_space<vmem>>, vector<1x512xf32>
    %240 = vector.broadcast %239 : vector<1x512xf32> to vector<32x512xf32>
    %241 = arith.mulf %238, %240 : vector<32x512xf32>
    %242 = arith.addf %232, %241 : vector<32x512xf32>
    %243 = vector.extract_strided_slice %4 {offsets = [71, 0], sizes = [441, 20], strides = [1, 1]} : vector<512x20xbf16> to vector<441x20xbf16>
    %244 = vector.extract_strided_slice %4 {offsets = [0, 0], sizes = [71, 20], strides = [1, 1]} : vector<512x20xbf16> to vector<71x20xbf16>
    %245 = tpu.concatenate %243, %244 in 0 : vector<441x20xbf16>, vector<71x20xbf16> -> vector<512x20xbf16>
    %c24 = arith.constant 24 : index
    %c0_126 = arith.constant 0 : index
    %c0_127 = arith.constant 0 : index
    %246 = vector.load %arg3[%c24, %c0_126, %c0_127] : memref<27x32x20xbf16, #tpu.memory_space<vmem>>, vector<1x32x20xbf16>
    %247 = vector.shape_cast %246 : vector<1x32x20xbf16> to vector<32x20xbf16>
    %cst_128 = arith.constant dense<0.000000e+00> : vector<32x512xf32>
    %248 = tpu.matmul %247, %245, %cst_128 {dimension_numbers = #tpu.dot_dimension_numbers<[1], [1], [0], [0], [0, 0, 1, 0], [], []>} : vector<32x20xbf16>, vector<512x20xbf16>, vector<32x512xf32> -> vector<32x512xf32>
    %c24_129 = arith.constant 24 : index
    %c0_130 = arith.constant 0 : index
    %249 = vector.load %arg4[%c24_129, %c0_130] : memref<27x512xf32, #tpu.memory_space<vmem>>, vector<1x512xf32>
    %250 = vector.broadcast %249 : vector<1x512xf32> to vector<32x512xf32>
    %251 = arith.mulf %248, %250 : vector<32x512xf32>
    %252 = arith.addf %242, %251 : vector<32x512xf32>
    %253 = vector.extract_strided_slice %4 {offsets = [72, 0], sizes = [440, 20], strides = [1, 1]} : vector<512x20xbf16> to vector<440x20xbf16>
    %254 = vector.extract_strided_slice %4 {offsets = [0, 0], sizes = [72, 20], strides = [1, 1]} : vector<512x20xbf16> to vector<72x20xbf16>
    %255 = tpu.concatenate %253, %254 in 0 : vector<440x20xbf16>, vector<72x20xbf16> -> vector<512x20xbf16>
    %c25 = arith.constant 25 : index
    %c0_131 = arith.constant 0 : index
    %c0_132 = arith.constant 0 : index
    %256 = vector.load %arg3[%c25, %c0_131, %c0_132] : memref<27x32x20xbf16, #tpu.memory_space<vmem>>, vector<1x32x20xbf16>
    %257 = vector.shape_cast %256 : vector<1x32x20xbf16> to vector<32x20xbf16>
    %cst_133 = arith.constant dense<0.000000e+00> : vector<32x512xf32>
    %258 = tpu.matmul %257, %255, %cst_133 {dimension_numbers = #tpu.dot_dimension_numbers<[1], [1], [0], [0], [0, 0, 1, 0], [], []>} : vector<32x20xbf16>, vector<512x20xbf16>, vector<32x512xf32> -> vector<32x512xf32>
    %c25_134 = arith.constant 25 : index
    %c0_135 = arith.constant 0 : index
    %259 = vector.load %arg4[%c25_134, %c0_135] : memref<27x512xf32, #tpu.memory_space<vmem>>, vector<1x512xf32>
    %260 = vector.broadcast %259 : vector<1x512xf32> to vector<32x512xf32>
    %261 = arith.mulf %258, %260 : vector<32x512xf32>
    %262 = arith.addf %252, %261 : vector<32x512xf32>
    %263 = vector.extract_strided_slice %4 {offsets = [73, 0], sizes = [439, 20], strides = [1, 1]} : vector<512x20xbf16> to vector<439x20xbf16>
    %264 = vector.extract_strided_slice %4 {offsets = [0, 0], sizes = [73, 20], strides = [1, 1]} : vector<512x20xbf16> to vector<73x20xbf16>
    %265 = tpu.concatenate %263, %264 in 0 : vector<439x20xbf16>, vector<73x20xbf16> -> vector<512x20xbf16>
    %c26 = arith.constant 26 : index
    %c0_136 = arith.constant 0 : index
    %c0_137 = arith.constant 0 : index
    %266 = vector.load %arg3[%c26, %c0_136, %c0_137] : memref<27x32x20xbf16, #tpu.memory_space<vmem>>, vector<1x32x20xbf16>
    %267 = vector.shape_cast %266 : vector<1x32x20xbf16> to vector<32x20xbf16>
    %cst_138 = arith.constant dense<0.000000e+00> : vector<32x512xf32>
    %268 = tpu.matmul %267, %265, %cst_138 {dimension_numbers = #tpu.dot_dimension_numbers<[1], [1], [0], [0], [0, 0, 1, 0], [], []>} : vector<32x20xbf16>, vector<512x20xbf16>, vector<32x512xf32> -> vector<32x512xf32>
    %c26_139 = arith.constant 26 : index
    %c0_140 = arith.constant 0 : index
    %269 = vector.load %arg4[%c26_139, %c0_140] : memref<27x512xf32, #tpu.memory_space<vmem>>, vector<1x512xf32>
    %270 = vector.broadcast %269 : vector<1x512xf32> to vector<32x512xf32>
    %271 = arith.mulf %268, %270 : vector<32x512xf32>
    %272 = arith.addf %262, %271 : vector<32x512xf32>
    %273 = vector.extract_strided_slice %272 {offsets = [0, 0], sizes = [16, 512], strides = [1, 1]} : vector<32x512xf32> to vector<16x512xf32>
    %c0_141 = arith.constant 0 : index
    %c0_142 = arith.constant 0 : index
    %c0_143 = arith.constant 0 : index
    %274 = vector.load %arg5[%c0_141, %c0_142, %c0_143] : memref<1x16x512xf32, #tpu.memory_space<vmem>>, vector<1x16x512xf32>
    %275 = vector.shape_cast %274 : vector<1x16x512xf32> to vector<16x512xf32>
    %276 = vector.shape_cast %273 : vector<16x512xf32> to vector<1x16x512xf32>
    tpu.vector_store %arg5[%c0_141, %c0_142, %c0_143], %276 {strides = array<i32>} : memref<1x16x512xf32, #tpu.memory_space<vmem>>, vector<1x16x512xf32>,
    %277 = vector.extract_strided_slice %272 {offsets = [16, 0], sizes = [16, 512], strides = [1, 1]} : vector<32x512xf32> to vector<16x512xf32>
    %c0_144 = arith.constant 0 : index
    %c0_145 = arith.constant 0 : index
    %c0_146 = arith.constant 0 : index
    %278 = vector.load %arg6[%c0_144, %c0_145, %c0_146] : memref<1x16x512xf32, #tpu.memory_space<vmem>>, vector<1x16x512xf32>
    %279 = vector.shape_cast %278 : vector<1x16x512xf32> to vector<16x512xf32>
    %280 = vector.shape_cast %277 : vector<16x512xf32> to vector<1x16x512xf32>
    tpu.vector_store %arg6[%c0_144, %c0_145, %c0_146], %280 {strides = array<i32>} : memref<1x16x512xf32, #tpu.memory_space<vmem>>, vector<1x16x512xf32>,
    return
  }
  func.func @transform_0(%arg0: i32) -> (i32, i32, i32) {
    %c0_i32 = arith.constant 0 : i32
    %c0_i32_0 = arith.constant 0 : i32
    %c0_i32_1 = arith.constant 0 : i32
    return %arg0, %c0_i32, %c0_i32_0 : i32, i32, i32
  }
  func.func @transform_1(%arg0: i32) -> (i32, i32) {
    %c0_i32 = arith.constant 0 : i32
    %c0_i32_0 = arith.constant 0 : i32
    %c0_i32_1 = arith.constant 0 : i32
    return %c0_i32, %c0_i32_0 : i32, i32
  }
  func.func @transform_2(%arg0: i32) -> (i32, i32, i32) {
    %c0_i32 = arith.constant 0 : i32
    %c0_i32_0 = arith.constant 0 : i32
    %c0_i32_1 = arith.constant 0 : i32
    %c0_i32_2 = arith.constant 0 : i32
    return %c0_i32, %c0_i32_0, %c0_i32_1 : i32, i32, i32
  }
  func.func @transform_3(%arg0: i32) -> (i32, i32) {
    %c0_i32 = arith.constant 0 : i32
    %c0_i32_0 = arith.constant 0 : i32
    %c0_i32_1 = arith.constant 0 : i32
    return %c0_i32, %c0_i32_0 : i32, i32
  }
  func.func @transform_4(%arg0: i32) -> (i32, i32, i32) {
    %c0_i32 = arith.constant 0 : i32
    %c0_i32_0 = arith.constant 0 : i32
    %c0_i32_1 = arith.constant 0 : i32
    return %arg0, %c0_i32, %c0_i32_0 : i32, i32, i32
  }
  func.func @transform_5(%arg0: i32) -> (i32, i32, i32) {
    %c0_i32 = arith.constant 0 : i32
    %c0_i32_0 = arith.constant 0 : i32
    %c0_i32_1 = arith.constant 0 : i32
    return %arg0, %c0_i32, %c0_i32_0 : i32, i32, i32
  }
}

</mosaic_0001>

<bundles_post_ra>
// kernel: _forward.1
= control target key start
LH: loop header
LB: loop body
LE: loop exit
PB: predicated region body
PF: predicated region fallthrough
CT: control target
= control target key end

     0   :  { %s7361_s18 = smov 0   ;;  %s13070_s0 = inlined_call_operand.vmem [shape: bf16[2,32,512], index: 0, kind: input, shape index: {}]   ;;  %s13071_s1 = inlined_call_operand.vmem [shape: bf16[20,32], index: 1, kind: input, shape index: {}]   ;;  %s13072_s2 = inlined_call_operand.vmem [shape: bf16[27,32,20], index: 2, kind: input, shape index: {}]   ;;  %s13073_s3 = inlined_call_operand.vmem [shape: f32[27,512], index: 3, kind: input, shape index: {}]   ;;  %s13074_s4 = inlined_call_operand.vmem [shape: f32[2,16,512], index: 4, kind: output, shape index: {0}]   ;;  %s13075_s5 = inlined_call_operand.vmem [shape: f32[2,16,512], index: 5, kind: output, shape index: {1}]  }
   0x1 LB: > { %s6545_s19 = sadd.s32 4294967295, %s7329_s18   ;;  %p6549_p0 = scmp.ge.s32.totalorder %s7329_s18, 1  ;;  %s7329_s18 = sphi %s7361_s18, %s16_s18  }
   0x2   : > { %p190_p1 = scmp.lt.s32.totalorder %s7329_s18, 3 }
   0x4   : > { %p191_p2 = pnand %p6549_p0, %p190_p1 }
   0x6   : > { %194 = sbr.rel (%p191_p2) target bundleno = 2824 (0xb08), region = 36 }
   0xb   : > { %p223_p3 = scmp.lt.s32.totalorder %s6545_s19, 1  ;;  %v249_v0 = vld [vmem:[%s13071_s1 + $0x8] sm:$0x3]  ;;  %vm346_vm0 = vcmask 261120   ;;  %v7199_v9 = vld [vmem:[%s13071_s1] sm:$0xff]  ;;  %vm1158_vm5 = vcmask 162816  }
   0xc   : > { %v343_v1 = vunpack.c.l.b16 %v249_v0  ;;  %v444_v11 = vsel %vm346_vm0, %v7199_v9, 0  ;;  %vm1651_vm1 = vsmask.f32 7424  ;;  %vm1687_vm2 = vsmask.f32 3328 }
   0xd   : > { %s15169_s19 = smov (!%p223_p3, %s6545_s19), 1  ;;  %vm2059_vm3 = vsmask.f32 256  ;;  %vm707_vm4 = vsmask.f32 4352  ;;  %vm1412_vm6 = vcmask 1043456  }
   0xe   : > { %v345_v2 = vpack.c.b16 %v343_v1, %v343_v1  ;;  %s7372_s22 = sshll.u32 %s15169_s19, 6  ;;  %vm1141_vm7 = vcmask 1044480   ;;  %vm2144_vm8 = vcmask 1040384   ;;  %vm8636_vm9 = vmand %vm1412_vm6, %vm1687_vm2  ;;  %vm2689_vm10 = vcmask 1047552  }
   0xf   : > { %s7378_s25 = scalar_lea.vmem %s13070_s0, %s7372_s22  ;;  %vm8645_vm11 = vmand %vm2144_vm8, %vm2059_vm3  ;;  %s12246_s27 = scalar_lea.vmem %s13074_s4, %s7372_s22 }
  0x10   : > { %v447_v3 = vsel %vm346_vm0, %v345_v2, 0  ;;  %v7191_v4 = vld [vmem:[%s7378_s25 + $0x4] sm:$0xf]  ;;  %v6558_v5 = vld [vmem:[%s7378_s25] sm:$0xf]  ;;  %vm8652_vm12 = vmand %vm1141_vm7, %vm707_vm4  ;;  %s12315_s9 = scalar_lea.vmem %s13075_s5, %s7372_s22 }
  0x11   : > { %v6560_v6 = vld [vmem:[%s7378_s25 + $0x10] sm:$0xf0]  ;;  %455 = vmatpush.bf16.xpose.msra.mxu0 %v447_v3  ;;  %v7193_v7 = vld [vmem:[%s7378_s25 + $0xc] sm:$0xf0]  ;;  %v7195_v12 = vld [vmem:[%s7378_s25 + $0x24] sm:$0xf] }
  0x12   : > { %v6563_v8 = vor.u32 %v7191_v4, %v6560_v6  ;;  %v6559_v10 = vor.u32 %v7193_v7, %v6558_v5  ;;  %v6574_v13 = vld [vmem:[%s7378_s25 + $0x20] sm:$0xf]  ;;  %v6576_v14 = vld [vmem:[%s7378_s25 + $0x30] sm:$0xf0]  ;;  %v7197_v15 = vld [vmem:[%s7378_s25 + $0x2c] sm:$0xf0] }
  0x13   : > { %v6575_v16 = vor.u32 %v7197_v15, %v6574_v13  ;;  %v6579_v17 = vor.u32 %v7195_v12, %v6576_v14  ;;  %v7192_v25 = vld [vmem:[%s7378_s25 + $0xc] sm:$0xf]  ;;  %v6566_v26 = vld [vmem:[%s7378_s25 + $0x8] sm:$0xf]  ;;  %v6568_v27 = vld [vmem:[%s7378_s25 + $0x18] sm:$0xf0] }
  0x14   : > { %290 = vxpose.binary.xlu0.c.b16.start [1/4] (short) %v6563_v8, %v6559_v10, 128  ;;  %v7194_v28 = vld [vmem:[%s7378_s25 + $0x14] sm:$0xf0]  ;;  %v6571_v29 = vor.u32 %v7192_v25, %v6568_v27  ;;  %v7196_v33 = vld [vmem:[%s7378_s25 + $0x2c] sm:$0xf]  ;;  %v6582_v34 = vld [vmem:[%s7378_s25 + $0x28] sm:$0xf] }
  0x15   : > { %v6567_v30 = vor.u32 %v7194_v28, %v6566_v26  ;;  %v6584_v35 = vld [vmem:[%s7378_s25 + $0x38] sm:$0xf0]  ;;  %v7198_v36 = vld [vmem:[%s7378_s25 + $0x34] sm:$0xf0]  ;;  %vm8667_vm13 = vmand %vm2689_vm10, %vm1651_vm1 }
  0x16   : > { %v6587_v37 = vor.u32 %v7196_v33, %v6584_v35  ;;  %v6583_v38 = vor.u32 %v7198_v36, %v6582_v34 }
  0x17   : > { %314 = vxpose.binary.xlu1.c.b16.start [1/4] (short) %v6571_v29, %v6567_v30, 128 }
  0x19   : > { %456 = vmatpush.bf16.xpose.msra.mxu0 %v444_v11 }
  0x24   : > { %291 = vxpose.binary.xlu0.c.b16.end [2/4] (short) %v6579_v17, %v6575_v16, 128 }
  0x27   : > { %315 = vxpose.binary.xlu1.c.b16.end [2/4] (short) %v6587_v37, %v6583_v38, 128 }
  0xc0   : > { %v298_v18 = vpop.trf.xlu0 }
  0xc1   : > { %6592 = vmatmul.msk.bf16.vlgmr.msra.gmra.mxu0 %vm346_vm0, %v298_v18 }
  0xc8   : > { %v299_v19 = vpop.trf.xlu0 }
  0xd0   : > { %v300_v20 = vpop.trf.xlu0 }
  0xd1   : > { %6593 = vmatmul.msk.bf16.gmra.mxu0 %vm346_vm0, %v300_v20 }
  0xd8   : > { %v301_v21 = vpop.trf.xlu0 }
  0xe0   : > { %v302_v22 = vpop.trf.xlu0 }
  0xe1   : > { %6594 = vmatmul.msk.bf16.gmra.mxu0 %vm346_vm0, %v302_v22 }
  0xe8   : > { %v7396_v23 = vpop.trf.xlu0 }
  0xf0   : > { %v304_v24 = vpop.trf.xlu0 }
  0xf1   : > { %6595 = vmatmul.msk.bf16.gmra.mxu0 %vm346_vm0, %v304_v24 }
  0xf8   : > { %v7403_v31 = vpop.trf.xlu0 }
 0x100   : > { %v306_v32 = vpop.trf.xlu0 }
 0x101   : > { %6596 = vmatmul.msk.bf16.gmra.mxu0 %vm346_vm0, %v306_v32 }
 0x108   : > { %v7410_v39 = vpop.trf.xlu0 }
 0x110   : > { %v308_v40 = vpop.trf.xlu0 }
 0x111   : > { %6597 = vmatmul.msk.bf16.gmra.mxu0 %vm346_vm0, %v308_v40 }
 0x118   : > { %v7413_v41 = vpop.trf.xlu0 }
 0x120   : > { %v310_v42 = vpop.trf.xlu0 }
 0x121   : > { %6598 = vmatmul.msk.bf16.gmra.mxu0 %vm346_vm0, %v310_v42 }
 0x128   : > { %v7416_v43 = vpop.trf.xlu0 }
 0x130   : > { %v312_v44 = vpop.trf.xlu0 }
 0x131   : > { %6599 = vmatmul.msk.bf16.gmra.mxu0 %vm346_vm0, %v312_v44 }
 0x13e   : > { %v458_v45 = vpop.f32.mrf.mxu0 }
 0x13f   : > { %v618_v46 = vpack.c.bf16 %v458_v45, %v458_v45 }
 0x141   : > { %6600 = vmatmul.msk.bf16.gmra.mxu0 %vm346_vm0, %v299_v19  ;;  %v7420_v49 = vunpack.c.l.b16 %v618_v46 }
 0x146   : > { %v460_v47 = vpop.f32.mrf.mxu0 }
 0x147   : > { %v619_v48 = vpack.c.bf16 %v460_v47, %v460_v47 }
 0x149   : > { %v808_v50 = vunpack.c.l.b16 %v619_v48 }
 0x14b   : > { %v7423_v51 = vpack.c.b16 %v808_v50, %v7420_v49 }
 0x14d   : > { %13681 = vst [vmem:[#allocation2_spill] sm:$0xff] %v7423_v51  ;;  %v7426_v52 = vshrl.u32 %v7423_v51, 16  ;;  %v7429_v53 = vshll.u32 %v7423_v51, 16 }
 0x14e   : > { %v463_v54 = vpop.f32.mrf.mxu0 }
 0x14f   : > { %v620_v55 = vpack.c.bf16 %v463_v54, %v463_v54  ;;  %v1688_v56 = vrot.slane %v7426_v52, 4  ;;  %v1689_v57 = vrot.slane %v7429_v53, 5  ;;  %v2060_v58 = vrot.slane %v7426_v52, 7 }
 0x150   : > { %v13076_v59 = vrot.slane %v7429_v53, 1 }
 0x151   : > { %v809_v60 = vunpack.c.l.b16 %v620_v55  ;;  %6601 = vmatmul.msk.bf16.gmra.mxu0 %vm346_vm0, %v301_v21  ;;  %v7436_v61 = vor.u32 %v1689_v57, %v1688_v56  ;;  %v7439_v62 = vor.u32 %v2060_v58, %v7429_v53 }
 0x152   : > { %v2601_v63 = vor.u32 %v13076_v59, %v7426_v52 }
 0x153   : > { %13682 = vst [vmem:[#allocation3_spill] sm:$0xff] %v7439_v62  ;;  %v7444_v0 = vpack.c.b16 %v809_v60, %v808_v50 }
 0x155   : > { %v4574_v8 = vshll.u32 %v7444_v0, 16 }
 0x156   : > { %v465_v1 = vpop.f32.mrf.mxu0 }
 0x157   : > { %v621_v2 = vpack.c.bf16 %v465_v1, %v465_v1  ;;  %v4576_v19 = vrot.slane %v4574_v8, 1 }
 0x159   : > { %v810_v3 = vunpack.c.l.b16 %v621_v2 }
 0x15b   : > { %v7446_v4 = vpack.c.b16 %v810_v3, %v809_v60 }
 0x15d   : > { %13683 = vst [vmem:[#allocation4_spill] sm:$0xff] %v7446_v4  ;;  %v7449_v5 = vshrl.u32 %v7446_v4, 16  ;;  %v7452_v6 = vshll.u32 %v7446_v4, 16 }
 0x15e   : > { %v468_v7 = vpop.f32.mrf.mxu0 }
 0x15f   : > { %v622_v9 = vpack.c.bf16 %v468_v7, %v468_v7  ;;  %v1691_v10 = vrot.slane %v7449_v5, 4  ;;  %v1692_v11 = vrot.slane %v7452_v6, 5  ;;  %v2062_v12 = vrot.slane %v7449_v5, 7 }
 0x160   : > { %v2602_v13 = vrot.slane %v7452_v6, 1 }
 0x161   : > { %v811_v14 = vunpack.c.l.b16 %v622_v9  ;;  %6602 = vmatmul.msk.bf16.gmra.mxu0 %vm346_vm0, %v7396_v23  ;;  %v1693_v15 = vor.u32 %v1692_v11, %v1691_v10  ;;  %v2063_v16 = vor.u32 %v2062_v12, %v7452_v6  ;;  %v4572_v23 = vshrl.u32 %v7444_v0, 16 }
 0x162   : > { %v2604_v17 = vor.u32 %v2602_v13, %v7449_v5  ;;  %v7464_v18 = vsel %vm1651_vm1, %v2601_v63, %v2602_v13 }
 0x163   : > { %13684 = vst [vmem:[#allocation5_spill] sm:$0xff] %v7464_v18  ;;  %v7466_v20 = vpack.c.b16 %v811_v14, %v810_v3  ;;  %v7470_v21 = vsel %vm1687_vm2, %v7436_v61, %v1693_v15  ;;  %v7473_v22 = vsel %vm2059_vm3, %v2060_v58, %v2063_v16  ;;  %v4577_v28 = vor.u32 %v4576_v19, %v4572_v23 }
 0x164   : > { %13685 = vst [vmem:[#allocation6_spill] sm:$0xff] %v7473_v22 }
 0x165   : > { %v4578_v24 = vshll.u32 %v7466_v20, 16  ;;  %v4582_v63 = vshrl.u32 %v7466_v20, 16 }
 0x166   : > { %v470_v25 = vpop.f32.mrf.mxu0 }
 0x167   : > { %v4580_v26 = vrot.slane %v4578_v24, 1  ;;  %v623_v27 = vpack.c.bf16 %v470_v25, %v470_v25 }
 0x169   : > { %v812_v29 = vunpack.c.l.b16 %v623_v27  ;;  %v7478_v30 = vsel %vm1651_vm1, %v4577_v28, %v4580_v26  ;;  %v4584_v10 = vor.u32 %v4582_v63, %v4580_v26 }
 0x16a   : > { %13686 = vst [vmem:[#allocation7_spill] sm:$0xff] %v7478_v30 }
 0x16b   : > { %v7480_v32 = vpack.c.b16 %v812_v29, %v811_v14 }
 0x16d   : > { %13687 = vst [vmem:[#allocation8_spill] sm:$0xff] %v7480_v32  ;;  %v7483_v33 = vshrl.u32 %v7480_v32, 16  ;;  %v910_v34 = vshll.u32 %v7480_v32, 16 }
 0x16e   : > { %v473_v35 = vpop.f32.mrf.mxu0 }
 0x16f   : > { %v624_v36 = vpack.c.bf16 %v473_v35, %v473_v35  ;;  %v1695_v37 = vrot.slane %v7483_v33, 4  ;;  %v1696_v38 = vrot.slane %v910_v34, 5  ;;  %v2065_v40 = vrot.slane %v7483_v33, 7 }
 0x170   : > { %v2605_v42 = vrot.slane %v910_v34, 1  ;;  %v912_v60 = vrot.slane %v910_v34, 4 }
 0x171   : > { %v813_v44 = vunpack.c.l.b16 %v624_v36  ;;  %6603 = vmatmul.msk.bf16.gmra.mxu0 %vm346_vm0, %v7403_v31  ;;  %v1697_v45 = vor.u32 %v1696_v38, %v1695_v37  ;;  %v2066_v46 = vor.u32 %v2065_v40, %v910_v34  ;;  %v909_v31 = vrot.slane %v7483_v33, 3 }
 0x172   : > { %v2607_v47 = vor.u32 %v2605_v42, %v7483_v33  ;;  %v7492_v48 = vsel %vm1651_vm1, %v2604_v17, %v2605_v42  ;;  %v900_v36 = vrot.slane %v7449_v5, 3  ;;  %v903_v37 = vrot.slane %v7452_v6, 4 }
 0x173   : > { %13688 = vst [vmem:[#allocation9_spill] sm:$0xff] %v7492_v48  ;;  %v7494_v50 = vpack.c.b16 %v813_v44, %v812_v29  ;;  %v4982_v54 = vpack.c.b16 %v813_v44, %v813_v44  ;;  %v7497_v55 = vsel %vm1687_vm2, %v1693_v15, %v1697_v45  ;;  %v7500_v56 = vsel %vm2059_vm3, %v2062_v12, %v2066_v46 }
 0x174   : > { %13689 = vst [vmem:[#allocation10_spill] sm:$0xff] %v7500_v56  ;;  %v913_v13 = vor.u32 %v912_v60, %v909_v31 }
 0x175   : > { %v4984_v57 = vshrl.u32 %v4982_v54, 16  ;;  %v4987_v58 = vshll.u32 %v4982_v54, 16  ;;  %v4585_v2 = vshll.u32 %v7494_v50, 16 }
 0x176   : > { %v475_v1 = vpop.f32.mrf.mxu0 }
 0x177   : > { %v4986_v3 = vrot.slane %v4984_v57, 3  ;;  %v4989_v7 = vrot.slane %v4987_v58, 4  ;;  %v625_v8 = vpack.c.bf16 %v475_v1, %v475_v1  ;;  %v4587_v9 = vrot.slane %v4585_v2, 1 }
 0x178   : > { %v904_v2 = vor.u32 %v903_v37, %v900_v36 }
 0x179   : > { %v814_v11 = vunpack.c.l.b16 %v625_v8  ;;  %v4990_v14 = vor.u32 %v4989_v7, %v4986_v3  ;;  %v7506_v12 = vsel %vm1651_vm1, %v4584_v10, %v4587_v9 }
 0x17a   : > { %13690 = vst [vmem:[#allocation11_spill] sm:$0xff] %v7506_v12 }
 0x17b   : > { %v7508_v15 = vpack.c.b16 %v814_v11, %v813_v44  ;;  %v7511_v16 = vsel %vm707_vm4, %v913_v13, %v4990_v14 }
 0x17c   : > { %13692 = vst [vmem:[#allocation13_spill] sm:$0xff] %v7511_v16 }
 0x17d   : > { %13691 = vst [vmem:[#allocation12_spill] sm:$0xff] %v7508_v15  ;;  %v7514_v17 = vshrl.u32 %v7508_v15, 16  ;;  %v919_v19 = vshll.u32 %v7508_v15, 16 }
 0x17e   : > { %v478_v23 = vpop.f32.mrf.mxu0 }
 0x17f   : > { %v626_v24 = vpack.c.bf16 %v478_v23, %v478_v23  ;;  %v918_v25 = vrot.slane %v7514_v17, 3  ;;  %v921_v26 = vrot.slane %v919_v19, 4  ;;  %v1699_v27 = vrot.slane %v7514_v17, 4 }
 0x180   : > { %v1700_v28 = vrot.slane %v919_v19, 5  ;;  %v2068_v29 = vrot.slane %v7514_v17, 7  ;;  %v2608_v33 = vrot.slane %v919_v19, 1 }
 0x181   : > { %v815_v34 = vunpack.c.l.b16 %v626_v24  ;;  %6604 = vmatmul.msk.bf16.gmra.mxu0 %vm346_vm0, %v7410_v39  ;;  %v7522_v35 = vor.u32 %v921_v26, %v918_v25  ;;  %v914_v24 = vsel %vm707_vm4, %v904_v2, %v913_v13 }
 0x182   : > { %v7526_v38 = vor.u32 %v1700_v28, %v1699_v27  ;;  %v2069_v42 = vor.u32 %v2068_v29, %v919_v19  ;;  %v2610_v44 = vor.u32 %v2608_v33, %v7514_v17  ;;  %v7532_v46 = vsel %vm1651_vm1, %v2607_v47, %v2608_v33 }
 0x183   : > { %13693 = vst [vmem:[#allocation14_spill] sm:$0xff] %v7532_v46  ;;  %v7534_v54 = vpack.c.b16 %v815_v34, %v814_v11  ;;  %v5863_v39 = vpack.c.b16 %v815_v34, %v815_v34  ;;  %v923_v57 = vsel %vm707_vm4, %v913_v13, %v7522_v35  ;;  %v4589_v47 = vshrl.u32 %v7494_v50, 16 }
 0x184   : > { %v7539_v5 = vsel %vm1158_vm5, %v923_v57, 0  ;;  %v7543_v6 = vsel %vm1687_vm2, %v1697_v45, %v7526_v38  ;;  %v7546_v58 = vsel %vm2059_vm3, %v2065_v40, %v2069_v42  ;;  %v892_v27 = vrot.slane %v7426_v52, 3 }
 0x185   : > { %13694 = vst [vmem:[#allocation15_spill] sm:$0xff] %v7539_v5  ;;  %v4592_v31 = vshll.u32 %v7534_v54, 16  ;;  %v5865_v60 = vshll.u32 %v5863_v39, 16  ;;  %v6012_v63 = vshrl.u32 %v5863_v39, 16  ;;  %1261 = vmatpush.bf16.xpose.msra.mxu1 %v7539_v5  ;;  %v4596_v3 = vshrl.u32 %v7534_v54, 16 }
 0x186   : > { %13695 = vst [vmem:[#allocation16_spill] sm:$0xff] %v7546_v58  ;;  %v480_v1 = vpop.f32.mrf.mxu0  ;;  %v4591_v7 = vor.u32 %v4589_v47, %v4587_v9  ;;  %v895_v28 = vrot.slane %v7429_v53, 4  ;;  %v7568_v13 = vsel %vm1158_vm5, %v914_v24, 0 }
 0x187   : > { %v6014_v8 = vrot.slane %v6012_v63, 3  ;;  %v6015_v10 = vrot.slane %v5865_v60, 4  ;;  %v627_v45 = vpack.c.bf16 %v480_v1, %v480_v1  ;;  %v4594_v11 = vrot.slane %v4592_v31, 1  ;;  %13700 = vst [vmem:[#allocation21_spill] sm:$0xff] %v7568_v13 }
 0x188   : > { %v5415_v14 = vrot.slane %v4596_v3, 3  ;;  %v5416_v40 = vrot.slane %v4592_v31, 4  ;;  %v5867_v19 = vrot.slane %v5865_v60, 1  ;;  %v7575_v57 = vor.u32 %v895_v28, %v892_v27 }
 0x189   : > { %v816_v23 = vunpack.c.l.b16 %v627_v45  ;;  %v7554_v25 = vsel %vm1651_vm1, %v4591_v7, %v4594_v11  ;;  %v6016_v26 = vor.u32 %v6015_v10, %v6014_v8 }
 0x18a   : > { %13696 = vst [vmem:[#allocation17_spill] sm:$0xff] %v7554_v25  ;;  %v5417_v33 = vor.u32 %v5416_v40, %v5415_v14  ;;  %v7559_v9 = vsel %vm1651_vm1, %v2610_v44, %v5867_v19  ;;  %v905_v10 = vsel %vm707_vm4, %v7575_v57, %v904_v2 }
 0x18b   : > { %13697 = vst [vmem:[#allocation18_spill] sm:$0xff] %v7559_v9  ;;  %v7561_v36 = vpack.c.b16 %v816_v23, %v815_v34  ;;  %v7565_v37 = vsel %vm707_vm4, %v7522_v35, %v6016_v26  ;;  %v7593_v28 = vsel %vm1158_vm5, %v905_v10, 0 }
 0x18c   : > { %13699 = vst [vmem:[#allocation20_spill] sm:$0xff] %v7565_v37 }
 0x18d   : > { %13698 = vst [vmem:[#allocation19_spill] sm:$0xff] %v7561_v36  ;;  %v7571_v42 = vshrl.u32 %v7561_v36, 16  ;;  %v928_v52 = vshll.u32 %v7561_v36, 16  ;;  %1262 = vmatpush.bf16.xpose.msra.mxu1 %v7568_v13 }
 0x18e   : > { %v483_v39 = vpop.f32.mrf.mxu0  ;;  %13702 = vst [vmem:[#allocation23_spill] sm:$0xff] %v7593_v28 }
 0x18f   : > { %v628_v47 = vpack.c.bf16 %v483_v39, %v483_v39  ;;  %v927_v34 = vrot.slane %v7571_v42, 3  ;;  %v930_v31 = vrot.slane %v928_v52, 4  ;;  %v1703_v60 = vrot.slane %v7571_v42, 4 }
 0x190   : > { %v1704_v63 = vrot.slane %v928_v52, 5  ;;  %v2071_v1 = vrot.slane %v7571_v42, 7  ;;  %v2611_v7 = vrot.slane %v928_v52, 1 }
 0x191   : > { %v817_v8 = vunpack.c.l.b16 %v628_v47  ;;  %6605 = vmatmul.msk.bf16.gmra.mxu0 %vm346_vm0, %v7413_v41  ;;  %v931_v45 = vor.u32 %v930_v31, %v927_v34 }
 0x192   : > { %v1705_v14 = vor.u32 %v1704_v63, %v1703_v60  ;;  %v2072_v40 = vor.u32 %v2071_v1, %v928_v52  ;;  %v7585_v19 = vsel %vm1651_vm1, %v2610_v44, %v2611_v7  ;;  %v2613_v24 = vor.u32 %v2611_v7, %v7571_v42 }
 0x193   : > { %13701 = vst [vmem:[#allocation22_spill] sm:$0xff] %v7585_v19  ;;  %v7588_v26 = vpack.c.b16 %v817_v8, %v816_v23  ;;  %v932_v27 = vsel %vm707_vm4, %v7522_v35, %v931_v45  ;;  %v4598_v52 = vor.u32 %v4596_v3, %v4594_v11 }
 0x194   : > { %v7596_v41 = vsel %vm1158_vm5, %v932_v27, 0  ;;  %v7600_v2 = vsel %vm1687_vm2, %v7526_v38, %v1705_v14  ;;  %v7605_v44 = vsel %vm2059_vm3, %v2068_v29, %v2072_v40 }
 0x195   : > { %13703 = vst [vmem:[#allocation24_spill] sm:$0xff] %v7596_v41  ;;  %v4599_v23 = vshll.u32 %v7588_v26, 16  ;;  %v4603_v42 = vshrl.u32 %v7588_v26, 16  ;;  %1263 = vmatpush.bf16.xpose.msra.mxu1 %v7593_v28  ;;  %2962 = vmatpush.bf16.xpose.msrb.mxu0 %v7596_v41 }
 0x196   : > { %13704 = vst [vmem:[#allocation25_spill] sm:$0xff] %v7600_v2  ;;  %v485_v35 = vpop.f32.mrf.mxu0 }
 0x197   : > { %13705 = vst [vmem:[#allocation26_spill] sm:$0xff] %v7605_v44  ;;  %v629_v39 = vpack.c.bf16 %v485_v35, %v485_v35  ;;  %v4601_v47 = vrot.slane %v4599_v23, 1  ;;  %v5418_v34 = vrot.slane %v4603_v42, 3  ;;  %v5419_v38 = vrot.slane %v4599_v23, 4 }
 0x199   : > { %v818_v31 = vunpack.c.l.b16 %v629_v39  ;;  %v7612_v17 = vsel %vm1651_vm1, %v4598_v52, %v4601_v47  ;;  %v5420_v29 = vor.u32 %v5419_v38, %v5418_v34  ;;  %v7624_v38 = vpop.trf.xlu1 }
 0x19a   : > { %13706 = vst [vmem:[#allocation27_spill] sm:$0xff] %v7612_v17 }
 0x19b   : > { %v7614_v60 = vpack.c.b16 %v818_v31, %v817_v8  ;;  %v7617_v63 = vsel %vm707_vm4, %v5417_v33, %v5420_v29 }
 0x19c   : > { %13708 = vst [vmem:[#allocation29_spill] sm:$0xff] %v7617_v63 }
 0x19d   : > { %13707 = vst [vmem:[#allocation28_spill] sm:$0xff] %v7614_v60  ;;  %v934_v7 = vshrl.u32 %v7614_v60, 16  ;;  %v937_v10 = vshll.u32 %v7614_v60, 16  ;;  %2963 = vmatpush.bf16.xpose.msrb.mxu0 %v7539_v5 }
 0x19e   : > { %v488_v3 = vpop.f32.mrf.mxu0 }
 0x19f   : > { %v630_v11 = vpack.c.bf16 %v488_v3, %v488_v3  ;;  %v936_v40 = vrot.slane %v934_v7, 3  ;;  %v939_v27 = vrot.slane %v937_v10, 4  ;;  %v2074_v23 = vrot.slane %v934_v7, 7 }
 0x1a0   : > { %v1707_v35 = vrot.slane %v934_v7, 4  ;;  %v1708_v52 = vrot.slane %v937_v10, 5  ;;  %v2614_v39 = vrot.slane %v937_v10, 1 }
 0x1a1   : > { %v819_v34 = vunpack.c.l.b16 %v630_v11  ;;  %6606 = vmatmul.msk.bf16.gmra.mxu0 %vm346_vm0, %v7416_v43  ;;  %v940_v33 = vor.u32 %v939_v27, %v936_v40  ;;  %v2075_v8 = vor.u32 %v2074_v23, %v937_v10 }
 0x1a2   : > { %v1709_v59 = vor.u32 %v1708_v52, %v1707_v35  ;;  %v2616_v37 = vor.u32 %v2614_v39, %v934_v7  ;;  %v7627_v9 = vsel %vm1651_vm1, %v2613_v24, %v2614_v39  ;;  %v4605_v24 = vor.u32 %v4603_v42, %v4601_v47 }
 0x1a3   : > { %13709 = vst [vmem:[#allocation30_spill] sm:$0xff] %v7627_v9  ;;  %v7629_v3 = vpack.c.b16 %v819_v34, %v818_v31  ;;  %v7632_v16 = vsel %vm707_vm4, %v931_v45, %v940_v33  ;;  %v7635_v63 = vsel %vm2059_vm3, %v2071_v1, %v2075_v8  ;;  %v7651_v8 = vpop.trf.xlu1 }
 0x1a4   : > { %13710 = vst [vmem:[#allocation31_spill] sm:$0xff] %v7635_v63  ;;  %v7638_v11 = vsel %vm1687_vm2, %v1705_v14, %v1709_v59 }
 0x1a5   : > { %13711 = vst [vmem:[#allocation32_spill] sm:$0xff] %v7638_v11  ;;  %v4606_v43 = vshll.u32 %v7629_v3, 16  ;;  %v4610_v10 = vshrl.u32 %v7629_v3, 16  ;;  %2964 = vmatpush.bf16.xpose.msrb.mxu0 %v7568_v13 }
 0x1a6   : > { %v490_v7 = vpop.f32.mrf.mxu0 }
 0x1a7   : > { %v631_v40 = vpack.c.bf16 %v490_v7, %v490_v7  ;;  %v4608_v31 = vrot.slane %v4606_v43, 1  ;;  %v5422_v27 = vrot.slane %v4610_v10, 3  ;;  %v5423_v35 = vrot.slane %v4606_v43, 4  ;;  %v313_v43 = vpop.trf.xlu0 }
 0x1a9   : > { %v820_v45 = vunpack.c.l.b16 %v631_v40  ;;  %v7644_v52 = vsel %vm1651_vm1, %v4605_v24, %v4608_v31  ;;  %v5424_v1 = vor.u32 %v5423_v35, %v5422_v27 }
 0x1aa   : > { %13712 = vst [vmem:[#allocation33_spill] sm:$0xff] %v7644_v52 }
 0x1ab   : > { %v7646_v39 = vpack.c.b16 %v820_v45, %v819_v34  ;;  %v7649_v14 = vsel %vm707_vm4, %v5420_v29, %v5424_v1 }
 0x1ac   : > { %13714 = vst [vmem:[#allocation35_spill] sm:$0xff] %v7649_v14 }
 0x1ad   : > { %13713 = vst [vmem:[#allocation34_spill] sm:$0xff] %v7646_v39  ;;  %v943_v30 = vshrl.u32 %v7646_v39, 16  ;;  %v946_v42 = vshll.u32 %v7646_v39, 16  ;;  %2965 = vmatpush.bf16.xpose.msrb.mxu0 %v7593_v28 }
 0x1ae   : > { %v493_v47 = vpop.f32.mrf.mxu0 }
 0x1af   : > { %v632_v7 = vpack.c.bf16 %v493_v47, %v493_v47  ;;  %v945_v40 = vrot.slane %v943_v30, 3  ;;  %v948_v24 = vrot.slane %v946_v42, 4  ;;  %v2077_v12 = vrot.slane %v943_v30, 7 }
 0x1b0   : > { %v1711_v27 = vrot.slane %v943_v30, 4  ;;  %v1712_v34 = vrot.slane %v946_v42, 5  ;;  %v2617_v35 = vrot.slane %v946_v42, 1 }
 0x1b1   : > { %v821_v25 = vunpack.c.l.b16 %v632_v7  ;;  %6607 = vmatmul.msk.bf16.gmra.mxu0 %vm346_vm0, %v313_v43  ;;  %v949_v29 = vor.u32 %v948_v24, %v945_v40  ;;  %v2078_v14 = vor.u32 %v2077_v12, %v946_v42  ;;  %v4612_v40 = vor.u32 %v4610_v10, %v4608_v31 }
 0x1b2   : > { %v1713_v17 = vor.u32 %v1712_v34, %v1711_v27  ;;  %v2619_v52 = vor.u32 %v2617_v35, %v943_v30  ;;  %v7658_v9 = vsel %vm1651_vm1, %v2616_v37, %v2617_v35  ;;  %v324_v30 = vpop.trf.xlu1 }
 0x1b3   : > { %13715 = vst [vmem:[#allocation36_spill] sm:$0xff] %v7658_v9  ;;  %v7660_v18 = vpack.c.b16 %v821_v25, %v820_v45  ;;  %v7663_v47 = vsel %vm707_vm4, %v940_v33, %v949_v29  ;;  %v7666_v51 = vsel %vm2059_vm3, %v2074_v23, %v2078_v14 }
 0x1b4   : > { %13716 = vst [vmem:[#allocation37_spill] sm:$0xff] %v7666_v51  ;;  %v7669_v48 = vsel %vm1687_vm2, %v1709_v59, %v1713_v17 }
 0x1b5   : > { %13717 = vst [vmem:[#allocation38_spill] sm:$0xff] %v7669_v48  ;;  %v4613_v43 = vshll.u32 %v7660_v18, 16  ;;  %v4617_v42 = vshrl.u32 %v7660_v18, 16 }
 0x1b6   : > { %v495_v7 = vpop.f32.mrf.mxu0 }
 0x1b7   : > { %v633_v37 = vpack.c.bf16 %v495_v7, %v495_v7  ;;  %v4615_v24 = vrot.slane %v4613_v43, 1  ;;  %v5426_v45 = vrot.slane %v4617_v42, 3  ;;  %v5427_v27 = vrot.slane %v4613_v43, 4 }
 0x1b9   : > { %v822_v34 = vunpack.c.l.b16 %v633_v37  ;;  %v7674_v33 = vsel %vm1651_vm1, %v4612_v40, %v4615_v24  ;;  %v5428_v23 = vor.u32 %v5427_v27, %v5426_v45 }
 0x1ba   : > { %13718 = vst [vmem:[#allocation39_spill] sm:$0xff] %v7674_v33  ;;  %v7683_v43 = vpop.trf.xlu1 }
 0x1bb   : > { %v7676_v14 = vpack.c.b16 %v822_v34, %v821_v25  ;;  %v7679_v59 = vsel %vm707_vm4, %v5424_v1, %v5428_v23 }
 0x1bc   : > { %13720 = vst [vmem:[#allocation41_spill] sm:$0xff] %v7679_v59 }
 0x1bd   : > { %13719 = vst [vmem:[#allocation40_spill] sm:$0xff] %v7676_v14  ;;  %v952_v35 = vshrl.u32 %v7676_v14, 16  ;;  %v955_v9 = vshll.u32 %v7676_v14, 16 }
 0x1be   : > { %v498_v22 = vpop.f32.mrf.mxu0 }
 0x1bf   : > { %v634_v10 = vpack.c.bf16 %v498_v22, %v498_v22  ;;  %v954_v31 = vrot.slane %v952_v35, 3  ;;  %v957_v7 = vrot.slane %v955_v9, 4  ;;  %v2080_v4 = vrot.slane %v952_v35, 7 }
 0x1c0   : > { %v1715_v37 = vrot.slane %v952_v35, 4  ;;  %v1716_v40 = vrot.slane %v955_v9, 5  ;;  %v2620_v33 = vrot.slane %v955_v9, 1 }
 0x1c1   : > { %v823_v45 = vunpack.c.l.b16 %v634_v10  ;;  %6608 = vmatmul.msk.bf16.gmra.mxu0 %vm346_vm0, %v7624_v38  ;;  %v958_v25 = vor.u32 %v957_v7, %v954_v31  ;;  %v2081_v1 = vor.u32 %v2080_v4, %v955_v9 }
 0x1c2   : > { %v1717_v27 = vor.u32 %v1716_v40, %v1715_v37  ;;  %v2622_v59 = vor.u32 %v2620_v33, %v952_v35  ;;  %v7688_v46 = vsel %vm1651_vm1, %v2619_v52, %v2620_v33  ;;  %v4619_v35 = vor.u32 %v4617_v42, %v4615_v24 }
 0x1c3   : > { %13721 = vst [vmem:[#allocation42_spill] sm:$0xff] %v7688_v46  ;;  %v7690_v22 = vpack.c.b16 %v823_v45, %v822_v34  ;;  %v7693_v56 = vsel %vm707_vm4, %v949_v29, %v958_v25  ;;  %v7696_v32 = vsel %vm2059_vm3, %v2077_v12, %v2081_v1  ;;  %v326_v12 = vpop.trf.xlu1 }
 0x1c4   : > { %13722 = vst [vmem:[#allocation43_spill] sm:$0xff] %v7696_v32  ;;  %v7699_v10 = vsel %vm1687_vm2, %v1713_v17, %v1717_v27 }
 0x1c5   : > { %13723 = vst [vmem:[#allocation44_spill] sm:$0xff] %v7699_v10  ;;  %v4620_v38 = vshll.u32 %v7690_v22, 16  ;;  %v4624_v9 = vshrl.u32 %v7690_v22, 16 }
 0x1c6   : > { %v500_v31 = vpop.f32.mrf.mxu0 }
 0x1c7   : > { %v4622_v7 = vrot.slane %v4620_v38, 1  ;;  %v635_v52 = vpack.c.bf16 %v500_v31, %v500_v31  ;;  %v5430_v33 = vrot.slane %v4624_v9, 3  ;;  %v5431_v34 = vrot.slane %v4620_v38, 4 }
 0x1c9   : > { %v824_v37 = vunpack.c.l.b16 %v635_v52  ;;  %v7704_v29 = vsel %vm1651_vm1, %v4619_v35, %v4622_v7  ;;  %v5432_v40 = vor.u32 %v5431_v34, %v5430_v33 }
 0x1ca   : > { %13724 = vst [vmem:[#allocation45_spill] sm:$0xff] %v7704_v29 }
 0x1cb   : > { %v7706_v1 = vpack.c.b16 %v824_v37, %v823_v45  ;;  %v7709_v17 = vsel %vm707_vm4, %v5428_v23, %v5432_v40 }
 0x1cc   : > { %13726 = vst [vmem:[#allocation47_spill] sm:$0xff] %v7709_v17 }
 0x1cd   : > { %13725 = vst [vmem:[#allocation46_spill] sm:$0xff] %v7706_v1  ;;  %v961_v46 = vshrl.u32 %v7706_v1, 16  ;;  %v964_v19 = vshll.u32 %v7706_v1, 16 }
 0x1ce   : > { %v503_v42 = vpop.f32.mrf.mxu0 }
 0x1cf   : > { %v636_v24 = vpack.c.bf16 %v503_v42, %v503_v42  ;;  %v963_v31 = vrot.slane %v961_v46, 3  ;;  %v966_v58 = vrot.slane %v964_v19, 4  ;;  %v2083_v38 = vrot.slane %v961_v46, 7 }
 0x1d0   : > { %v1719_v52 = vrot.slane %v961_v46, 4  ;;  %v1720_v36 = vrot.slane %v964_v19, 5  ;;  %v2623_v35 = vrot.slane %v964_v19, 1 }
 0x1d1   : > { %v825_v29 = vunpack.c.l.b16 %v636_v24  ;;  %6609 = vmatmul.msk.bf16.gmra.mxu0 %vm346_vm0, %v324_v30  ;;  %v7714_v45 = vor.u32 %v966_v58, %v963_v31  ;;  %v2084_v33 = vor.u32 %v2083_v38, %v964_v19  ;;  %v7728_v24 = vpop.trf.xlu1  ;;  %v4626_v30 = vor.u32 %v4624_v9, %v4622_v7 }
 0x1d2   : > { %v1721_v23 = vor.u32 %v1720_v36, %v1719_v52  ;;  %v2625_v34 = vor.u32 %v2623_v35, %v961_v46  ;;  %v7717_v17 = vsel %vm1651_vm1, %v2622_v59, %v2623_v35 }
 0x1d3   : > { %13727 = vst [vmem:[#allocation48_spill] sm:$0xff] %v7717_v17  ;;  %v7719_v15 = vpack.c.b16 %v825_v29, %v824_v37  ;;  %v7723_v42 = vsel %vm707_vm4, %v958_v25, %v7714_v45  ;;  %v7726_v44 = vsel %vm2059_vm3, %v2080_v4, %v2084_v33 }
 0x1d4   : > { %13728 = vst [vmem:[#allocation49_spill] sm:$0xff] %v7726_v44  ;;  %v7731_v58 = vsel %vm1687_vm2, %v1717_v27, %v1721_v23 }
 0x1d5   : > { %13729 = vst [vmem:[#allocation50_spill] sm:$0xff] %v7731_v58  ;;  %v4627_v36 = vshll.u32 %v7719_v15, 16  ;;  %v4631_v46 = vshrl.u32 %v7719_v15, 16 }
 0x1d6   : > { %v505_v19 = vpop.f32.mrf.mxu0 }
 0x1d7   : > { %v637_v59 = vpack.c.bf16 %v505_v19, %v505_v19  ;;  %v4629_v37 = vrot.slane %v4627_v36, 1  ;;  %v5434_v31 = vrot.slane %v4631_v46, 3  ;;  %v5435_v52 = vrot.slane %v4627_v36, 4 }
 0x1d9   : > { %v826_v25 = vunpack.c.l.b16 %v637_v59  ;;  %v7736_v35 = vsel %vm1651_vm1, %v4626_v30, %v4629_v37  ;;  %v4633_v4 = vor.u32 %v4631_v46, %v4629_v37  ;;  %v5436_v33 = vor.u32 %v5435_v52, %v5434_v31  ;;  %v328_v19 = vpop.trf.xlu1 }
 0x1da   : > { %13730 = vst [vmem:[#allocation51_spill] sm:$0xff] %v7736_v35 }
 0x1db   : > { %v7738_v17 = vpack.c.b16 %v826_v25, %v825_v29  ;;  %v7741_v27 = vsel %vm707_vm4, %v5432_v40, %v5436_v33 }
 0x1dc   : > { %13732 = vst [vmem:[#allocation53_spill] sm:$0xff] %v7741_v27 }
 0x1dd   : > { %13731 = vst [vmem:[#allocation52_spill] sm:$0xff] %v7738_v17  ;;  %v7744_v60 = vshrl.u32 %v7738_v17, 16  ;;  %v7747_v9 = vshll.u32 %v7738_v17, 16 }
 0x1de   : > { %v508_v7 = vpop.f32.mrf.mxu0 }
 0x1df   : > { %v638_v36 = vpack.c.bf16 %v508_v7, %v508_v7  ;;  %v2086_v59 = vrot.slane %v7744_v60, 7  ;;  %v1723_v30 = vrot.slane %v7744_v60, 4  ;;  %v1724_v46 = vrot.slane %v7747_v9, 5 }
 0x1e0   : > { %v2626_v29 = vrot.slane %v7747_v9, 1 }
 0x1e1   : > { %v827_v37 = vunpack.c.l.b16 %v638_v36  ;;  %6610 = vmatmul.msk.bf16.gmra.mxu0 %vm346_vm0, %v326_v12  ;;  %v2087_v40 = vor.u32 %v2086_v59, %v7747_v9  ;;  %v1725_v31 = vor.u32 %v1724_v46, %v1723_v30  ;;  %v7769_v48 = vpop.trf.xlu1 }
 0x1e2   : > { %v2628_v52 = vor.u32 %v2626_v29, %v7744_v60  ;;  %v7757_v27 = vsel %vm1651_vm1, %v2625_v34, %v2626_v29 }
 0x1e3   : > { %13733 = vst [vmem:[#allocation54_spill] sm:$0xff] %v7757_v27  ;;  %v7759_v7 = vpack.c.b16 %v827_v37, %v826_v25  ;;  %v7762_v35 = vsel %vm2059_vm3, %v2083_v38, %v2087_v40  ;;  %v7765_v11 = vsel %vm1687_vm2, %v1721_v23, %v1725_v31 }
 0x1e4   : > { %13734 = vst [vmem:[#allocation55_spill] sm:$0xff] %v7762_v35 }
 0x1e5   : > { %13735 = vst [vmem:[#allocation56_spill] sm:$0xff] %v7765_v11  ;;  %v4634_v36 = vshll.u32 %v7759_v7, 16  ;;  %v4638_v12 = vshrl.u32 %v7759_v7, 16 }
 0x1e6   : > { %v510_v63 = vpop.f32.mrf.mxu0 }
 0x1e7   : > { %v639_v28 = vpack.c.bf16 %v510_v63, %v510_v63  ;;  %v4636_v30 = vrot.slane %v4634_v36, 1  ;;  %v5438_v46 = vrot.slane %v4638_v12, 3  ;;  %v5439_v39 = vrot.slane %v4634_v36, 4 }
 0x1e9   : > { %v828_v34 = vunpack.c.l.b16 %v639_v28  ;;  %v7772_v25 = vsel %vm1651_vm1, %v4633_v4, %v4636_v30  ;;  %v5440_v38 = vor.u32 %v5439_v39, %v5438_v46  ;;  %v330_v39 = vpop.trf.xlu1  ;;  %v4640_v5 = vor.u32 %v4638_v12, %v4636_v30 }
 0x1ea   : > { %13736 = vst [vmem:[#allocation57_spill] sm:$0xff] %v7772_v25 }
 0x1eb   : > { %v7774_v29 = vpack.c.b16 %v828_v34, %v827_v37  ;;  %v7777_v23 = vsel %vm707_vm4, %v5436_v33, %v5440_v38 }
 0x1ec   : > { %13738 = vst [vmem:[#allocation59_spill] sm:$0xff] %v7777_v23 }
 0x1ed   : > { %13737 = vst [vmem:[#allocation58_spill] sm:$0xff] %v7774_v29  ;;  %v979_v40 = vshrl.u32 %v7774_v29, 16  ;;  %v982_v27 = vshll.u32 %v7774_v29, 16 }
 0x1ee   : > { %v513_v63 = vpop.f32.mrf.mxu0 }
 0x1ef   : > { %v640_v51 = vpack.c.bf16 %v513_v63, %v513_v63  ;;  %v2089_v13 = vrot.slane %v979_v40, 7  ;;  %v1727_v36 = vrot.slane %v979_v40, 4  ;;  %v1728_v14 = vrot.slane %v982_v27, 5 }
 0x1f0   : > { %v2629_v10 = vrot.slane %v982_v27, 1  ;;  %v981_v30 = vrot.slane %v979_v40, 3 }
 0x1f1   : > { %v829_v28 = vunpack.c.l.b16 %v640_v51  ;;  %6611 = vmatmul.msk.bf16.gmra.mxu0 %vm346_vm0, %v328_v19  ;;  %v2090_v4 = vor.u32 %v2089_v13, %v982_v27  ;;  %v1729_v37 = vor.u32 %v1728_v14, %v1727_v36 }
 0x1f2   : > { %v2631_v46 = vor.u32 %v2629_v10, %v979_v40  ;;  %v7783_v33 = vsel %vm1651_vm1, %v2628_v52, %v2629_v10 }
 0x1f3   : > { %13739 = vst [vmem:[#allocation60_spill] sm:$0xff] %v7783_v33  ;;  %v7785_v23 = vpack.c.b16 %v829_v28, %v828_v34  ;;  %v7788_v25 = vsel %vm2059_vm3, %v2086_v59, %v2090_v4  ;;  %v7791_v63 = vsel %vm1687_vm2, %v1725_v31, %v1729_v37  ;;  %v7803_v4 = vpop.trf.xlu1 }
 0x1f4   : > { %13740 = vst [vmem:[#allocation61_spill] sm:$0xff] %v7788_v25 }
 0x1f5   : > { %13741 = vst [vmem:[#allocation62_spill] sm:$0xff] %v7791_v63  ;;  %v4641_v32 = vshll.u32 %v7785_v23, 16  ;;  %v4645_v51 = vshrl.u32 %v7785_v23, 16 }
 0x1f6   : > { %v515_v19 = vpop.f32.mrf.mxu0 }
 0x1f7   : > { %v4643_v1 = vrot.slane %v4641_v32, 1  ;;  %v5442_v14 = vrot.slane %v4645_v51, 3  ;;  %v5443_v36 = vrot.slane %v4641_v32, 4  ;;  %v641_v58 = vpack.c.bf16 %v515_v19, %v515_v19 }
 0x1f8   : > { %v984_v32 = vrot.slane %v982_v27, 4  ;;  %v975_v27 = vrot.slane %v7747_v9, 4 }
 0x1f9   : > { %v830_v10 = vunpack.c.l.b16 %v641_v58  ;;  %v7796_v52 = vsel %vm1651_vm1, %v4640_v5, %v4643_v1  ;;  %v5444_v34 = vor.u32 %v5443_v36, %v5442_v14  ;;  %v972_v14 = vrot.slane %v7744_v60, 3 }
 0x1fa   : > { %13742 = vst [vmem:[#allocation63_spill] sm:$0xff] %v7796_v52  ;;  %v985_v17 = vor.u32 %v984_v32, %v981_v30 }
 0x1fb   : > { %v7798_v59 = vpack.c.b16 %v830_v10, %v829_v28  ;;  %v7801_v31 = vsel %vm707_vm4, %v5440_v38, %v5444_v34 }
 0x1fc   : > { %13744 = vst [vmem:[#allocation65_spill] sm:$0xff] %v7801_v31 }
 0x1fd   : > { %13743 = vst [vmem:[#allocation64_spill] sm:$0xff] %v7798_v59  ;;  %v7806_v33 = vshrl.u32 %v7798_v59, 16  ;;  %v991_v12 = vshll.u32 %v7798_v59, 16  ;;  %v7912_v59 = vsel %vm1158_vm5, %v7693_v56, 0 }
 0x1fe   : > { %v518_v19 = vpop.f32.mrf.mxu0  ;;  %13765 = vst [vmem:[#allocation86_spill] sm:$0xff] %v7912_v59 }
 0x1ff   : > { %v642_v58 = vpack.c.bf16 %v518_v19, %v518_v19  ;;  %v990_v5 = vrot.slane %v7806_v33, 3  ;;  %v993_v52 = vrot.slane %v991_v12, 4  ;;  %v1731_v28 = vrot.slane %v7806_v33, 4 }
 0x200   : > { %v1732_v38 = vrot.slane %v991_v12, 5  ;;  %v2092_v36 = vrot.slane %v7806_v33, 7  ;;  %v2632_v31 = vrot.slane %v991_v12, 1 }
 0x201   : > { %v831_v44 = vunpack.c.l.b16 %v642_v58  ;;  %6612 = vmatmul.msk.bf16.gmra.mxu0 %vm346_vm0, %v330_v39  ;;  %v994_v11 = vor.u32 %v993_v52, %v990_v5 }
 0x202   : > { %v1733_v40 = vor.u32 %v1732_v38, %v1731_v28  ;;  %v2093_v19 = vor.u32 %v2092_v36, %v991_v12  ;;  %v2634_v35 = vor.u32 %v2632_v31, %v7806_v33  ;;  %v7817_v29 = vsel %vm1651_vm1, %v2631_v46, %v2632_v31  ;;  %v332_v31 = vpop.trf.xlu1 }
 0x203   : > { %13745 = vst [vmem:[#allocation66_spill] sm:$0xff] %v7817_v29  ;;  %v7819_v63 = vpack.c.b16 %v831_v44, %v830_v10  ;;  %v995_v60 = vsel %vm707_vm4, %v985_v17, %v994_v11  ;;  %v976_v10 = vor.u32 %v975_v27, %v972_v14  ;;  %v4647_v12 = vor.u32 %v4645_v51, %v4643_v1 }
 0x204   : > { %v7823_v25 = vsel %vm1158_vm5, %v995_v60, 0  ;;  %v7826_v39 = vsel %vm2059_vm3, %v2089_v13, %v2093_v19  ;;  %v7829_v52 = vsel %vm1687_vm2, %v1729_v37, %v1733_v40 }
 0x205   : > { %13746 = vst [vmem:[#allocation67_spill] sm:$0xff] %v7819_v63  ;;  %v4648_v9 = vshll.u32 %v7819_v63, 16  ;;  %v4652_v33 = vshrl.u32 %v7819_v63, 16  ;;  %1280 = vmatpush.bf16.xpose.msra.mxu2 %v7823_v25  ;;  %v986_v13 = vsel %vm707_vm4, %v976_v10, %v985_v17 }
 0x206   : > { %13747 = vst [vmem:[#allocation68_spill] sm:$0xff] %v7823_v25  ;;  %v520_v46 = vpop.f32.mrf.mxu0  ;;  %v7844_v14 = vsel %vm1158_vm5, %v986_v13, 0 }
 0x207   : > { %13748 = vst [vmem:[#allocation69_spill] sm:$0xff] %v7826_v39  ;;  %v5446_v30 = vrot.slane %v4652_v33, 3  ;;  %v5447_v32 = vrot.slane %v4648_v9, 4  ;;  %v643_v58 = vpack.c.bf16 %v520_v46, %v520_v46  ;;  %v4650_v5 = vrot.slane %v4648_v9, 1 }
 0x208   : > { %13749 = vst [vmem:[#allocation70_spill] sm:$0xff] %v7829_v52  ;;  %v7957_v39 = vsel %vm1158_vm5, %v7632_v16, 0 }
 0x209   : > { %v832_v28 = vunpack.c.l.b16 %v643_v58  ;;  %v7836_v37 = vsel %vm1651_vm1, %v4647_v12, %v4650_v5  ;;  %v5448_v38 = vor.u32 %v5447_v32, %v5446_v30  ;;  %v4654_v19 = vor.u32 %v4652_v33, %v4650_v5  ;;  %13753 = vst [vmem:[#allocation74_spill] sm:$0xff] %v7844_v14 }
 0x20a   : > { %13750 = vst [vmem:[#allocation71_spill] sm:$0xff] %v7836_v37  ;;  %v7853_v46 = vpop.trf.xlu1  ;;  %v977_v58 = vsel %vm707_vm4, %v7714_v45, %v976_v10 }
 0x20b   : > { %v7838_v60 = vpack.c.b16 %v832_v28, %v831_v44  ;;  %v7841_v25 = vsel %vm707_vm4, %v5444_v34, %v5448_v38  ;;  %13774 = vst [vmem:[#allocation95_spill] sm:$0xff] %v7957_v39 }
 0x20c   : > { %13752 = vst [vmem:[#allocation73_spill] sm:$0xff] %v7841_v25 }
 0x20d   : > { %13751 = vst [vmem:[#allocation72_spill] sm:$0xff] %v7838_v60  ;;  %v7847_v1 = vshrl.u32 %v7838_v60, 16  ;;  %v1000_v51 = vshll.u32 %v7838_v60, 16  ;;  %1281 = vmatpush.bf16.xpose.msra.mxu2 %v7844_v14 }
 0x20e   : > { %v523_v17 = vpop.f32.mrf.mxu0 }
 0x20f   : > { %v644_v27 = vpack.c.bf16 %v523_v17, %v523_v17  ;;  %v999_v9 = vrot.slane %v7847_v1, 3  ;;  %v1002_v33 = vrot.slane %v1000_v51, 4  ;;  %v1735_v44 = vrot.slane %v7847_v1, 4 }
 0x210   : > { %v1736_v34 = vrot.slane %v1000_v51, 5  ;;  %v2095_v12 = vrot.slane %v7847_v1, 7  ;;  %v2635_v30 = vrot.slane %v1000_v51, 1 }
 0x211   : > { %v833_v32 = vunpack.c.l.b16 %v644_v27  ;;  %6613 = vmatmul.msk.bf16.gmra.mxu0 %vm346_vm0, %v332_v31  ;;  %v1003_v5 = vor.u32 %v1002_v33, %v999_v9  ;;  %v7869_v27 = vsel %vm1158_vm5, %v977_v58, 0  ;;  %v7890_v58 = vsel %vm1158_vm5, %v7723_v42, 0 }
 0x212   : > { %v1737_v13 = vor.u32 %v1736_v34, %v1735_v44  ;;  %v2096_v17 = vor.u32 %v2095_v12, %v1000_v51  ;;  %v2637_v25 = vor.u32 %v2635_v30, %v7847_v1  ;;  %v7861_v37 = vsel %vm1651_vm1, %v2634_v35, %v2635_v30  ;;  %13756 = vst [vmem:[#allocation77_spill] sm:$0xff] %v7869_v27  ;;  %v334_v34 = vpop.trf.xlu1 }
 0x213   : > { %13754 = vst [vmem:[#allocation75_spill] sm:$0xff] %v7861_v37  ;;  %v7863_v14 = vpack.c.b16 %v833_v32, %v832_v28  ;;  %v7866_v29 = vsel %vm707_vm4, %v994_v11, %v1003_v5 }
 0x214   : > { %v7872_v31 = vsel %vm1687_vm2, %v1733_v40, %v1737_v13  ;;  %v7875_v45 = vsel %vm2059_vm3, %v2092_v36, %v2096_v17  ;;  %13762 = vst [vmem:[#allocation83_spill] sm:$0xff] %v7890_v58 }
 0x215   : > { %13755 = vst [vmem:[#allocation76_spill] sm:$0xff] %v7863_v14  ;;  %v4655_v10 = vshll.u32 %v7863_v14, 16  ;;  %v4659_v1 = vshrl.u32 %v7863_v14, 16  ;;  %1282 = vmatpush.bf16.xpose.msra.mxu2 %v7869_v27 }
 0x216   : > { %13757 = vst [vmem:[#allocation78_spill] sm:$0xff] %v7872_v31  ;;  %v525_v35 = vpop.f32.mrf.mxu0 }
 0x217   : > { %13758 = vst [vmem:[#allocation79_spill] sm:$0xff] %v7875_v45  ;;  %v645_v28 = vpack.c.bf16 %v525_v35, %v525_v35  ;;  %v4657_v51 = vrot.slane %v4655_v10, 1  ;;  %v5450_v11 = vrot.slane %v4659_v1, 3  ;;  %v5451_v9 = vrot.slane %v4655_v10, 4 }
 0x219   : > { %v834_v33 = vunpack.c.l.b16 %v645_v28  ;;  %v7881_v44 = vsel %vm1651_vm1, %v4654_v19, %v4657_v51  ;;  %v5452_v40 = vor.u32 %v5451_v9, %v5450_v11 }
 0x21a   : > { %13759 = vst [vmem:[#allocation80_spill] sm:$0xff] %v7881_v44 }
 0x21b   : > { %v7883_v30 = vpack.c.b16 %v834_v33, %v833_v32  ;;  %v7886_v36 = vsel %vm707_vm4, %v5448_v38, %v5452_v40 }
 0x21c   : > { %13761 = vst [vmem:[#allocation82_spill] sm:$0xff] %v7886_v36 }
 0x21d   : > { %13760 = vst [vmem:[#allocation81_spill] sm:$0xff] %v7883_v30  ;;  %v7893_v17 = vshrl.u32 %v7883_v30, 16  ;;  %v1009_v10 = vshll.u32 %v7883_v30, 16  ;;  %1283 = vmatpush.bf16.xpose.msra.mxu2 %v7890_v58 }
 0x21e   : > { %v528_v19 = vpop.f32.mrf.mxu0 }
 0x21f   : > { %v646_v35 = vpack.c.bf16 %v528_v19, %v528_v19  ;;  %v1008_v28 = vrot.slane %v7893_v17, 3  ;;  %v1011_v32 = vrot.slane %v1009_v10, 4  ;;  %v1739_v11 = vrot.slane %v7893_v17, 4 }
 0x220   : > { %v1740_v38 = vrot.slane %v1009_v10, 5  ;;  %v2098_v9 = vrot.slane %v7893_v17, 7  ;;  %v2638_v36 = vrot.slane %v1009_v10, 1 }
 0x221   : > { %v835_v42 = vunpack.c.l.b16 %v646_v35  ;;  %6614 = vmatmul.msk.bf16.gmra.mxu0 %vm346_vm0, %v334_v34  ;;  %v1012_v44 = vor.u32 %v1011_v32, %v1008_v28  ;;  %v7914_v35 = vpop.trf.xlu1 }
 0x222   : > { %v1741_v27 = vor.u32 %v1740_v38, %v1739_v11  ;;  %v2099_v37 = vor.u32 %v2098_v9, %v1009_v10  ;;  %v2640_v60 = vor.u32 %v2638_v36, %v7893_v17  ;;  %v7903_v58 = vsel %vm1651_vm1, %v2637_v25, %v2638_v36 }
 0x223   : > { %13763 = vst [vmem:[#allocation84_spill] sm:$0xff] %v7903_v58  ;;  %v7905_v19 = vpack.c.b16 %v835_v42, %v834_v33  ;;  %v7908_v30 = vsel %vm707_vm4, %v1003_v5, %v1012_v44  ;;  %v4661_v36 = vor.u32 %v4659_v1, %v4657_v51 }
 0x224   : > { %v7917_v34 = vsel %vm1687_vm2, %v1737_v13, %v1741_v27  ;;  %v7920_v10 = vsel %vm2059_vm3, %v2095_v12, %v2099_v37  ;;  %v7935_v12 = vsel %vm1158_vm5, %v7663_v47, 0 }
 0x225   : > { %13764 = vst [vmem:[#allocation85_spill] sm:$0xff] %v7905_v19  ;;  %v4662_v25 = vshll.u32 %v7905_v19, 16  ;;  %v4666_v33 = vshrl.u32 %v7905_v19, 16  ;;  %1284 = vmatpush.bf16.xpose.msra.mxu2 %v7912_v59 }
 0x226   : > { %13766 = vst [vmem:[#allocation87_spill] sm:$0xff] %v7917_v34  ;;  %v530_v5 = vpop.f32.mrf.mxu0 }
 0x227   : > { %13767 = vst [vmem:[#allocation88_spill] sm:$0xff] %v7920_v10  ;;  %v647_v17 = vpack.c.bf16 %v530_v5, %v530_v5  ;;  %v4664_v28 = vrot.slane %v4662_v25, 1  ;;  %v5454_v56 = vrot.slane %v4666_v33, 3  ;;  %v5455_v32 = vrot.slane %v4662_v25, 4 }
 0x228   : > { %13771 = vst [vmem:[#allocation92_spill] sm:$0xff] %v7935_v12 }
 0x229   : > { %v836_v11 = vunpack.c.l.b16 %v647_v17  ;;  %v7926_v38 = vsel %vm1651_vm1, %v4661_v36, %v4664_v28  ;;  %v5456_v13 = vor.u32 %v5455_v32, %v5454_v56  ;;  %v336_v5 = vpop.trf.xlu1 }
 0x22a   : > { %13768 = vst [vmem:[#allocation89_spill] sm:$0xff] %v7926_v38 }
 0x22b   : > { %v7928_v58 = vpack.c.b16 %v836_v11, %v835_v42  ;;  %v7931_v37 = vsel %vm707_vm4, %v5452_v40, %v5456_v13 }
 0x22c   : > { %13770 = vst [vmem:[#allocation91_spill] sm:$0xff] %v7931_v37 }
 0x22d   : > { %13769 = vst [vmem:[#allocation90_spill] sm:$0xff] %v7928_v58  ;;  %v7938_v1 = vshrl.u32 %v7928_v58, 16  ;;  %v1018_v51 = vshll.u32 %v7928_v58, 16  ;;  %1285 = vmatpush.bf16.xpose.msra.mxu2 %v7935_v12 }
 0x22e   : > { %v533_v25 = vpop.f32.mrf.mxu0 }
 0x22f   : > { %v648_v36 = vpack.c.bf16 %v533_v25, %v533_v25  ;;  %v1017_v42 = vrot.slane %v7938_v1, 3  ;;  %v1020_v17 = vrot.slane %v1018_v51, 4  ;;  %v1743_v40 = vrot.slane %v7938_v1, 4 }
 0x230   : > { %v1744_v56 = vrot.slane %v1018_v51, 5  ;;  %v2101_v32 = vrot.slane %v7938_v1, 7  ;;  %v2641_v47 = vrot.slane %v1018_v51, 1 }
 0x231   : > { %v837_v37 = vunpack.c.l.b16 %v648_v36  ;;  %6615 = vmatmul.msk.bf16.gmra.mxu0 %vm346_vm0, %v336_v5  ;;  %v1021_v38 = vor.u32 %v1020_v17, %v1017_v42 }
 0x232   : > { %v1745_v52 = vor.u32 %v1744_v56, %v1743_v40  ;;  %v2102_v58 = vor.u32 %v2101_v32, %v1018_v51  ;;  %v2643_v12 = vor.u32 %v2641_v47, %v7938_v1  ;;  %v7948_v45 = vsel %vm1651_vm1, %v2640_v60, %v2641_v47 }
 0x233   : > { %13772 = vst [vmem:[#allocation93_spill] sm:$0xff] %v7948_v45  ;;  %v7950_v25 = vpack.c.b16 %v837_v37, %v836_v11  ;;  %v7953_v63 = vsel %vm707_vm4, %v1012_v44, %v1021_v38  ;;  %v4668_v51 = vor.u32 %v4666_v33, %v4664_v28  ;;  %v7983_v33 = vsel %vm1158_vm5, %v7494_v50, 0 }
 0x234   : > { %v7960_v36 = vsel %vm1687_vm2, %v1741_v27, %v1745_v52  ;;  %v7963_v5 = vsel %vm2059_vm3, %v2098_v9, %v2102_v58  ;;  %13780 = vst [vmem:[#allocation101_spill] sm:$0xff] %v7983_v33 }
 0x235   : > { %13773 = vst [vmem:[#allocation94_spill] sm:$0xff] %v7950_v25  ;;  %v4669_v1 = vshll.u32 %v7950_v25, 16  ;;  %v4673_v60 = vshrl.u32 %v7950_v25, 16  ;;  %1286 = vmatpush.bf16.xpose.msra.mxu2 %v7957_v39 }
 0x236   : > { %13775 = vst [vmem:[#allocation96_spill] sm:$0xff] %v7960_v36  ;;  %v535_v11 = vpop.f32.mrf.mxu0 }
 0x237   : > { %13776 = vst [vmem:[#allocation97_spill] sm:$0xff] %v7963_v5  ;;  %v649_v44 = vpack.c.bf16 %v535_v11, %v535_v11  ;;  %v4671_v42 = vrot.slane %v4669_v1, 1  ;;  %v5458_v17 = vrot.slane %v4673_v60, 3  ;;  %v5459_v40 = vrot.slane %v4669_v1, 4 }
 0x239   : > { %v838_v16 = vunpack.c.l.b16 %v649_v44  ;;  %v7969_v56 = vsel %vm1651_vm1, %v4668_v51, %v4671_v42  ;;  %v5460_v27 = vor.u32 %v5459_v40, %v5458_v17 }
 0x23a   : > { %13777 = vst [vmem:[#allocation98_spill] sm:$0xff] %v7969_v56 }
 0x23b   : > { %v7971_v47 = vpack.c.b16 %v838_v16, %v837_v37  ;;  %v7974_v58 = vsel %vm707_vm4, %v5456_v13, %v5460_v27 }
 0x23c   : > { %13779 = vst [vmem:[#allocation100_spill] sm:$0xff] %v7974_v58 }
 0x23d   : > { %13778 = vst [vmem:[#allocation99_spill] sm:$0xff] %v7971_v47  ;;  %v7977_v9 = vshrl.u32 %v7971_v47, 16  ;;  %v1027_v45 = vshll.u32 %v7971_v47, 16  ;;  %1287 = vmatpush.bf16.xpose.msra.mxu2 %v7596_v41 }
 0x23e   : > { %v538_v28 = vpop.f32.mrf.mxu0 }
 0x23f   : > { %v650_v1 = vpack.c.bf16 %v538_v28, %v538_v28  ;;  %v1026_v37 = vrot.slane %v7977_v9, 3  ;;  %v1029_v11 = vrot.slane %v1027_v45, 4  ;;  %v1747_v13 = vrot.slane %v7977_v9, 4 }
 0x240   : > { %v1748_v51 = vrot.slane %v1027_v45, 5  ;;  %v2104_v44 = vrot.slane %v7977_v9, 7  ;;  %v2644_v17 = vrot.slane %v1027_v45, 1 }
 0x241   : > { %v839_v40 = vunpack.c.l.b16 %v650_v1  ;;  %6616 = vmatmul.msk.bf16.gmra.mxu0 %vm346_vm0, %v7651_v8  ;;  %v1030_v58 = vor.u32 %v1029_v11, %v1026_v37  ;;  %v8008_v8 = vsel %vm1158_vm5, %v7466_v20, 0 }
 0x242   : > { %v1749_v50 = vor.u32 %v1748_v51, %v1747_v13  ;;  %v2105_v56 = vor.u32 %v2104_v44, %v1027_v45  ;;  %v2646_v47 = vor.u32 %v2644_v17, %v7977_v9  ;;  %v7993_v28 = vsel %vm1651_vm1, %v2643_v12, %v2644_v17  ;;  %13785 = vst [vmem:[#allocation106_spill] sm:$0xff] %v8008_v8 }
 0x243   : > { %13781 = vst [vmem:[#allocation102_spill] sm:$0xff] %v7993_v28  ;;  %v7995_v41 = vpack.c.b16 %v839_v40, %v838_v16  ;;  %v7998_v39 = vsel %vm707_vm4, %v1021_v38, %v1030_v58  ;;  %v4675_v16 = vor.u32 %v4673_v60, %v4671_v42  ;;  %v8023_v17 = vsel %vm1158_vm5, %v7444_v0, 0 }
 0x244   : > { %v8001_v31 = vsel %vm1687_vm2, %v1745_v52, %v1749_v50  ;;  %v8004_v1 = vsel %vm2059_vm3, %v2101_v32, %v2105_v56  ;;  %13789 = vst [vmem:[#allocation110_spill] sm:$0xff] %v8023_v17 }
 0x245   : > { %1532 = vmatpush.bf16.xpose.msrb.mxu2 %v7983_v33  ;;  %13782 = vst [vmem:[#allocation103_spill] sm:$0xff] %v7995_v41  ;;  %v4676_v45 = vshll.u32 %v7995_v41, 16  ;;  %v4680_v12 = vshrl.u32 %v7995_v41, 16 }
 0x246   : > { %13783 = vst [vmem:[#allocation104_spill] sm:$0xff] %v8001_v31  ;;  %v540_v9 = vpop.f32.mrf.mxu0 }
 0x247   : > { %13784 = vst [vmem:[#allocation105_spill] sm:$0xff] %v8004_v1  ;;  %v4678_v38 = vrot.slane %v4676_v45, 1  ;;  %v651_v37 = vpack.c.bf16 %v540_v9, %v540_v9  ;;  %v5462_v11 = vrot.slane %v4680_v12, 3  ;;  %v5463_v52 = vrot.slane %v4676_v45, 4 }
 0x249   : > { %v840_v13 = vunpack.c.l.b16 %v651_v37  ;;  %v8014_v32 = vsel %vm1651_vm1, %v4675_v16, %v4678_v38  ;;  %v5464_v56 = vor.u32 %v5463_v52, %v5462_v11 }
 0x24a   : > { %13786 = vst [vmem:[#allocation107_spill] sm:$0xff] %v8014_v32 }
 0x24b   : > { %v8016_v51 = vpack.c.b16 %v840_v13, %v839_v40  ;;  %v8019_v20 = vsel %vm707_vm4, %v5460_v27, %v5464_v56 }
 0x24c   : > { %13788 = vst [vmem:[#allocation109_spill] sm:$0xff] %v8019_v20 }
 0x24d   : > { %1533 = vmatpush.bf16.xpose.msrb.mxu2 %v8008_v8  ;;  %13787 = vst [vmem:[#allocation108_spill] sm:$0xff] %v8016_v51  ;;  %v1033_v60 = vshrl.u32 %v8016_v51, 16  ;;  %v1036_v42 = vshll.u32 %v8016_v51, 16 }
 0x24e   : > { %v543_v9 = vpop.f32.mrf.mxu0 }
 0x24f   : > { %v652_v45 = vpack.c.bf16 %v543_v9, %v543_v9  ;;  %v1035_v16 = vrot.slane %v1033_v60, 3  ;;  %v1038_v37 = vrot.slane %v1036_v42, 4  ;;  %v1751_v11 = vrot.slane %v1033_v60, 4 }
 0x250   : > { %v1752_v40 = vrot.slane %v1036_v42, 5  ;;  %v2107_v52 = vrot.slane %v1033_v60, 7  ;;  %v2647_v32 = vrot.slane %v1036_v42, 1 }
 0x251   : > { %v841_v27 = vunpack.c.l.b16 %v652_v45  ;;  %6617 = vmatmul.msk.bf16.gmra.mxu0 %vm346_vm0, %v7683_v43  ;;  %v8030_v0 = vor.u32 %v1038_v37, %v1035_v16  ;;  %v4682_v16 = vor.u32 %v4680_v12, %v4678_v38 }
 0x252   : > { %v1753_v20 = vor.u32 %v1752_v40, %v1751_v11  ;;  %v2108_v28 = vor.u32 %v2107_v52, %v1036_v42  ;;  %v2649_v59 = vor.u32 %v2647_v32, %v1033_v60  ;;  %v8033_v51 = vsel %vm1651_vm1, %v2646_v47, %v2647_v32 }
 0x253   : > { %13790 = vst [vmem:[#allocation111_spill] sm:$0xff] %v8033_v51  ;;  %v8035_v10 = vpack.c.b16 %v841_v27, %v840_v13  ;;  %v8039_v9 = vsel %vm707_vm4, %v1030_v58, %v8030_v0 }
 0x254   : > { %v8042_v14 = vsel %vm1687_vm2, %v1749_v50, %v1753_v20  ;;  %v8045_v45 = vsel %vm2059_vm3, %v2104_v44, %v2108_v28 }
 0x255   : > { %1534 = vmatpush.bf16.xpose.msrb.mxu2 %v8023_v17  ;;  %13791 = vst [vmem:[#allocation112_spill] sm:$0xff] %v8035_v10  ;;  %v4683_v43 = vshll.u32 %v8035_v10, 16  ;;  %v4687_v42 = vshrl.u32 %v8035_v10, 16 }
 0x256   : > { %13792 = vst [vmem:[#allocation113_spill] sm:$0xff] %v8042_v14  ;;  %v545_v60 = vpop.f32.mrf.mxu0 }
 0x257   : > { %13793 = vst [vmem:[#allocation114_spill] sm:$0xff] %v8045_v45  ;;  %v653_v47 = vpack.c.bf16 %v545_v60, %v545_v60  ;;  %v4685_v32 = vrot.slane %v4683_v43, 1  ;;  %v5466_v13 = vrot.slane %v4687_v42, 3  ;;  %v5467_v37 = vrot.slane %v4683_v43, 4 }
 0x259   : > { %v842_v11 = vunpack.c.l.b16 %v653_v47  ;;  %v8050_v58 = vsel %vm1651_vm1, %v4682_v16, %v4685_v32  ;;  %v5468_v40 = vor.u32 %v5467_v37, %v5466_v13 }
 0x25a   : > { %13794 = vst [vmem:[#allocation115_spill] sm:$0xff] %v8050_v58 }
 0x25b   : > { %v8052_v50 = vpack.c.b16 %v842_v11, %v841_v27  ;;  %v8055_v44 = vsel %vm707_vm4, %v5464_v56, %v5468_v40 }
 0x25c   : > { %13796 = vst [vmem:[#allocation117_spill] sm:$0xff] %v8055_v44 }
 0x25d   : > { %13795 = vst [vmem:[#allocation116_spill] sm:$0xff] %v8052_v50  ;;  %v8058_v28 = vshrl.u32 %v8052_v50, 16  ;;  %v8061_v51 = vshll.u32 %v8052_v50, 16 }
 0x25e   : > { %v548_v12 = vpop.f32.mrf.mxu0 }
 0x25f   : > { %v654_v38 = vpack.c.bf16 %v548_v12, %v548_v12  ;;  %v1755_v43 = vrot.slane %v8058_v28, 4  ;;  %v1756_v60 = vrot.slane %v8061_v51, 5  ;;  %v2110_v16 = vrot.slane %v8058_v28, 7 }
 0x260   : > { %v2650_v27 = vrot.slane %v8061_v51, 1 }
 0x261   : > { %v843_v47 = vunpack.c.l.b16 %v654_v38  ;;  %6618 = vmatmul.msk.bf16.gmra.mxu0 %vm346_vm0, %v7728_v24  ;;  %v1757_v56 = vor.u32 %v1756_v60, %v1755_v43  ;;  %v2111_v13 = vor.u32 %v2110_v16, %v8061_v51  ;;  %v4689_v60 = vor.u32 %v4687_v42, %v4685_v32 }
 0x262   : > { %v2652_v37 = vor.u32 %v2650_v27, %v8058_v28  ;;  %v8072_v44 = vsel %vm1651_vm1, %v2649_v59, %v2650_v27 }
 0x263   : > { %13797 = vst [vmem:[#allocation118_spill] sm:$0xff] %v8072_v44  ;;  %v8074_v12 = vpack.c.b16 %v843_v47, %v842_v11  ;;  %v8077_v58 = vsel %vm1687_vm2, %v1753_v20, %v1757_v56  ;;  %v8080_v50 = vsel %vm2059_vm3, %v2107_v52, %v2111_v13 }
 0x264   : > { %13799 = vst [vmem:[#allocation120_spill] sm:$0xff] %v8077_v58 }
 0x265   : > { %13798 = vst [vmem:[#allocation119_spill] sm:$0xff] %v8074_v12  ;;  %v4690_v38 = vshll.u32 %v8074_v12, 16  ;;  %v4694_v24 = vshrl.u32 %v8074_v12, 16 }
 0x266   : > { %13800 = vst [vmem:[#allocation121_spill] sm:$0xff] %v8080_v50  ;;  %v550_v43 = vpop.f32.mrf.mxu0 }
 0x267   : > { %v655_v34 = vpack.c.bf16 %v550_v43, %v550_v43  ;;  %v4692_v5 = vrot.slane %v4690_v38, 1  ;;  %v5470_v19 = vrot.slane %v4694_v24, 3  ;;  %v5471_v36 = vrot.slane %v4690_v38, 4 }
 0x269   : > { %v844_v59 = vunpack.c.l.b16 %v655_v34  ;;  %v8085_v11 = vsel %vm1651_vm1, %v4689_v60, %v4692_v5  ;;  %v5472_v27 = vor.u32 %v5471_v36, %v5470_v19 }
 0x26a   : > { %13801 = vst [vmem:[#allocation122_spill] sm:$0xff] %v8085_v11 }
 0x26b   : > { %v8087_v20 = vpack.c.b16 %v844_v59, %v843_v47  ;;  %v8090_v52 = vsel %vm707_vm4, %v5468_v40, %v5472_v27 }
 0x26c   : > { %13803 = vst [vmem:[#allocation124_spill] sm:$0xff] %v8090_v52 }
 0x26d   : > { %13802 = vst [vmem:[#allocation123_spill] sm:$0xff] %v8087_v20  ;;  %v1051_v13 = vshrl.u32 %v8087_v20, 16  ;;  %v1054_v44 = vshll.u32 %v8087_v20, 16 }
 0x26e   : > { %v553_v1 = vpop.f32.mrf.mxu0 }
 0x26f   : > { %v656_v42 = vpack.c.bf16 %v553_v1, %v553_v1  ;;  %v1759_v32 = vrot.slane %v1051_v13, 4  ;;  %v1760_v43 = vrot.slane %v1054_v44, 5  ;;  %v2113_v25 = vrot.slane %v1051_v13, 7 }
 0x270   : > { %v2653_v38 = vrot.slane %v1054_v44, 1 }
 0x271   : > { %v845_v34 = vunpack.c.l.b16 %v656_v42  ;;  %6619 = vmatmul.msk.bf16.gmra.mxu0 %vm346_vm0, %v7769_v48  ;;  %v1761_v19 = vor.u32 %v1760_v43, %v1759_v32  ;;  %v2114_v36 = vor.u32 %v2113_v25, %v1054_v44  ;;  %v4696_v48 = vor.u32 %v4694_v24, %v4692_v5 }
 0x272   : > { %v2655_v47 = vor.u32 %v2653_v38, %v1051_v13  ;;  %v8097_v40 = vsel %vm1651_vm1, %v2652_v37, %v2653_v38  ;;  %v1053_v5 = vrot.slane %v1051_v13, 3  ;;  %v1056_v24 = vrot.slane %v1054_v44, 4 }
 0x273   : > { %13804 = vst [vmem:[#allocation125_spill] sm:$0xff] %v8097_v40  ;;  %v8099_v60 = vpack.c.b16 %v845_v34, %v844_v59  ;;  %v8102_v52 = vsel %vm1687_vm2, %v1757_v56, %v1761_v19  ;;  %v8105_v1 = vsel %vm2059_vm3, %v2110_v16, %v2114_v36  ;;  %v1047_v44 = vrot.slane %v8061_v51, 4 }
 0x274   : > { %13806 = vst [vmem:[#allocation127_spill] sm:$0xff] %v8102_v52 }
 0x275   : > { %13805 = vst [vmem:[#allocation126_spill] sm:$0xff] %v8099_v60  ;;  %v4697_v11 = vshll.u32 %v8099_v60, 16  ;;  %v4701_v42 = vshrl.u32 %v8099_v60, 16 }
 0x276   : > { %13807 = vst [vmem:[#allocation128_spill] sm:$0xff] %v8105_v1  ;;  %v555_v20 = vpop.f32.mrf.mxu0 }
 0x277   : > { %v5474_v32 = vrot.slane %v4701_v42, 3  ;;  %v5475_v43 = vrot.slane %v4697_v11, 4  ;;  %v657_v31 = vpack.c.bf16 %v555_v20, %v555_v20  ;;  %v4699_v45 = vrot.slane %v4697_v11, 1 }
 0x279   : > { %v846_v37 = vunpack.c.l.b16 %v657_v31  ;;  %v8110_v59 = vsel %vm1651_vm1, %v4696_v48, %v4699_v45  ;;  %v5476_v38 = vor.u32 %v5475_v43, %v5474_v32 }
 0x27a   : > { %13808 = vst [vmem:[#allocation129_spill] sm:$0xff] %v8110_v59  ;;  %v1057_v59 = vor.u32 %v1056_v24, %v1053_v5 }
 0x27b   : > { %v8112_v56 = vpack.c.b16 %v846_v37, %v845_v34  ;;  %v8115_v16 = vsel %vm707_vm4, %v5472_v27, %v5476_v38  ;;  %v1044_v34 = vrot.slane %v8058_v28, 3 }
 0x27c   : > { %13810 = vst [vmem:[#allocation131_spill] sm:$0xff] %v8115_v16 }
 0x27d   : > { %13809 = vst [vmem:[#allocation130_spill] sm:$0xff] %v8112_v56  ;;  %v8118_v36 = vshrl.u32 %v8112_v56, 16  ;;  %v1063_v40 = vshll.u32 %v8112_v56, 16 }
 0x27e   : > { %v558_v41 = vpop.f32.mrf.mxu0 }
 0x27f   : > { %v658_v20 = vpack.c.bf16 %v558_v41, %v558_v41  ;;  %v1062_v31 = vrot.slane %v8118_v36, 3  ;;  %v1065_v11 = vrot.slane %v1063_v40, 4  ;;  %v1763_v48 = vrot.slane %v8118_v36, 4 }
 0x280   : > { %v1764_v32 = vrot.slane %v1063_v40, 5  ;;  %v2116_v27 = vrot.slane %v8118_v36, 7  ;;  %v2656_v43 = vrot.slane %v1063_v40, 1 }
 0x281   : > { %v847_v16 = vunpack.c.l.b16 %v658_v20  ;;  %6620 = vmatmul.msk.bf16.gmra.mxu0 %vm346_vm0, %v7803_v4  ;;  %v1066_v13 = vor.u32 %v1065_v11, %v1062_v31 }
 0x282   : > { %v1765_v41 = vor.u32 %v1764_v32, %v1763_v48  ;;  %v2117_v56 = vor.u32 %v2116_v27, %v1063_v40  ;;  %v2658_v14 = vor.u32 %v2656_v43, %v8118_v36  ;;  %v8130_v50 = vsel %vm1651_vm1, %v2655_v47, %v2656_v43 }
 0x283   : > { %13811 = vst [vmem:[#allocation132_spill] sm:$0xff] %v8130_v50  ;;  %v8132_v28 = vpack.c.b16 %v847_v16, %v846_v37  ;;  %v1067_v10 = vsel %vm707_vm4, %v1057_v59, %v1066_v13  ;;  %v1048_v37 = vor.u32 %v1047_v44, %v1044_v34  ;;  %v4703_v36 = vor.u32 %v4701_v42, %v4699_v45 }
 0x284   : > { %v8136_v20 = vsel %vm1158_vm5, %v1067_v10, 0  ;;  %v8139_v4 = vsel %vm1687_vm2, %v1761_v19, %v1765_v41  ;;  %v8142_v5 = vsel %vm2059_vm3, %v2113_v25, %v2117_v56 }
 0x285   : > { %13812 = vst [vmem:[#allocation133_spill] sm:$0xff] %v8132_v28  ;;  %v4704_v51 = vshll.u32 %v8132_v28, 16  ;;  %v4708_v40 = vshrl.u32 %v8132_v28, 16  ;;  %1299 = vmatpush.bf16.xpose.msra.mxu3 %v8136_v20  ;;  %v1058_v19 = vsel %vm707_vm4, %v1048_v37, %v1057_v59 }
 0x286   : > { %13813 = vst [vmem:[#allocation134_spill] sm:$0xff] %v8136_v20  ;;  %v560_v47 = vpop.f32.mrf.mxu0  ;;  %v8157_v20 = vsel %vm1158_vm5, %v1058_v19, 0 }
 0x287   : > { %13814 = vst [vmem:[#allocation135_spill] sm:$0xff] %v8139_v4  ;;  %v659_v24 = vpack.c.bf16 %v560_v47, %v560_v47  ;;  %v4706_v31 = vrot.slane %v4704_v51, 1  ;;  %v5478_v11 = vrot.slane %v4708_v40, 3  ;;  %v5479_v10 = vrot.slane %v4704_v51, 4 }
 0x288   : > { %13815 = vst [vmem:[#allocation136_spill] sm:$0xff] %v8142_v5 }
 0x289   : > { %v848_v48 = vunpack.c.l.b16 %v659_v24  ;;  %v8149_v32 = vsel %vm1651_vm1, %v4703_v36, %v4706_v31  ;;  %v5480_v25 = vor.u32 %v5479_v10, %v5478_v11  ;;  %13819 = vst [vmem:[#allocation140_spill] sm:$0xff] %v8157_v20  ;;  %v1049_v11 = vsel %vm707_vm4, %v8030_v0, %v1048_v37 }
 0x28a   : > { %13816 = vst [vmem:[#allocation137_spill] sm:$0xff] %v8149_v32 }
 0x28b   : > { %v8151_v56 = vpack.c.b16 %v848_v48, %v847_v16  ;;  %v8154_v43 = vsel %vm707_vm4, %v5476_v38, %v5480_v25 }
 0x28c   : > { %13818 = vst [vmem:[#allocation139_spill] sm:$0xff] %v8154_v43 }
 0x28d   : > { %13817 = vst [vmem:[#allocation138_spill] sm:$0xff] %v8151_v56  ;;  %v8160_v45 = vshrl.u32 %v8151_v56, 16  ;;  %v1072_v42 = vshll.u32 %v8151_v56, 16  ;;  %1300 = vmatpush.bf16.xpose.msra.mxu3 %v8157_v20 }
 0x28e   : > { %v563_v59 = vpop.f32.mrf.mxu0 }
 0x28f   : > { %v660_v34 = vpack.c.bf16 %v563_v59, %v563_v59  ;;  %v1071_v44 = vrot.slane %v8160_v45, 3  ;;  %v1074_v51 = vrot.slane %v1072_v42, 4  ;;  %v1767_v16 = vrot.slane %v8160_v45, 4 }
 0x290   : > { %v1768_v47 = vrot.slane %v1072_v42, 5  ;;  %v2119_v38 = vrot.slane %v8160_v45, 7  ;;  %v2659_v36 = vrot.slane %v1072_v42, 1 }
 0x291   : > { %v849_v24 = vunpack.c.l.b16 %v660_v34  ;;  %6621 = vmatmul.msk.bf16.gmra.mxu0 %vm346_vm0, %v7853_v46  ;;  %v1075_v10 = vor.u32 %v1074_v51, %v1071_v44  ;;  %v8181_v34 = vsel %vm1158_vm5, %v1049_v11, 0 }
 0x292   : > { %v1769_v19 = vor.u32 %v1768_v47, %v1767_v16  ;;  %v8172_v59 = vsel %vm1651_vm1, %v2658_v14, %v2659_v36  ;;  %v2120_v43 = vor.u32 %v2119_v38, %v1072_v42  ;;  %v2661_v32 = vor.u32 %v2659_v36, %v8160_v45  ;;  %13823 = vst [vmem:[#allocation144_spill] sm:$0xff] %v8181_v34 }
 0x293   : > { %13820 = vst [vmem:[#allocation141_spill] sm:$0xff] %v8172_v59  ;;  %v8175_v20 = vpack.c.b16 %v849_v24, %v848_v48  ;;  %v8178_v50 = vsel %vm707_vm4, %v1066_v13, %v1075_v10  ;;  %v4710_v45 = vor.u32 %v4708_v40, %v4706_v31  ;;  %v8225_v59 = vsel %vm1158_vm5, %v7998_v39, 0 }
 0x294   : > { %13822 = vst [vmem:[#allocation143_spill] sm:$0xff] %v8178_v50  ;;  %v8184_v46 = vsel %vm1687_vm2, %v1765_v41, %v1769_v19  ;;  %v8187_v0 = vsel %vm2059_vm3, %v2116_v27, %v2120_v43  ;;  %v8202_v43 = vsel %vm1158_vm5, %v8039_v9, 0 }
 0x295   : > { %13821 = vst [vmem:[#allocation142_spill] sm:$0xff] %v8175_v20  ;;  %v4711_v14 = vshll.u32 %v8175_v20, 16  ;;  %v4715_v37 = vshrl.u32 %v8175_v20, 16  ;;  %1301 = vmatpush.bf16.xpose.msra.mxu3 %v8181_v34 }
 0x296   : > { %13824 = vst [vmem:[#allocation145_spill] sm:$0xff] %v8184_v46  ;;  %v565_v48 = vpop.f32.mrf.mxu0 }
 0x297   : > { %13825 = vst [vmem:[#allocation146_spill] sm:$0xff] %v8187_v0  ;;  %v661_v42 = vpack.c.bf16 %v565_v48, %v565_v48  ;;  %v4713_v13 = vrot.slane %v4711_v14, 1  ;;  %v5482_v44 = vrot.slane %v4715_v37, 3  ;;  %v5483_v51 = vrot.slane %v4711_v14, 4 }
 0x298   : > { %13829 = vst [vmem:[#allocation150_spill] sm:$0xff] %v8202_v43 }
 0x299   : > { %v850_v16 = vunpack.c.l.b16 %v661_v42  ;;  %v8193_v47 = vsel %vm1651_vm1, %v4710_v45, %v4713_v13  ;;  %v5484_v41 = vor.u32 %v5483_v51, %v5482_v44  ;;  %13833 = vst [vmem:[#allocation154_spill] sm:$0xff] %v8225_v59 }
 0x29a   : > { %13826 = vst [vmem:[#allocation147_spill] sm:$0xff] %v8193_v47 }
 0x29b   : > { %v8195_v36 = vpack.c.b16 %v850_v16, %v849_v24  ;;  %v8198_v27 = vsel %vm707_vm4, %v5480_v25, %v5484_v41 }
 0x29c   : > { %13828 = vst [vmem:[#allocation149_spill] sm:$0xff] %v8198_v27 }
 0x29d   : > { %13827 = vst [vmem:[#allocation148_spill] sm:$0xff] %v8195_v36  ;;  %v8205_v40 = vshrl.u32 %v8195_v36, 16  ;;  %v1081_v31 = vshll.u32 %v8195_v36, 16  ;;  %1302 = vmatpush.bf16.xpose.msra.mxu3 %v8202_v43  ;;  %v8268_v36 = vsel %vm1158_vm5, %v7908_v30, 0 }
 0x29e   : > { %v568_v11 = vpop.f32.mrf.mxu0  ;;  %13842 = vst [vmem:[#allocation163_spill] sm:$0xff] %v8268_v36 }
 0x29f   : > { %v662_v14 = vpack.c.bf16 %v568_v11, %v568_v11  ;;  %v1080_v48 = vrot.slane %v8205_v40, 3  ;;  %v1083_v24 = vrot.slane %v1081_v31, 4  ;;  %v1771_v45 = vrot.slane %v8205_v40, 4 }
 0x2a0   : > { %v1772_v25 = vrot.slane %v1081_v31, 5  ;;  %v2122_v42 = vrot.slane %v8205_v40, 7  ;;  %v2662_v44 = vrot.slane %v1081_v31, 1 }
 0x2a1   : > { %v851_v9 = vunpack.c.l.b16 %v662_v14  ;;  %6622 = vmatmul.msk.bf16.gmra.mxu0 %vm346_vm0, %v7914_v35  ;;  %v1084_v51 = vor.u32 %v1083_v24, %v1080_v48 }
 0x2a2   : > { %v1773_v27 = vor.u32 %v1772_v25, %v1771_v45  ;;  %v2123_v47 = vor.u32 %v2122_v42, %v1081_v31  ;;  %v2664_v43 = vor.u32 %v2662_v44, %v8205_v40  ;;  %v8216_v11 = vsel %vm1651_vm1, %v2661_v32, %v2662_v44 }
 0x2a3   : > { %13830 = vst [vmem:[#allocation151_spill] sm:$0xff] %v8216_v11  ;;  %v8218_v34 = vpack.c.b16 %v851_v9, %v850_v16  ;;  %v8221_v0 = vsel %vm707_vm4, %v1075_v10, %v1084_v51  ;;  %v4717_v31 = vor.u32 %v4715_v37, %v4713_v13 }
 0x2a4   : > { %13832 = vst [vmem:[#allocation153_spill] sm:$0xff] %v8221_v0  ;;  %v8228_v14 = vsel %vm1687_vm2, %v1769_v19, %v1773_v27  ;;  %v8231_v35 = vsel %vm2059_vm3, %v2119_v38, %v2123_v47  ;;  %v8246_v47 = vsel %vm1158_vm5, %v7953_v63, 0 }
 0x2a5   : > { %13831 = vst [vmem:[#allocation152_spill] sm:$0xff] %v8218_v34  ;;  %v4718_v40 = vshll.u32 %v8218_v34, 16  ;;  %v4722_v32 = vshrl.u32 %v8218_v34, 16  ;;  %1303 = vmatpush.bf16.xpose.msra.mxu3 %v8225_v59 }
 0x2a6   : > { %13834 = vst [vmem:[#allocation155_spill] sm:$0xff] %v8228_v14  ;;  %v570_v16 = vpop.f32.mrf.mxu0 }
 0x2a7   : > { %13835 = vst [vmem:[#allocation156_spill] sm:$0xff] %v8231_v35  ;;  %v663_v10 = vpack.c.bf16 %v570_v16, %v570_v16  ;;  %v4720_v48 = vrot.slane %v4718_v40, 1  ;;  %v5486_v24 = vrot.slane %v4722_v32, 3  ;;  %v5487_v45 = vrot.slane %v4718_v40, 4  ;;  %v337_v16 = vpop.trf.xlu1 }
 0x2a8   : > { %13839 = vst [vmem:[#allocation160_spill] sm:$0xff] %v8246_v47 }
 0x2a9   : > { %v852_v39 = vunpack.c.l.b16 %v663_v10  ;;  %v8237_v25 = vsel %vm1651_vm1, %v4717_v31, %v4720_v48  ;;  %v5488_v19 = vor.u32 %v5487_v45, %v5486_v24 }
 0x2aa   : > { %13836 = vst [vmem:[#allocation157_spill] sm:$0xff] %v8237_v25 }
 0x2ab   : > { %v8239_v44 = vpack.c.b16 %v852_v39, %v851_v9  ;;  %v8242_v38 = vsel %vm707_vm4, %v5484_v41, %v5488_v19 }
 0x2ac   : > { %13838 = vst [vmem:[#allocation159_spill] sm:$0xff] %v8242_v38 }
 0x2ad   : > { %13837 = vst [vmem:[#allocation158_spill] sm:$0xff] %v8239_v44  ;;  %v8249_v37 = vshrl.u32 %v8239_v44, 16  ;;  %v1090_v13 = vshll.u32 %v8239_v44, 16  ;;  %1304 = vmatpush.bf16.xpose.msra.mxu3 %v8246_v47 }
 0x2ae   : > { %v573_v40 = vpop.f32.mrf.mxu0 }
 0x2af   : > { %v664_v31 = vpack.c.bf16 %v573_v40, %v573_v40  ;;  %v1089_v9 = vrot.slane %v8249_v37, 3  ;;  %v1092_v10 = vrot.slane %v1090_v13, 4  ;;  %v1775_v41 = vrot.slane %v8249_v37, 4 }
 0x2b0   : > { %v1776_v24 = vrot.slane %v1090_v13, 5  ;;  %v2125_v45 = vrot.slane %v8249_v37, 7  ;;  %v2665_v63 = vrot.slane %v1090_v13, 1 }
 0x2b1   : > { %v853_v38 = vunpack.c.l.b16 %v664_v31  ;;  %6623 = vmatmul.msk.bf16.gmra.mxu0 %vm346_vm0, %v337_v16  ;;  %v1093_v25 = vor.u32 %v1092_v10, %v1089_v9 }
 0x2b2   : > { %v1777_v59 = vor.u32 %v1776_v24, %v1775_v41  ;;  %v2126_v11 = vor.u32 %v2125_v45, %v1090_v13  ;;  %v2667_v47 = vor.u32 %v2665_v63, %v8249_v37  ;;  %v8259_v56 = vsel %vm1651_vm1, %v2664_v43, %v2665_v63 }
 0x2b3   : > { %13840 = vst [vmem:[#allocation161_spill] sm:$0xff] %v8259_v56  ;;  %v8261_v40 = vpack.c.b16 %v853_v38, %v852_v39  ;;  %v8264_v35 = vsel %vm707_vm4, %v1084_v51, %v1093_v25  ;;  %v4724_v13 = vor.u32 %v4722_v32, %v4720_v48  ;;  %v8293_v32 = vsel %vm1158_vm5, %v7785_v23, 0 }
 0x2b4   : > { %13841 = vst [vmem:[#allocation162_spill] sm:$0xff] %v8264_v35  ;;  %v8271_v31 = vsel %vm1687_vm2, %v1773_v27, %v1777_v59  ;;  %v8274_v16 = vsel %vm2059_vm3, %v2122_v42, %v2126_v11  ;;  %v8289_v11 = vsel %vm1158_vm5, %v7866_v29, 0 }
 0x2b5   : > { %13843 = vst [vmem:[#allocation164_spill] sm:$0xff] %v8271_v31  ;;  %v4725_v37 = vshll.u32 %v8261_v40, 16  ;;  %v4729_v43 = vshrl.u32 %v8261_v40, 16  ;;  %1305 = vmatpush.bf16.xpose.msra.mxu3 %v8268_v36 }
 0x2b6   : > { %13844 = vst [vmem:[#allocation165_spill] sm:$0xff] %v8274_v16  ;;  %v575_v39 = vpop.f32.mrf.mxu0 }
 0x2b7   : > { %v665_v51 = vpack.c.bf16 %v575_v39, %v575_v39  ;;  %v4727_v9 = vrot.slane %v4725_v37, 1  ;;  %v5490_v10 = vrot.slane %v4729_v43, 3  ;;  %v5491_v41 = vrot.slane %v4725_v37, 4  ;;  %13848 = vst [vmem:[#allocation169_spill] sm:$0xff] %v8289_v11 }
 0x2b8   : > { %13849 = vst [vmem:[#allocation170_spill] sm:$0xff] %v8293_v32 }
 0x2b9   : > { %v854_v30 = vunpack.c.l.b16 %v665_v51  ;;  %v8280_v24 = vsel %vm1651_vm1, %v4724_v13, %v4727_v9  ;;  %v5492_v27 = vor.u32 %v5491_v41, %v5490_v10 }
 0x2ba   : > { %13845 = vst [vmem:[#allocation166_spill] sm:$0xff] %v8280_v24 }
 0x2bb   : > { %v8282_v63 = vpack.c.b16 %v854_v30, %v853_v38  ;;  %v8285_v42 = vsel %vm707_vm4, %v5488_v19, %v5492_v27 }
 0x2bc   : > { %13847 = vst [vmem:[#allocation168_spill] sm:$0xff] %v8285_v42 }
 0x2bd   : > { %13846 = vst [vmem:[#allocation167_spill] sm:$0xff] %v8282_v63  ;;  %v1096_v48 = vshrl.u32 %v8282_v63, 16  ;;  %v1099_v37 = vshll.u32 %v8282_v63, 16  ;;  %1306 = vmatpush.bf16.xpose.msra.mxu3 %v8289_v11 }
 0x2be   : > { %v578_v39 = vpop.f32.mrf.mxu0 }
 0x2bf   : > { %v666_v38 = vpack.c.bf16 %v578_v39, %v578_v39  ;;  %v1098_v19 = vrot.slane %v1096_v48, 3  ;;  %v1101_v13 = vrot.slane %v1099_v37, 4  ;;  %v1779_v51 = vrot.slane %v1096_v48, 4 }
 0x2c0   : > { %v1780_v10 = vrot.slane %v1099_v37, 5  ;;  %v2128_v29 = vrot.slane %v1096_v48, 7  ;;  %v2668_v41 = vrot.slane %v1099_v37, 1 }
 0x2c1   : > { %v855_v42 = vunpack.c.l.b16 %v666_v38  ;;  %v1102_v24 = vor.u32 %v1101_v13, %v1098_v19  ;;  %v8315_v38 = vsel %vm1158_vm5, %v7759_v7, 0 }
 0x2c2   : > { %v1781_v23 = vor.u32 %v1780_v10, %v1779_v51  ;;  %v2129_v36 = vor.u32 %v2128_v29, %v1099_v37  ;;  %v2670_v56 = vor.u32 %v2668_v41, %v1096_v48  ;;  %v8300_v16 = vsel %vm1651_vm1, %v2667_v47, %v2668_v41  ;;  %13853 = vst [vmem:[#allocation174_spill] sm:$0xff] %v8315_v38 }
 0x2c3   : > { %13850 = vst [vmem:[#allocation171_spill] sm:$0xff] %v8300_v16  ;;  %v8302_v44 = vpack.c.b16 %v855_v42, %v854_v30  ;;  %v8305_v11 = vsel %vm707_vm4, %v1093_v25, %v1102_v24  ;;  %v4731_v30 = vor.u32 %v4729_v43, %v4727_v9  ;;  %v8330_v41 = vsel %vm1158_vm5, %v7719_v15, 0 }
 0x2c4   : > { %v8308_v39 = vsel %vm1687_vm2, %v1777_v59, %v1781_v23  ;;  %13857 = vst [vmem:[#allocation178_spill] sm:$0xff] %v8330_v41 }
 0x2c5   : > { %1551 = vmatpush.bf16.xpose.msrb.mxu3 %v8293_v32  ;;  %13851 = vst [vmem:[#allocation172_spill] sm:$0xff] %v8308_v39  ;;  %v8311_v32 = vsel %vm2059_vm3, %v2125_v45, %v2129_v36  ;;  %v4732_v48 = vshll.u32 %v8302_v44, 16  ;;  %v4736_v47 = vshrl.u32 %v8302_v44, 16  ;;  %v13914_v39 = vmov 0 }
 0x2c6   : > { %13852 = vst [vmem:[#allocation173_spill] sm:$0xff] %v8311_v32  ;;  %v580_v37 = vpop.f32.mrf.mxu0  ;;  %v13915_v39 = vsel %vm8667_vm13, 4294967295, %v13914_v39 }
 0x2c7   : > { %v4734_v25 = vrot.slane %v4732_v48, 1  ;;  %v667_v19 = vpack.c.bf16 %v580_v37, %v580_v37  ;;  %v5494_v13 = vrot.slane %v4736_v47, 3  ;;  %v5495_v59 = vrot.slane %v4732_v48, 4  ;;  %13916 = vst [vmem:[#allocation229_spill] sm:$0xff] %v13915_v39 }
 0x2c9   : > { %v856_v51 = vunpack.c.l.b16 %v667_v19  ;;  %v8321_v36 = vsel %vm1651_vm1, %v4731_v30, %v4734_v25  ;;  %v5496_v45 = vor.u32 %v5495_v59, %v5494_v13 }
 0x2ca   : > { %13854 = vst [vmem:[#allocation175_spill] sm:$0xff] %v8321_v36 }
 0x2cb   : > { %v8323_v10 = vpack.c.b16 %v856_v51, %v855_v42  ;;  %v8326_v7 = vsel %vm707_vm4, %v5492_v27, %v5496_v45 }
 0x2cc   : > { %13856 = vst [vmem:[#allocation177_spill] sm:$0xff] %v8326_v7 }
 0x2cd   : > { %1552 = vmatpush.bf16.xpose.msrb.mxu3 %v8315_v38  ;;  %13855 = vst [vmem:[#allocation176_spill] sm:$0xff] %v8323_v10  ;;  %v1105_v43 = vshrl.u32 %v8323_v10, 16  ;;  %v1108_v9 = vshll.u32 %v8323_v10, 16 }
 0x2ce   : > { %v583_v37 = vpop.f32.mrf.mxu0 }
 0x2cf   : > { %v668_v48 = vpack.c.bf16 %v583_v37, %v583_v37  ;;  %v1107_v30 = vrot.slane %v1105_v43, 3  ;;  %v1110_v19 = vrot.slane %v1108_v9, 4  ;;  %v1783_v13 = vrot.slane %v1105_v43, 4 }
 0x2d0   : > { %v1784_v42 = vrot.slane %v1108_v9, 5  ;;  %v2131_v59 = vrot.slane %v1105_v43, 7  ;;  %v2671_v36 = vrot.slane %v1108_v9, 1 }
 0x2d1   : > { %v857_v27 = vunpack.c.l.b16 %v668_v48  ;;  %v1111_v7 = vor.u32 %v1110_v19, %v1107_v30  ;;  %v8351_v48 = vsel %vm1158_vm5, %v7690_v22, 0 }
 0x2d2   : > { %v1785_v38 = vor.u32 %v1784_v42, %v1783_v13  ;;  %v2132_v16 = vor.u32 %v2131_v59, %v1108_v9  ;;  %v2673_v15 = vor.u32 %v2671_v36, %v1105_v43  ;;  %v8336_v32 = vsel %vm1651_vm1, %v2670_v56, %v2671_v36  ;;  %13860 = vst [vmem:[#allocation181_spill] sm:$0xff] %v8351_v48 }
 0x2d3   : > { %13858 = vst [vmem:[#allocation179_spill] sm:$0xff] %v8336_v32  ;;  %v8338_v63 = vpack.c.b16 %v857_v27, %v856_v51  ;;  %v8341_v10 = vsel %vm707_vm4, %v1102_v24, %v1111_v7  ;;  %v8358_v51 = vld [vmem:[%s13072_s2] sm:$0xff] }
 0x2d4   : > { %v8344_v37 = vsel %vm1687_vm2, %v1781_v23, %v1785_v38  ;;  %v4738_v23 = vor.u32 %v4736_v47, %v4734_v25  ;;  %6636 = vmatmul.msk.bf16.vlgmr.msra.gmra.mxu3 %vm1158_vm5, %v8358_v51  ;;  %6634 = vmatmul.msk.bf16.vlgmr.msra.gmra.mxu2 %vm1158_vm5, %v8358_v51  ;;  %v8375_v47 = vsel %vm1158_vm5, %v7660_v18, 0 }
 0x2d5   : > { %1553 = vmatpush.bf16.xpose.msrb.mxu3 %v8330_v41  ;;  %v8347_v41 = vsel %vm2059_vm3, %v2128_v29, %v2132_v16  ;;  %v4739_v43 = vshll.u32 %v8338_v63, 16  ;;  %v4743_v56 = vshrl.u32 %v8338_v63, 16  ;;  %13864 = vst [vmem:[#allocation185_spill] sm:$0xff] %v8375_v47 }
 0x2d6   : > { %13859 = vst [vmem:[#allocation180_spill] sm:$0xff] %v8347_v41  ;;  %v585_v24 = vpop.f32.mrf.mxu0 }
 0x2d7   : > { %v669_v36 = vpack.c.bf16 %v585_v24, %v585_v24  ;;  %v4741_v22 = vrot.slane %v4739_v43, 1  ;;  %v5498_v16 = vrot.slane %v4743_v56, 3  ;;  %v5499_v29 = vrot.slane %v4739_v43, 4 }
 0x2d9   : > { %v858_v9 = vunpack.c.l.b16 %v669_v36  ;;  %v8366_v30 = vsel %vm1651_vm1, %v4738_v23, %v4741_v22  ;;  %v5500_v19 = vor.u32 %v5499_v29, %v5498_v16 }
 0x2da   : > { %13861 = vst [vmem:[#allocation182_spill] sm:$0xff] %v8366_v30 }
 0x2db   : > { %v8368_v13 = vpack.c.b16 %v858_v9, %v857_v27  ;;  %v8371_v42 = vsel %vm707_vm4, %v5496_v45, %v5500_v19 }
 0x2dc   : > { %13863 = vst [vmem:[#allocation184_spill] sm:$0xff] %v8371_v42 }
 0x2dd   : > { %1554 = vmatpush.bf16.xpose.msrb.mxu3 %v8351_v48  ;;  %13862 = vst [vmem:[#allocation183_spill] sm:$0xff] %v8368_v13  ;;  %v1114_v25 = vshrl.u32 %v8368_v13, 16  ;;  %v1117_v24 = vshll.u32 %v8368_v13, 16 }
 0x2de   : > { %v588_v48 = vpop.f32.mrf.mxu0 }
 0x2df   : > { %v670_v43 = vpack.c.bf16 %v588_v48, %v588_v48  ;;  %v1116_v23 = vrot.slane %v1114_v25, 3  ;;  %v1119_v36 = vrot.slane %v1117_v24, 4  ;;  %v1787_v16 = vrot.slane %v1114_v25, 4 }
 0x2e0   : > { %v1788_v27 = vrot.slane %v1117_v24, 5  ;;  %v2134_v29 = vrot.slane %v1114_v25, 7  ;;  %v2674_v30 = vrot.slane %v1117_v24, 1 }
 0x2e1   : > { %v859_v45 = vunpack.c.l.b16 %v670_v43  ;;  %v1120_v42 = vor.u32 %v1119_v36, %v1116_v23  ;;  %v8396_v43 = vsel %vm1158_vm5, %v7629_v3, 0 }
 0x2e2   : > { %v1789_v32 = vor.u32 %v1788_v27, %v1787_v16  ;;  %v2135_v41 = vor.u32 %v2134_v29, %v1117_v24  ;;  %v2676_v18 = vor.u32 %v2674_v30, %v1114_v25  ;;  %v8381_v58 = vsel %vm1651_vm1, %v2673_v15, %v2674_v30  ;;  %13867 = vst [vmem:[#allocation188_spill] sm:$0xff] %v8396_v43 }
 0x2e3   : > { %13865 = vst [vmem:[#allocation186_spill] sm:$0xff] %v8381_v58  ;;  %v8383_v1 = vpack.c.b16 %v859_v45, %v858_v9  ;;  %v8386_v13 = vsel %vm707_vm4, %v1111_v7, %v1120_v42  ;;  %v4745_v9 = vor.u32 %v4743_v56, %v4741_v22  ;;  %v8411_v27 = vsel %vm1158_vm5, %v7588_v26, 0 }
 0x2e4   : > { %v8389_v48 = vsel %vm1687_vm2, %v1785_v38, %v1789_v32  ;;  %13871 = vst [vmem:[#allocation192_spill] sm:$0xff] %v8411_v27 }
 0x2e5   : > { %1555 = vmatpush.bf16.xpose.msrb.mxu3 %v8375_v47  ;;  %v8392_v47 = vsel %vm2059_vm3, %v2131_v59, %v2135_v41  ;;  %v4746_v25 = vshll.u32 %v8383_v1, 16  ;;  %v4750_v15 = vshrl.u32 %v8383_v1, 16 }
 0x2e6   : > { %13866 = vst [vmem:[#allocation187_spill] sm:$0xff] %v8392_v47  ;;  %v590_v30 = vpop.f32.mrf.mxu0 }
 0x2e7   : > { %v671_v7 = vpack.c.bf16 %v590_v30, %v590_v30  ;;  %v4748_v24 = vrot.slane %v4746_v25, 1  ;;  %v5502_v23 = vrot.slane %v4750_v15, 3  ;;  %v5503_v38 = vrot.slane %v4746_v25, 4 }
 0x2e9   : > { %v860_v36 = vunpack.c.l.b16 %v671_v7  ;;  %v8402_v41 = vsel %vm1651_vm1, %v4745_v9, %v4748_v24  ;;  %v5504_v59 = vor.u32 %v5503_v38, %v5502_v23 }
 0x2ea   : > { %13868 = vst [vmem:[#allocation189_spill] sm:$0xff] %v8402_v41 }
 0x2eb   : > { %v8404_v16 = vpack.c.b16 %v860_v36, %v859_v45  ;;  %v8407_v3 = vsel %vm707_vm4, %v5500_v19, %v5504_v59 }
 0x2ec   : > { %13870 = vst [vmem:[#allocation191_spill] sm:$0xff] %v8407_v3 }
 0x2ed   : > { %1556 = vmatpush.bf16.xpose.msrb.mxu3 %v8396_v43  ;;  %13869 = vst [vmem:[#allocation190_spill] sm:$0xff] %v8404_v16  ;;  %v8414_v56 = vshrl.u32 %v8404_v16, 16  ;;  %v1126_v22 = vshll.u32 %v8404_v16, 16 }
 0x2ee   : > { %v593_v25 = vpop.f32.mrf.mxu0 }
 0x2ef   : > { %v672_v30 = vpack.c.bf16 %v593_v25, %v593_v25  ;;  %v1125_v9 = vrot.slane %v8414_v56, 3  ;;  %v1128_v45 = vrot.slane %v1126_v22, 4  ;;  %v1791_v7 = vrot.slane %v8414_v56, 4 }
 0x2f0   : > { %v1792_v19 = vrot.slane %v1126_v22, 5  ;;  %v2137_v23 = vrot.slane %v8414_v56, 7  ;;  %v2677_v38 = vrot.slane %v1126_v22, 1 }
 0x2f1   : > { %v692_v26 = vunpack.c.l.b16 %v672_v30  ;;  %v1129_v3 = vor.u32 %v1128_v45, %v1125_v9 }
 0x2f2   : > { %v1793_v41 = vor.u32 %v1792_v19, %v1791_v7  ;;  %v2138_v58 = vor.u32 %v2137_v23, %v1126_v22  ;;  %v2679_v47 = vor.u32 %v2677_v38, %v8414_v56  ;;  %v8423_v16 = vsel %vm1651_vm1, %v2676_v18, %v2677_v38 }
 0x2f3   : > { %13872 = vst [vmem:[#allocation193_spill] sm:$0xff] %v8423_v16  ;;  %v8425_v25 = vpack.c.b16 %v692_v26, %v860_v36  ;;  %v8428_v43 = vsel %vm707_vm4, %v1120_v42, %v1129_v3  ;;  %v8439_v18 = vsel %vm1158_vm5, %v7534_v54, 0  ;;  %v8444_v42 = vsel %vm1158_vm5, %v7543_v6, 0 }
 0x2f4   : > { %v8431_v12 = vsel %vm1687_vm2, %v1789_v32, %v1793_v41  ;;  %v8434_v52 = vsel %vm2059_vm3, %v2134_v29, %v2138_v58  ;;  %13874 = vst [vmem:[#allocation195_spill] sm:$0xff] %v8439_v18  ;;  %v4752_v36 = vor.u32 %v4750_v15, %v4748_v24 }
 0x2f5   : > { %1557 = vmatpush.bf16.xpose.msrb.mxu3 %v8411_v27  ;;  %v888_v27 = vpack.c.b16 %v692_v26, %v692_v26  ;;  %13873 = vst [vmem:[#allocation194_spill] sm:$0xff] %v8434_v52  ;;  %v4753_v22 = vshll.u32 %v8425_v25, 16  ;;  %v4757_v32 = vshrl.u32 %v8425_v25, 16 }
 0x2f6   : > { %v595_v56 = vpop.f32.mrf.mxu0  ;;  %13875 = vst [vmem:[#allocation196_spill] sm:$0xff] %v8444_v42 }
 0x2f7   : > { %v1132_v30 = vshrl.u32 %v888_v27, 16  ;;  %v1135_v9 = vshll.u32 %v888_v27, 16  ;;  %v673_v58 = vpack.c.bf16 %v595_v56, %v595_v56  ;;  %v4755_v45 = vrot.slane %v4753_v22, 1 }
 0x2f8   : > { %v5506_v7 = vrot.slane %v4757_v32, 3  ;;  %v5507_v19 = vrot.slane %v4753_v22, 4  ;;  %v8465_v22 = vsel %vm1158_vm5, %v7497_v55, 0 }
 0x2f9   : > { %v1134_v29 = vrot.slane %v1132_v30, 3  ;;  %v1137_v27 = vrot.slane %v1135_v9, 4  ;;  %v693_v54 = vunpack.c.l.b16 %v673_v58  ;;  %v8449_v16 = vsel %vm1651_vm1, %v4752_v36, %v4755_v45  ;;  %13879 = vst [vmem:[#allocation200_spill] sm:$0xff] %v8465_v22 }
 0x2fa   : > { %13876 = vst [vmem:[#allocation197_spill] sm:$0xff] %v8449_v16  ;;  %v5508_v52 = vor.u32 %v5507_v19, %v5506_v7 }
 0x2fb   : > { %v1138_v38 = vor.u32 %v1137_v27, %v1134_v29  ;;  %v8451_v5 = vpack.c.b16 %v693_v54, %v692_v26 }
 0x2fc   : > { %v8457_v15 = vsel %vm707_vm4, %v5504_v59, %v5508_v52 }
 0x2fd   : > { %1558 = vmatpush.bf16.xpose.msrb.mxu3 %v8439_v18  ;;  %13877 = vst [vmem:[#allocation198_spill] sm:$0xff] %v8451_v5  ;;  %v8454_v6 = vsel %vm707_vm4, %v1129_v3, %v1138_v38  ;;  %v8460_v24 = vshrl.u32 %v8451_v5, 16  ;;  %v712_v30 = vshll.u32 %v8451_v5, 16 }
 0x2fe   : > { %13878 = vst [vmem:[#allocation199_spill] sm:$0xff] %v8457_v15  ;;  %v598_v9 = vpop.f32.mrf.mxu0 }
 0x2ff   : > { %v674_v56 = vpack.c.bf16 %v598_v9, %v598_v9  ;;  %v711_v26 = vrot.slane %v8460_v24, 3  ;;  %v714_v36 = vrot.slane %v712_v30, 4  ;;  %v1795_v58 = vrot.slane %v8460_v24, 4 }
 0x300   : > { %v1796_v59 = vrot.slane %v712_v30, 5  ;;  %v2140_v29 = vrot.slane %v8460_v24, 7  ;;  %v2680_v27 = vrot.slane %v712_v30, 1 }
 0x301   : > { %v694_v7 = vunpack.c.l.b16 %v674_v56  ;;  %v715_v19 = vor.u32 %v714_v36, %v711_v26  ;;  %v4759_v36 = vor.u32 %v4757_v32, %v4755_v45 }
 0x302   : > { %v1797_v38 = vor.u32 %v1796_v59, %v1795_v58  ;;  %v2141_v15 = vor.u32 %v2140_v29, %v712_v30  ;;  %v2682_v16 = vor.u32 %v2680_v27, %v8460_v24  ;;  %v8473_v55 = vsel %vm1651_vm1, %v2679_v47, %v2680_v27 }
 0x303   : > { %13880 = vst [vmem:[#allocation201_spill] sm:$0xff] %v8473_v55  ;;  %v8475_v9 = vpack.c.b16 %v694_v7, %v693_v54  ;;  %v2599_v5 = vpack.c.b16 %v694_v7, %v694_v7  ;;  %v8490_v54 = vsel %vm1158_vm5, %v7470_v21, 0 }
 0x304   : > { %v8484_v60 = vsel %vm2059_vm3, %v2137_v23, %v2141_v15  ;;  %13883 = vst [vmem:[#allocation204_spill] sm:$0xff] %v8490_v54 }
 0x305   : > { %1920 = vmatpush.bf16.xpose.msra.mxu3 %v8444_v42  ;;  %v8481_v42 = vsel %vm1687_vm2, %v1793_v41, %v1797_v38  ;;  %13882 = vst [vmem:[#allocation203_spill] sm:$0xff] %v8484_v60  ;;  %v13169_v56 = vshrl.u32 %v8475_v9, 16  ;;  %v1654_v30 = vshll.u32 %v8475_v9, 16  ;;  %v2684_v24 = vshll.u32 %v2599_v5, 16 }
 0x306   : > { %v2929_v26 = vshrl.u32 %v2599_v5, 16  ;;  %v600_v47 = vpop.f32.mrf.mxu0 }
 0x307   : > { %v2932_v58 = vrot.slane %v2684_v24, 4  ;;  %v675_v59 = vpack.c.bf16 %v600_v47, %v600_v47  ;;  %v8493_v41 = vrot.slane %v1654_v30, 1  ;;  %v2039_v23 = vrot.slane %v13169_v56, 3 }
 0x308   : > { %v2040_v15 = vrot.slane %v1654_v30, 4  ;;  %v2686_v27 = vrot.slane %v2684_v24, 1 }
 0x309   : > { %v8499_v55 = vsel %vm1651_vm1, %v4759_v36, %v8493_v41 }
 0x30a   : > { %13884 = vst [vmem:[#allocation205_spill] sm:$0xff] %v8499_v55  ;;  %v2041_v21 = vor.u32 %v2040_v15, %v2039_v23  ;;  %v8502_v32 = vsel %vm1651_vm1, %v2682_v16, %v2686_v27 }
 0x30b   : > { %13885 = vst [vmem:[#allocation206_spill] sm:$0xff] %v8502_v32 }
 0x30c   : > { %v8510_v47 = vsel %vm707_vm4, %v5508_v52, %v2041_v21 }
 0x30d   : > { %1921 = vmatpush.bf16.xpose.msra.mxu3 %v8465_v22  ;;  %v8478_v22 = vsel %vm707_vm4, %v1129_v3, %v715_v19  ;;  %v2931_v3 = vrot.slane %v2929_v26, 3  ;;  %13888 = vst [vmem:[#allocation209_spill] sm:$0xff] %v8510_v47 }
 0x30e   : > { %13881 = vst [vmem:[#allocation202_spill] sm:$0xff] %v8478_v22  ;;  %v695_v22 = vunpack.c.l.b16 %v675_v59 }
 0x30f   : > { %v2933_v5 = vor.u32 %v2932_v58, %v2931_v3  ;;  %v603_v3 = vpop.f32.mrf.mxu0 }
 0x310   : > { %v8504_v45 = vpack.c.b16 %v695_v22, %v694_v7  ;;  %v676_v58 = vpack.c.bf16 %v603_v3, %v603_v3 }
 0x311   : > { %v8507_v26 = vsel %vm707_vm4, %v715_v19, %v2933_v5 }
 0x312   : > { %13886 = vst [vmem:[#allocation207_spill] sm:$0xff] %v8504_v45  ;;  %v717_v30 = vshrl.u32 %v8504_v45, 16  ;;  %v720_v24 = vshll.u32 %v8504_v45, 16  ;;  %v696_v7 = vunpack.c.l.b16 %v676_v58 }
 0x313   : > { %13887 = vst [vmem:[#allocation208_spill] sm:$0xff] %v8507_v26 }
 0x314   : > { %v719_v36 = vrot.slane %v717_v30, 3  ;;  %v722_v59 = vrot.slane %v720_v24, 4  ;;  %v2587_v23 = vrot.slane %v720_v24, 1  ;;  %v3221_v15 = vrot.slane %v717_v30, 4 }
 0x315   : > { %1922 = vmatpush.bf16.xpose.msra.mxu3 %v8490_v54  ;;  %v3222_v27 = vrot.slane %v720_v24, 5  ;;  %v3826_v56 = vrot.slane %v717_v30, 7  ;;  %v8519_v32 = vpack.c.b16 %v696_v7, %v695_v22 }
 0x316   : > { %v8514_v55 = vor.u32 %v722_v59, %v719_v36  ;;  %v2588_v5 = vor.u32 %v2587_v23, %v717_v30  ;;  %v8517_v26 = vsel %vm1651_vm1, %v2682_v16, %v2587_v23 }
 0x317   : > { %13889 = vst [vmem:[#allocation210_spill] sm:$0xff] %v8517_v26  ;;  %v3223_v52 = vor.u32 %v3222_v27, %v3221_v15  ;;  %v3827_v47 = vor.u32 %v3826_v56, %v720_v24  ;;  %v13172_v58 = vshll.u32 %v8519_v32, 16  ;;  %v13171_v30 = vshrl.u32 %v8519_v32, 16  ;;  %v605_v16 = vpop.f32.mrf.mxu0 }
 0x318   : > { %v8523_v3 = vsel %vm707_vm4, %v715_v19, %v8514_v55  ;;  %v677_v36 = vpack.c.bf16 %v605_v16, %v605_v16 }
 0x319   : > { %v8526_v60 = vsel %vm1687_vm2, %v1797_v38, %v3223_v52  ;;  %v8529_v45 = vsel %vm2059_vm3, %v2140_v29, %v3827_v47  ;;  %v2042_v22 = vrot.slane %v13171_v30, 3  ;;  %v2043_v24 = vrot.slane %v13172_v58, 4 }
 0x31a   : > { %13890 = vst [vmem:[#allocation211_spill] sm:$0xff] %v8526_v60  ;;  %v697_v19 = vunpack.c.l.b16 %v677_v36 }
 0x31b   : > { %13891 = vst [vmem:[#allocation212_spill] sm:$0xff] %v8529_v45  ;;  %v2044_v59 = vor.u32 %v2043_v24, %v2042_v22 }
 0x31c   : > { %v8537_v23 = vpack.c.b16 %v697_v19, %v696_v7 }
 0x31d   : > { %v8540_v38 = vsel %vm707_vm4, %v2041_v21, %v2044_v59 }
 0x31e   : > { %13892 = vst [vmem:[#allocation213_spill] sm:$0xff] %v8537_v23  ;;  %v8543_v29 = vshrl.u32 %v8537_v23, 16  ;;  %v8546_v47 = vshll.u32 %v8537_v23, 16 }
 0x31f   : > { %13893 = vst [vmem:[#allocation214_spill] sm:$0xff] %v8540_v38  ;;  %v608_v15 = vpop.f32.mrf.mxu0 }
 0x320   : > { %v678_v27 = vpack.c.bf16 %v608_v15, %v608_v15  ;;  %v2589_v16 = vrot.slane %v8546_v47, 1  ;;  %v3665_v30 = vrot.slane %v8543_v29, 4  ;;  %v3666_v36 = vrot.slane %v8546_v47, 5 }
 0x321   : > { %v3829_v7 = vrot.slane %v8543_v29, 7 }
 0x322   : > { %v698_v22 = vunpack.c.l.b16 %v678_v27  ;;  %v2591_v21 = vor.u32 %v2589_v16, %v8543_v29  ;;  %v8554_v24 = vsel %vm1651_vm1, %v2588_v5, %v2589_v16  ;;  %v3667_v58 = vor.u32 %v3666_v36, %v3665_v30 }
 0x323   : > { %13894 = vst [vmem:[#allocation215_spill] sm:$0xff] %v8554_v24  ;;  %v3830_v26 = vor.u32 %v3829_v7, %v8546_v47 }
 0x324   : > { %v8557_v45 = vpack.c.b16 %v698_v22, %v697_v19  ;;  %v8560_v15 = vsel %vm1687_vm2, %v3223_v52, %v3667_v58 }
 0x325   : > { %13895 = vst [vmem:[#allocation216_spill] sm:$0xff] %v8560_v15  ;;  %v8563_v60 = vsel %vm2059_vm3, %v3826_v56, %v3830_v26 }
 0x326   : > { %13896 = vst [vmem:[#allocation217_spill] sm:$0xff] %v8563_v60  ;;  %v13177_v38 = vshll.u32 %v8557_v45, 16  ;;  %v13176_v27 = vshrl.u32 %v8557_v45, 16 }
 0x327   : > { %v610_v23 = vpop.f32.mrf.mxu0 }
 0x328   : > { %v679_v54 = vpack.c.bf16 %v610_v23, %v610_v23  ;;  %v2046_v5 = vrot.slane %v13176_v27, 3  ;;  %v2047_v30 = vrot.slane %v13177_v38, 4 }
 0x32a   : > { %v699_v19 = vunpack.c.l.b16 %v679_v54  ;;  %v2048_v16 = vor.u32 %v2047_v30, %v2046_v5 }
 0x32c   : > { %v8571_v36 = vpack.c.b16 %v699_v19, %v698_v22  ;;  %v8574_v52 = vsel %vm707_vm4, %v2044_v59, %v2048_v16 }
 0x32d   : > { %13898 = vst [vmem:[#allocation219_spill] sm:$0xff] %v8574_v52 }
 0x32e   : > { %13897 = vst [vmem:[#allocation218_spill] sm:$0xff] %v8571_v36  ;;  %v8577_v56 = vshrl.u32 %v8571_v36, 16  ;;  %v738_v26 = vshll.u32 %v8571_v36, 16 }
 0x32f   : > { %v613_v60 = vpop.f32.mrf.mxu0 }
 0x330   : > { %v680_v23 = vpack.c.bf16 %v613_v60, %v613_v60  ;;  %v2592_v15 = vrot.slane %v738_v26, 1  ;;  %v3669_v27 = vrot.slane %v8577_v56, 4  ;;  %v3670_v24 = vrot.slane %v738_v26, 5 }
 0x331   : > { %v13179_v38 = vrot.slane %v8577_v56, 7 }
 0x332   : > { %v700_v54 = vunpack.c.l.b16 %v680_v23  ;;  %v8583_v22 = vor.u32 %v2592_v15, %v8577_v56  ;;  %v8586_v59 = vsel %vm1651_vm1, %v2591_v21, %v2592_v15  ;;  %v8588_v5 = vor.u32 %v3670_v24, %v3669_v27 }
 0x333   : > { %13899 = vst [vmem:[#allocation220_spill] sm:$0xff] %v8586_v59  ;;  %v3833_v30 = vor.u32 %v13179_v38, %v738_v26  ;;  %v1384_v27 = vpack.c.b16 %v7420_v49, %v7420_v49  ;;  %v740_v59 = vrot.slane %v738_v26, 4 }
 0x334   : > { %v8592_v52 = vpack.c.b16 %v700_v54, %v699_v19  ;;  %v3368_v60 = vpack.c.b16 %v700_v54, %v700_v54  ;;  %v8596_v36 = vsel %vm1687_vm2, %v3667_v58, %v8588_v5  ;;  %v737_v19 = vrot.slane %v8577_v56, 3  ;;  %v8609_v58 = vld [vmem:[%s13072_s2 + $0x8] sm:$0xff] }
 0x335   : > { %13900 = vst [vmem:[#allocation221_spill] sm:$0xff] %v8596_v36  ;;  %v8599_v23 = vsel %vm2059_vm3, %v3829_v7, %v3833_v30  ;;  %6637 = vmatmul.msk.bf16.gmra.mxu3 %vm1158_vm5, %v8609_v58  ;;  %6635 = vmatmul.msk.bf16.gmra.mxu2 %vm1158_vm5, %v8609_v58  ;;  %v4282_v50 = vshrl.u32 %v1384_v27, 16  ;;  %v4131_v2 = vshll.u32 %v1384_v27, 16 }
 0x336   : > { %13901 = vst [vmem:[#allocation222_spill] sm:$0xff] %v8599_v23  ;;  %v1672_v46 = vshll.u32 %v8592_v52, 16  ;;  %v13181_v21 = vshrl.u32 %v8592_v52, 16  ;;  %v3370_v15 = vshrl.u32 %v3368_v60, 16  ;;  %v3373_v24 = vshll.u32 %v3368_v60, 16 }
 0x337   : > { %v615_v38 = vpop.f32.mrf.mxu0  ;;  %v8620_v4 = vor.u32 %v740_v59, %v737_v19 }
 0x338   : > { %v3372_v7 = vrot.slane %v3370_v15, 3  ;;  %v3375_v30 = vrot.slane %v3373_v24, 4  ;;  %v681_v23 = vpack.c.bf16 %v615_v38, %v615_v38  ;;  %v2050_v49 = vrot.slane %v13181_v21, 3 }
 0x339   : > { %v2051_v60 = vrot.slane %v1672_v46, 4 }
 0x33a   : > { %v701_v36 = vunpack.c.l.b16 %v681_v23  ;;  %v8618_v26 = vsel %vm1412_vm6, %v681_v23, %v1384_v27  ;;  %v3376_v24 = vor.u32 %v3375_v30, %v3372_v7 }
 0x33b   : > { %13902 = vst [vmem:[#allocation223_spill] sm:$0xff] %v8618_v26  ;;  %v2052_v15 = vor.u32 %v2051_v60, %v2050_v49  ;;  %v4285_v26 = vrot.slane %v4131_v2, 4 }
 0x33c   : > { %v8622_v38 = vpack.c.b16 %v701_v36, %v700_v54  ;;  %v1383_v28 = vpack.c.b16 %v701_v36, %v701_v36  ;;  %v8629_v21 = vsel %vm707_vm4, %v8620_v4, %v3376_v24 }
 0x33d   : > { %v8625_v14 = vsel %vm707_vm4, %v2048_v16, %v2052_v15  ;;  %13905 = vst [vmem:[#allocation226_spill] sm:$0xff] %v8629_v21  ;;  %v4284_v16 = vrot.slane %v4282_v50, 3 }
 0x33e   : > { %13903 = vst [vmem:[#allocation224_spill] sm:$0xff] %v8622_v38  ;;  %v744_v23 = vshrl.u32 %v8622_v38, 16  ;;  %v747_v59 = vshll.u32 %v8622_v38, 16  ;;  %v1679_v19 = vshll.u32 %v1383_v28, 16  ;;  %v1683_v49 = vshrl.u32 %v1383_v28, 16 }
 0x33f   : > { %13904 = vst [vmem:[#allocation225_spill] sm:$0xff] %v8625_v14  ;;  %v1415_v54 = vsel %vm1412_vm6, %v1383_v28, %v1384_v27  ;;  %v13927_v28 = vshll.u32 %v8557_v45, 16 }
 0x340   : > { %v1681_v7 = vrot.slane %v1679_v19, 1  ;;  %v8641_v30 = vsel %vm1158_vm5, %v1415_v54, 0  ;;  %v746_v60 = vrot.slane %v744_v23, 3  ;;  %v749_v24 = vrot.slane %v747_v59, 4 }
 0x341   : > { %13908 = vst [vmem:[#allocation227_spill] sm:$0xff] %v8641_v30  ;;  %1535 = vmatpush.bf16.xpose.msrb.mxu2 %v8641_v30  ;;  %v8656_v50 = vrot.slane %v1683_v49, 3  ;;  %v2055_v27 = vrot.slane %v1679_v19, 4  ;;  %v2595_v54 = vrot.slane %v747_v59, 1  ;;  %v3673_v0 = vrot.slane %v744_v23, 4 }
 0x342   : > { %v1685_v14 = vor.u32 %v1683_v49, %v1681_v7  ;;  %v750_v38 = vor.u32 %v749_v24, %v746_v60  ;;  %v3674_v20 = vrot.slane %v747_v59, 5  ;;  %v1674_v19 = vrot.slane %v1672_v46, 1 }
 0x343   : > { %v2056_v35 = vor.u32 %v2055_v27, %v8656_v50  ;;  %v8663_v34 = vor.u32 %v2595_v54, %v744_v23  ;;  %v8677_v24 = vrot.slane %v4131_v2, 1  ;;  %v4286_v46 = vor.u32 %v4285_v26, %v4284_v16 }
 0x344   : > { %v1143_v49 = vsel %vm8652_vm12, %v750_v38, %v7575_v57  ;;  %v1802_v60 = vsel %vm8636_vm9, %v1685_v14, %v7436_v61  ;;  %v13920_v57 = vrot.slane %v7429_v53, 1  ;;  %v8699_v2 = vsel %vm1651_vm1, %v8583_v22, %v2595_v54 }
 0x345   : > { %13913 = vst [vmem:[#allocation228_spill] sm:$0xff] %v8663_v34  ;;  %v8680_v27 = vsel %vm1158_vm5, %v1143_v49, 0  ;;  %v8683_v31 = vsel %vm1158_vm5, %v1802_v60, 0  ;;  %v8686_v62 = vsel %vm707_vm4, %v2052_v15, %v2056_v35  ;;  %v3675_v14 = vor.u32 %v3674_v20, %v3673_v0  ;;  %v8705_v35 = vld [vmem:[%s13072_s2 + $0x10] sm:$0xff] }
 0x346   : > { %13917 = vst [vmem:[#allocation230_spill] sm:$0xff] %v8677_v24  ;;  %1264 = vmatpush.bf16.xpose.msra.mxu1 %v8680_v27  ;;  %1923 = vmatpush.bf16.xpose.msra.mxu3 %v8683_v31  ;;  %v8695_v61 = vsel %vm8667_vm13, %v8663_v34, %v13920_v57  ;;  %v3835_v26 = vrot.slane %v744_v23, 7  ;;  %v8713_v15 = vsel %vm1158_vm5, %v8592_v52, 0  ;;  %v13922_v22 = vshrl.u32 %v8592_v52, 16  ;;  %v13989_v34 = vld [vmem:[#allocation128_spill] sm:$0xff] }
 0x347   : > { %13918 = vst [vmem:[#allocation231_spill] sm:$0xff] %v8680_v27  ;;  %2966 = vmatpush.bf16.xpose.msrb.mxu0 %v8680_v27  ;;  %v8719_v0 = vsel %vm1687_vm2, %v8588_v5, %v3675_v14  ;;  %v8723_v36 = vsel %vm8652_vm12, %v750_v38, %v4286_v46  ;;  %6654 = vmatmul.msk.bf16.vlgmr.msrb.gmra.mxu3 %vm1158_vm5, %v8705_v35  ;;  %v13925_v54 = vrot.slane %v8577_v56, 7  ;;  %v1667_v49 = vrot.slane %v13927_v28, 1 }
 0x348   : > { %13919 = vst [vmem:[#allocation232_spill] sm:$0xff] %v8683_v31  ;;  %v1678_v20 = vor.u32 %v13922_v22, %v1674_v19  ;;  %v3836_v23 = vor.u32 %v3835_v26, %v747_v59  ;;  %v751_v16 = vsel %vm707_vm4, %v8620_v4, %v750_v38  ;;  %v728_v60 = vrot.slane %v8543_v29, 3 }
 0x349   : > { %13921 = vst [vmem:[#allocation233_spill] sm:$0xff] %v8713_v15  ;;  %1536 = vmatpush.bf16.xpose.msrb.mxu2 %v8713_v15  ;;  %v731_v46 = vrot.slane %v8546_v47, 4  ;;  %v8741_v57 = vsel %vm1158_vm5, %v751_v16, 0  ;;  %v8751_v56 = vsel %vm1158_vm5, %v8557_v45, 0  ;;  %v13931_v29 = vshrl.u32 %v8557_v45, 16 }
 0x34a   : > { %13923 = vst [vmem:[#allocation234_spill] sm:$0xff] %v8719_v0  ;;  %v1682_v52 = vsel %vm1651_vm1, %v1678_v20, %v1681_v7  ;;  %v8734_v5 = vsel %vm2059_vm3, %v13925_v54, %v3836_v23  ;;  %v13932_v26 = vshll.u32 %v8519_v32, 16  ;;  %v13936_v45 = vshrl.u32 %v8519_v32, 16  ;;  %v13999_v0 = vld [vmem:[#allocation113_spill] sm:$0xff] }
 0x34b   : > { %13924 = vst [vmem:[#allocation235_spill] sm:$0xff] %v8723_v36  ;;  %v8744_v59 = vsel %vm1158_vm5, %v1682_v52, 0  ;;  %v1671_v38 = vor.u32 %v13931_v29, %v1667_v49  ;;  %v732_v47 = vor.u32 %v731_v46, %v728_v60  ;;  %v8800_v60 = vsel %vm1158_vm5, %v8425_v25, 0  ;;  %v8807_v29 = vld [vmem:[%s13072_s2 + $0x18] sm:$0xff] }
 0x34c   : > { %13926 = vst [vmem:[#allocation236_spill] sm:$0xff] %v8734_v5  ;;  %v1660_v22 = vrot.slane %v13932_v26, 1  ;;  %v1259_v25 = vsel %vm1158_vm5, %v8454_v6, 0  ;;  %v8843_v6 = vsel %vm1158_vm5, %v8431_v12, 0  ;;  %v8862_v12 = vsel %vm1158_vm5, %v8386_v13, 0  ;;  %v13958_v26 = vld [vmem:[#allocation152_spill] sm:$0xff] }
 0x34d   : > { %13928 = vst [vmem:[#allocation237_spill] sm:$0xff] %v8741_v57  ;;  %v742_v7 = vsel %vm707_vm4, %v732_v47, %v8620_v4  ;;  %v1675_v14 = vsel %vm1651_vm1, %v1671_v38, %v1674_v19  ;;  %v8772_v4 = vsel %vm1158_vm5, %v8519_v32, 0  ;;  %v733_v16 = vsel %vm707_vm4, %v8514_v55, %v732_v47  ;;  %v13996_v5 = vld [vmem:[#allocation121_spill] sm:$0xff] }
 0x34e   : > { %13929 = vst [vmem:[#allocation238_spill] sm:$0xff] %v8744_v59  ;;  %1265 = vmatpush.bf16.xpose.msra.mxu1 %v8741_v57  ;;  %1924 = vmatpush.bf16.xpose.msra.mxu3 %v8744_v59  ;;  %v8762_v20 = vsel %vm1158_vm5, %v742_v7, 0  ;;  %v8765_v23 = vsel %vm1158_vm5, %v1675_v14, 0  ;;  %v1664_v19 = vor.u32 %v13936_v45, %v1660_v22  ;;  %v8781_v54 = vsel %vm1158_vm5, %v733_v16, 0  ;;  %v13956_v14 = vld [vmem:[#allocation172_spill] sm:$0xff] }
 0x34f   : > { %2967 = vmatpush.bf16.xpose.msrb.mxu0 %v8741_v57  ;;  %13930 = vst [vmem:[#allocation239_spill] sm:$0xff] %v8751_v56  ;;  %v8792_v32 = vsel %vm1158_vm5, %v8475_v9, 0  ;;  %v13940_v55 = vshrl.u32 %v8475_v9, 16  ;;  %v8813_v9 = vsel %vm1158_vm5, %v8523_v3, 0  ;;  %v8824_v38 = vsel %vm1158_vm5, %v8481_v42, 0 }
 0x350   : > { %13933 = vst [vmem:[#allocation240_spill] sm:$0xff] %v8762_v20  ;;  %v1668_v52 = vsel %vm1651_vm1, %v1664_v19, %v1667_v49  ;;  %v8832_v3 = vsel %vm1158_vm5, %v8383_v1, 0  ;;  %v8839_v42 = vsel %vm1158_vm5, %v8428_v43, 0  ;;  %v8850_v1 = vsel %vm1158_vm5, %v8338_v63, 0  ;;  %v8856_v43 = vld [vmem:[%s13072_s2 + $0x20] sm:$0xff]  ;;  %v13962_v19 = vld [vmem:[#allocation164_spill] sm:$0xff] }
 0x351   : > { %1537 = vmatpush.bf16.xpose.msrb.mxu2 %v8751_v56  ;;  %13934 = vst [vmem:[#allocation241_spill] sm:$0xff] %v8765_v23  ;;  %v8784_v28 = vsel %vm1158_vm5, %v1668_v52, 0  ;;  %v1657_v49 = vor.u32 %v8493_v41, %v13940_v55  ;;  %v8866_v47 = vsel %vm1158_vm5, %v8389_v48, 0  ;;  %v7212_v63 = vld [vmem:[%s13072_s2 + $0x60] sm:$0xff]  ;;  %v8878_v13 = vsel %vm1158_vm5, %v8302_v44, 0 }
 0x352   : > { %13935 = vst [vmem:[#allocation242_spill] sm:$0xff] %v8772_v4  ;;  %v8886_v48 = vsel %vm1158_vm5, %v8341_v10, 0  ;;  %v8890_v7 = vsel %vm1158_vm5, %v8344_v37, 0  ;;  %v8897_v44 = vsel %vm1158_vm5, %v8261_v40, 0  ;;  %v8902_v10 = vsel %vm1158_vm5, %v8305_v11, 0  ;;  %v8919_v11 = vld [vmem:[%s13072_s2 + $0x28] sm:$0xff] }
 0x353   : > { %13937 = vst [vmem:[#allocation243_spill] sm:$0xff] %v8781_v54  ;;  %v1661_v46 = vsel %vm1651_vm1, %v1657_v49, %v1660_v22  ;;  %v8906_v37 = vsel %vm1158_vm5, %v13956_v14, 0  ;;  %v8913_v40 = vsel %vm1158_vm5, %v13958_v26, 0  ;;  %v13960_v22 = vld [vmem:[#allocation162_spill] sm:$0xff]  ;;  %v8929_v16 = vsel %vm1158_vm5, %v13962_v19, 0  ;;  %v13966_v49 = vld [vmem:[#allocation153_spill] sm:$0xff] }
 0x354   : > { %13938 = vst [vmem:[#allocation244_spill] sm:$0xff] %v8784_v28  ;;  %v8816_v41 = vsel %vm1158_vm5, %v1661_v46, 0  ;;  %v8925_v45 = vsel %vm1158_vm5, %v13960_v22, 0  ;;  %v13964_v52 = vld [vmem:[#allocation142_spill] sm:$0xff]  ;;  %v8941_v46 = vsel %vm1158_vm5, %v13966_v49, 0  ;;  %v13970_v14 = vld [vmem:[#allocation25_spill] sm:$0xff] }
 0x355   : > { %13939 = vst [vmem:[#allocation245_spill] sm:$0xff] %v8792_v32  ;;  %v8936_v55 = vsel %vm1158_vm5, %v13964_v52, 0  ;;  %v8952_v26 = vsel %vm1158_vm5, %v13970_v14, 0  ;;  %v13972_v22 = vld [vmem:[#allocation133_spill] sm:$0xff]  ;;  %v13974_v52 = vld [vmem:[#allocation135_spill] sm:$0xff]  ;;  %v9007_v39 = vsel %vm1158_vm5, %v13989_v34, 0 }
 0x356   : > { %1266 = vmatpush.bf16.xpose.msra.mxu1 %v8762_v20  ;;  %1925 = vmatpush.bf16.xpose.msra.mxu3 %v8765_v23  ;;  %13941 = vst [vmem:[#allocation246_spill] sm:$0xff] %v8800_v60  ;;  %v8956_v19 = vsel %vm1158_vm5, %v13972_v22, 0  ;;  %v8962_v49 = vsel %vm1158_vm5, %v13974_v52, 0  ;;  %v13978_v14 = vld [vmem:[#allocation145_spill] sm:$0xff]  ;;  %v13980_v22 = vld [vmem:[#allocation126_spill] sm:$0xff]  ;;  %v13982_v52 = vld [vmem:[#allocation136_spill] sm:$0xff] }
 0x357   : > { %2968 = vmatpush.bf16.xpose.msrb.mxu0 %v8762_v20  ;;  %6655 = vmatmul.msk.bf16.gmra.mxu3 %vm1158_vm5, %v8807_v29  ;;  %13942 = vst [vmem:[#allocation247_spill] sm:$0xff] %v8813_v9  ;;  %v8981_v57 = vsel %vm1158_vm5, %v13982_v52, 0  ;;  %v13987_v52 = vld [vmem:[#allocation119_spill] sm:$0xff]  ;;  %v9023_v34 = vsel %vm1158_vm5, %v13996_v5, 0  ;;  %v9039_v5 = vpop.f32.mrf.mxu3 }
 0x358   : > { %13943 = vst [vmem:[#allocation248_spill] sm:$0xff] %v8816_v41  ;;  %v9003_v24 = vsel %vm1158_vm5, %v13987_v52, 0  ;;  %v14032_v20 = vld [vmem:[#allocation67_spill] sm:$0xff] }
 0x359   : > { %1538 = vmatpush.bf16.xpose.msrb.mxu2 %v8772_v4  ;;  %13944 = vst [vmem:[#allocation249_spill] sm:$0xff] %v8824_v38 }
 0x35a   : > { %13945 = vst [vmem:[#allocation250_spill] sm:$0xff] %v8832_v3 }
 0x35b   : > { %13946 = vst [vmem:[#allocation251_spill] sm:$0xff] %v8839_v42 }
 0x35c   : > { %13947 = vst [vmem:[#allocation252_spill] sm:$0xff] %v8843_v6 }
 0x35d   : > { %13948 = vst [vmem:[#allocation253_spill] sm:$0xff] %v8850_v1 }
 0x35e   : > { %1267 = vmatpush.bf16.xpose.msra.mxu1 %v8781_v54  ;;  %1926 = vmatpush.bf16.xpose.msra.mxu3 %v8784_v28  ;;  %13949 = vst [vmem:[#allocation254_spill] sm:$0xff] %v8862_v12 }
 0x35f   : > { %2969 = vmatpush.bf16.xpose.msrb.mxu0 %v8781_v54  ;;  %13950 = vst [vmem:[#allocation255_spill] sm:$0xff] %v8866_v47 }
 0x360   : > { %13951 = vst [vmem:[#allocation256_spill] sm:$0xff] %v8878_v13 }
 0x361   : > { %1539 = vmatpush.bf16.xpose.msrb.mxu2 %v8792_v32  ;;  %13952 = vst [vmem:[#allocation257_spill] sm:$0xff] %v8886_v48 }
 0x362   : > { %13953 = vst [vmem:[#allocation258_spill] sm:$0xff] %v8890_v7 }
 0x363   : > { %13954 = vst [vmem:[#allocation259_spill] sm:$0xff] %v8897_v44 }
 0x364   : > { %13955 = vst [vmem:[#allocation260_spill] sm:$0xff] %v8902_v10 }
 0x365   : > { %13957 = vst [vmem:[#allocation172_spill] sm:$0xff] %v8906_v37 }
 0x366   : > { %1268 = vmatpush.bf16.xpose.msra.mxu1 %v8813_v9  ;;  %1927 = vmatpush.bf16.xpose.msra.mxu3 %v8816_v41  ;;  %13959 = vst [vmem:[#allocation152_spill] sm:$0xff] %v8913_v40  ;;  %v8971_v41 = vsel %vm1158_vm5, %v13978_v14, 0  ;;  %v7213_v14 = vld [vmem:[%s13072_s2 + $0x68] sm:$0xff] }
 0x367   : > { %3102 = vmatpush.bf16.xpose.msra.mxu0 %v8439_v18  ;;  %13961 = vst [vmem:[#allocation162_spill] sm:$0xff] %v8925_v45 }
 0x368   : > { %6652 = vmatmul.msk.bf16.vlgmr.msrb.gmra.mxu2 %vm1158_vm5, %v8705_v35  ;;  %6757 = vmatmul.msk.bf16.vlgmr.msrb.gmra.mxu0 %vm1158_vm5, %v7212_v63  ;;  %13963 = vst [vmem:[#allocation164_spill] sm:$0xff] %v8929_v16 }
 0x369   : > { %1589 = vmatpush.bf16.xpose.msra.mxu2 %v8800_v60  ;;  %13965 = vst [vmem:[#allocation142_spill] sm:$0xff] %v8936_v55 }
 0x36a   : > { %13967 = vst [vmem:[#allocation153_spill] sm:$0xff] %v8941_v46 }
 0x36b   : > { %13971 = vst [vmem:[#allocation25_spill] sm:$0xff] %v8952_v26 }
 0x36c   : > { %13973 = vst [vmem:[#allocation133_spill] sm:$0xff] %v8956_v19 }
 0x36d   : > { %6632 = vmatmul.msk.bf16.vlgmr.msra.gmra.mxu1 %vm1158_vm5, %v8358_v51  ;;  %6673 = vmatmul.msk.bf16.vlgmr.msra.gmra.mxu3 %vm1158_vm5, %v8856_v43  ;;  %13975 = vst [vmem:[#allocation135_spill] sm:$0xff] %v8962_v49 }
 0x36e   : > { %1318 = vmatpush.bf16.xpose.msrb.mxu1 %v1259_v25  ;;  %1977 = vmatpush.bf16.xpose.msrb.mxu3 %v8824_v38  ;;  %v13968_v25 = vld [vmem:[#allocation155_spill] sm:$0xff]  ;;  %13979 = vst [vmem:[#allocation145_spill] sm:$0xff] %v8971_v41 }
 0x36f   : > { %3103 = vmatpush.bf16.xpose.msra.mxu0 %v7983_v33  ;;  %v8945_v63 = vsel %vm1158_vm5, %v13968_v25, 0  ;;  %v13976_v25 = vld [vmem:[#allocation143_spill] sm:$0xff]  ;;  %13983 = vst [vmem:[#allocation136_spill] sm:$0xff] %v8981_v57 }
 0x370   : > { %13969 = vst [vmem:[#allocation155_spill] sm:$0xff] %v8945_v63  ;;  %v8967_v53 = vsel %vm1158_vm5, %v13976_v25, 0  ;;  %v13984_v25 = vld [vmem:[#allocation196_spill] sm:$0xff] }
 0x371   : > { %1590 = vmatpush.bf16.xpose.msra.mxu2 %v8832_v3  ;;  %13977 = vst [vmem:[#allocation143_spill] sm:$0xff] %v8967_v53 }
 0x372   : > { %13988 = vst [vmem:[#allocation119_spill] sm:$0xff] %v9003_v24 }
 0x373   : > { %13990 = vst [vmem:[#allocation128_spill] sm:$0xff] %v9007_v39 }
 0x374   : > { %13997 = vst [vmem:[#allocation121_spill] sm:$0xff] %v9023_v34 }
 0x376   : > { %1319 = vmatpush.bf16.xpose.msrb.mxu1 %v8839_v42  ;;  %1978 = vmatpush.bf16.xpose.msrb.mxu3 %v8843_v6 }
 0x377   : > { %3104 = vmatpush.bf16.xpose.msra.mxu0 %v8008_v8 }
 0x378   : > { %6653 = vmatmul.msk.bf16.gmra.mxu2 %vm1158_vm5, %v8807_v29  ;;  %6758 = vmatmul.msk.bf16.gmra.mxu0 %vm1158_vm5, %v7213_v14  ;;  %v13992_v14 = vld [vmem:[#allocation120_spill] sm:$0xff] }
 0x379   : > { %1591 = vmatpush.bf16.xpose.msra.mxu2 %v8850_v1 }
 0x37d   : > { %6633 = vmatmul.msk.bf16.gmra.mxu1 %vm1158_vm5, %v8609_v58  ;;  %6674 = vmatmul.msk.bf16.gmra.mxu3 %vm1158_vm5, %v8919_v11 }
 0x37e   : > { %1320 = vmatpush.bf16.xpose.msrb.mxu1 %v8862_v12  ;;  %1979 = vmatpush.bf16.xpose.msrb.mxu3 %v8866_v47 }
 0x37f   : > { %3105 = vmatpush.bf16.xpose.msra.mxu0 %v8023_v17 }
 0x381   : > { %1592 = vmatpush.bf16.xpose.msra.mxu2 %v8878_v13 }
 0x386   : > { %1321 = vmatpush.bf16.xpose.msrb.mxu1 %v8886_v48  ;;  %1980 = vmatpush.bf16.xpose.msrb.mxu3 %v8890_v7 }
 0x387   : > { %3106 = vmatpush.bf16.xpose.msra.mxu0 %v8641_v30  ;;  %v8975_v30 = vsel %vm1158_vm5, %v13980_v22, 0  ;;  %v13985_v22 = vld [vmem:[#allocation127_spill] sm:$0xff] }
 0x388   : > { %13981 = vst [vmem:[#allocation126_spill] sm:$0xff] %v8975_v30  ;;  %v8993_v36 = vsel %vm1158_vm5, %v13985_v22, 0  ;;  %v13991_v22 = vld [vmem:[#allocation200_spill] sm:$0xff] }
 0x389   : > { %1593 = vmatpush.bf16.xpose.msra.mxu2 %v8897_v44  ;;  %13986 = vst [vmem:[#allocation127_spill] sm:$0xff] %v8993_v36 }
 0x38e   : > { %1322 = vmatpush.bf16.xpose.msrb.mxu1 %v8902_v10  ;;  %1981 = vmatpush.bf16.xpose.msrb.mxu3 %v8906_v37  ;;  %v14071_v37 = vld [vmem:[#allocation40_spill] sm:$0xff] }
 0x38f   : > { %3107 = vmatpush.bf16.xpose.msra.mxu0 %v8713_v15  ;;  %v9061_v15 = vpop.f32.mrf.mxu3 }
 0x390   : > { %14007 = vst [vmem:[#allocation261_spill] sm:$0xff] %v9061_v15 }
 0x391   : > { %1594 = vmatpush.bf16.xpose.msra.mxu2 %v8913_v40 }
 0x396   : > { %1323 = vmatpush.bf16.xpose.msrb.mxu1 %v8925_v45  ;;  %1982 = vmatpush.bf16.xpose.msrb.mxu3 %v8929_v16  ;;  %v14038_v16 = vld [vmem:[#allocation64_spill] sm:$0xff] }
 0x397   : > { %3108 = vmatpush.bf16.xpose.msra.mxu0 %v8751_v56  ;;  %v14003_v56 = vld [vmem:[#allocation114_spill] sm:$0xff] }
 0x399   : > { %1595 = vmatpush.bf16.xpose.msra.mxu2 %v8936_v55 }
 0x39e   : > { %1324 = vmatpush.bf16.xpose.msrb.mxu1 %v8941_v46  ;;  %1983 = vmatpush.bf16.xpose.msrb.mxu3 %v8945_v63 }
 0x39f   : > { %3109 = vmatpush.bf16.xpose.msra.mxu0 %v8772_v4 }
 0x3a1   : > { %1596 = vmatpush.bf16.xpose.msra.mxu2 %v8956_v19  ;;  %v14096_v19 = vld [vmem:[#allocation22_spill] sm:$0xff] }
 0x3a2   : > { %v9354_v40 = vsel %vm1158_vm5, %v14096_v19, 0  ;;  %v9371_v19 = vld [vmem:[%s13072_s2 + $0x40] sm:$0xff] }
 0x3a6   : > { %1325 = vmatpush.bf16.xpose.msrb.mxu1 %v8967_v53  ;;  %1984 = vmatpush.bf16.xpose.msrb.mxu3 %v8971_v41  ;;  %v14036_v41 = vld [vmem:[#allocation70_spill] sm:$0xff] }
 0x3a7   : > { %3249 = vmatpush.bf16.xpose.msrb.mxu0 %v8952_v26 }
 0x3a8   : > { %6658 = vmatmul.msk.bf16.vlgmr.msra.gmra.mxu2 %vm1158_vm5, %v8705_v35 }
 0x3a9   : > { %1958 = vmatpush.bf16.xpose.msrb.mxu2 %v8962_v49 }
 0x3ad   : > { %6638 = vmatmul.msk.bf16.vlgmr.msrb.gmra.mxu1 %vm1158_vm5, %v8358_v51  ;;  %6679 = vmatmul.msk.bf16.vlgmr.msrb.gmra.mxu3 %vm1158_vm5, %v8856_v43  ;;  %v9014_v51 = vsel %vm1158_vm5, %v13992_v14, 0  ;;  %v7214_v14 = vld [vmem:[%s13072_s2 + $0x70] sm:$0xff] }
 0x3ae   : > { %1570 = vmatpush.bf16.xpose.msra.mxu1 %v8975_v30  ;;  %2302 = vmatpush.bf16.xpose.msra.mxu3 %v8981_v57  ;;  %13993 = vst [vmem:[#allocation120_spill] sm:$0xff] %v9014_v51  ;;  %v13994_v57 = vld [vmem:[#allocation112_spill] sm:$0xff] }
 0x3af   : > { %3250 = vmatpush.bf16.xpose.msrb.mxu0 %v13984_v25  ;;  %v9019_v52 = vsel %vm1158_vm5, %v13994_v57, 0  ;;  %v9035_v57 = vsel %vm1158_vm5, %v13999_v0, 0  ;;  %v9051_v0 = vsel %vm1158_vm5, %v14003_v56, 0  ;;  %v14010_v56 = vld [vmem:[#allocation105_spill] sm:$0xff] }
 0x3b0   : > { %13995 = vst [vmem:[#allocation112_spill] sm:$0xff] %v9019_v52  ;;  %6778 = vmatmul.msk.bf16.vlgmr.msra.gmra.mxu0 %vm1158_vm5, %v7214_v14  ;;  %v14005_v14 = vld [vmem:[#allocation104_spill] sm:$0xff]  ;;  %v9069_v9 = vsel %vm1158_vm5, %v14010_v56, 0  ;;  %v14016_v56 = vld [vmem:[#allocation97_spill] sm:$0xff] }
 0x3b1   : > { %1959 = vmatpush.bf16.xpose.msrb.mxu2 %v8993_v36  ;;  %14000 = vst [vmem:[#allocation113_spill] sm:$0xff] %v9035_v57  ;;  %v9132_v36 = vld [vmem:[%s13073_s3 + $0x1] ss:$8 sm:$0xf] }
 0x3b2   : > { %14004 = vst [vmem:[#allocation114_spill] sm:$0xff] %v9051_v0 }
 0x3b3   : > { %14011 = vst [vmem:[#allocation105_spill] sm:$0xff] %v9069_v9 }
 0x3b6   : > { %1571 = vmatpush.bf16.xpose.msra.mxu1 %v9003_v24  ;;  %2303 = vmatpush.bf16.xpose.msra.mxu3 %v9007_v39  ;;  %v13998_v39 = vld [vmem:[#allocation204_spill] sm:$0xff] }
 0x3b7   : > { %3251 = vmatpush.bf16.xpose.msrb.mxu0 %v13991_v22 }
 0x3b8   : > { %6659 = vmatmul.msk.bf16.gmra.mxu2 %vm1158_vm5, %v8807_v29  ;;  %v9079_v15 = vpop.f32.mrf.mxu3 }
 0x3b9   : > { %1960 = vmatpush.bf16.xpose.msrb.mxu2 %v9014_v51  ;;  %v9087_v51 = vsel %vm1158_vm5, %v14016_v56, 0  ;;  %v14023_v56 = vld [vmem:[#allocation88_spill] sm:$0xff] }
 0x3ba   : > { %14017 = vst [vmem:[#allocation97_spill] sm:$0xff] %v9087_v51  ;;  %v9105_v54 = vsel %vm1158_vm5, %v14023_v56, 0  ;;  %v14028_v56 = vld [vmem:[#allocation69_spill] sm:$0xff] }
 0x3bb   : > { %14024 = vst [vmem:[#allocation88_spill] sm:$0xff] %v9105_v54 }
 0x3bd   : > { %6639 = vmatmul.msk.bf16.gmra.mxu1 %vm1158_vm5, %v8609_v58  ;;  %6680 = vmatmul.msk.bf16.gmra.mxu3 %vm1158_vm5, %v8919_v11  ;;  %v9058_v58 = vsel %vm1158_vm5, %v14005_v14, 0  ;;  %v14012_v14 = vld [vmem:[#allocation96_spill] sm:$0xff] }
 0x3be   : > { %1572 = vmatpush.bf16.xpose.msra.mxu1 %v9019_v52  ;;  %2304 = vmatpush.bf16.xpose.msra.mxu3 %v9023_v34  ;;  %v14001_v34 = vld [vmem:[#allocation103_spill] sm:$0xff]  ;;  %14006 = vst [vmem:[#allocation104_spill] sm:$0xff] %v9058_v58 }
 0x3bf   : > { %3252 = vmatpush.bf16.xpose.msrb.mxu0 %v13998_v39  ;;  %v9047_v4 = vsel %vm1158_vm5, %v14001_v34, 0  ;;  %v14008_v34 = vld [vmem:[#allocation94_spill] sm:$0xff] }
 0x3c0   : > { %14002 = vst [vmem:[#allocation103_spill] sm:$0xff] %v9047_v4 }
 0x3c1   : > { %1961 = vmatpush.bf16.xpose.msrb.mxu2 %v9035_v57  ;;  %v9065_v57 = vsel %vm1158_vm5, %v14008_v34, 0  ;;  %v14014_v34 = vld [vmem:[#allocation85_spill] sm:$0xff] }
 0x3c2   : > { %14009 = vst [vmem:[#allocation94_spill] sm:$0xff] %v9065_v57 }
 0x3c6   : > { %1573 = vmatpush.bf16.xpose.msra.mxu1 %v9047_v4  ;;  %2305 = vmatpush.bf16.xpose.msra.mxu3 %v9051_v0  ;;  %v9076_v0 = vsel %vm1158_vm5, %v14012_v14, 0  ;;  %v14018_v14 = vld [vmem:[#allocation87_spill] sm:$0xff]  ;;  %v14073_v4 = vld [vmem:[#allocation21_spill] sm:$0xff] }
 0x3c7   : > { %3253 = vmatpush.bf16.xpose.msrb.mxu0 %v8683_v31  ;;  %14013 = vst [vmem:[#allocation96_spill] sm:$0xff] %v9076_v0 }
 0x3c9   : > { %1962 = vmatpush.bf16.xpose.msrb.mxu2 %v9058_v58  ;;  %v9083_v58 = vsel %vm1158_vm5, %v14014_v34, 0  ;;  %v14021_v34 = vld [vmem:[#allocation76_spill] sm:$0xff] }
 0x3ca   : > { %14015 = vst [vmem:[#allocation85_spill] sm:$0xff] %v9083_v58 }
 0x3ce   : > { %1574 = vmatpush.bf16.xpose.msra.mxu1 %v9065_v57  ;;  %2306 = vmatpush.bf16.xpose.msra.mxu3 %v9069_v9  ;;  %v9097_v9 = vpop.f32.mrf.mxu3 }
 0x3cf   : > { %3254 = vmatpush.bf16.xpose.msrb.mxu0 %v8744_v59  ;;  %v9094_v59 = vsel %vm1158_vm5, %v14018_v14, 0  ;;  %14020 = vst [vmem:[#allocation262_spill] sm:$0xff] %v9097_v9  ;;  %v9113_v14 = vld [vmem:[%s13073_s3] ss:$8 sm:$0xf] }
 0x3d0   : > { %14019 = vst [vmem:[#allocation87_spill] sm:$0xff] %v9094_v59  ;;  %v14025_v9 = vld [vmem:[#allocation86_spill] sm:$0xff] }
 0x3d1   : > { %1963 = vmatpush.bf16.xpose.msrb.mxu2 %v9076_v0  ;;  %v9101_v0 = vsel %vm1158_vm5, %v14021_v34, 0 }
 0x3d2   : > { %14022 = vst [vmem:[#allocation76_spill] sm:$0xff] %v9101_v0 }
 0x3d6   : > { %1575 = vmatpush.bf16.xpose.msra.mxu1 %v9083_v58  ;;  %2307 = vmatpush.bf16.xpose.msra.mxu3 %v9087_v51  ;;  %v9123_v51 = vsel %vm1158_vm5, %v14028_v56, 0  ;;  %v9140_v56 = vsel %vm1158_vm5, %v14032_v20, 0  ;;  %v14054_v58 = vld [vmem:[#allocation52_spill] sm:$0xff] }
 0x3d7   : > { %3255 = vmatpush.bf16.xpose.msrb.mxu0 %v8765_v23  ;;  %v14026_v23 = vld [vmem:[#allocation78_spill] sm:$0xff]  ;;  %14029 = vst [vmem:[#allocation69_spill] sm:$0xff] %v9123_v51 }
 0x3d8   : > { %v9118_v34 = vsel %vm1158_vm5, %v14026_v23, 0  ;;  %v9135_v23 = vperm.slane %v9132_v36, 1  ;;  %14033 = vst [vmem:[#allocation67_spill] sm:$0xff] %v9140_v56 }
 0x3d9   : > { %1964 = vmatpush.bf16.xpose.msrb.mxu2 %v9094_v59  ;;  %14027 = vst [vmem:[#allocation78_spill] sm:$0xff] %v9118_v34  ;;  %v1560_v59 = vpop.f32.mrf.mxu3 }
 0x3da   : > { %14031 = vst [vmem:[#allocation264_spill] sm:$0xff] %v9135_v23  ;;  %v1620_v63 = vmul.f32 %v9135_v23, %v1560_v59  ;;  %v7215_v59 = vld [vmem:[%s13072_s2 + $0x78] sm:$0xff] }
 0x3db   : > { %6779 = vmatmul.msk.bf16.gmra.mxu0 %vm1158_vm5, %v7215_v59  ;;  %v14049_v59 = vld [vmem:[#allocation95_spill] sm:$0xff] }
 0x3de   : > { %1576 = vmatpush.bf16.xpose.msra.mxu1 %v9101_v0  ;;  %2308 = vmatpush.bf16.xpose.msra.mxu3 %v9105_v54  ;;  %v9127_v54 = vperm.slane %v9113_v14, 1  ;;  %v9151_v0 = vsel %vm1158_vm5, %v14036_v41, 0  ;;  %v14041_v41 = vld [vmem:[#allocation61_spill] sm:$0xff] }
 0x3df   : > { %3256 = vmatpush.bf16.xpose.msrb.mxu0 %v8784_v28  ;;  %v1289_v28 = vpop.f32.mrf.mxu2  ;;  %14037 = vst [vmem:[#allocation70_spill] sm:$0xff] %v9151_v0 }
 0x3e0   : > { %14030 = vst [vmem:[#allocation263_spill] sm:$0xff] %v9127_v54 }
 0x3e1   : > { %1965 = vmatpush.bf16.xpose.msrb.mxu2 %v9118_v34  ;;  %v1348_v34 = vmul.f32 %v9127_v54, %v1289_v28  ;;  %v9155_v28 = vsel %vm1158_vm5, %v14038_v16, 0  ;;  %v9174_v16 = vld [vmem:[%s13072_s2 + $0x30] sm:$0xff] }
 0x3e2   : > { %14039 = vst [vmem:[#allocation64_spill] sm:$0xff] %v9155_v28 }
 0x3e3   : > { %v9159_v20 = vadd.f32 %v1620_v63, %v1348_v34  ;;  %v9180_v34 = vpop.f32.mrf.mxu3 }
 0x3e4   : > { %14044 = vst [vmem:[#allocation266_spill] sm:$0xff] %v9180_v34  ;;  %v14050_v34 = vld [vmem:[#allocation55_spill] sm:$0xff] }
 0x3e6   : > { %1577 = vmatpush.bf16.xpose.msra.mxu1 %v9140_v56 }
 0x3e7   : > { %3402 = vmatpush.bf16.xpose.msra.mxu0 %v14025_v9  ;;  %v9178_v63 = vpop.f32.mrf.mxu2  ;;  %v9279_v9 = vsel %vm1158_vm5, %v14071_v37, 0 }
 0x3e8   : > { %6677 = vmatmul.msk.bf16.vlgmr.msrb.gmra.mxu2 %vm1158_vm5, %v8856_v43  ;;  %14043 = vst [vmem:[#allocation265_spill] sm:$0xff] %v9178_v63 }
 0x3e9   : > { %2283 = vmatpush.bf16.xpose.msra.mxu2 %v9123_v51  ;;  %v14034_v51 = vld [vmem:[#allocation79_spill] sm:$0xff] }
 0x3ea   : > { %v9144_v49 = vsel %vm1158_vm5, %v14034_v51, 0  ;;  %v14040_v51 = vld [vmem:[#allocation92_spill] sm:$0xff] }
 0x3eb   : > { %14035 = vst [vmem:[#allocation79_spill] sm:$0xff] %v9144_v49  ;;  %2309 = vmatpush.bf16.xpose.msra.mxu3 %v9144_v49  ;;  %v9169_v49 = vsel %vm1158_vm5, %v14041_v41, 0  ;;  %v14045_v41 = vld [vmem:[#allocation62_spill] sm:$0xff] }
 0x3ec   : > { %14042 = vst [vmem:[#allocation61_spill] sm:$0xff] %v9169_v49 }
 0x3ed   : > { %6656 = vmatmul.msk.bf16.vlgmr.msra.gmra.mxu1 %vm1158_vm5, %v8705_v35  ;;  %v9199_v35 = vsel %vm1158_vm5, %v14050_v34, 0  ;;  %v14056_v34 = vld [vmem:[#allocation24_spill] sm:$0xff] }
 0x3ee   : > { %1939 = vmatpush.bf16.xpose.msrb.mxu1 %v9151_v0  ;;  %v14047_v0 = vld [vmem:[#allocation58_spill] sm:$0xff]  ;;  %14051 = vst [vmem:[#allocation55_spill] sm:$0xff] %v9199_v35 }
 0x3ef   : > { %3403 = vmatpush.bf16.xpose.msra.mxu0 %v14040_v51  ;;  %v9192_v56 = vsel %vm1158_vm5, %v14047_v0, 0  ;;  %v1294_v63 = vpop.f32.mrf.mxu2  ;;  %v14052_v51 = vld [vmem:[#allocation56_spill] sm:$0xff] }
 0x3f0   : > { %14048 = vst [vmem:[#allocation58_spill] sm:$0xff] %v9192_v56  ;;  %v9205_v0 = vsel %vm1158_vm5, %v14052_v51, 0  ;;  %v7216_v51 = vld [vmem:[%s13072_s2 + $0x80] sm:$0xff] }
 0x3f1   : > { %2284 = vmatpush.bf16.xpose.msra.mxu2 %v9169_v49  ;;  %v1565_v49 = vpop.f32.mrf.mxu3  ;;  %14053 = vst [vmem:[#allocation56_spill] sm:$0xff] %v9205_v0  ;;  %6799 = vmatmul.msk.bf16.vlgmr.msrb.gmra.mxu0 %vm1158_vm5, %v7216_v51  ;;  %v14065_v51 = vld [vmem:[#allocation15_spill] sm:$0xff] }
 0x3f2   : > { %6698 = vmatmul.msk.bf16.vlgmr.msra.gmra.mxu3 %vm1158_vm5, %v9174_v16 }
 0x3f3   : > { %2487 = vmatpush.bf16.xpose.msrb.mxu3 %v9155_v28  ;;  %v9188_v28 = vsel %vm1158_vm5, %v14045_v41, 0  ;;  %v1356_v41 = vmul.f32 %v9127_v54, %v1294_v63  ;;  %v14057_v54 = vld [vmem:[#allocation49_spill] sm:$0xff] }
 0x3f4   : > { %14046 = vst [vmem:[#allocation62_spill] sm:$0xff] %v9188_v28 }
 0x3f6   : > { %1940 = vmatpush.bf16.xpose.msrb.mxu1 %v9188_v28  ;;  %v9209_v28 = vsel %vm1158_vm5, %v14054_v58, 0  ;;  %v9224_v58 = vsel %vm1158_vm5, %v14057_v54, 0  ;;  %v14061_v54 = vld [vmem:[#allocation50_spill] sm:$0xff] }
 0x3f7   : > { %3404 = vmatpush.bf16.xpose.msra.mxu0 %v14049_v59  ;;  %14055 = vst [vmem:[#allocation52_spill] sm:$0xff] %v9209_v28 }
 0x3f8   : > { %6678 = vmatmul.msk.bf16.gmra.mxu2 %vm1158_vm5, %v8919_v11  ;;  %14058 = vst [vmem:[#allocation49_spill] sm:$0xff] %v9224_v58 }
 0x3f9   : > { %2285 = vmatpush.bf16.xpose.msra.mxu2 %v9199_v35 }
 0x3fb   : > { %2488 = vmatpush.bf16.xpose.msrb.mxu3 %v9192_v56  ;;  %v1628_v56 = vmul.f32 %v9135_v23, %v1565_v49  ;;  %v9229_v49 = vld [vmem:[%s13072_s2 + $0x38] sm:$0xff]  ;;  %v9233_v23 = vpop.f32.mrf.mxu2 }
 0x3fc   : > { %14059 = vst [vmem:[#allocation267_spill] sm:$0xff] %v9233_v23 }
 0x3fd   : > { %v9217_v63 = vadd.f32 %v1628_v56, %v1356_v41  ;;  %6657 = vmatmul.msk.bf16.gmra.mxu1 %vm1158_vm5, %v8807_v29  ;;  %v9239_v56 = vpop.f32.mrf.mxu3  ;;  %v9243_v41 = vsel %vm1158_vm5, %v14061_v54, 0  ;;  %v14066_v29 = vld [vmem:[#allocation43_spill] sm:$0xff]  ;;  %v9261_v54 = vperm.slane %v9132_v36, 0 }
 0x3fe   : > { %1941 = vmatpush.bf16.xpose.msrb.mxu1 %v9205_v0  ;;  %14060 = vst [vmem:[#allocation268_spill] sm:$0xff] %v9239_v56  ;;  %v9254_v23 = vsel %vm1158_vm5, %v14066_v29, 0  ;;  %v9258_v56 = vperm.slane %v9113_v14, 0 }
 0x3ff   : > { %3405 = vmatpush.bf16.xpose.msra.mxu0 %v14056_v34  ;;  %14062 = vst [vmem:[#allocation50_spill] sm:$0xff] %v9243_v41  ;;  %v14070_v34 = vld [vmem:[#allocation44_spill] sm:$0xff] }
 0x400   : > { %14067 = vst [vmem:[#allocation43_spill] sm:$0xff] %v9258_v56  ;;  %v9275_v59 = vsel %vm1158_vm5, %v14070_v34, 0  ;;  %v14075_v34 = vld [vmem:[#allocation38_spill] sm:$0xff] }
 0x401   : > { %2286 = vmatpush.bf16.xpose.msra.mxu2 %v9224_v58  ;;  %14068 = vst [vmem:[#allocation269_spill] sm:$0xff] %v9261_v54  ;;  %v9294_v37 = vsel %vm1158_vm5, %v14075_v34, 0  ;;  %v14083_v34 = vld [vmem:[#allocation32_spill] sm:$0xff] }
 0x402   : > { %6699 = vmatmul.msk.bf16.gmra.mxu3 %vm1158_vm5, %v9229_v49  ;;  %14072 = vst [vmem:[#allocation44_spill] sm:$0xff] %v9279_v9 }
 0x403   : > { %2489 = vmatpush.bf16.xpose.msrb.mxu3 %v9209_v28  ;;  %v14063_v28 = vld [vmem:[#allocation46_spill] sm:$0xff]  ;;  %v1541_v58 = vpop.f32.mrf.mxu2  ;;  %14076 = vst [vmem:[#allocation40_spill] sm:$0xff] %v9294_v37 }
 0x404   : > { %v9247_v35 = vsel %vm1158_vm5, %v14063_v28, 0  ;;  %v9266_v28 = vld [vmem:[%s13073_s3 + $0x2] ss:$8 sm:$0xf]  ;;  %v1619_v0 = vmul.f32 %v9261_v54, %v1541_v58 }
 0x405   : > { %14064 = vst [vmem:[#allocation46_spill] sm:$0xff] %v9247_v35 }
 0x406   : > { %1942 = vmatpush.bf16.xpose.msrb.mxu1 %v9243_v41  ;;  %v9269_v41 = vperm.slane %v9266_v28, 0 }
 0x407   : > { %3406 = vmatpush.bf16.xpose.msra.mxu0 %v14065_v51  ;;  %v1929_v51 = vpop.f32.mrf.mxu3 }
 0x408   : > { %14069 = vst [vmem:[#allocation270_spill] sm:$0xff] %v9269_v41  ;;  %v2007_v57 = vmul.f32 %v9269_v41, %v1929_v51  ;;  %v14077_v51 = vld [vmem:[#allocation34_spill] sm:$0xff] }
 0x409   : > { %2287 = vmatpush.bf16.xpose.msra.mxu2 %v9254_v23  ;;  %v9298_v52 = vsel %vm1158_vm5, %v14077_v51, 0  ;;  %v9314_v51 = vsel %vm1158_vm5, %v14083_v34, 0 }
 0x40b   : > { %2490 = vmatpush.bf16.xpose.msrb.mxu3 %v9247_v35  ;;  %v1270_v35 = vpop.f32.mrf.mxu1 }
 0x40c   : > { %v1347_v29 = vmul.f32 %v9258_v56, %v1270_v35  ;;  %v14074_v35 = vld [vmem:[#allocation37_spill] sm:$0xff] }
 0x40d   : > { %v9287_v58 = vsel %vm1158_vm5, %v14074_v35, 0  ;;  %14078 = vst [vmem:[#allocation37_spill] sm:$0xff] %v9298_v52  ;;  %v9310_v35 = vpop.f32.mrf.mxu2 }
 0x40e   : > { %1943 = vmatpush.bf16.xpose.msrb.mxu1 %v9275_v59  ;;  %v1635_v7 = vadd.f32 %v1619_v0, %v1347_v29  ;;  %v14079_v0 = vld [vmem:[#allocation23_spill] sm:$0xff]  ;;  %14082 = vst [vmem:[#allocation34_spill] sm:$0xff] %v9310_v35 }
 0x40f   : > { %3407 = vmatpush.bf16.xpose.msra.mxu0 %v14073_v4  ;;  %v14080_v29 = vld [vmem:[#allocation31_spill] sm:$0xff]  ;;  %v14085_v4 = vld [vmem:[#allocation28_spill] sm:$0xff]  ;;  %v9320_v24 = vpop.f32.mrf.mxu3 }
 0x410   : > { %v9289_v47 = vadd.f32 %v2007_v57, %v1635_v7  ;;  %v9305_v7 = vsel %vm1158_vm5, %v14080_v29, 0  ;;  %14084 = vst [vmem:[#allocation31_spill] sm:$0xff] %v9314_v51  ;;  %v9318_v6 = vsel %vm1158_vm5, %v14085_v4, 0  ;;  %v14088_v29 = vld [vmem:[#allocation185_spill] sm:$0xff] }
 0x411   : > { %2288 = vmatpush.bf16.xpose.msra.mxu2 %v9287_v58  ;;  %14086 = vst [vmem:[#allocation32_spill] sm:$0xff] %v9318_v6 }
 0x412   : > { %14087 = vst [vmem:[#allocation28_spill] sm:$0xff] %v9320_v24 }
 0x413   : > { %2491 = vmatpush.bf16.xpose.msrb.mxu3 %v9279_v9  ;;  %v9307_v57 = vpop.f32.mrf.mxu1 }
 0x414   : > { %14081 = vst [vmem:[#allocation38_spill] sm:$0xff] %v9307_v57  ;;  %v14089_v57 = vld [vmem:[#allocation26_spill] sm:$0xff] }
 0x415   : > { %v9328_v35 = vsel %vm1158_vm5, %v14089_v57, 0  ;;  %v1546_v38 = vpop.f32.mrf.mxu2  ;;  %v14092_v57 = vld [vmem:[#allocation19_spill] sm:$0xff] }
 0x416   : > { %1944 = vmatpush.bf16.xpose.msrb.mxu1 %v9294_v37  ;;  %v9344_v30 = vsel %vm1158_vm5, %v14092_v57, 0 }
 0x417   : > { %3408 = vmatpush.bf16.xpose.msra.mxu0 %v14079_v0  ;;  %v14090_v0 = vld [vmem:[#allocation12_spill] sm:$0xff] }
 0x418   : > { %v9333_v4 = vsel %vm1158_vm5, %v14090_v0, 0  ;;  %14093 = vst [vmem:[#allocation12_spill] sm:$0xff] %v9344_v30  ;;  %v1934_v0 = vpop.f32.mrf.mxu3 }
 0x419   : > { %2289 = vmatpush.bf16.xpose.msra.mxu2 %v9305_v7  ;;  %14091 = vst [vmem:[#allocation26_spill] sm:$0xff] %v9333_v4 }
 0x41b   : > { %2492 = vmatpush.bf16.xpose.msrb.mxu3 %v9298_v52  ;;  %v1275_v34 = vpop.f32.mrf.mxu1 }
 0x41c   : > { %v1355_v24 = vmul.f32 %v9258_v56, %v1275_v34  ;;  %v14094_v34 = vld [vmem:[#allocation16_spill] sm:$0xff] }
 0x41d   : > { %v9350_v56 = vsel %vm1158_vm5, %v14094_v34, 0  ;;  %14097 = vst [vmem:[#allocation16_spill] sm:$0xff] %v9354_v40  ;;  %v14104_v34 = vld [vmem:[#allocation14_spill] sm:$0xff] }
 0x41e   : > { %1945 = vmatpush.bf16.xpose.msrb.mxu1 %v9314_v51  ;;  %14095 = vst [vmem:[#allocation19_spill] sm:$0xff] %v9350_v56 }
 0x41f   : > { %3409 = vmatpush.bf16.xpose.msra.mxu0 %v8680_v27  ;;  %v7217_v27 = vld [vmem:[%s13072_s2 + $0x88] sm:$0xff] }
 0x420   : > { %6800 = vmatmul.msk.bf16.gmra.mxu0 %vm1158_vm5, %v7217_v27  ;;  %v2015_v27 = vmul.f32 %v9269_v41, %v1934_v0  ;;  %v14102_v0 = vld [vmem:[#allocation10_spill] sm:$0xff]  ;;  %v9390_v41 = vpop.f32.mrf.mxu2 }
 0x421   : > { %2290 = vmatpush.bf16.xpose.msra.mxu2 %v9328_v35  ;;  %14107 = vst [vmem:[#allocation272_spill] sm:$0xff] %v9390_v41  ;;  %v14113_v41 = vld [vmem:[#allocation6_spill] sm:$0xff] }
 0x423   : > { %2493 = vmatpush.bf16.xpose.msrb.mxu3 %v9318_v6 }
 0x426   : > { %1946 = vmatpush.bf16.xpose.msrb.mxu1 %v8952_v26 }
 0x427   : > { %3546 = vmatpush.bf16.xpose.msrb.mxu0 %v14088_v29  ;;  %v1627_v29 = vmul.f32 %v9261_v54, %v1546_v38  ;;  %v14109_v54 = vld [vmem:[#allocation4_spill] sm:$0xff] }
 0x428   : > { %6696 = vmatmul.msk.bf16.vlgmr.msra.gmra.mxu2 %vm1158_vm5, %v9174_v16 }
 0x429   : > { %2468 = vmatpush.bf16.xpose.msrb.mxu2 %v9333_v4  ;;  %v1643_v55 = vadd.f32 %v1627_v29, %v1355_v24  ;;  %v14098_v24 = vld [vmem:[#allocation188_spill] sm:$0xff] }
 0x42a   : > { %v14100_v29 = vld [vmem:[#allocation8_spill] sm:$0xff] }
 0x42b   : > { %2494 = vmatpush.bf16.xpose.msrb.mxu3 %v9344_v30  ;;  %v9362_v38 = vadd.f32 %v2015_v27, %v1643_v55  ;;  %v9366_v57 = vsel %vm1158_vm5, %v14100_v29, 0  ;;  %v9380_v55 = vsel %vm1158_vm5, %v14102_v0, 0  ;;  %v9384_v27 = vsel %vm1158_vm5, %v14104_v34, 0  ;;  %v9386_v29 = vpop.f32.mrf.mxu1  ;;  %v7218_v0 = vld [vmem:[%s13072_s2 + $0x90] sm:$0xff]  ;;  %v9401_v34 = vpop.f32.mrf.mxu3 }
 0x42c   : > { %14101 = vst [vmem:[#allocation8_spill] sm:$0xff] %v9366_v57  ;;  %v1598_v44 = vpop.f32.mrf.mxu2 }
 0x42d   : > { %14099 = vst [vmem:[#allocation22_spill] sm:$0xff] %v9362_v38  ;;  %6675 = vmatmul.msk.bf16.vlgmr.msrb.gmra.mxu1 %vm1158_vm5, %v8856_v43  ;;  %v14108_v43 = vld [vmem:[#allocation192_spill] sm:$0xff] }
 0x42e   : > { %2264 = vmatpush.bf16.xpose.msra.mxu1 %v9350_v56  ;;  %14103 = vst [vmem:[#allocation10_spill] sm:$0xff] %v9380_v55 }
 0x42f   : > { %3547 = vmatpush.bf16.xpose.msrb.mxu0 %v14098_v24  ;;  %14105 = vst [vmem:[#allocation14_spill] sm:$0xff] %v9384_v27  ;;  %v9395_v24 = vsel %vm1158_vm5, %v14109_v54, 0 }
 0x430   : > { %14106 = vst [vmem:[#allocation271_spill] sm:$0xff] %v9386_v29  ;;  %6820 = vmatmul.msk.bf16.vlgmr.msra.gmra.mxu0 %vm1158_vm5, %v7218_v0  ;;  %v9405_v29 = vperm.slane %v9113_v14, 3 }
 0x431   : > { %2469 = vmatpush.bf16.xpose.msrb.mxu2 %v9366_v57  ;;  %14110 = vst [vmem:[#allocation4_spill] sm:$0xff] %v9395_v24 }
 0x432   : > { %6717 = vmatmul.msk.bf16.vlgmr.msrb.gmra.mxu3 %vm1158_vm5, %v9371_v19  ;;  %14111 = vst [vmem:[#allocation273_spill] sm:$0xff] %v9401_v34  ;;  %v14118_v34 = vld [vmem:[#allocation2_spill] sm:$0xff] }
 0x433   : > { %2809 = vmatpush.bf16.xpose.msra.mxu3 %v9354_v40  ;;  %14112 = vst [vmem:[#allocation274_spill] sm:$0xff] %v9405_v29  ;;  %v9416_v40 = vperm.slane %v9132_v36, 3  ;;  %v1327_v0 = vpop.f32.mrf.mxu1  ;;  %v1986_v13 = vpop.f32.mrf.mxu3 }
 0x435   : > { %14117 = vst [vmem:[#allocation275_spill] sm:$0xff] %v9416_v40 }
 0x436   : > { %2265 = vmatpush.bf16.xpose.msra.mxu1 %v9380_v55 }
 0x437   : > { %3548 = vmatpush.bf16.xpose.msrb.mxu0 %v14108_v43  ;;  %v9409_v43 = vsel %vm1158_vm5, %v14113_v41, 0  ;;  %v9425_v41 = vsel %vm1158_vm5, %v14118_v34, 0  ;;  %v14121_v34 = vld [vmem:[#allocation3_spill] sm:$0xff] }
 0x438   : > { %14114 = vst [vmem:[#allocation6_spill] sm:$0xff] %v9409_v43  ;;  %6697 = vmatmul.msk.bf16.gmra.mxu2 %vm1158_vm5, %v9229_v49 }
 0x439   : > { %2470 = vmatpush.bf16.xpose.msrb.mxu2 %v9395_v24  ;;  %14119 = vst [vmem:[#allocation2_spill] sm:$0xff] %v9425_v41  ;;  %v1350_v24 = vmul.f32 %v9405_v29, %v1327_v0  ;;  %v14122_v0 = vsel %vm8645_vm11, %v8656_v50, %v14121_v34  ;;  %v9466_v34 = vpop.f32.mrf.mxu2 }
 0x43a   : > { %v9448_v57 = vsel %vm1158_vm5, %v14122_v0, 0  ;;  %14129 = vst [vmem:[#allocation278_spill] sm:$0xff] %v9466_v34 }
 0x43b   : > { %2810 = vmatpush.bf16.xpose.msra.mxu3 %v9384_v27  ;;  %v14115_v27 = vld [vmem:[#allocation9_spill] sm:$0xff]  ;;  %14123 = vst [vmem:[#allocation3_spill] sm:$0xff] %v9448_v57  ;;  %v9458_v21 = vpop.f32.mrf.mxu1  ;;  %v9477_v0 = vpop.f32.mrf.mxu3 }
 0x43c   : > { %v9413_v54 = vsel %vm1158_vm5, %v14115_v27, 0  ;;  %v9430_v27 = vld [vmem:[%s13072_s2 + $0x48] sm:$0xff]  ;;  %14126 = vst [vmem:[#allocation277_spill] sm:$0xff] %v9458_v21 }
 0x43d   : > { %14116 = vst [vmem:[#allocation9_spill] sm:$0xff] %v9413_v54  ;;  %6676 = vmatmul.msk.bf16.gmra.mxu1 %vm1158_vm5, %v8919_v11  ;;  %v14127_v11 = vld [vmem:[#allocation224_spill] sm:$0xff] }
 0x43e   : > { %2266 = vmatpush.bf16.xpose.msra.mxu1 %v9409_v43  ;;  %v9462_v50 = vsel %vm1158_vm5, %v14127_v11, 0  ;;  %14132 = vst [vmem:[#allocation281_spill] sm:$0xff] %v9477_v0  ;;  %v7219_v11 = vld [vmem:[%s13072_s2 + $0x98] sm:$0xff] }
 0x43f   : > { %3549 = vmatpush.bf16.xpose.msrb.mxu0 %v8439_v18  ;;  %v1622_v18 = vmul.f32 %v9416_v40, %v1598_v44  ;;  %14128 = vst [vmem:[#allocation224_spill] sm:$0xff] %v9462_v50 }
 0x440   : > { %6821 = vmatmul.msk.bf16.gmra.mxu0 %vm1158_vm5, %v7219_v11 }
 0x441   : > { %2471 = vmatpush.bf16.xpose.msrb.mxu2 %v9425_v41  ;;  %v1638_v38 = vadd.f32 %v1622_v18, %v1350_v24  ;;  %v14124_v41 = vld [vmem:[#allocation5_spill] sm:$0xff]  ;;  %v1603_v34 = vpop.f32.mrf.mxu2 }
 0x442   : > { %6718 = vmatmul.msk.bf16.gmra.mxu3 %vm1158_vm5, %v9430_v27  ;;  %v9452_v44 = vsel %vm1158_vm5, %v14124_v41, 0  ;;  %v9471_v41 = vsel %vm1158_vm5, %v8686_v62, 0  ;;  %v1630_v0 = vmul.f32 %v9416_v40, %v1603_v34 }
 0x443   : > { %2811 = vmatpush.bf16.xpose.msra.mxu3 %v9413_v54  ;;  %v9436_v54 = vperm.slane %v9266_v28, 3  ;;  %14125 = vst [vmem:[#allocation5_spill] sm:$0xff] %v9452_v44 }
 0x444   : > { %14130 = vst [vmem:[#allocation279_spill] sm:$0xff] %v9471_v41 }
 0x445   : > { %14120 = vst [vmem:[#allocation276_spill] sm:$0xff] %v9436_v54  ;;  %v2010_v18 = vmul.f32 %v9436_v54, %v1986_v13  ;;  %v9475_v13 = vsel %vm1158_vm5, %v8695_v61, 0 }
 0x446   : > { %2267 = vmatpush.bf16.xpose.msra.mxu1 %v9448_v57  ;;  %14131 = vst [vmem:[#allocation280_spill] sm:$0xff] %v9475_v13 }
 0x447   : > { %3550 = vmatpush.bf16.xpose.msrb.mxu0 %v7983_v33  ;;  %v9464_v24 = vadd.f32 %v2010_v18, %v1638_v38  ;;  %v1332_v38 = vpop.f32.mrf.mxu1  ;;  %v14133_v18 = vld [vmem:[#allocation218_spill] sm:$0xff] }
 0x448   : > { %v9487_v62 = vsel %vm1158_vm5, %v14133_v18, 0  ;;  %v1358_v61 = vmul.f32 %v9405_v29, %v1332_v38  ;;  %v1991_v18 = vpop.f32.mrf.mxu3  ;;  %v14138_v38 = vld [vmem:[#allocation213_spill] sm:$0xff]  ;;  %v9520_v29 = vpop.f32.mrf.mxu0 }
 0x449   : > { %2472 = vmatpush.bf16.xpose.msrb.mxu2 %v9462_v50  ;;  %14134 = vst [vmem:[#allocation218_spill] sm:$0xff] %v9487_v62  ;;  %v9499_v50 = vsel %vm1158_vm5, %v8699_v2, 0  ;;  %v2018_v11 = vmul.f32 %v9436_v54, %v1991_v18  ;;  %v9507_v34 = vsel %vm1158_vm5, %v14138_v38, 0  ;;  %v14144_v18 = vld [vmem:[#allocation223_spill] sm:$0xff]  ;;  %v14149_v54 = vld [vmem:[#allocation214_spill] sm:$0xff] }
 0x44a   : > { %v1646_v21 = vadd.f32 %v1630_v0, %v1358_v61  ;;  %14137 = vst [vmem:[#allocation282_spill] sm:$0xff] %v9499_v50  ;;  %v14142_v61 = vld [vmem:[#allocation220_spill] sm:$0xff] }
 0x44b   : > { %2812 = vmatpush.bf16.xpose.msra.mxu3 %v9452_v44  ;;  %14139 = vst [vmem:[#allocation213_spill] sm:$0xff] %v9507_v34  ;;  %v9518_v40 = vsel %vm1158_vm5, %v14142_v61, 0 }
 0x44c   : > { %v9509_v0 = vadd.f32 %v2018_v11, %v1646_v21  ;;  %14143 = vst [vmem:[#allocation220_spill] sm:$0xff] %v9518_v40  ;;  %v3544_v21 = vsel %vm1158_vm5, %v14144_v18, 0  ;;  %v14145_v11 = vld [vmem:[#allocation207_spill] sm:$0xff] }
 0x44d   : > { %v9529_v38 = vsel %vm1158_vm5, %v14145_v11, 0  ;;  %v14151_v18 = vld [vmem:[#allocation215_spill] sm:$0xff]  ;;  %v7220_v11 = vld [vmem:[%s13072_s2 + $0xa0] sm:$0xff] }
 0x44e   : > { %2268 = vmatpush.bf16.xpose.msra.mxu1 %v9471_v41  ;;  %v14135_v41 = vld [vmem:[#allocation225_spill] sm:$0xff]  ;;  %14146 = vst [vmem:[#allocation223_spill] sm:$0xff] %v9529_v38 }
 0x44f   : > { %3551 = vmatpush.bf16.xpose.msrb.mxu0 %v8008_v8  ;;  %v14197_v8 = vld [vmem:[#allocation171_spill] sm:$0xff] }
 0x451   : > { %2473 = vmatpush.bf16.xpose.msrb.mxu2 %v9487_v62  ;;  %v14173_v62 = vld [vmem:[#allocation193_spill] sm:$0xff] }
 0x453   : > { %2813 = vmatpush.bf16.xpose.msra.mxu3 %v9475_v13  ;;  %v9495_v13 = vsel %vm1158_vm5, %v14135_v41, 0  ;;  %v14140_v41 = vld [vmem:[#allocation219_spill] sm:$0xff] }
 0x454   : > { %14136 = vst [vmem:[#allocation225_spill] sm:$0xff] %v9495_v13  ;;  %v9514_v2 = vsel %vm1158_vm5, %v14140_v41, 0  ;;  %v14147_v41 = vld [vmem:[#allocation198_spill] sm:$0xff] }
 0x455   : > { %14141 = vst [vmem:[#allocation219_spill] sm:$0xff] %v9514_v2  ;;  %v9534_v61 = vsel %vm1158_vm5, %v14147_v41, 0  ;;  %v14154_v41 = vld [vmem:[#allocation203_spill] sm:$0xff] }
 0x456   : > { %2269 = vmatpush.bf16.xpose.msra.mxu1 %v9495_v13  ;;  %14148 = vst [vmem:[#allocation207_spill] sm:$0xff] %v9534_v61  ;;  %v9548_v13 = vpop.f32.mrf.mxu0 }
 0x457   : > { %3552 = vmatpush.bf16.xpose.msrb.mxu0 %v8023_v17  ;;  %14153 = vst [vmem:[#allocation215_spill] sm:$0xff] %v9548_v13  ;;  %v14161_v13 = vld [vmem:[#allocation201_spill] sm:$0xff]  ;;  %v14179_v17 = vld [vmem:[#allocation180_spill] sm:$0xff] }
 0x459   : > { %2474 = vmatpush.bf16.xpose.msrb.mxu2 %v9507_v34  ;;  %v14171_v34 = vld [vmem:[#allocation187_spill] sm:$0xff] }
 0x45b   : > { %2814 = vmatpush.bf16.xpose.msra.mxu3 %v9499_v50 }
 0x45e   : > { %2270 = vmatpush.bf16.xpose.msra.mxu1 %v9514_v2  ;;  %v9539_v2 = vsel %vm1158_vm5, %v14149_v54, 0  ;;  %v14156_v54 = vld [vmem:[#allocation206_spill] sm:$0xff] }
 0x45f   : > { %3553 = vmatpush.bf16.xpose.msrb.mxu0 %v3544_v21  ;;  %14150 = vst [vmem:[#allocation198_spill] sm:$0xff] %v9539_v2  ;;  %v9543_v21 = vsel %vm1158_vm5, %v14151_v18, 0  ;;  %v2807_v50 = vsel %vm1158_vm5, %v14156_v54, 0  ;;  %v14157_v18 = vld [vmem:[#allocation190_spill] sm:$0xff] }
 0x460   : > { %14152 = vst [vmem:[#allocation214_spill] sm:$0xff] %v9543_v21  ;;  %v14159_v54 = vld [vmem:[#allocation194_spill] sm:$0xff] }
 0x461   : > { %2475 = vmatpush.bf16.xpose.msrb.mxu2 %v9529_v38 }
 0x463   : > { %2815 = vmatpush.bf16.xpose.msra.mxu3 %v9518_v40  ;;  %v9554_v40 = vsel %vm1158_vm5, %v14154_v41, 0  ;;  %v9569_v41 = vld [vmem:[%s13072_s2 + $0x50] sm:$0xff] }
 0x464   : > { %14155 = vst [vmem:[#allocation203_spill] sm:$0xff] %v9554_v40 }
 0x466   : > { %2271 = vmatpush.bf16.xpose.msra.mxu1 %v9539_v2  ;;  %v9564_v2 = vsel %vm1158_vm5, %v14157_v18, 0  ;;  %6841 = vmatmul.msk.bf16.vlgmr.msrb.gmra.mxu0 %vm1158_vm5, %v7220_v11  ;;  %v9581_v18 = vsel %vm1158_vm5, %v14159_v54, 0  ;;  %v9591_v11 = vpop.f32.mrf.mxu2  ;;  %v9599_v54 = vpop.f32.mrf.mxu3 }
 0x467   : > { %3707 = vmatpush.bf16.xpose.msra.mxu0 %v9275_v59  ;;  %14158 = vst [vmem:[#allocation206_spill] sm:$0xff] %v9564_v2 }
 0x468   : > { %6715 = vmatmul.msk.bf16.vlgmr.msrb.gmra.mxu2 %vm1158_vm5, %v9371_v19  ;;  %14160 = vst [vmem:[#allocation190_spill] sm:$0xff] %v9581_v18 }
 0x469   : > { %2525 = vmatpush.bf16.xpose.msra.mxu2 %v9534_v61  ;;  %v9587_v61 = vpop.f32.mrf.mxu1  ;;  %14164 = vst [vmem:[#allocation283_spill] sm:$0xff] %v9591_v11  ;;  %v7221_v11 = vld [vmem:[%s13072_s2 + $0xa8] sm:$0xff] }
 0x46a   : > { %14163 = vst [vmem:[#allocation201_spill] sm:$0xff] %v9587_v61  ;;  %v9605_v61 = vperm.slane %v9132_v36, 2 }
 0x46b   : > { %2816 = vmatpush.bf16.xpose.msra.mxu3 %v9543_v21  ;;  %v9585_v21 = vsel %vm1158_vm5, %v14161_v13, 0  ;;  %14167 = vst [vmem:[#allocation284_spill] sm:$0xff] %v9599_v54  ;;  %v9602_v13 = vperm.slane %v9113_v14, 2  ;;  %v9621_v14 = vperm.slane %v9266_v28, 2 }
 0x46c   : > { %14162 = vst [vmem:[#allocation194_spill] sm:$0xff] %v9585_v21 }
 0x46d   : > { %6694 = vmatmul.msk.bf16.vlgmr.msra.gmra.mxu1 %vm1158_vm5, %v9174_v16  ;;  %14168 = vst [vmem:[#allocation285_spill] sm:$0xff] %v9602_v13 }
 0x46e   : > { %2321 = vmatpush.bf16.xpose.msrb.mxu1 %v9554_v40  ;;  %14169 = vst [vmem:[#allocation286_spill] sm:$0xff] %v9605_v61 }
 0x46f   : > { %3708 = vmatpush.bf16.xpose.msra.mxu0 %v9294_v37  ;;  %14175 = vst [vmem:[#allocation288_spill] sm:$0xff] %v9621_v14 }
 0x471   : > { %2526 = vmatpush.bf16.xpose.msra.mxu2 %v9564_v2  ;;  %v14165_v2 = vld [vmem:[#allocation183_spill] sm:$0xff]  ;;  %v1579_v36 = vpop.f32.mrf.mxu1 }
 0x472   : > { %6736 = vmatmul.msk.bf16.vlgmr.msra.gmra.mxu3 %vm1158_vm5, %v9569_v41  ;;  %v9596_v38 = vsel %vm1158_vm5, %v14165_v2, 0  ;;  %v9614_v2 = vsel %vm1158_vm5, %v14171_v34, 0  ;;  %v9631_v34 = vld [vmem:[%s13073_s3 + $0x3] ss:$8 sm:$0xf]  ;;  %v1621_v54 = vmul.f32 %v9605_v61, %v1579_v36 }
 0x473   : > { %2866 = vmatpush.bf16.xpose.msrb.mxu3 %v2807_v50  ;;  %v9577_v50 = vpop.f32.mrf.mxu0  ;;  %14166 = vst [vmem:[#allocation183_spill] sm:$0xff] %v9596_v38 }
 0x474   : > { %14172 = vst [vmem:[#allocation187_spill] sm:$0xff] %v9614_v2 }
 0x476   : > { %2322 = vmatpush.bf16.xpose.msrb.mxu1 %v9581_v18  ;;  %6842 = vmatmul.msk.bf16.gmra.mxu0 %vm1158_vm5, %v7221_v11  ;;  %v9659_v11 = vsel %vm1158_vm5, %v14179_v17, 0 }
 0x477   : > { %3709 = vmatpush.bf16.xpose.msra.mxu0 %v9314_v51  ;;  %v2311_v51 = vpop.f32.mrf.mxu3  ;;  %14180 = vst [vmem:[#allocation180_spill] sm:$0xff] %v9659_v11 }
 0x478   : > { %6716 = vmatmul.msk.bf16.gmra.mxu2 %vm1158_vm5, %v9430_v27 }
 0x479   : > { %2527 = vmatpush.bf16.xpose.msra.mxu2 %v9596_v38  ;;  %v9618_v38 = vsel %vm1158_vm5, %v14173_v62, 0  ;;  %v1349_v62 = vmul.f32 %v9602_v13, %v9039_v5  ;;  %v9649_v5 = vperm.slane %v9631_v34, 2 }
 0x47a   : > { %14174 = vst [vmem:[#allocation193_spill] sm:$0xff] %v9618_v38 }
 0x47b   : > { %2867 = vmatpush.bf16.xpose.msrb.mxu3 %v9585_v21  ;;  %v9610_v21 = vpop.f32.mrf.mxu0  ;;  %v1637_v40 = vadd.f32 %v1621_v54, %v1349_v62  ;;  %14178 = vst [vmem:[#allocation289_spill] sm:$0xff] %v9649_v5  ;;  %v2353_v54 = vmul.f32 %v9649_v5, %v2311_v51  ;;  %v14184_v62 = vld [vmem:[#allocation167_spill] sm:$0xff] }
 0x47c   : > { %14170 = vst [vmem:[#allocation287_spill] sm:$0xff] %v9610_v21  ;;  %v14176_v21 = vld [vmem:[#allocation176_spill] sm:$0xff]  ;;  %v9675_v17 = vsel %vm1158_vm5, %v14184_v62, 0  ;;  %v1357_v62 = vmul.f32 %v9602_v13, %v9079_v15  ;;  %v9710_v15 = vsel %vm1158_vm5, %v14197_v8, 0 }
 0x47d   : > { %6695 = vmatmul.msk.bf16.gmra.mxu1 %vm1158_vm5, %v9229_v49  ;;  %14185 = vst [vmem:[#allocation167_spill] sm:$0xff] %v9675_v17  ;;  %v14201_v8 = vld [vmem:[#allocation156_spill] sm:$0xff] }
 0x47e   : > { %2323 = vmatpush.bf16.xpose.msrb.mxu1 %v9614_v2  ;;  %v9638_v2 = vsel %vm1158_vm5, %v14176_v21, 0  ;;  %14198 = vst [vmem:[#allocation171_spill] sm:$0xff] %v9710_v15 }
 0x47f   : > { %3710 = vmatpush.bf16.xpose.msra.mxu0 %v8952_v26  ;;  %14177 = vst [vmem:[#allocation176_spill] sm:$0xff] %v9638_v2  ;;  %v9643_v26 = vld [vmem:[%s13072_s2 + $0x58] sm:$0xff]  ;;  %v9682_v51 = vpop.f32.mrf.mxu3 }
 0x480   : > { %14188 = vst [vmem:[#allocation293_spill] sm:$0xff] %v9682_v51 }
 0x481   : > { %2528 = vmatpush.bf16.xpose.msra.mxu2 %v9638_v2  ;;  %v14181_v2 = vld [vmem:[#allocation186_spill] sm:$0xff] }
 0x482   : > { %6737 = vmatmul.msk.bf16.gmra.mxu3 %vm1158_vm5, %v9643_v26 }
 0x483   : > { %2868 = vmatpush.bf16.xpose.msrb.mxu3 %v9618_v38  ;;  %v1967_v38 = vpop.f32.mrf.mxu2  ;;  %v9655_v21 = vpop.f32.mrf.mxu0 }
 0x484   : > { %v2009_v18 = vmul.f32 %v9621_v14, %v1967_v38  ;;  %v9663_v38 = vsel %vm1158_vm5, %v14181_v2, 0 }
 0x485   : > { %14182 = vst [vmem:[#allocation186_spill] sm:$0xff] %v9663_v38 }
 0x486   : > { %v2025_v36 = vadd.f32 %v2009_v18, %v1637_v40  ;;  %2324 = vmatpush.bf16.xpose.msrb.mxu1 %v9659_v11  ;;  %v9669_v40 = vpop.f32.mrf.mxu1  ;;  %v14189_v11 = vld [vmem:[#allocation173_spill] sm:$0xff] }
 0x487   : > { %3711 = vmatpush.bf16.xpose.msra.mxu0 %v13984_v25  ;;  %14183 = vst [vmem:[#allocation290_spill] sm:$0xff] %v9669_v40  ;;  %v14191_v25 = vld [vmem:[#allocation179_spill] sm:$0xff] }
 0x488   : > { %v9671_v18 = vadd.f32 %v2353_v54, %v2025_v36  ;;  %v9690_v36 = vsel %vm1158_vm5, %v14191_v25, 0 }
 0x489   : > { %2529 = vmatpush.bf16.xpose.msra.mxu2 %v9675_v17  ;;  %14192 = vst [vmem:[#allocation179_spill] sm:$0xff] %v9690_v36 }
 0x48b   : > { %2869 = vmatpush.bf16.xpose.msrb.mxu3 %v9663_v38  ;;  %v9677_v37 = vpop.f32.mrf.mxu2  ;;  %v9680_v2 = vpop.f32.mrf.mxu0  ;;  %v9686_v38 = vsel %vm1158_vm5, %v14189_v11, 0 }
 0x48c   : > { %14186 = vst [vmem:[#allocation291_spill] sm:$0xff] %v9677_v37  ;;  %v14193_v37 = vld [vmem:[#allocation158_spill] sm:$0xff] }
 0x48d   : > { %14187 = vst [vmem:[#allocation292_spill] sm:$0xff] %v9680_v2  ;;  %v9700_v11 = vsel %vm1158_vm5, %v14193_v37, 0 }
 0x48e   : > { %14190 = vst [vmem:[#allocation173_spill] sm:$0xff] %v9686_v38  ;;  %2325 = vmatpush.bf16.xpose.msrb.mxu1 %v9686_v38  ;;  %v1584_v54 = vpop.f32.mrf.mxu1  ;;  %v14195_v38 = vld [vmem:[#allocation165_spill] sm:$0xff] }
 0x48f   : > { %3712 = vmatpush.bf16.xpose.msra.mxu0 %v13991_v22  ;;  %v1629_v51 = vmul.f32 %v9605_v61, %v1584_v54  ;;  %14194 = vst [vmem:[#allocation158_spill] sm:$0xff] %v9700_v11  ;;  %v9706_v22 = vsel %vm1158_vm5, %v14195_v38, 0  ;;  %v14216_v61 = vld [vmem:[#allocation208_spill] sm:$0xff] }
 0x490   : > { %14196 = vst [vmem:[#allocation165_spill] sm:$0xff] %v9706_v22 }
 0x491   : > { %2530 = vmatpush.bf16.xpose.msra.mxu2 %v9700_v11  ;;  %v1645_v2 = vadd.f32 %v1629_v51, %v1357_v62  ;;  %v9727_v51 = vsel %vm1158_vm5, %v14201_v8, 0  ;;  %v14203_v62 = vld [vmem:[#allocation161_spill] sm:$0xff] }
 0x492   : > { %14202 = vst [vmem:[#allocation156_spill] sm:$0xff] %v9727_v51 }
 0x493   : > { %2870 = vmatpush.bf16.xpose.msrb.mxu3 %v9690_v36  ;;  %v1972_v40 = vpop.f32.mrf.mxu2  ;;  %v2316_v36 = vpop.f32.mrf.mxu3 }
 0x494   : > { %v2017_v25 = vmul.f32 %v9621_v14, %v1972_v40  ;;  %v9712_v54 = vpop.f32.mrf.mxu0  ;;  %v2361_v37 = vmul.f32 %v9649_v5, %v2316_v36  ;;  %v9731_v36 = vsel %vm1158_vm5, %v14203_v62, 0  ;;  %v7222_v62 = vld [vmem:[%s13072_s2 + $0xb0] sm:$0xff]  ;;  %v14210_v5 = vld [vmem:[#allocation146_spill] sm:$0xff] }
 0x495   : > { %14204 = vst [vmem:[#allocation161_spill] sm:$0xff] %v9731_v36  ;;  %v9754_v14 = vsel %vm1158_vm5, %v14210_v5, 0  ;;  %v2960_v5 = vsel %vm1158_vm5, %v14216_v61, 0  ;;  %v14219_v61 = vld [vmem:[#allocation123_spill] sm:$0xff] }
 0x496   : > { %v2033_v17 = vadd.f32 %v2017_v25, %v1645_v2  ;;  %2326 = vmatpush.bf16.xpose.msrb.mxu1 %v9706_v22  ;;  %v14199_v2 = vld [vmem:[#allocation148_spill] sm:$0xff]  ;;  %v14206_v25 = vld [vmem:[#allocation138_spill] sm:$0xff]  ;;  %14211 = vst [vmem:[#allocation146_spill] sm:$0xff] %v9754_v14 }
 0x497   : > { %3713 = vmatpush.bf16.xpose.msra.mxu0 %v13998_v39  ;;  %v9722_v38 = vsel %vm1158_vm5, %v14199_v2, 0  ;;  %v14208_v2 = vld [vmem:[#allocation141_spill] sm:$0xff]  ;;  %v14289_v22 = vld [vmem:[#allocation48_spill] sm:$0xff] }
 0x498   : > { %v9718_v40 = vadd.f32 %v2361_v37, %v2033_v17  ;;  %14200 = vst [vmem:[#allocation148_spill] sm:$0xff] %v9722_v38  ;;  %v9741_v37 = vsel %vm1158_vm5, %v14206_v25, 0  ;;  %v9746_v8 = vsel %vm1158_vm5, %v14208_v2, 0  ;;  %v14214_v2 = vld [vmem:[#allocation130_spill] sm:$0xff] }
 0x499   : > { %2531 = vmatpush.bf16.xpose.msra.mxu2 %v9722_v38  ;;  %14207 = vst [vmem:[#allocation138_spill] sm:$0xff] %v9741_v37  ;;  %v9764_v13 = vsel %vm1158_vm5, %v14214_v2, 0  ;;  %v14221_v2 = vld [vmem:[#allocation202_spill] sm:$0xff] }
 0x49a   : > { %14209 = vst [vmem:[#allocation141_spill] sm:$0xff] %v9746_v8  ;;  %v14286_v38 = vld [vmem:[#allocation150_spill] sm:$0xff] }
 0x49b   : > { %2871 = vmatpush.bf16.xpose.msrb.mxu3 %v9710_v15  ;;  %14215 = vst [vmem:[#allocation130_spill] sm:$0xff] %v9764_v13  ;;  %v14236_v15 = vld [vmem:[#allocation108_spill] sm:$0xff] }
 0x49c   : > { %v9736_v17 = vpop.f32.mrf.mxu0 }
 0x49d   : > { %14205 = vst [vmem:[#allocation294_spill] sm:$0xff] %v9736_v17  ;;  %v14225_v17 = vld [vmem:[#allocation125_spill] sm:$0xff] }
 0x49e   : > { %2327 = vmatpush.bf16.xpose.msrb.mxu1 %v9727_v51 }
 0x49f   : > { %3714 = vmatpush.bf16.xpose.msra.mxu0 %v8683_v31  ;;  %v9801_v31 = vsel %vm1158_vm5, %v14225_v17, 0  ;;  %v9820_v17 = vperm.slane %v9631_v34, 1 }
 0x4a0   : > { %14226 = vst [vmem:[#allocation125_spill] sm:$0xff] %v9801_v31 }
 0x4a1   : > { %2532 = vmatpush.bf16.xpose.msra.mxu2 %v9741_v37  ;;  %14232 = vst [vmem:[#allocation299_spill] sm:$0xff] %v9820_v17 }
 0x4a3   : > { %2872 = vmatpush.bf16.xpose.msrb.mxu3 %v9731_v36 }
 0x4a4   : > { %v9777_v39 = vpop.f32.mrf.mxu0 }
 0x4a6   : > { %6862 = vmatmul.msk.bf16.vlgmr.msra.gmra.mxu0 %vm1158_vm5, %v7222_v62  ;;  %2328 = vmatpush.bf16.xpose.msrb.mxu1 %v9754_v14  ;;  %v14217_v62 = vld [vmem:[#allocation132_spill] sm:$0xff] }
 0x4a7   : > { %3871 = vmatpush.bf16.xpose.msrb.mxu0 %v9254_v23  ;;  %v14212_v23 = vld [vmem:[#allocation151_spill] sm:$0xff] }
 0x4a8   : > { %v9760_v25 = vsel %vm1158_vm5, %v14212_v23, 0  ;;  %6721 = vmatmul.msk.bf16.vlgmr.msra.gmra.mxu2 %vm1158_vm5, %v9371_v19  ;;  %v9775_v23 = vsel %vm1158_vm5, %v14217_v62, 0  ;;  %v9793_v62 = vpop.f32.mrf.mxu1 }
 0x4a9   : > { %2847 = vmatpush.bf16.xpose.msrb.mxu2 %v9746_v8  ;;  %14213 = vst [vmem:[#allocation151_spill] sm:$0xff] %v9760_v25 }
 0x4aa   : > { %14218 = vst [vmem:[#allocation208_spill] sm:$0xff] %v9775_v23 }
 0x4ab   : > { %2873 = vmatpush.bf16.xpose.msrb.mxu3 %v9760_v25  ;;  %14223 = vst [vmem:[#allocation202_spill] sm:$0xff] %v9793_v62  ;;  %v9810_v62 = vperm.slane %v9266_v28, 1  ;;  %v9828_v28 = vld [vmem:[%s13073_s3 + $0x4] ss:$8 sm:$0xf] }
 0x4ac   : > { %v9841_v25 = vperm.slane %v9828_v28, 1 }
 0x4ad   : > { %6700 = vmatmul.msk.bf16.vlgmr.msrb.gmra.mxu1 %vm1158_vm5, %v9174_v16  ;;  %v9797_v16 = vpop.f32.mrf.mxu2  ;;  %14228 = vst [vmem:[#allocation297_spill] sm:$0xff] %v9810_v62 }
 0x4ae   : > { %2506 = vmatpush.bf16.xpose.msra.mxu1 %v9764_v13  ;;  %14224 = vst [vmem:[#allocation295_spill] sm:$0xff] %v9797_v16 }
 0x4af   : > { %3872 = vmatpush.bf16.xpose.msrb.mxu0 %v9287_v58  ;;  %v9786_v58 = vsel %vm1158_vm5, %v14219_v61, 0  ;;  %v7223_v61 = vld [vmem:[%s13072_s2 + $0xb8] sm:$0xff]  ;;  %14235 = vst [vmem:[#allocation300_spill] sm:$0xff] %v9841_v25 }
 0x4b0   : > { %14220 = vst [vmem:[#allocation132_spill] sm:$0xff] %v9786_v58 }
 0x4b1   : > { %2848 = vmatpush.bf16.xpose.msrb.mxu2 %v9775_v23  ;;  %v9812_v23 = vpop.f32.mrf.mxu3 }
 0x4b2   : > { %6742 = vmatmul.msk.bf16.vlgmr.msrb.gmra.mxu3 %vm1158_vm5, %v9569_v41  ;;  %14229 = vst [vmem:[#allocation298_spill] sm:$0xff] %v9812_v23 }
 0x4b3   : > { %3019 = vmatpush.bf16.xpose.msra.mxu3 %v2960_v5  ;;  %v9791_v5 = vsel %vm1158_vm5, %v14221_v2, 0  ;;  %v9807_v2 = vpop.f32.mrf.mxu0 }
 0x4b4   : > { %14222 = vst [vmem:[#allocation123_spill] sm:$0xff] %v9791_v5 }
 0x4b5   : > { %14227 = vst [vmem:[#allocation296_spill] sm:$0xff] %v9807_v2  ;;  %v1948_v2 = vpop.f32.mrf.mxu1 }
 0x4b6   : > { %2507 = vmatpush.bf16.xpose.msra.mxu1 %v9786_v58  ;;  %6863 = vmatmul.msk.bf16.gmra.mxu0 %vm1158_vm5, %v7223_v61  ;;  %v2008_v61 = vmul.f32 %v9810_v62, %v1948_v2 }
 0x4b7   : > { %3873 = vmatpush.bf16.xpose.msrb.mxu0 %v9305_v7  ;;  %v14230_v7 = vld [vmem:[#allocation116_spill] sm:$0xff] }
 0x4b8   : > { %v9817_v16 = vsel %vm1158_vm5, %v14230_v7, 0  ;;  %6722 = vmatmul.msk.bf16.gmra.mxu2 %vm1158_vm5, %v9430_v27  ;;  %v14233_v7 = vld [vmem:[#allocation118_spill] sm:$0xff]  ;;  %v2024_v8 = vadd.f32 %v2008_v61, %v9159_v20 }
 0x4b9   : > { %2849 = vmatpush.bf16.xpose.msrb.mxu2 %v9801_v31  ;;  %14231 = vst [vmem:[#allocation116_spill] sm:$0xff] %v9817_v16  ;;  %v9835_v23 = vsel %vm1158_vm5, %v14233_v7, 0  ;;  %v2292_v31 = vpop.f32.mrf.mxu2  ;;  %v2496_v7 = vpop.f32.mrf.mxu3 }
 0x4ba   : > { %14234 = vst [vmem:[#allocation118_spill] sm:$0xff] %v9835_v23 }
 0x4bb   : > { %3020 = vmatpush.bf16.xpose.msra.mxu3 %v9791_v5  ;;  %v9845_v2 = vpop.f32.mrf.mxu0 }
 0x4bd   : > { %6701 = vmatmul.msk.bf16.gmra.mxu1 %vm1158_vm5, %v9229_v49  ;;  %v9857_v20 = vpop.f32.mrf.mxu1 }
 0x4be   : > { %2508 = vmatpush.bf16.xpose.msra.mxu1 %v9817_v16  ;;  %14238 = vst [vmem:[#allocation301_spill] sm:$0xff] %v9857_v20 }
 0x4bf   : > { %3874 = vmatpush.bf16.xpose.msrb.mxu0 %v9328_v35  ;;  %v2352_v35 = vmul.f32 %v9820_v17, %v2292_v31  ;;  %v2556_v31 = vmul.f32 %v9841_v25, %v2496_v7  ;;  %v14243_v7 = vld [vmem:[#allocation99_spill] sm:$0xff] }
 0x4c1   : > { %2850 = vmatpush.bf16.xpose.msrb.mxu2 %v9835_v23  ;;  %v2368_v36 = vadd.f32 %v2352_v35, %v2024_v8  ;;  %v9851_v23 = vsel %vm1158_vm5, %v14236_v15, 0  ;;  %v14239_v8 = vld [vmem:[#allocation111_spill] sm:$0xff]  ;;  %v9865_v35 = vpop.f32.mrf.mxu2  ;;  %v9868_v15 = vpop.f32.mrf.mxu3 }
 0x4c2   : > { %6743 = vmatmul.msk.bf16.gmra.mxu3 %vm1158_vm5, %v9643_v26  ;;  %14237 = vst [vmem:[#allocation108_spill] sm:$0xff] %v9851_v23  ;;  %v9863_v61 = vsel %vm1158_vm5, %v14239_v8, 0  ;;  %v14246_v8 = vld [vmem:[#allocation102_spill] sm:$0xff] }
 0x4c3   : > { %3021 = vmatpush.bf16.xpose.msra.mxu3 %v8839_v42  ;;  %v9859_v49 = vadd.f32 %v2556_v31, %v2368_v36  ;;  %14240 = vst [vmem:[#allocation111_spill] sm:$0xff] %v9863_v61 }
 0x4c4   : > { %14241 = vst [vmem:[#allocation302_spill] sm:$0xff] %v9865_v35  ;;  %v9882_v35 = vsel %vm1158_vm5, %v14246_v8, 0  ;;  %v14250_v8 = vld [vmem:[#allocation93_spill] sm:$0xff] }
 0x4c5   : > { %14242 = vst [vmem:[#allocation303_spill] sm:$0xff] %v9868_v15  ;;  %v1953_v36 = vpop.f32.mrf.mxu1 }
 0x4c6   : > { %2509 = vmatpush.bf16.xpose.msra.mxu1 %v9851_v23  ;;  %v9872_v23 = vsel %vm1158_vm5, %v14243_v7, 0  ;;  %v2016_v31 = vmul.f32 %v9810_v62, %v1953_v36  ;;  %14247 = vst [vmem:[#allocation102_spill] sm:$0xff] %v9882_v35 }
 0x4c7   : > { %3875 = vmatpush.bf16.xpose.msrb.mxu0 %v9350_v56  ;;  %14244 = vst [vmem:[#allocation99_spill] sm:$0xff] %v9872_v23  ;;  %v9875_v56 = vpop.f32.mrf.mxu0 }
 0x4c8   : > { %14245 = vst [vmem:[#allocation304_spill] sm:$0xff] %v9875_v56  ;;  %v2032_v20 = vadd.f32 %v2016_v31, %v9217_v63 }
 0x4c9   : > { %2851 = vmatpush.bf16.xpose.msrb.mxu2 %v9863_v61  ;;  %v2297_v15 = vpop.f32.mrf.mxu2  ;;  %v2501_v56 = vpop.f32.mrf.mxu3 }
 0x4ca   : > { %v2360_v7 = vmul.f32 %v9820_v17, %v2297_v15  ;;  %v9899_v15 = vsel %vm1158_vm5, %v14250_v8, 0 }
 0x4cb   : > { %3022 = vmatpush.bf16.xpose.msra.mxu3 %v8862_v12  ;;  %14251 = vst [vmem:[#allocation93_spill] sm:$0xff] %v9899_v15 }
 0x4cc   : > { %v2376_v61 = vadd.f32 %v2360_v7, %v2032_v20  ;;  %v14257_v7 = vld [vmem:[#allocation72_spill] sm:$0xff] }
 0x4cd   : > { %v9925_v8 = vsel %vm1158_vm5, %v14257_v7, 0  ;;  %v14261_v7 = vld [vmem:[#allocation134_spill] sm:$0xff]  ;;  %v9956_v62 = vpop.f32.mrf.mxu1 }
 0x4ce   : > { %2510 = vmatpush.bf16.xpose.msra.mxu1 %v9872_v23  ;;  %v14248_v23 = vld [vmem:[#allocation90_spill] sm:$0xff]  ;;  %14258 = vst [vmem:[#allocation72_spill] sm:$0xff] %v9925_v8 }
 0x4cf   : > { %3876 = vmatpush.bf16.xpose.msrb.mxu0 %v9380_v55  ;;  %v9889_v16 = vsel %vm1158_vm5, %v14248_v23, 0  ;;  %v2564_v55 = vmul.f32 %v9841_v25, %v2501_v56  ;;  %v9901_v63 = vpop.f32.mrf.mxu0  ;;  %v14252_v23 = vld [vmem:[#allocation81_spill] sm:$0xff]  ;;  %v14254_v56 = vld [vmem:[#allocation84_spill] sm:$0xff]  ;;  %v14262_v25 = vld [vmem:[#allocation66_spill] sm:$0xff]  ;;  %14264 = vst [vmem:[#allocation306_spill] sm:$0xff] %v9956_v62 }
 0x4d0   : > { %14249 = vst [vmem:[#allocation90_spill] sm:$0xff] %v9889_v16  ;;  %v9906_v20 = vsel %vm1158_vm5, %v14252_v23, 0  ;;  %v14259_v23 = vld [vmem:[#allocation75_spill] sm:$0xff]  ;;  %v9953_v17 = vsel %vm1158_vm5, %v14262_v25, 0  ;;  %v14269_v62 = vld [vmem:[#allocation60_spill] sm:$0xff] }
 0x4d1   : > { %2852 = vmatpush.bf16.xpose.msrb.mxu2 %v9882_v35  ;;  %v9895_v36 = vadd.f32 %v2564_v55, %v2376_v61  ;;  %14253 = vst [vmem:[#allocation81_spill] sm:$0xff] %v9906_v20  ;;  %v9914_v55 = vsel %vm1158_vm5, %v14254_v56, 0  ;;  %v7224_v61 = vld [vmem:[%s13072_s2 + $0xc0] sm:$0xff]  ;;  %v9931_v56 = vsel %vm1158_vm5, %v14259_v23, 0  ;;  %v9969_v25 = vpop.f32.mrf.mxu3 }
 0x4d2   : > { %14255 = vst [vmem:[#allocation84_spill] sm:$0xff] %v9914_v55  ;;  %v9947_v23 = vld [vmem:[%s13072_s2 + $0x60] sm:$0xff] }
 0x4d3   : > { %3023 = vmatpush.bf16.xpose.msra.mxu3 %v8886_v48  ;;  %14260 = vst [vmem:[#allocation75_spill] sm:$0xff] %v9931_v56 }
 0x4d4   : > { %14263 = vst [vmem:[#allocation66_spill] sm:$0xff] %v9953_v17 }
 0x4d5   : > { %14268 = vst [vmem:[#allocation309_spill] sm:$0xff] %v9969_v25 }
 0x4d6   : > { %2511 = vmatpush.bf16.xpose.msra.mxu1 %v9889_v16 }
 0x4d7   : > { %3877 = vmatpush.bf16.xpose.msrb.mxu0 %v9409_v43  ;;  %v9921_v31 = vpop.f32.mrf.mxu0  ;;  %v7225_v43 = vld [vmem:[%s13072_s2 + $0xc8] sm:$0xff] }
 0x4d8   : > { %14256 = vst [vmem:[#allocation305_spill] sm:$0xff] %v9921_v31  ;;  %v9967_v31 = vperm.slane %v9631_v34, 0 }
 0x4d9   : > { %2853 = vmatpush.bf16.xpose.msrb.mxu2 %v9899_v15  ;;  %v10014_v15 = vld [vmem:[%s13073_s3 + $0x20] ss:$8 sm:$0xf] }
 0x4da   : > { %14267 = vst [vmem:[#allocation308_spill] sm:$0xff] %v9967_v31 }
 0x4db   : > { %3024 = vmatpush.bf16.xpose.msra.mxu3 %v8902_v10  ;;  %14276 = vst [vmem:[#allocation314_spill] sm:$0xff] %v10014_v15 }
 0x4de   : > { %2512 = vmatpush.bf16.xpose.msra.mxu1 %v9906_v20  ;;  %v14279_v20 = vld [vmem:[#allocation54_spill] sm:$0xff] }
 0x4df   : > { %3878 = vmatpush.bf16.xpose.msrb.mxu0 %v9448_v57  ;;  %v14266_v57 = vld [vmem:[#allocation140_spill] sm:$0xff] }
 0x4e1   : > { %2854 = vmatpush.bf16.xpose.msrb.mxu2 %v9914_v55 }
 0x4e3   : > { %3025 = vmatpush.bf16.xpose.msra.mxu3 %v8925_v45 }
 0x4e6   : > { %6883 = vmatmul.msk.bf16.vlgmr.msrb.gmra.mxu0 %vm1158_vm5, %v7224_v61  ;;  %2513 = vmatpush.bf16.xpose.msra.mxu1 %v9925_v8  ;;  %v9940_v61 = vpop.f32.mrf.mxu0 }
 0x4e7   : > { %4011 = vmatpush.bf16.xpose.msra.mxu0 %v9279_v9 }
 0x4e8   : > { %6740 = vmatmul.msk.bf16.vlgmr.msrb.gmra.mxu2 %vm1158_vm5, %v9569_v41 }
 0x4e9   : > { %3000 = vmatpush.bf16.xpose.msra.mxu2 %v8967_v53 }
 0x4eb   : > { %3026 = vmatpush.bf16.xpose.msra.mxu3 %v8941_v46 }
 0x4ed   : > { %6719 = vmatmul.msk.bf16.vlgmr.msra.gmra.mxu1 %vm1158_vm5, %v9371_v19  ;;  %v9960_v19 = vpop.f32.mrf.mxu2 }
 0x4ee   : > { %2828 = vmatpush.bf16.xpose.msrb.mxu1 %v9931_v56  ;;  %14265 = vst [vmem:[#allocation307_spill] sm:$0xff] %v9960_v19  ;;  %v9979_v19 = vpop.f32.mrf.mxu0  ;;  %v14273_v56 = vld [vmem:[#allocation144_spill] sm:$0xff] }
 0x4ef   : > { %4012 = vmatpush.bf16.xpose.msra.mxu0 %v9298_v52  ;;  %14272 = vst [vmem:[#allocation311_spill] sm:$0xff] %v9979_v19  ;;  %v9985_v52 = vld [vmem:[%s13073_s3 + $0x6] ss:$8 sm:$0xf] }
 0x4f0   : > { %v10005_v9 = vperm.slane %v9985_v52, 0 }
 0x4f1   : > { %3001 = vmatpush.bf16.xpose.msra.mxu2 %v14261_v7 }
 0x4f2   : > { %6763 = vmatmul.msk.bf16.vlgmr.msra.gmra.mxu3 %vm1158_vm5, %v9947_v23  ;;  %14274 = vst [vmem:[#allocation312_spill] sm:$0xff] %v10005_v9 }
 0x4f3   : > { %3159 = vmatpush.bf16.xpose.msrb.mxu3 %v8792_v32 }
 0x4f5   : > { %v2477_v19 = vpop.f32.mrf.mxu2 }
 0x4f6   : > { %2829 = vmatpush.bf16.xpose.msrb.mxu1 %v9953_v17  ;;  %6884 = vmatmul.msk.bf16.gmra.mxu0 %vm1158_vm5, %v7225_v43  ;;  %v9974_v17 = vsel %vm1158_vm5, %v14269_v62, 0  ;;  %v2273_v43 = vpop.f32.mrf.mxu1  ;;  %v9992_v62 = vld [vmem:[%s13073_s3 + $0x5] ss:$8 sm:$0xf]  ;;  %v3555_v13 = vpop.f32.mrf.mxu0 }
 0x4f7   : > { %4013 = vmatpush.bf16.xpose.msra.mxu0 %v9318_v6  ;;  %14270 = vst [vmem:[#allocation60_spill] sm:$0xff] %v9974_v17  ;;  %v9977_v6 = vperm.slane %v9828_v28, 0  ;;  %v2351_v25 = vmul.f32 %v9967_v31, %v2273_v43  ;;  %v10009_v43 = vperm.slane %v9992_v62, 0 }
 0x4f8   : > { %6741 = vmatmul.msk.bf16.gmra.mxu2 %vm1158_vm5, %v9643_v26 }
 0x4f9   : > { %3002 = vmatpush.bf16.xpose.msra.mxu2 %v14266_v57  ;;  %14271 = vst [vmem:[#allocation310_spill] sm:$0xff] %v9977_v6  ;;  %v2367_v55 = vadd.f32 %v2351_v25, %v9289_v47  ;;  %v10029_v47 = vld [vmem:[%s13072_s2 + $0x68] sm:$0xff]  ;;  %v2818_v25 = vpop.f32.mrf.mxu3 }
 0x4fa   : > { %14275 = vst [vmem:[#allocation313_spill] sm:$0xff] %v10009_v43  ;;  %v2896_v16 = vmul.f32 %v10009_v43, %v2818_v25 }
 0x4fb   : > { %3160 = vmatpush.bf16.xpose.msrb.mxu3 %v8800_v60 }
 0x4fd   : > { %6720 = vmatmul.msk.bf16.gmra.mxu1 %vm1158_vm5, %v9430_v27  ;;  %v3049_v27 = vmul.f32 %v10005_v9, %v9520_v29 }
 0x4fe   : > { %2830 = vmatpush.bf16.xpose.msrb.mxu1 %v9974_v17  ;;  %v10000_v17 = vld [vmem:[%s13073_s3 + $0x7] ss:$8 sm:$0xf]  ;;  %v10046_v58 = vpop.f32.mrf.mxu1 }
 0x4ff   : > { %4014 = vmatpush.bf16.xpose.msra.mxu0 %v9344_v30  ;;  %v2555_v30 = vmul.f32 %v9977_v6, %v2477_v19  ;;  %v10017_v35 = vperm.slane %v10000_v17, 0  ;;  %v10024_v19 = vld [vmem:[%s13073_s3 + $0x21] ss:$8 sm:$0xf]  ;;  %14282 = vst [vmem:[#allocation318_spill] sm:$0xff] %v10046_v58 }
 0x500   : > { %14278 = vst [vmem:[#allocation316_spill] sm:$0xff] %v10024_v19  ;;  %v10056_v37 = vperm.slane %v10024_v19, 0  ;;  %v14295_v19 = vld [vmem:[#allocation22_spill] sm:$0xff] }
 0x501   : > { %3003 = vmatpush.bf16.xpose.msra.mxu2 %v14273_v56  ;;  %14277 = vst [vmem:[#allocation315_spill] sm:$0xff] %v10017_v35  ;;  %v2571_v8 = vadd.f32 %v2555_v30, %v2367_v55  ;;  %v10035_v30 = vsel %vm1158_vm5, %v14279_v20, 0  ;;  %v10040_v55 = vperm.slane %v10014_v15, 0  ;;  %v10051_v20 = vld [vmem:[%s13073_s3 + $0x22] ss:$8 sm:$0xf]  ;;  %v3189_v29 = vmul.f32 %v10017_v35, %v9655_v21  ;;  %v10068_v21 = vpop.f32.mrf.mxu3 }
 0x502   : > { %6764 = vmatmul.msk.bf16.gmra.mxu3 %vm1158_vm5, %v10029_v47  ;;  %14280 = vst [vmem:[#allocation54_spill] sm:$0xff] %v10035_v30  ;;  %v10064_v11 = vperm.slane %v10051_v20, 0  ;;  %v3489_v14 = vmul.f32 %v10056_v37, %v9901_v63 }
 0x503   : > { %3161 = vmatpush.bf16.xpose.msrb.mxu3 %v8832_v3  ;;  %14281 = vst [vmem:[#allocation317_spill] sm:$0xff] %v10040_v55  ;;  %v2912_v25 = vadd.f32 %v2896_v16, %v2571_v8  ;;  %v10072_v16 = vsel %vm1158_vm5, %v14289_v22, 0  ;;  %v10081_v22 = vpop.f32.mrf.mxu0 }
 0x504   : > { %14283 = vst [vmem:[#allocation319_spill] sm:$0xff] %v10051_v20 }
 0x505   : > { %14284 = vst [vmem:[#allocation320_spill] sm:$0xff] %v10056_v37  ;;  %v3065_v58 = vadd.f32 %v3049_v27, %v2912_v25  ;;  %v14292_v27 = vld [vmem:[#allocation8_spill] sm:$0xff] }
 0x506   : > { %2831 = vmatpush.bf16.xpose.msrb.mxu1 %v10035_v30  ;;  %v10058_v30 = vpop.f32.mrf.mxu2  ;;  %14287 = vst [vmem:[#allocation322_spill] sm:$0xff] %v10064_v11  ;;  %v2278_v25 = vpop.f32.mrf.mxu1 }
 0x507   : > { %4015 = vmatpush.bf16.xpose.msra.mxu0 %v9333_v4  ;;  %14285 = vst [vmem:[#allocation321_spill] sm:$0xff] %v10058_v30  ;;  %v3336_v4 = vmul.f32 %v10040_v55, %v9777_v39  ;;  %v3205_v51 = vadd.f32 %v3189_v29, %v3065_v58  ;;  %v3633_v30 = vmul.f32 %v10064_v11, %v3555_v13  ;;  %v14291_v39 = vld [vmem:[#allocation256_spill] sm:$0xff]  ;;  %v14293_v29 = vld [vmem:[#allocation154_spill] sm:$0xff] }
 0x508   : > { %14288 = vst [vmem:[#allocation323_spill] sm:$0xff] %v10068_v21  ;;  %v2359_v20 = vmul.f32 %v9967_v31, %v2278_v25  ;;  %v3057_v25 = vmul.f32 %v10005_v9, %v9577_v50  ;;  %v3497_v50 = vmul.f32 %v10056_v37, %v9940_v61  ;;  %v10166_v9 = vperm.slane %v9631_v34, 3 }
 0x509   : > { %3004 = vmatpush.bf16.xpose.msra.mxu2 %v14286_v38  ;;  %14290 = vst [vmem:[#allocation48_spill] sm:$0xff] %v10072_v16  ;;  %v3352_v8 = vadd.f32 %v3336_v4, %v3205_v51  ;;  %v2823_v13 = vpop.f32.mrf.mxu3  ;;  %v14296_v38 = vld [vmem:[#allocation42_spill] sm:$0xff] }
 0x50a   : > { %14294 = vst [vmem:[#allocation324_spill] sm:$0xff] %v10081_v22  ;;  %v2375_v15 = vadd.f32 %v2359_v20, %v14295_v19  ;;  %v3197_v19 = vmul.f32 %v10017_v35, %v9712_v54 }
 0x50b   : > { %3162 = vmatpush.bf16.xpose.msrb.mxu3 %v8850_v1  ;;  %v3505_v63 = vadd.f32 %v3489_v14, %v3352_v8  ;;  %v2904_v14 = vmul.f32 %v10009_v43, %v2823_v13  ;;  %v14298_v8 = vld [vmem:[#allocation259_spill] sm:$0xff]  ;;  %v14301_v13 = vld [vmem:[#allocation36_spill] sm:$0xff]  ;;  %14321 = vst [vmem:[#allocation326_spill] sm:$0xff] %v10166_v9  ;;  %v14323_v43 = vld [vmem:[#allocation74_spill] sm:$0xff] }
 0x50d   : > { %v3649_v4 = vadd.f32 %v3633_v30, %v3505_v63  ;;  %v14300_v30 = vld [vmem:[#allocation160_spill] sm:$0xff] }
 0x50e   : > { %2832 = vmatpush.bf16.xpose.msrb.mxu1 %v10072_v16  ;;  %v2482_v58 = vpop.f32.mrf.mxu2 }
 0x50f   : > { %4016 = vmatpush.bf16.xpose.msra.mxu0 %v14292_v27  ;;  %v2563_v21 = vmul.f32 %v9977_v6, %v2482_v58  ;;  %v14299_v58 = vld [vmem:[#allocation4_spill] sm:$0xff]  ;;  %v10103_v27 = vsel %vm1158_vm5, %v14301_v13, 0 }
 0x510   : > { %14302 = vst [vmem:[#allocation42_spill] sm:$0xff] %v10103_v27 }
 0x511   : > { %3005 = vmatpush.bf16.xpose.msra.mxu2 %v14293_v29  ;;  %v2579_v51 = vadd.f32 %v2563_v21, %v2375_v15  ;;  %v3560_v21 = vpop.f32.mrf.mxu0 }
 0x512   : > { %v3641_v54 = vmul.f32 %v10064_v11, %v3560_v21  ;;  %v14311_v21 = vld [vmem:[#allocation169_spill] sm:$0xff] }
 0x513   : > { %3163 = vmatpush.bf16.xpose.msrb.mxu3 %v14291_v39  ;;  %v10086_v39 = vsel %vm1158_vm5, %v14296_v38, 0  ;;  %v2920_v15 = vadd.f32 %v2904_v14, %v2579_v51  ;;  %v3344_v38 = vmul.f32 %v10040_v55, %v9845_v2  ;;  %v14303_v51 = vld [vmem:[#allocation152_spill] sm:$0xff]  ;;  %v14304_v14 = vld [vmem:[#allocation2_spill] sm:$0xff]  ;;  %v14318_v11 = vld [vmem:[#allocation249_spill] sm:$0xff] }
 0x514   : > { %14297 = vst [vmem:[#allocation22_spill] sm:$0xff] %v10086_v39  ;;  %v14320_v55 = vld [vmem:[#allocation119_spill] sm:$0xff] }
 0x515   : > { %v3073_v20 = vadd.f32 %v3057_v25, %v2920_v15  ;;  %v14305_v25 = vld [vmem:[#allocation163_spill] sm:$0xff]  ;;  %v10115_v15 = vld [vmem:[%s13072_s2 + $0xd0] sm:$0xff] }
 0x516   : > { %2833 = vmatpush.bf16.xpose.msrb.mxu1 %v10086_v39  ;;  %14307 = vst [vmem:[#allocation36_spill] sm:$0xff] %v10115_v15 }
 0x517   : > { %4017 = vmatpush.bf16.xpose.msra.mxu0 %v14299_v58  ;;  %v3213_v63 = vadd.f32 %v3197_v19, %v3073_v20  ;;  %v14306_v19 = vld [vmem:[#allocation133_spill] sm:$0xff] }
 0x519   : > { %3006 = vmatpush.bf16.xpose.msra.mxu2 %v14300_v30  ;;  %v3360_v58 = vadd.f32 %v3344_v38, %v3213_v63  ;;  %v14308_v38 = vld [vmem:[#allocation30_spill] sm:$0xff]  ;;  %v10130_v13 = vpop.f32.mrf.mxu0 }
 0x51a   : > { %v10119_v20 = vsel %vm1158_vm5, %v14308_v38, 0  ;;  %v10145_v38 = vld [vmem:[%s13072_s2 + $0x70] sm:$0xff] }
 0x51b   : > { %3164 = vmatpush.bf16.xpose.msrb.mxu3 %v14298_v8  ;;  %v3513_v2 = vadd.f32 %v3497_v50, %v3360_v58  ;;  %14309 = vst [vmem:[#allocation30_spill] sm:$0xff] %v10119_v20  ;;  %v14310_v58 = vld [vmem:[#allocation142_spill] sm:$0xff]  ;;  %v14312_v50 = vld [vmem:[#allocation211_spill] sm:$0xff] }
 0x51c   : > { %v10128_v63 = vsel %vm1158_vm5, %v14312_v50, 0  ;;  %14313 = vst [vmem:[#allocation211_spill] sm:$0xff] %v10130_v13  ;;  %v10152_v13 = vpop.f32.mrf.mxu1 }
 0x51d   : > { %v3657_v61 = vadd.f32 %v3641_v54, %v3513_v2  ;;  %v14314_v54 = vld [vmem:[#allocation126_spill] sm:$0xff] }
 0x51e   : > { %2834 = vmatpush.bf16.xpose.msrb.mxu1 %v10103_v27  ;;  %v6870_v2 = vld [vmem:[%s13073_s3 + $0x23] ss:$8 sm:$0xf] }
 0x51f   : > { %4018 = vmatpush.bf16.xpose.msra.mxu0 %v14304_v14  ;;  %v10149_v50 = vperm.slane %v6870_v2, 0  ;;  %v14316_v14 = vld [vmem:[#allocation68_spill] sm:$0xff]  ;;  %v7227_v2 = vld [vmem:[%s13072_s2 + $0xd8] sm:$0xff] }
 0x520   : > { %14317 = vst [vmem:[#allocation68_spill] sm:$0xff] %v10152_v13  ;;  %v10169_v13 = vpop.f32.mrf.mxu3 }
 0x521   : > { %3007 = vmatpush.bf16.xpose.msra.mxu2 %v14305_v25  ;;  %14315 = vst [vmem:[#allocation325_spill] sm:$0xff] %v10149_v50 }
 0x522   : > { %14322 = vst [vmem:[#allocation327_spill] sm:$0xff] %v10169_v13 }
 0x523   : > { %3165 = vmatpush.bf16.xpose.msrb.mxu3 %v14303_v51  ;;  %v3716_v22 = vpop.f32.mrf.mxu0 }
 0x524   : > { %v3794_v37 = vmul.f32 %v10149_v50, %v3716_v22  ;;  %v14325_v22 = vld [vmem:[#allocation252_spill] sm:$0xff] }
 0x526   : > { %6904 = vmatmul.msk.bf16.vlgmr.msra.gmra.mxu0 %vm1158_vm5, %v10115_v15  ;;  %2835 = vmatpush.bf16.xpose.msrb.mxu1 %v10119_v20  ;;  %v10163_v35 = vadd.f32 %v3794_v37, %v3649_v4  ;;  %v14327_v4 = vld [vmem:[#allocation112_spill] sm:$0xff]  ;;  %v14333_v15 = vld [vmem:[#allocation103_spill] sm:$0xff] }
 0x527   : > { %4163 = vmatpush.bf16.xpose.msrb.mxu0 %v10072_v16 }
 0x528   : > { %6761 = vmatmul.msk.bf16.vlgmr.msra.gmra.mxu2 %vm1158_vm5, %v9947_v23 }
 0x529   : > { %3140 = vmatpush.bf16.xpose.msrb.mxu2 %v14306_v19 }
 0x52a   : > { %v2330_v6 = vpop.f32.mrf.mxu1 }
 0x52b   : > { %3166 = vmatpush.bf16.xpose.msrb.mxu3 %v14310_v58  ;;  %v2354_v34 = vmul.f32 %v10166_v9, %v2330_v6  ;;  %v10180_v37 = vpop.f32.mrf.mxu0  ;;  %v10193_v6 = vld [vmem:[%s13072_s2 + $0x78] sm:$0xff] }
 0x52c   : > { %14326 = vst [vmem:[#allocation329_spill] sm:$0xff] %v10180_v37 }
 0x52d   : > { %6738 = vmatmul.msk.bf16.vlgmr.msrb.gmra.mxu1 %vm1158_vm5, %v9569_v41  ;;  %v10156_v41 = vpop.f32.mrf.mxu2  ;;  %v2370_v13 = vadd.f32 %v2354_v34, %v9464_v24  ;;  %v14330_v34 = vld [vmem:[#allocation255_spill] sm:$0xff] }
 0x52e   : > { %2981 = vmatpush.bf16.xpose.msra.mxu1 %v14311_v21  ;;  %14319 = vst [vmem:[#allocation249_spill] sm:$0xff] %v10156_v41  ;;  %v10173_v41 = vperm.slane %v9828_v28, 3 }
 0x52f   : > { %4164 = vmatpush.bf16.xpose.msrb.mxu0 %v10086_v39 }
 0x530   : > { %14324 = vst [vmem:[#allocation328_spill] sm:$0xff] %v10173_v41 }
 0x531   : > { %3141 = vmatpush.bf16.xpose.msrb.mxu2 %v14314_v54 }
 0x532   : > { %6784 = vmatmul.msk.bf16.vlgmr.msrb.gmra.mxu3 %vm1158_vm5, %v10145_v38 }
 0x533   : > { %3306 = vmatpush.bf16.xpose.msra.mxu3 %v10128_v63 }
 0x535   : > { %v2875_v37 = vpop.f32.mrf.mxu3 }
 0x536   : > { %2982 = vmatpush.bf16.xpose.msra.mxu1 %v14316_v14  ;;  %6905 = vmatmul.msk.bf16.gmra.mxu0 %vm1158_vm5, %v7227_v2  ;;  %v2534_v2 = vpop.f32.mrf.mxu2 }
 0x537   : > { %4165 = vmatpush.bf16.xpose.msrb.mxu0 %v10103_v27  ;;  %v2558_v31 = vmul.f32 %v10173_v41, %v2534_v2  ;;  %v10186_v27 = vperm.slane %v9992_v62, 3  ;;  %v10200_v2 = vpop.f32.mrf.mxu1 }
 0x538   : > { %6762 = vmatmul.msk.bf16.gmra.mxu2 %vm1158_vm5, %v10029_v47  ;;  %14331 = vst [vmem:[#allocation331_spill] sm:$0xff] %v10200_v2 }
 0x539   : > { %3142 = vmatpush.bf16.xpose.msrb.mxu2 %v14320_v55  ;;  %14328 = vst [vmem:[#allocation330_spill] sm:$0xff] %v10186_v27  ;;  %v2574_v39 = vadd.f32 %v2558_v31, %v2370_v13  ;;  %v2899_v24 = vmul.f32 %v10186_v27, %v2875_v37  ;;  %v14332_v31 = vld [vmem:[#allocation16_spill] sm:$0xff]  ;;  %v14336_v37 = vld [vmem:[#allocation83_spill] sm:$0xff] }
 0x53b   : > { %3307 = vmatpush.bf16.xpose.msra.mxu3 %v14318_v11  ;;  %v10203_v13 = vadd.f32 %v2899_v24, %v2574_v39  ;;  %v14339_v24 = vld [vmem:[#allocation94_spill] sm:$0xff] }
 0x53d   : > { %6739 = vmatmul.msk.bf16.gmra.mxu1 %vm1158_vm5, %v9643_v26  ;;  %v3721_v26 = vpop.f32.mrf.mxu0 }
 0x53e   : > { %2983 = vmatpush.bf16.xpose.msra.mxu1 %v14323_v43  ;;  %v3802_v16 = vmul.f32 %v10149_v50, %v3721_v26  ;;  %v14338_v43 = vld [vmem:[#allocation14_spill] sm:$0xff] }
 0x53f   : > { %4166 = vmatpush.bf16.xpose.msrb.mxu0 %v10119_v20  ;;  %v14329_v20 = vld [vmem:[#allocation77_spill] sm:$0xff]  ;;  %v2335_v2 = vpop.f32.mrf.mxu1  ;;  %v14340_v50 = vld [vmem:[#allocation86_spill] sm:$0xff] }
 0x540   : > { %v2362_v39 = vmul.f32 %v10166_v9, %v2335_v2  ;;  %v14343_v2 = vld [vmem:[#allocation85_spill] sm:$0xff]  ;;  %v14344_v9 = vld [vmem:[#allocation92_spill] sm:$0xff] }
 0x541   : > { %3143 = vmatpush.bf16.xpose.msrb.mxu2 %v14327_v4  ;;  %v10207_v4 = vpop.f32.mrf.mxu2 }
 0x542   : > { %6785 = vmatmul.msk.bf16.gmra.mxu3 %vm1158_vm5, %v10193_v6  ;;  %14334 = vst [vmem:[#allocation16_spill] sm:$0xff] %v10207_v4  ;;  %v2378_v26 = vadd.f32 %v2362_v39, %v9509_v0  ;;  %v14346_v0 = vld [vmem:[#allocation76_spill] sm:$0xff]  ;;  %v10236_v39 = vld [vmem:[%s13072_s2 + $0xe0] sm:$0xff] }
 0x543   : > { %3308 = vmatpush.bf16.xpose.msra.mxu3 %v14325_v22  ;;  %v10209_v22 = vadd.f32 %v3802_v16, %v3657_v61 }
 0x546   : > { %2984 = vmatpush.bf16.xpose.msra.mxu1 %v14329_v20  ;;  %v10211_v20 = vpop.f32.mrf.mxu3 }
 0x547   : > { %4167 = vmatpush.bf16.xpose.msrb.mxu0 %v14332_v31  ;;  %14335 = vst [vmem:[#allocation332_spill] sm:$0xff] %v10211_v20 }
 0x549   : > { %3144 = vmatpush.bf16.xpose.msrb.mxu2 %v14333_v15  ;;  %v2539_v31 = vpop.f32.mrf.mxu2  ;;  %v14341_v15 = vld [vmem:[#allocation172_spill] sm:$0xff] }
 0x54a   : > { %v2566_v4 = vmul.f32 %v10173_v41, %v2539_v31  ;;  %14348 = vst [vmem:[#allocation172_spill] sm:$0xff] %v10236_v39  ;;  %v14350_v31 = vld [vmem:[#allocation155_spill] sm:$0xff] }
 0x54b   : > { %3309 = vmatpush.bf16.xpose.msra.mxu3 %v14330_v34  ;;  %v14337_v34 = vld [vmem:[#allocation258_spill] sm:$0xff]  ;;  %v14354_v41 = vld [vmem:[#allocation135_spill] sm:$0xff] }
 0x54c   : > { %v2582_v16 = vadd.f32 %v2566_v4, %v2378_v26  ;;  %v14347_v4 = vld [vmem:[#allocation145_spill] sm:$0xff]  ;;  %v14351_v26 = vld [vmem:[#allocation67_spill] sm:$0xff] }
 0x54e   : > { %2985 = vmatpush.bf16.xpose.msra.mxu1 %v14336_v37  ;;  %v2880_v61 = vpop.f32.mrf.mxu3 }
 0x54f   : > { %4168 = vmatpush.bf16.xpose.msrb.mxu0 %v14338_v43  ;;  %v2907_v20 = vmul.f32 %v10186_v27, %v2880_v61  ;;  %v10247_v27 = vpop.f32.mrf.mxu0 }
 0x551   : > { %3145 = vmatpush.bf16.xpose.msrb.mxu2 %v14339_v24  ;;  %v10224_v43 = vadd.f32 %v2907_v20, %v2582_v16  ;;  %v14345_v24 = vld [vmem:[#allocation164_spill] sm:$0xff]  ;;  %v14349_v20 = vld [vmem:[#allocation95_spill] sm:$0xff]  ;;  %v14352_v16 = vld [vmem:[#allocation226_spill] sm:$0xff] }
 0x552   : > { %v3400_v61 = vsel %vm1158_vm5, %v14352_v16, 0  ;;  %14353 = vst [vmem:[#allocation164_spill] sm:$0xff] %v10247_v27  ;;  %v14357_v27 = vld [vmem:[#allocation170_spill] sm:$0xff] }
 0x553   : > { %3310 = vmatpush.bf16.xpose.msra.mxu3 %v14337_v34  ;;  %v14342_v34 = vld [vmem:[#allocation9_spill] sm:$0xff] }
 0x556   : > { %2986 = vmatpush.bf16.xpose.msra.mxu1 %v14340_v50 }
 0x557   : > { %4169 = vmatpush.bf16.xpose.msrb.mxu0 %v14342_v34  ;;  %v10259_v34 = vld [vmem:[%s13072_s2 + $0x80] sm:$0xff] }
 0x559   : > { %3146 = vmatpush.bf16.xpose.msrb.mxu2 %v14343_v2 }
 0x55b   : > { %3311 = vmatpush.bf16.xpose.msra.mxu3 %v14341_v15 }
 0x55e   : > { %2987 = vmatpush.bf16.xpose.msra.mxu1 %v14344_v9 }
 0x55f   : > { %4170 = vmatpush.bf16.xpose.msrb.mxu0 %v9452_v44  ;;  %v6891_v44 = vld [vmem:[%s13073_s3 + $0x24] ss:$8 sm:$0xf] }
 0x560   : > { %v10263_v16 = vperm.slane %v6891_v44, 0  ;;  %v7229_v44 = vld [vmem:[%s13072_s2 + $0xe8] sm:$0xff] }
 0x561   : > { %3147 = vmatpush.bf16.xpose.msrb.mxu2 %v14346_v0 }
 0x562   : > { %14355 = vst [vmem:[#allocation226_spill] sm:$0xff] %v10263_v16 }
 0x563   : > { %3312 = vmatpush.bf16.xpose.msra.mxu3 %v14345_v24 }
 0x566   : > { %2988 = vmatpush.bf16.xpose.msra.mxu1 %v14349_v20  ;;  %6925 = vmatmul.msk.bf16.vlgmr.msrb.gmra.mxu0 %vm1158_vm5, %v10236_v39  ;;  %v14358_v39 = vld [vmem:[#allocation240_spill] sm:$0xff] }
 0x567   : > { %4313 = vmatpush.bf16.xpose.msra.mxu0 %v14336_v37 }
 0x568   : > { %6782 = vmatmul.msk.bf16.vlgmr.msrb.gmra.mxu2 %vm1158_vm5, %v10145_v38 }
 0x569   : > { %3287 = vmatpush.bf16.xpose.msra.mxu2 %v14347_v4 }
 0x56b   : > { %3313 = vmatpush.bf16.xpose.msra.mxu3 %v14350_v31 }
 0x56d   : > { %6759 = vmatmul.msk.bf16.vlgmr.msra.gmra.mxu1 %vm1158_vm5, %v9947_v23  ;;  %v10270_v23 = vpop.f32.mrf.mxu2 }
 0x56e   : > { %3121 = vmatpush.bf16.xpose.msrb.mxu1 %v14351_v26  ;;  %14359 = vst [vmem:[#allocation334_spill] sm:$0xff] %v10270_v23  ;;  %v14360_v26 = vld [vmem:[#allocation127_spill] sm:$0xff]  ;;  %v10287_v23 = vperm.slane %v9992_v62, 2 }
 0x56f   : > { %4314 = vmatpush.bf16.xpose.msra.mxu0 %v14340_v50 }
 0x570   : > { %14363 = vst [vmem:[#allocation337_spill] sm:$0xff] %v10287_v23 }
 0x571   : > { %3288 = vmatpush.bf16.xpose.msra.mxu2 %v14354_v41  ;;  %v3880_v41 = vpop.f32.mrf.mxu0 }
 0x572   : > { %6805 = vmatmul.msk.bf16.vlgmr.msra.gmra.mxu3 %vm1158_vm5, %v10259_v34  ;;  %v3958_v50 = vmul.f32 %v10263_v16, %v3880_v41  ;;  %v14364_v41 = vld [vmem:[#allocation174_spill] sm:$0xff] }
 0x573   : > { %3459 = vmatpush.bf16.xpose.msrb.mxu3 %v3400_v61  ;;  %v10265_v61 = vpop.f32.mrf.mxu1 }
 0x574   : > { %14356 = vst [vmem:[#allocation333_spill] sm:$0xff] %v10265_v61  ;;  %v10278_v4 = vadd.f32 %v3958_v50, %v10163_v35  ;;  %v10281_v61 = vperm.slane %v9828_v28, 2  ;;  %v14367_v50 = vld [vmem:[#allocation120_spill] sm:$0xff] }
 0x576   : > { %3122 = vmatpush.bf16.xpose.msrb.mxu1 %v14357_v27  ;;  %14361 = vst [vmem:[#allocation335_spill] sm:$0xff] %v10281_v61  ;;  %6926 = vmatmul.msk.bf16.gmra.mxu0 %vm1158_vm5, %v7229_v44  ;;  %v2856_v44 = vpop.f32.mrf.mxu2 }
 0x577   : > { %4315 = vmatpush.bf16.xpose.msra.mxu0 %v14344_v9  ;;  %v14365_v9 = vld [vmem:[#allocation243_spill] sm:$0xff]  ;;  %v2898_v27 = vmul.f32 %v10287_v23, %v2856_v44 }
 0x578   : > { %6783 = vmatmul.msk.bf16.gmra.mxu2 %vm1158_vm5, %v10193_v6 }
 0x579   : > { %3289 = vmatpush.bf16.xpose.msra.mxu2 %v14360_v26  ;;  %v10295_v35 = vpop.f32.mrf.mxu0 }
 0x57a   : > { %14366 = vst [vmem:[#allocation338_spill] sm:$0xff] %v10295_v35 }
 0x57b   : > { %3460 = vmatpush.bf16.xpose.msrb.mxu3 %v14358_v39  ;;  %v10283_v39 = vpop.f32.mrf.mxu3  ;;  %v2515_v26 = vpop.f32.mrf.mxu1 }
 0x57c   : > { %14362 = vst [vmem:[#allocation336_spill] sm:$0xff] %v10283_v39  ;;  %v2557_v28 = vmul.f32 %v10281_v61, %v2515_v26  ;;  %v10310_v26 = vld [vmem:[%s13072_s2 + $0x88] sm:$0xff] }
 0x57d   : > { %6760 = vmatmul.msk.bf16.gmra.mxu1 %vm1158_vm5, %v10029_v47 }
 0x57e   : > { %3123 = vmatpush.bf16.xpose.msrb.mxu1 %v14364_v41  ;;  %v2573_v39 = vadd.f32 %v2557_v28, %v9671_v18  ;;  %v10301_v41 = vperm.slane %v9985_v52, 3  ;;  %v14369_v28 = vld [vmem:[#allocation178_spill] sm:$0xff]  ;;  %v10325_v31 = vpop.f32.mrf.mxu2 }
 0x57f   : > { %4316 = vmatpush.bf16.xpose.msra.mxu0 %v14349_v20  ;;  %v14373_v20 = vld [vmem:[#allocation113_spill] sm:$0xff]  ;;  %14374 = vst [vmem:[#allocation341_spill] sm:$0xff] %v10325_v31 }
 0x580   : > { %14368 = vst [vmem:[#allocation339_spill] sm:$0xff] %v10301_v41  ;;  %v10303_v0 = vadd.f32 %v2898_v27, %v2573_v39  ;;  %v14371_v27 = vld [vmem:[#allocation247_spill] sm:$0xff]  ;;  %v14372_v39 = vld [vmem:[#allocation24_spill] sm:$0xff] }
 0x581   : > { %3290 = vmatpush.bf16.xpose.msra.mxu2 %v14367_v50  ;;  %v3885_v47 = vpop.f32.mrf.mxu0 }
 0x582   : > { %6806 = vmatmul.msk.bf16.gmra.mxu3 %vm1158_vm5, %v10310_v26  ;;  %v3966_v50 = vmul.f32 %v10263_v16, %v3885_v47 }
 0x583   : > { %3461 = vmatpush.bf16.xpose.msrb.mxu3 %v14365_v9  ;;  %v3028_v35 = vpop.f32.mrf.mxu3  ;;  %v10316_v44 = vpop.f32.mrf.mxu1 }
 0x584   : > { %v3052_v18 = vmul.f32 %v10301_v41, %v3028_v35  ;;  %14370 = vst [vmem:[#allocation340_spill] sm:$0xff] %v10316_v44  ;;  %v10328_v35 = vadd.f32 %v3966_v50, %v10209_v22  ;;  %v14376_v44 = vld [vmem:[#allocation181_spill] sm:$0xff] }
 0x586   : > { %3124 = vmatpush.bf16.xpose.msrb.mxu1 %v14369_v28  ;;  %v10321_v9 = vadd.f32 %v3052_v18, %v10203_v13  ;;  %v14378_v18 = vld [vmem:[#allocation104_spill] sm:$0xff]  ;;  %v2861_v47 = vpop.f32.mrf.mxu2 }
 0x587   : > { %4317 = vmatpush.bf16.xpose.msra.mxu0 %v14372_v39  ;;  %v14377_v39 = vld [vmem:[#allocation15_spill] sm:$0xff]  ;;  %v2906_v31 = vmul.f32 %v10287_v23, %v2861_v47  ;;  %v14388_v47 = vld [vmem:[#allocation233_spill] sm:$0xff]  ;;  %v10379_v23 = vld [vmem:[%s13072_s2 + $0x90] sm:$0xff] }
 0x589   : > { %3291 = vmatpush.bf16.xpose.msra.mxu2 %v14373_v20  ;;  %v14379_v20 = vld [vmem:[#allocation185_spill] sm:$0xff] }
 0x58b   : > { %3462 = vmatpush.bf16.xpose.msrb.mxu3 %v14371_v27  ;;  %v10330_v28 = vpop.f32.mrf.mxu3  ;;  %v2520_v27 = vpop.f32.mrf.mxu1 }
 0x58c   : > { %14375 = vst [vmem:[#allocation342_spill] sm:$0xff] %v10330_v28  ;;  %v2565_v13 = vmul.f32 %v10281_v61, %v2520_v27  ;;  %v14381_v61 = vld [vmem:[#allocation96_spill] sm:$0xff] }
 0x58e   : > { %3125 = vmatpush.bf16.xpose.msrb.mxu1 %v14376_v44  ;;  %v2581_v16 = vadd.f32 %v2565_v13, %v9718_v40  ;;  %v14383_v40 = vld [vmem:[#allocation23_spill] sm:$0xff]  ;;  %v10362_v13 = vpop.f32.mrf.mxu0 }
 0x58f   : > { %4318 = vmatpush.bf16.xpose.msra.mxu0 %v14377_v39  ;;  %v14382_v39 = vld [vmem:[#allocation188_spill] sm:$0xff]  ;;  %14387 = vst [vmem:[#allocation104_spill] sm:$0xff] %v10362_v13  ;;  %v14391_v13 = vld [vmem:[#allocation70_spill] sm:$0xff] }
 0x590   : > { %v10339_v22 = vadd.f32 %v2906_v31, %v2581_v16  ;;  %v14384_v31 = vld [vmem:[#allocation87_spill] sm:$0xff]  ;;  %v7230_v16 = vld [vmem:[%s13072_s2 + $0xf0] sm:$0xff] }
 0x591   : > { %3292 = vmatpush.bf16.xpose.msra.mxu2 %v14378_v18 }
 0x593   : > { %3463 = vmatpush.bf16.xpose.msrb.mxu3 %v9791_v5  ;;  %v3033_v50 = vpop.f32.mrf.mxu3  ;;  %v14380_v5 = vld [vmem:[#allocation21_spill] sm:$0xff] }
 0x594   : > { %v3060_v28 = vmul.f32 %v10301_v41, %v3033_v50  ;;  %v6912_v50 = vld [vmem:[%s13073_s3 + $0x25] ss:$8 sm:$0xf]  ;;  %v10383_v41 = vpop.f32.mrf.mxu1 }
 0x595   : > { %14390 = vst [vmem:[#allocation87_spill] sm:$0xff] %v10383_v41  ;;  %v10399_v41 = vperm.slane %v9992_v62, 1 }
 0x596   : > { %3126 = vmatpush.bf16.xpose.msrb.mxu1 %v14379_v20  ;;  %v10346_v27 = vadd.f32 %v3060_v28, %v10224_v43  ;;  %v14385_v43 = vld [vmem:[#allocation192_spill] sm:$0xff]  ;;  %v14386_v28 = vld [vmem:[#allocation78_spill] sm:$0xff] }
 0x597   : > { %4319 = vmatpush.bf16.xpose.msra.mxu0 %v14380_v5  ;;  %v14393_v5 = vld [vmem:[#allocation239_spill] sm:$0xff]  ;;  %14394 = vst [vmem:[#allocation70_spill] sm:$0xff] %v10399_v41 }
 0x599   : > { %3293 = vmatpush.bf16.xpose.msra.mxu2 %v14381_v61 }
 0x59b   : > { %3464 = vmatpush.bf16.xpose.msrb.mxu3 %v8839_v42 }
 0x59e   : > { %3127 = vmatpush.bf16.xpose.msrb.mxu1 %v14382_v39 }
 0x59f   : > { %4320 = vmatpush.bf16.xpose.msra.mxu0 %v14383_v40  ;;  %v10386_v40 = vpop.f32.mrf.mxu2 }
 0x5a0   : > { %14392 = vst [vmem:[#allocation78_spill] sm:$0xff] %v10386_v40  ;;  %v10402_v40 = vperm.slane %v9985_v52, 2 }
 0x5a1   : > { %3294 = vmatpush.bf16.xpose.msra.mxu2 %v14384_v31 }
 0x5a2   : > { %14395 = vst [vmem:[#allocation343_spill] sm:$0xff] %v10402_v40 }
 0x5a3   : > { %3465 = vmatpush.bf16.xpose.msrb.mxu3 %v8862_v12 }
 0x5a6   : > { %6946 = vmatmul.msk.bf16.vlgmr.msra.gmra.mxu0 %vm1158_vm5, %v7230_v16  ;;  %3128 = vmatpush.bf16.xpose.msrb.mxu1 %v14385_v43  ;;  %v10374_v16 = vperm.slane %v6912_v50, 0  ;;  %v7231_v50 = vld [vmem:[%s13072_s2 + $0xf8] sm:$0xff] }
 0x5a7   : > { %4453 = vmatpush.bf16.xpose.msrb.mxu0 %v14376_v44 }
 0x5a8   : > { %6803 = vmatmul.msk.bf16.vlgmr.msra.gmra.mxu2 %vm1158_vm5, %v10259_v34  ;;  %14389 = vst [vmem:[#allocation96_spill] sm:$0xff] %v10374_v16 }
 0x5a9   : > { %3440 = vmatpush.bf16.xpose.msrb.mxu2 %v8902_v10  ;;  %v14398_v10 = vld [vmem:[#allocation242_spill] sm:$0xff] }
 0x5ab   : > { %3466 = vmatpush.bf16.xpose.msrb.mxu3 %v8886_v48  ;;  %v10424_v48 = vperm.slane %v10000_v17, 3 }
 0x5ad   : > { %6780 = vmatmul.msk.bf16.vlgmr.msrb.gmra.mxu1 %vm1158_vm5, %v10145_v38  ;;  %14400 = vst [vmem:[#allocation345_spill] sm:$0xff] %v10424_v48 }
 0x5ae   : > { %3268 = vmatpush.bf16.xpose.msra.mxu1 %v14386_v28 }
 0x5af   : > { %4454 = vmatpush.bf16.xpose.msrb.mxu0 %v14379_v20 }
 0x5b1   : > { %3441 = vmatpush.bf16.xpose.msrb.mxu2 %v8925_v45  ;;  %v4020_v45 = vpop.f32.mrf.mxu0 }
 0x5b2   : > { %6826 = vmatmul.msk.bf16.vlgmr.msrb.gmra.mxu3 %vm1158_vm5, %v10379_v23  ;;  %v4098_v38 = vmul.f32 %v10374_v16, %v4020_v45  ;;  %v14397_v45 = vld [vmem:[#allocation62_spill] sm:$0xff] }
 0x5b3   : > { %3603 = vmatpush.bf16.xpose.msra.mxu3 %v14388_v47 }
 0x5b4   : > { %v10396_v47 = vadd.f32 %v4098_v38, %v10278_v4  ;;  %v3009_v38 = vpop.f32.mrf.mxu2 }
 0x5b5   : > { %v3051_v12 = vmul.f32 %v10402_v40, %v3009_v38 }
 0x5b6   : > { %3269 = vmatpush.bf16.xpose.msra.mxu1 %v14391_v13  ;;  %6947 = vmatmul.msk.bf16.gmra.mxu0 %vm1158_vm5, %v7231_v50 }
 0x5b7   : > { %4455 = vmatpush.bf16.xpose.msrb.mxu0 %v14382_v39 }
 0x5b8   : > { %6804 = vmatmul.msk.bf16.gmra.mxu2 %vm1158_vm5, %v10310_v26 }
 0x5b9   : > { %3442 = vmatpush.bf16.xpose.msrb.mxu2 %v8941_v46  ;;  %v2837_v46 = vpop.f32.mrf.mxu1  ;;  %v10412_v62 = vpop.f32.mrf.mxu0 }
 0x5ba   : > { %v2897_v4 = vmul.f32 %v10399_v41, %v2837_v46  ;;  %14399 = vst [vmem:[#allocation62_spill] sm:$0xff] %v10412_v62  ;;  %v10431_v46 = vld [vmem:[%s13072_s2 + $0x98] sm:$0xff] }
 0x5bb   : > { %3604 = vmatpush.bf16.xpose.msra.mxu3 %v14393_v5  ;;  %v10404_v5 = vpop.f32.mrf.mxu3 }
 0x5bc   : > { %14396 = vst [vmem:[#allocation344_spill] sm:$0xff] %v10404_v5  ;;  %v10418_v50 = vadd.f32 %v2897_v4, %v9859_v49  ;;  %v10421_v5 = vadd.f32 %v3051_v12, %v10303_v0  ;;  %v14401_v4 = vld [vmem:[#allocation56_spill] sm:$0xff]  ;;  %v10440_v0 = vpop.f32.mrf.mxu2 }
 0x5bd   : > { %6781 = vmatmul.msk.bf16.gmra.mxu1 %vm1158_vm5, %v10193_v6  ;;  %14403 = vst [vmem:[#allocation346_spill] sm:$0xff] %v10440_v0 }
 0x5be   : > { %3270 = vmatpush.bf16.xpose.msra.mxu1 %v14397_v45 }
 0x5bf   : > { %4456 = vmatpush.bf16.xpose.msrb.mxu0 %v14385_v43 }
 0x5c1   : > { %3443 = vmatpush.bf16.xpose.msrb.mxu2 %v8967_v53  ;;  %v10437_v12 = vpop.f32.mrf.mxu1  ;;  %v4025_v6 = vpop.f32.mrf.mxu0  ;;  %v14404_v53 = vld [vmem:[#allocation195_spill] sm:$0xff] }
 0x5c2   : > { %6827 = vmatmul.msk.bf16.gmra.mxu3 %vm1158_vm5, %v10431_v46  ;;  %14402 = vst [vmem:[#allocation56_spill] sm:$0xff] %v10437_v12  ;;  %v14406_v12 = vld [vmem:[#allocation50_spill] sm:$0xff] }
 0x5c3   : > { %3605 = vmatpush.bf16.xpose.msra.mxu3 %v14398_v10  ;;  %v3168_v38 = vpop.f32.mrf.mxu3  ;;  %v4106_v10 = vmul.f32 %v10374_v16, %v4025_v6  ;;  %v14428_v16 = vld [vmem:[#allocation216_spill] sm:$0xff] }
 0x5c4   : > { %v3192_v49 = vmul.f32 %v10424_v48, %v3168_v38 }
 0x5c5   : > { %v10449_v38 = vadd.f32 %v4106_v10, %v10328_v35 }
 0x5c6   : > { %3271 = vmatpush.bf16.xpose.msra.mxu1 %v14401_v4  ;;  %v10443_v62 = vadd.f32 %v3192_v49, %v10321_v9  ;;  %v3014_v9 = vpop.f32.mrf.mxu2 }
 0x5c7   : > { %4457 = vmatpush.bf16.xpose.msrb.mxu0 %v14404_v53  ;;  %v3059_v49 = vmul.f32 %v10402_v40, %v3014_v9  ;;  %v14408_v9 = vld [vmem:[#allocation40_spill] sm:$0xff] }
 0x5c9   : > { %3444 = vmatpush.bf16.xpose.msrb.mxu2 %v14261_v7  ;;  %v10463_v10 = vadd.f32 %v3059_v49, %v10339_v22  ;;  %v14410_v22 = vld [vmem:[#allocation51_spill] sm:$0xff]  ;;  %v14414_v49 = vld [vmem:[#allocation256_spill] sm:$0xff] }
 0x5cb   : > { %3606 = vmatpush.bf16.xpose.msra.mxu3 %v8792_v32  ;;  %v10451_v42 = vpop.f32.mrf.mxu3  ;;  %v2842_v32 = vpop.f32.mrf.mxu1 }
 0x5cc   : > { %14405 = vst [vmem:[#allocation347_spill] sm:$0xff] %v10451_v42  ;;  %v2905_v0 = vmul.f32 %v10399_v41, %v2842_v32  ;;  %v14407_v41 = vld [vmem:[#allocation106_spill] sm:$0xff] }
 0x5ce   : > { %3272 = vmatpush.bf16.xpose.msra.mxu1 %v14406_v12  ;;  %v10460_v6 = vadd.f32 %v2905_v0, %v9895_v36  ;;  %v14409_v36 = vld [vmem:[#allocation110_spill] sm:$0xff]  ;;  %v10478_v0 = vsel %vm1158_vm5, %v14410_v22, 0  ;;  %v14416_v22 = vld [vmem:[#allocation45_spill] sm:$0xff] }
 0x5cf   : > { %4458 = vmatpush.bf16.xpose.msrb.mxu0 %v7983_v33  ;;  %14411 = vst [vmem:[#allocation50_spill] sm:$0xff] %v10478_v0  ;;  %v10496_v40 = vsel %vm1158_vm5, %v14416_v22, 0  ;;  %v10518_v22 = vpop.f32.mrf.mxu2 }
 0x5d0   : > { %14417 = vst [vmem:[#allocation40_spill] sm:$0xff] %v10496_v40 }
 0x5d1   : > { %3445 = vmatpush.bf16.xpose.msrb.mxu2 %v14266_v57  ;;  %14421 = vst [vmem:[#allocation45_spill] sm:$0xff] %v10518_v22 }
 0x5d3   : > { %3607 = vmatpush.bf16.xpose.msra.mxu3 %v8800_v60  ;;  %v3173_v35 = vpop.f32.mrf.mxu3 }
 0x5d4   : > { %v3200_v42 = vmul.f32 %v10424_v48, %v3173_v35  ;;  %v14415_v35 = vld [vmem:[#allocation234_spill] sm:$0xff]  ;;  %v10498_v48 = vpop.f32.mrf.mxu0 }
 0x5d5   : > { %14418 = vst [vmem:[#allocation51_spill] sm:$0xff] %v10498_v48 }
 0x5d6   : > { %3273 = vmatpush.bf16.xpose.msra.mxu1 %v9275_v59  ;;  %v10469_v32 = vadd.f32 %v3200_v42, %v10346_v27  ;;  %v14412_v59 = vld [vmem:[#allocation150_spill] sm:$0xff]  ;;  %v14413_v27 = vld [vmem:[#allocation31_spill] sm:$0xff] }
 0x5d7   : > { %4459 = vmatpush.bf16.xpose.msrb.mxu0 %v14407_v41  ;;  %v7232_v42 = vld [vmem:[%s13072_s2 + $0x100] sm:$0xff] }
 0x5d9   : > { %3446 = vmatpush.bf16.xpose.msrb.mxu2 %v14273_v56 }
 0x5db   : > { %3608 = vmatpush.bf16.xpose.msra.mxu3 %v8832_v3 }
 0x5de   : > { %3274 = vmatpush.bf16.xpose.msra.mxu1 %v14408_v9  ;;  %v3705_v9 = vsel %vm1158_vm5, %v14415_v35, 0 }
 0x5df   : > { %4460 = vmatpush.bf16.xpose.msrb.mxu0 %v14409_v36  ;;  %v14422_v36 = vld [vmem:[#allocation221_spill] sm:$0xff] }
 0x5e0   : > { %v3702_v48 = vsel %vm1158_vm5, %v14422_v36, 0  ;;  %v10537_v36 = vperm.slane %v9985_v52, 1 }
 0x5e1   : > { %3447 = vmatpush.bf16.xpose.msrb.mxu2 %v14412_v59 }
 0x5e3   : > { %3609 = vmatpush.bf16.xpose.msra.mxu3 %v8850_v1  ;;  %v4172_v33 = vpop.f32.mrf.mxu0 }
 0x5e6   : > { %3275 = vmatpush.bf16.xpose.msra.mxu1 %v14413_v27  ;;  %6967 = vmatmul.msk.bf16.vlgmr.msrb.gmra.mxu0 %vm1158_vm5, %v7232_v42  ;;  %v6933_v42 = vld [vmem:[%s13073_s3 + $0x26] ss:$8 sm:$0xf] }
 0x5e7   : > { %4863 = vmatpush.bf16.xpose.msra.mxu0 %v10478_v0  ;;  %v10510_v27 = vld [vmem:[%s13072_s2 + $0xa0] sm:$0xff]  ;;  %v10514_v35 = vperm.slane %v6933_v42, 0 }
 0x5e8   : > { %6824 = vmatmul.msk.bf16.vlgmr.msrb.gmra.mxu2 %vm1158_vm5, %v10379_v23 }
 0x5e9   : > { %3584 = vmatpush.bf16.xpose.msra.mxu2 %v14298_v8  ;;  %14419 = vst [vmem:[#allocation31_spill] sm:$0xff] %v10514_v35  ;;  %v4250_v42 = vmul.f32 %v10514_v35, %v4172_v33 }
 0x5eb   : > { %3610 = vmatpush.bf16.xpose.msra.mxu3 %v14414_v49  ;;  %v10534_v22 = vadd.f32 %v4250_v42, %v10396_v47  ;;  %v3699_v47 = vsel %vm1158_vm5, %v14428_v16, 0  ;;  %v14429_v42 = vld [vmem:[#allocation33_spill] sm:$0xff] }
 0x5ec   : > { %v10552_v52 = vsel %vm1158_vm5, %v14429_v42, 0  ;;  %v14432_v42 = vld [vmem:[#allocation314_spill] sm:$0xff] }
 0x5ed   : > { %6801 = vmatmul.msk.bf16.vlgmr.msra.gmra.mxu1 %vm1158_vm5, %v10259_v34  ;;  %v14423_v34 = vld [vmem:[#allocation39_spill] sm:$0xff]  ;;  %14430 = vst [vmem:[#allocation216_spill] sm:$0xff] %v10552_v52 }
 0x5ee   : > { %3421 = vmatpush.bf16.xpose.msrb.mxu1 %v14293_v29  ;;  %v10525_v41 = vsel %vm1158_vm5, %v14423_v34, 0  ;;  %14425 = vst [vmem:[#allocation39_spill] sm:$0xff] %v10537_v36  ;;  %v10540_v34 = vperm.slane %v10000_v17, 2 }
 0x5ef   : > { %4864 = vmatpush.bf16.xpose.msra.mxu0 %v10496_v40  ;;  %14424 = vst [vmem:[#allocation221_spill] sm:$0xff] %v10525_v41 }
 0x5f0   : > { %14426 = vst [vmem:[#allocation348_spill] sm:$0xff] %v10540_v34 }
 0x5f1   : > { %3585 = vmatpush.bf16.xpose.msra.mxu2 %v14303_v51  ;;  %v10567_v51 = vperm.slane %v14432_v42, 3 }
 0x5f2   : > { %6847 = vmatmul.msk.bf16.vlgmr.msra.gmra.mxu3 %vm1158_vm5, %v10510_v27 }
 0x5f3   : > { %3764 = vmatpush.bf16.xpose.msrb.mxu3 %v3705_v9  ;;  %v10516_v9 = vpop.f32.mrf.mxu1  ;;  %14433 = vst [vmem:[#allocation314_spill] sm:$0xff] %v10567_v51 }
 0x5f4   : > { %14420 = vst [vmem:[#allocation234_spill] sm:$0xff] %v10516_v9  ;;  %v7233_v9 = vld [vmem:[%s13072_s2 + $0x108] sm:$0xff] }
 0x5f6   : > { %3422 = vmatpush.bf16.xpose.msrb.mxu1 %v14300_v30  ;;  %6968 = vmatmul.msk.bf16.gmra.mxu0 %vm1158_vm5, %v7233_v9  ;;  %v3149_v30 = vpop.f32.mrf.mxu2 }
 0x5f7   : > { %4865 = vmatpush.bf16.xpose.msra.mxu0 %v10525_v41  ;;  %v3191_v9 = vmul.f32 %v10540_v34, %v3149_v30  ;;  %v10574_v30 = vld [vmem:[%s13072_s2 + $0xa8] sm:$0xff] }
 0x5f8   : > { %6825 = vmatmul.msk.bf16.gmra.mxu2 %vm1158_vm5, %v10431_v46 }
 0x5f9   : > { %3586 = vmatpush.bf16.xpose.msra.mxu2 %v14310_v58  ;;  %v10564_v16 = vadd.f32 %v3191_v9, %v10421_v5  ;;  %v14435_v5 = vld [vmem:[#allocation27_spill] sm:$0xff] }
 0x5fb   : > { %3765 = vmatpush.bf16.xpose.msrb.mxu3 %v3702_v48  ;;  %v10542_v48 = vpop.f32.mrf.mxu3  ;;  %v2990_v33 = vpop.f32.mrf.mxu1 }
 0x5fc   : > { %14427 = vst [vmem:[#allocation349_spill] sm:$0xff] %v10542_v48  ;;  %v3050_v58 = vmul.f32 %v10537_v36, %v2990_v33  ;;  %v10557_v48 = vpop.f32.mrf.mxu0 }
 0x5fd   : > { %14431 = vst [vmem:[#allocation33_spill] sm:$0xff] %v10557_v48  ;;  %6802 = vmatmul.msk.bf16.gmra.mxu1 %vm1158_vm5, %v10310_v26 }
 0x5fe   : > { %3423 = vmatpush.bf16.xpose.msrb.mxu1 %v14305_v25  ;;  %v10560_v25 = vadd.f32 %v3050_v58, %v10418_v50  ;;  %v10586_v26 = vpop.f32.mrf.mxu2 }
 0x5ff   : > { %4866 = vmatpush.bf16.xpose.msra.mxu0 %v10552_v52  ;;  %14436 = vst [vmem:[#allocation27_spill] sm:$0xff] %v10586_v26  ;;  %v14438_v26 = vld [vmem:[#allocation17_spill] sm:$0xff] }
 0x601   : > { %3587 = vmatpush.bf16.xpose.msra.mxu2 %v14306_v19 }
 0x602   : > { %6848 = vmatmul.msk.bf16.gmra.mxu3 %vm1158_vm5, %v10574_v30 }
 0x603   : > { %3766 = vmatpush.bf16.xpose.msrb.mxu3 %v3699_v47  ;;  %v3315_v58 = vpop.f32.mrf.mxu3  ;;  %v10579_v33 = vpop.f32.mrf.mxu1  ;;  %v10584_v47 = vsel %vm1158_vm5, %v14435_v5, 0 }
 0x604   : > { %v3339_v50 = vmul.f32 %v10567_v51, %v3315_v58  ;;  %14434 = vst [vmem:[#allocation350_spill] sm:$0xff] %v10579_v33  ;;  %v4177_v48 = vpop.f32.mrf.mxu0 }
 0x605   : > { %v4258_v58 = vmul.f32 %v10514_v35, %v4177_v48 }
 0x606   : > { %3424 = vmatpush.bf16.xpose.msrb.mxu1 %v14311_v21  ;;  %v10589_v9 = vadd.f32 %v3339_v50, %v10443_v62  ;;  %v4789_v62 = vsel %vm1158_vm5, %v14438_v26, 0  ;;  %v3154_v50 = vpop.f32.mrf.mxu2  ;;  %v14439_v26 = vld [vmem:[#allocation74_spill] sm:$0xff] }
 0x607   : > { %4867 = vmatpush.bf16.xpose.msra.mxu0 %v10584_v47  ;;  %v10596_v33 = vadd.f32 %v4258_v58, %v10449_v38  ;;  %v3199_v48 = vmul.f32 %v10540_v34, %v3154_v50  ;;  %v14456_v34 = vld [vmem:[#allocation155_spill] sm:$0xff] }
 0x609   : > { %3588 = vmatpush.bf16.xpose.msra.mxu2 %v14314_v54  ;;  %v10611_v38 = vadd.f32 %v3199_v48, %v10463_v10  ;;  %v14444_v10 = vld [vmem:[#allocation7_spill] sm:$0xff] }
 0x60a   : > { %v4783_v50 = vsel %vm1158_vm5, %v14444_v10, 0  ;;  %v14445_v48 = vld [vmem:[#allocation255_spill] sm:$0xff] }
 0x60b   : > { %3767 = vmatpush.bf16.xpose.msrb.mxu3 %v10128_v63  ;;  %v10598_v21 = vpop.f32.mrf.mxu3  ;;  %v2995_v5 = vpop.f32.mrf.mxu1 }
 0x60c   : > { %14437 = vst [vmem:[#allocation351_spill] sm:$0xff] %v10598_v21  ;;  %v3058_v63 = vmul.f32 %v10537_v36, %v2995_v5  ;;  %v14440_v5 = vld [vmem:[#allocation11_spill] sm:$0xff]  ;;  %v10641_v10 = vpop.f32.mrf.mxu0 }
 0x60d   : > { %v4786_v36 = vsel %vm1158_vm5, %v14440_v5, 0  ;;  %v14450_v5 = vld [vmem:[#allocation236_spill] sm:$0xff]  ;;  %14451 = vst [vmem:[#allocation74_spill] sm:$0xff] %v10641_v10  ;;  %v10678_v10 = vperm.slane %v10000_v17, 1 }
 0x60e   : > { %3425 = vmatpush.bf16.xpose.msrb.mxu1 %v14316_v14  ;;  %v10607_v35 = vadd.f32 %v3058_v63, %v10460_v6  ;;  %v14442_v6 = vld [vmem:[#allocation112_spill] sm:$0xff]  ;;  %v14443_v63 = vld [vmem:[#allocation77_spill] sm:$0xff] }
 0x60f   : > { %4868 = vmatpush.bf16.xpose.msra.mxu0 %v4789_v62  ;;  %v14441_v62 = vld [vmem:[#allocation252_spill] sm:$0xff]  ;;  %14457 = vst [vmem:[#allocation255_spill] sm:$0xff] %v10678_v10 }
 0x611   : > { %3589 = vmatpush.bf16.xpose.msra.mxu2 %v14320_v55 }
 0x613   : > { %3768 = vmatpush.bf16.xpose.msrb.mxu3 %v14318_v11  ;;  %v3320_v58 = vpop.f32.mrf.mxu3 }
 0x614   : > { %v3347_v21 = vmul.f32 %v10567_v51, %v3320_v58  ;;  %v14446_v58 = vld [vmem:[#allocation103_spill] sm:$0xff]  ;;  %v7235_v51 = vld [vmem:[%s13072_s2 + $0x118] sm:$0xff] }
 0x616   : > { %3426 = vmatpush.bf16.xpose.msrb.mxu1 %v14439_v26  ;;  %v10618_v11 = vadd.f32 %v3347_v21, %v10469_v32  ;;  %v10632_v21 = vld [vmem:[%s13072_s2 + $0x110] sm:$0xff]  ;;  %v14448_v32 = vld [vmem:[#allocation258_spill] sm:$0xff] }
 0x617   : > { %4869 = vmatpush.bf16.xpose.msra.mxu0 %v4786_v36  ;;  %14447 = vst [vmem:[#allocation17_spill] sm:$0xff] %v10632_v21  ;;  %v14449_v36 = vld [vmem:[#allocation94_spill] sm:$0xff] }
 0x619   : > { %3590 = vmatpush.bf16.xpose.msra.mxu2 %v14442_v6 }
 0x61b   : > { %3769 = vmatpush.bf16.xpose.msrb.mxu3 %v14441_v62  ;;  %v3869_v62 = vsel %vm1158_vm5, %v14450_v5, 0 }
 0x61e   : > { %3427 = vmatpush.bf16.xpose.msrb.mxu1 %v14443_v63 }
 0x61f   : > { %4870 = vmatpush.bf16.xpose.msra.mxu0 %v4783_v50 }
 0x621   : > { %3591 = vmatpush.bf16.xpose.msra.mxu2 %v14446_v58 }
 0x623   : > { %3770 = vmatpush.bf16.xpose.msrb.mxu3 %v14445_v48  ;;  %v10657_v48 = vld [vmem:[%s13072_s2 + $0xb0] sm:$0xff] }
 0x626   : > { %6988 = vmatmul.msk.bf16.vlgmr.msra.gmra.mxu0 %vm1158_vm5, %v10632_v21  ;;  %3428 = vmatpush.bf16.xpose.msrb.mxu1 %v14336_v37 }
 0x627   : > { %5016 = vmatpush.bf16.xpose.msrb.mxu0 %v14316_v14 }
 0x628   : > { %6845 = vmatmul.msk.bf16.vlgmr.msra.gmra.mxu2 %vm1158_vm5, %v10510_v27 }
 0x629   : > { %3745 = vmatpush.bf16.xpose.msrb.mxu2 %v14341_v15  ;;  %v6954_v15 = vld [vmem:[%s13073_s3 + $0x27] ss:$8 sm:$0xf] }
 0x62a   : > { %v10652_v50 = vperm.slane %v6954_v15, 0 }
 0x62b   : > { %3771 = vmatpush.bf16.xpose.msrb.mxu3 %v14448_v32  ;;  %v10661_v32 = vpop.f32.mrf.mxu1 }
 0x62c   : > { %14452 = vst [vmem:[#allocation11_spill] sm:$0xff] %v10652_v50 }
 0x62d   : > { %6822 = vmatmul.msk.bf16.vlgmr.msrb.gmra.mxu1 %vm1158_vm5, %v10379_v23  ;;  %14453 = vst [vmem:[#allocation252_spill] sm:$0xff] %v10661_v32  ;;  %v4322_v23 = vpop.f32.mrf.mxu0 }
 0x62e   : > { %3565 = vmatpush.bf16.xpose.msra.mxu1 %v14449_v36  ;;  %v4400_v15 = vmul.f32 %v10652_v50, %v4322_v23  ;;  %v14460_v23 = vld [vmem:[#allocation76_spill] sm:$0xff] }
 0x62f   : > { %5017 = vmatpush.bf16.xpose.msrb.mxu0 %v14439_v26  ;;  %v14464_v36 = vld [vmem:[#allocation316_spill] sm:$0xff] }
 0x630   : > { %v10675_v32 = vadd.f32 %v4400_v15, %v10534_v22  ;;  %v10704_v21 = vperm.slane %v14464_v36, 3 }
 0x631   : > { %3746 = vmatpush.bf16.xpose.msrb.mxu2 %v14345_v24  ;;  %v14454_v24 = vld [vmem:[#allocation222_spill] sm:$0xff] }
 0x632   : > { %6868 = vmatmul.msk.bf16.vlgmr.msrb.gmra.mxu3 %vm1158_vm5, %v10657_v48  ;;  %v3866_v5 = vsel %vm1158_vm5, %v14454_v24, 0  ;;  %v10681_v24 = vperm.slane %v14432_v42, 2  ;;  %14465 = vst [vmem:[#allocation155_spill] sm:$0xff] %v10704_v21 }
 0x633   : > { %3928 = vmatpush.bf16.xpose.msra.mxu3 %v3869_v62  ;;  %v10666_v62 = vpop.f32.mrf.mxu2 }
 0x634   : > { %14455 = vst [vmem:[#allocation7_spill] sm:$0xff] %v10666_v62 }
 0x635   : > { %14458 = vst [vmem:[#allocation258_spill] sm:$0xff] %v10681_v24  ;;  %v10692_v15 = vpop.f32.mrf.mxu0 }
 0x636   : > { %3566 = vmatpush.bf16.xpose.msra.mxu1 %v14343_v2  ;;  %6989 = vmatmul.msk.bf16.gmra.mxu0 %vm1158_vm5, %v7235_v51  ;;  %v3130_v2 = vpop.f32.mrf.mxu1  ;;  %14462 = vst [vmem:[#allocation222_spill] sm:$0xff] %v10692_v15  ;;  %v14463_v51 = vld [vmem:[#allocation145_spill] sm:$0xff] }
 0x637   : > { %5018 = vmatpush.bf16.xpose.msrb.mxu0 %v14443_v63  ;;  %v3190_v17 = vmul.f32 %v10678_v10, %v3130_v2  ;;  %v10711_v2 = vld [vmem:[%s13072_s2 + $0xb8] sm:$0xff]  ;;  %v14471_v63 = vld [vmem:[#allocation135_spill] sm:$0xff] }
 0x638   : > { %6846 = vmatmul.msk.bf16.gmra.mxu2 %vm1158_vm5, %v10574_v30 }
 0x639   : > { %3747 = vmatpush.bf16.xpose.msrb.mxu2 %v14456_v34  ;;  %v14461_v34 = vld [vmem:[#allocation217_spill] sm:$0xff] }
 0x63a   : > { %v3863_v62 = vsel %vm1158_vm5, %v14461_v34, 0 }
 0x63b   : > { %3929 = vmatpush.bf16.xpose.msra.mxu3 %v3866_v5  ;;  %v10683_v5 = vpop.f32.mrf.mxu3  ;;  %v3296_v22 = vpop.f32.mrf.mxu2 }
 0x63c   : > { %14459 = vst [vmem:[#allocation236_spill] sm:$0xff] %v10683_v5  ;;  %v3338_v5 = vmul.f32 %v10681_v24, %v3296_v22 }
 0x63d   : > { %6823 = vmatmul.msk.bf16.gmra.mxu1 %vm1158_vm5, %v10431_v46 }
 0x63e   : > { %3567 = vmatpush.bf16.xpose.msra.mxu1 %v14460_v23  ;;  %v10698_v23 = vadd.f32 %v3190_v17, %v10560_v25  ;;  %v10701_v34 = vadd.f32 %v3338_v5, %v10564_v16  ;;  %v14466_v17 = vld [vmem:[#allocation67_spill] sm:$0xff]  ;;  %v14467_v16 = vld [vmem:[#allocation212_spill] sm:$0xff]  ;;  %v10719_v22 = vpop.f32.mrf.mxu1 }
 0x63f   : > { %5019 = vmatpush.bf16.xpose.msrb.mxu0 %v14336_v37  ;;  %v3860_v5 = vsel %vm1158_vm5, %v14467_v16, 0  ;;  %14468 = vst [vmem:[#allocation217_spill] sm:$0xff] %v10719_v22  ;;  %v14470_v37 = vld [vmem:[#allocation86_spill] sm:$0xff]  ;;  %v14474_v22 = vld [vmem:[#allocation203_spill] sm:$0xff] }
 0x640   : > { %v14473_v16 = vld [vmem:[#allocation170_spill] sm:$0xff] }
 0x641   : > { %3748 = vmatpush.bf16.xpose.msrb.mxu2 %v14463_v51  ;;  %v4327_v51 = vpop.f32.mrf.mxu0 }
 0x642   : > { %6869 = vmatmul.msk.bf16.gmra.mxu3 %vm1158_vm5, %v10711_v2  ;;  %v4408_v58 = vmul.f32 %v10652_v50, %v4327_v51  ;;  %v14476_v51 = vld [vmem:[#allocation127_spill] sm:$0xff]  ;;  %v14477_v50 = vld [vmem:[#allocation174_spill] sm:$0xff] }
 0x643   : > { %3930 = vmatpush.bf16.xpose.msra.mxu3 %v3863_v62  ;;  %v3468_v62 = vpop.f32.mrf.mxu3  ;;  %v10721_v46 = vpop.f32.mrf.mxu2 }
 0x644   : > { %v3492_v25 = vmul.f32 %v10704_v21, %v3468_v62  ;;  %14469 = vst [vmem:[#allocation145_spill] sm:$0xff] %v10721_v46  ;;  %v10730_v62 = vadd.f32 %v4408_v58, %v10596_v33 }
 0x646   : > { %3568 = vmatpush.bf16.xpose.msra.mxu1 %v14466_v17  ;;  %v10724_v15 = vadd.f32 %v3492_v25, %v10589_v9  ;;  %v14475_v25 = vld [vmem:[#allocation92_spill] sm:$0xff] }
 0x647   : > { %5020 = vmatpush.bf16.xpose.msrb.mxu0 %v14470_v37 }
 0x649   : > { %3749 = vmatpush.bf16.xpose.msrb.mxu2 %v14471_v63 }
 0x64b   : > { %3931 = vmatpush.bf16.xpose.msra.mxu3 %v3860_v5  ;;  %v10732_v17 = vpop.f32.mrf.mxu3  ;;  %v3135_v5 = vpop.f32.mrf.mxu1 }
 0x64c   : > { %14472 = vst [vmem:[#allocation316_spill] sm:$0xff] %v10732_v17  ;;  %v3198_v46 = vmul.f32 %v10678_v10, %v3135_v5  ;;  %v3301_v9 = vpop.f32.mrf.mxu2  ;;  %v14479_v10 = vld [vmem:[#allocation95_spill] sm:$0xff] }
 0x64d   : > { %v3346_v37 = vmul.f32 %v10681_v24, %v3301_v9  ;;  %v14480_v9 = vld [vmem:[#allocation120_spill] sm:$0xff] }
 0x64e   : > { %3569 = vmatpush.bf16.xpose.msra.mxu1 %v14473_v16  ;;  %v10741_v63 = vadd.f32 %v3198_v46, %v10607_v35  ;;  %v14482_v35 = vld [vmem:[#allocation187_spill] sm:$0xff]  ;;  %v14485_v46 = vld [vmem:[#allocation173_spill] sm:$0xff] }
 0x64f   : > { %5021 = vmatpush.bf16.xpose.msrb.mxu0 %v14475_v25  ;;  %v10744_v33 = vadd.f32 %v3346_v37, %v10611_v38  ;;  %v14483_v37 = vld [vmem:[#allocation24_spill] sm:$0xff]  ;;  %v14484_v38 = vld [vmem:[#allocation113_spill] sm:$0xff] }
 0x651   : > { %3750 = vmatpush.bf16.xpose.msrb.mxu2 %v14476_v51  ;;  %v14481_v51 = vld [vmem:[#allocation178_spill] sm:$0xff] }
 0x653   : > { %3932 = vmatpush.bf16.xpose.msra.mxu3 %v14474_v22  ;;  %v3473_v58 = vpop.f32.mrf.mxu3  ;;  %v14478_v22 = vld [vmem:[#allocation190_spill] sm:$0xff] }
 0x654   : > { %v3500_v17 = vmul.f32 %v10704_v21, %v3473_v58  ;;  %v10769_v58 = vpop.f32.mrf.mxu0  ;;  %v14499_v21 = vld [vmem:[#allocation319_spill] sm:$0xff] }
 0x655   : > { %14487 = vst [vmem:[#allocation212_spill] sm:$0xff] %v10769_v58  ;;  %v14623_v58 = vld [vmem:[#allocation143_spill] sm:$0xff] }
 0x656   : > { %3570 = vmatpush.bf16.xpose.msra.mxu1 %v14477_v50  ;;  %v10750_v5 = vadd.f32 %v3500_v17, %v10618_v11  ;;  %v7236_v11 = vld [vmem:[%s13072_s2 + $0x120] sm:$0xff]  ;;  %v14486_v17 = vld [vmem:[#allocation180_spill] sm:$0xff] }
 0x657   : > { %5022 = vmatpush.bf16.xpose.msrb.mxu0 %v14479_v10 }
 0x659   : > { %3751 = vmatpush.bf16.xpose.msrb.mxu2 %v14480_v9  ;;  %v14489_v9 = vld [vmem:[#allocation165_spill] sm:$0xff] }
 0x65b   : > { %3933 = vmatpush.bf16.xpose.msra.mxu3 %v14478_v22  ;;  %v14488_v22 = vld [vmem:[#allocation224_spill] sm:$0xff] }
 0x65e   : > { %3571 = vmatpush.bf16.xpose.msra.mxu1 %v14481_v51 }
 0x65f   : > { %5023 = vmatpush.bf16.xpose.msrb.mxu0 %v14483_v37 }
 0x661   : > { %3752 = vmatpush.bf16.xpose.msrb.mxu2 %v14484_v38  ;;  %v10788_v38 = vpop.f32.mrf.mxu1 }
 0x662   : > { %14490 = vst [vmem:[#allocation135_spill] sm:$0xff] %v10788_v38  ;;  %v10804_v38 = vperm.slane %v14432_v42, 1 }
 0x663   : > { %3934 = vmatpush.bf16.xpose.msra.mxu3 %v14482_v35  ;;  %v6975_v35 = vld [vmem:[%s13073_s3 + $0x40] ss:$8 sm:$0xf] }
 0x664   : > { %v10786_v37 = vperm.slane %v6975_v35, 0  ;;  %v7237_v35 = vld [vmem:[%s13072_s2 + $0x128] sm:$0xff]  ;;  %14494 = vst [vmem:[#allocation203_spill] sm:$0xff] %v10804_v38 }
 0x666   : > { %3572 = vmatpush.bf16.xpose.msra.mxu1 %v14376_v44  ;;  %7009 = vmatmul.msk.bf16.vlgmr.msrb.gmra.mxu0 %vm1158_vm5, %v7236_v11  ;;  %v14492_v11 = vld [vmem:[#allocation218_spill] sm:$0xff] }
 0x667   : > { %5156 = vmatpush.bf16.xpose.msra.mxu0 %v14473_v16 }
 0x668   : > { %6866 = vmatmul.msk.bf16.vlgmr.msrb.gmra.mxu2 %vm1158_vm5, %v10657_v48 }
 0x669   : > { %3909 = vmatpush.bf16.xpose.msra.mxu2 %v14485_v46  ;;  %v10790_v46 = vpop.f32.mrf.mxu2 }
 0x66a   : > { %14491 = vst [vmem:[#allocation170_spill] sm:$0xff] %v10790_v46  ;;  %v10809_v46 = vpop.f32.mrf.mxu3 }
 0x66b   : > { %3935 = vmatpush.bf16.xpose.msra.mxu3 %v14486_v17  ;;  %14496 = vst [vmem:[#allocation127_spill] sm:$0xff] %v10809_v46 }
 0x66d   : > { %6843 = vmatmul.msk.bf16.vlgmr.msra.gmra.mxu1 %vm1158_vm5, %v10510_v27  ;;  %v4462_v27 = vpop.f32.mrf.mxu0 }
 0x66e   : > { %3726 = vmatpush.bf16.xpose.msrb.mxu1 %v14378_v18  ;;  %v10782_v18 = vld [vmem:[%s13072_s2 + $0xc0] sm:$0xff]  ;;  %v4540_v17 = vmul.f32 %v10786_v37, %v4462_v27  ;;  %v3277_v27 = vpop.f32.mrf.mxu1 }
 0x66f   : > { %5157 = vmatpush.bf16.xpose.msra.mxu0 %v14477_v50 }
 0x670   : > { %v10801_v24 = vadd.f32 %v4540_v17, %v10675_v32  ;;  %v14497_v17 = vld [vmem:[#allocation213_spill] sm:$0xff] }
 0x671   : > { %3910 = vmatpush.bf16.xpose.msra.mxu2 %v14489_v9  ;;  %v14493_v9 = vld [vmem:[#allocation156_spill] sm:$0xff]  ;;  %v3449_v32 = vpop.f32.mrf.mxu2 }
 0x672   : > { %6889 = vmatmul.msk.bf16.vlgmr.msra.gmra.mxu3 %vm1158_vm5, %v10782_v18 }
 0x673   : > { %4068 = vmatpush.bf16.xpose.msrb.mxu3 %v14488_v22 }
 0x676   : > { %3727 = vmatpush.bf16.xpose.msrb.mxu1 %v14381_v61  ;;  %v10807_v61 = vperm.slane %v14464_v36, 2  ;;  %7010 = vmatmul.msk.bf16.gmra.mxu0 %vm1158_vm5, %v7237_v35  ;;  %v10819_v36 = vpop.f32.mrf.mxu0  ;;  %v14498_v35 = vld [vmem:[#allocation146_spill] sm:$0xff] }
 0x677   : > { %5158 = vmatpush.bf16.xpose.msra.mxu0 %v14481_v51 }
 0x678   : > { %14495 = vst [vmem:[#allocation92_spill] sm:$0xff] %v10807_v61  ;;  %6867 = vmatmul.msk.bf16.gmra.mxu2 %vm1158_vm5, %v10711_v2  ;;  %v3491_v42 = vmul.f32 %v10807_v61, %v3449_v32  ;;  %v10841_v32 = vpop.f32.mrf.mxu1 }
 0x679   : > { %3911 = vmatpush.bf16.xpose.msra.mxu2 %v14493_v9  ;;  %v3337_v9 = vmul.f32 %v10804_v38, %v3277_v27  ;;  %v10836_v27 = vld [vmem:[%s13072_s2 + $0xc8] sm:$0xff]  ;;  %14501 = vst [vmem:[#allocation190_spill] sm:$0xff] %v10841_v32 }
 0x67b   : > { %4069 = vmatpush.bf16.xpose.msrb.mxu3 %v14492_v11  ;;  %v10822_v46 = vadd.f32 %v3337_v9, %v10698_v23  ;;  %v10829_v11 = vperm.slane %v14499_v21, 3  ;;  %v3612_v23 = vpop.f32.mrf.mxu3  ;;  %v10844_v21 = vpop.f32.mrf.mxu2 }
 0x67c   : > { %14502 = vst [vmem:[#allocation95_spill] sm:$0xff] %v10844_v21  ;;  %v14506_v21 = vld [vmem:[#allocation207_spill] sm:$0xff] }
 0x67d   : > { %14500 = vst [vmem:[#allocation174_spill] sm:$0xff] %v10829_v11  ;;  %6844 = vmatmul.msk.bf16.gmra.mxu1 %vm1158_vm5, %v10574_v30  ;;  %v3636_v9 = vmul.f32 %v10829_v11, %v3612_v23  ;;  %v14503_v30 = vld [vmem:[#allocation223_spill] sm:$0xff] }
 0x67e   : > { %3728 = vmatpush.bf16.xpose.msrb.mxu1 %v14384_v31  ;;  %v10826_v31 = vadd.f32 %v3491_v42, %v10701_v34  ;;  %v4467_v42 = vpop.f32.mrf.mxu0 }
 0x67f   : > { %5159 = vmatpush.bf16.xpose.msra.mxu0 %v14376_v44  ;;  %v10847_v34 = vadd.f32 %v3636_v9, %v10724_v15 }
 0x681   : > { %3912 = vmatpush.bf16.xpose.msra.mxu2 %v14498_v35  ;;  %v4548_v35 = vmul.f32 %v10786_v37, %v4467_v42 }
 0x682   : > { %6890 = vmatmul.msk.bf16.gmra.mxu3 %vm1158_vm5, %v10836_v27 }
 0x683   : > { %4070 = vmatpush.bf16.xpose.msrb.mxu3 %v14497_v17  ;;  %v14504_v17 = vld [vmem:[#allocation136_spill] sm:$0xff]  ;;  %v10854_v23 = vadd.f32 %v4548_v35, %v10730_v62  ;;  %v10856_v32 = vpop.f32.mrf.mxu3  ;;  %v3454_v9 = vpop.f32.mrf.mxu2 }
 0x684   : > { %14505 = vst [vmem:[#allocation120_spill] sm:$0xff] %v10856_v32  ;;  %v14530_v32 = vld [vmem:[#allocation57_spill] sm:$0xff] }
 0x686   : > { %3729 = vmatpush.bf16.xpose.msrb.mxu1 %v14386_v28  ;;  %v3282_v28 = vpop.f32.mrf.mxu1 }
 0x687   : > { %5160 = vmatpush.bf16.xpose.msra.mxu0 %v14379_v20  ;;  %v3345_v15 = vmul.f32 %v10804_v38, %v3282_v28  ;;  %v14508_v38 = vld [vmem:[#allocation206_spill] sm:$0xff] }
 0x689   : > { %3913 = vmatpush.bf16.xpose.msra.mxu2 %v14504_v17  ;;  %v10864_v42 = vadd.f32 %v3345_v15, %v10741_v63  ;;  %v14507_v17 = vld [vmem:[#allocation128_spill] sm:$0xff]  ;;  %v14510_v63 = vld [vmem:[#allocation183_spill] sm:$0xff] }
 0x68a   : > { %v7238_v15 = vld [vmem:[%s13072_s2 + $0x130] sm:$0xff] }
 0x68b   : > { %4071 = vmatpush.bf16.xpose.msrb.mxu3 %v14503_v30  ;;  %v3499_v30 = vmul.f32 %v10807_v61, %v3454_v9  ;;  %v3617_v35 = vpop.f32.mrf.mxu3  ;;  %v14509_v9 = vld [vmem:[#allocation121_spill] sm:$0xff]  ;;  %v10901_v61 = vpop.f32.mrf.mxu0 }
 0x68c   : > { %14521 = vst [vmem:[#allocation187_spill] sm:$0xff] %v10901_v61  ;;  %v14622_v61 = vld [vmem:[#allocation44_spill] sm:$0xff] }
 0x68d   : > { %v10868_v62 = vadd.f32 %v3499_v30, %v10744_v33  ;;  %v14511_v33 = vld [vmem:[#allocation71_spill] sm:$0xff] }
 0x68e   : > { %3730 = vmatpush.bf16.xpose.msrb.mxu1 %v14391_v13  ;;  %v3644_v13 = vmul.f32 %v10829_v11, %v3617_v35  ;;  %v10883_v30 = vsel %vm1158_vm5, %v14511_v33, 0  ;;  %v6996_v35 = vld [vmem:[%s13073_s3 + $0x41] ss:$8 sm:$0xf] }
 0x68f   : > { %5161 = vmatpush.bf16.xpose.msra.mxu0 %v14382_v39  ;;  %14512 = vst [vmem:[#allocation178_spill] sm:$0xff] %v10883_v30  ;;  %v14529_v11 = vld [vmem:[#allocation282_spill] sm:$0xff] }
 0x690   : > { %v10873_v28 = vadd.f32 %v3644_v13, %v10750_v5  ;;  %v14514_v5 = vld [vmem:[#allocation167_spill] sm:$0xff]  ;;  %v14518_v13 = vld [vmem:[#allocation228_spill] sm:$0xff] }
 0x691   : > { %3914 = vmatpush.bf16.xpose.msra.mxu2 %v14507_v17  ;;  %v14516_v17 = vld [vmem:[#allocation105_spill] sm:$0xff] }
 0x693   : > { %4072 = vmatpush.bf16.xpose.msrb.mxu3 %v14506_v21 }
 0x696   : > { %3731 = vmatpush.bf16.xpose.msrb.mxu1 %v14397_v45  ;;  %v14513_v45 = vld [vmem:[#allocation114_spill] sm:$0xff] }
 0x697   : > { %5162 = vmatpush.bf16.xpose.msra.mxu0 %v14385_v43 }
 0x699   : > { %3915 = vmatpush.bf16.xpose.msra.mxu2 %v14509_v9  ;;  %v14519_v9 = vld [vmem:[#allocation230_spill] sm:$0xff] }
 0x69a   : > { %v14520_v33 = vsel %vm8667_vm13, %v14518_v13, %v14519_v9  ;;  %v10916_v13 = vperm.slane %v6996_v35, 0  ;;  %v14525_v9 = vld [vmem:[#allocation36_spill] sm:$0xff] }
 0x69b   : > { %4073 = vmatpush.bf16.xpose.msrb.mxu3 %v14508_v38  ;;  %v14532_v35 = vld [vmem:[#allocation148_spill] sm:$0xff] }
 0x69e   : > { %3732 = vmatpush.bf16.xpose.msrb.mxu1 %v14401_v4  ;;  %v14515_v4 = vld [vmem:[#allocation176_spill] sm:$0xff] }
 0x69f   : > { %5163 = vmatpush.bf16.xpose.msra.mxu0 %v14404_v53  ;;  %v10928_v53 = vsel %vm1158_vm5, %v14530_v32, 0 }
 0x6a0   : > { %14531 = vst [vmem:[#allocation180_spill] sm:$0xff] %v10928_v53 }
 0x6a1   : > { %3916 = vmatpush.bf16.xpose.msra.mxu2 %v14513_v45  ;;  %v4161_v45 = vsel %vm1158_vm5, %v14520_v33, 0  ;;  %v10920_v33 = vpop.f32.mrf.mxu1 }
 0x6a2   : > { %14526 = vst [vmem:[#allocation113_spill] sm:$0xff] %v10920_v33  ;;  %v7277_v33 = vld [vmem:[%s13073_s3 + $0x21] ss:$8 sm:$0xf] }
 0x6a3   : > { %4074 = vmatpush.bf16.xpose.msrb.mxu3 %v14510_v63  ;;  %v10942_v32 = vperm.slane %v7277_v33, 1  ;;  %v14537_v33 = vld [vmem:[#allocation220_spill] sm:$0xff] }
 0x6a5   : > { %14533 = vst [vmem:[#allocation165_spill] sm:$0xff] %v10942_v32 }
 0x6a6   : > { %7030 = vmatmul.msk.bf16.vlgmr.msra.gmra.mxu0 %vm1158_vm5, %v7238_v15  ;;  %3733 = vmatpush.bf16.xpose.msrb.mxu1 %v14406_v12  ;;  %v14522_v15 = vld [vmem:[#allocation63_spill] sm:$0xff] }
 0x6a7   : > { %5296 = vmatpush.bf16.xpose.msrb.mxu0 %v10883_v30  ;;  %v10907_v12 = vsel %vm1158_vm5, %v14522_v15, 0  ;;  %v10923_v15 = vpop.f32.mrf.mxu2 }
 0x6a8   : > { %6887 = vmatmul.msk.bf16.vlgmr.msra.gmra.mxu2 %vm1158_vm5, %v10782_v18  ;;  %14523 = vst [vmem:[#allocation24_spill] sm:$0xff] %v10907_v12 }
 0x6a9   : > { %4049 = vmatpush.bf16.xpose.msrb.mxu2 %v14514_v5  ;;  %14528 = vst [vmem:[#allocation173_spill] sm:$0xff] %v10923_v15  ;;  %v10947_v15 = vld [vmem:[%s13073_s3 + $0x22] ss:$8 sm:$0xf] }
 0x6ab   : > { %4075 = vmatpush.bf16.xpose.msrb.mxu3 %v14515_v4 }
 0x6ad   : > { %6864 = vmatmul.msk.bf16.vlgmr.msrb.gmra.mxu1 %vm1158_vm5, %v10657_v48 }
 0x6ae   : > { %3890 = vmatpush.bf16.xpose.msra.mxu1 %v14516_v17  ;;  %v14524_v17 = vld [vmem:[#allocation158_spill] sm:$0xff] }
 0x6af   : > { %5297 = vmatpush.bf16.xpose.msrb.mxu0 %v10907_v12  ;;  %v3593_v5 = vpop.f32.mrf.mxu2  ;;  %v14585_v12 = vld [vmem:[#allocation141_spill] sm:$0xff] }
 0x6b1   : > { %4050 = vmatpush.bf16.xpose.msrb.mxu2 %v14524_v17  ;;  %v4872_v17 = vpop.f32.mrf.mxu0 }
 0x6b2   : > { %6910 = vmatmul.msk.bf16.vlgmr.msrb.gmra.mxu3 %vm1158_vm5, %v14525_v9  ;;  %v4950_v48 = vmul.f32 %v10916_v13, %v4872_v17  ;;  %v7239_v9 = vld [vmem:[%s13072_s2 + $0x138] sm:$0xff]  ;;  %v10950_v17 = vperm.slane %v10947_v15, 2 }
 0x6b3   : > { %4220 = vmatpush.bf16.xpose.msra.mxu3 %v4161_v45  ;;  %v14527_v45 = vld [vmem:[#allocation97_spill] sm:$0xff] }
 0x6b4   : > { %14534 = vst [vmem:[#allocation156_spill] sm:$0xff] %v10950_v17  ;;  %v3635_v63 = vmul.f32 %v10950_v17, %v3593_v5  ;;  %v10984_v5 = vld [vmem:[%s13072_s2 + $0xd8] sm:$0xff] }
 0x6b6   : > { %3891 = vmatpush.bf16.xpose.msra.mxu1 %v14527_v45  ;;  %v10937_v45 = vadd.f32 %v4950_v48, %v10801_v24  ;;  %7031 = vmatmul.msk.bf16.gmra.mxu0 %vm1158_vm5, %v7239_v9  ;;  %v14536_v24 = vld [vmem:[#allocation88_spill] sm:$0xff]  ;;  %v3430_v48 = vpop.f32.mrf.mxu1 }
 0x6b7   : > { %5298 = vmatpush.bf16.xpose.msrb.mxu0 %v10928_v53  ;;  %v10993_v38 = vpop.f32.mrf.mxu2 }
 0x6b8   : > { %6888 = vmatmul.msk.bf16.gmra.mxu2 %vm1158_vm5, %v10836_v27  ;;  %14543 = vst [vmem:[#allocation128_spill] sm:$0xff] %v10993_v38 }
 0x6b9   : > { %4051 = vmatpush.bf16.xpose.msrb.mxu2 %v14532_v35  ;;  %v10952_v35 = vpop.f32.mrf.mxu3  ;;  %v10960_v4 = vpop.f32.mrf.mxu0 }
 0x6ba   : > { %14535 = vst [vmem:[#allocation146_spill] sm:$0xff] %v10952_v35  ;;  %v14538_v35 = vld [vmem:[#allocation138_spill] sm:$0xff] }
 0x6bb   : > { %4221 = vmatpush.bf16.xpose.msra.mxu3 %v14529_v11  ;;  %v3490_v11 = vmul.f32 %v10942_v32, %v3430_v48 }
 0x6bd   : > { %v10966_v9 = vadd.f32 %v3490_v11, %v10822_v46  ;;  %6865 = vmatmul.msk.bf16.gmra.mxu1 %vm1158_vm5, %v10711_v2 }
 0x6be   : > { %3892 = vmatpush.bf16.xpose.msra.mxu1 %v14536_v24  ;;  %v10969_v24 = vadd.f32 %v3635_v63, %v10826_v31  ;;  %v14540_v31 = vld [vmem:[#allocation79_spill] sm:$0xff]  ;;  %v10990_v63 = vpop.f32.mrf.mxu1 }
 0x6bf   : > { %5299 = vmatpush.bf16.xpose.msrb.mxu0 %v10478_v0  ;;  %14541 = vst [vmem:[#allocation136_spill] sm:$0xff] %v10990_v63  ;;  %v14544_v0 = vld [vmem:[#allocation130_spill] sm:$0xff]  ;;  %v14546_v63 = vld [vmem:[#allocation69_spill] sm:$0xff] }
 0x6c1   : > { %4052 = vmatpush.bf16.xpose.msrb.mxu2 %v14538_v35  ;;  %v3773_v46 = vpop.f32.mrf.mxu3  ;;  %v14542_v35 = vld [vmem:[#allocation214_spill] sm:$0xff]  ;;  %v4877_v2 = vpop.f32.mrf.mxu0 }
 0x6c2   : > { %6911 = vmatmul.msk.bf16.gmra.mxu3 %vm1158_vm5, %v10984_v5  ;;  %v4958_v22 = vmul.f32 %v10916_v13, %v4877_v2 }
 0x6c3   : > { %4222 = vmatpush.bf16.xpose.msra.mxu3 %v14537_v33  ;;  %v10974_v33 = vld [vmem:[%s13073_s3 + $0x23] ss:$8 sm:$0xf] }
 0x6c4   : > { %v10977_v48 = vperm.slane %v10974_v33, 3 }
 0x6c6   : > { %14539 = vst [vmem:[#allocation319_spill] sm:$0xff] %v10977_v48  ;;  %v3797_v11 = vmul.f32 %v10977_v48, %v3773_v46  ;;  %3893 = vmatpush.bf16.xpose.msra.mxu1 %v14540_v31  ;;  %v11002_v46 = vadd.f32 %v4958_v22, %v10854_v23  ;;  %v3435_v53 = vpop.f32.mrf.mxu1  ;;  %v14549_v22 = vld [vmem:[#allocation132_spill] sm:$0xff] }
 0x6c7   : > { %5300 = vmatpush.bf16.xpose.msrb.mxu0 %v10496_v40 }
 0x6c8   : > { %v10996_v21 = vadd.f32 %v3797_v11, %v10847_v34  ;;  %v3498_v34 = vmul.f32 %v10942_v32, %v3435_v53  ;;  %v3598_v11 = vpop.f32.mrf.mxu2  ;;  %v14553_v32 = vld [vmem:[#allocation55_spill] sm:$0xff] }
 0x6c9   : > { %4053 = vmatpush.bf16.xpose.msrb.mxu2 %v14544_v0  ;;  %v11004_v31 = vpop.f32.mrf.mxu3  ;;  %v3643_v2 = vmul.f32 %v10950_v17, %v3598_v11  ;;  %v14550_v0 = vld [vmem:[#allocation61_spill] sm:$0xff]  ;;  %v14552_v11 = vld [vmem:[#allocation116_spill] sm:$0xff] }
 0x6ca   : > { %14545 = vst [vmem:[#allocation121_spill] sm:$0xff] %v11004_v31  ;;  %v11017_v23 = vadd.f32 %v3498_v34, %v10864_v42  ;;  %v14554_v42 = vld [vmem:[#allocation193_spill] sm:$0xff] }
 0x6cb   : > { %4223 = vmatpush.bf16.xpose.msra.mxu3 %v14542_v35  ;;  %v14547_v35 = vld [vmem:[#allocation210_spill] sm:$0xff]  ;;  %v14562_v17 = vld [vmem:[#allocation65_spill] sm:$0xff] }
 0x6cc   : > { %v11009_v38 = vsel %vm1158_vm5, %v14547_v35, 0 }
 0x6cd   : > { %14548 = vst [vmem:[#allocation71_spill] sm:$0xff] %v11009_v38 }
 0x6ce   : > { %3894 = vmatpush.bf16.xpose.msra.mxu1 %v14546_v63  ;;  %v11020_v63 = vadd.f32 %v3643_v2, %v10868_v62  ;;  %v14555_v62 = vld [vmem:[#allocation73_spill] sm:$0xff]  ;;  %v14556_v2 = vld [vmem:[#allocation108_spill] sm:$0xff] }
 0x6cf   : > { %5301 = vmatpush.bf16.xpose.msrb.mxu0 %v10525_v41  ;;  %v5554_v34 = vsel %vm1158_vm5, %v14555_v62, 0  ;;  %v14561_v62 = vld [vmem:[#allocation235_spill] sm:$0xff] }
 0x6d0   : > { %v14584_v41 = vld [vmem:[#allocation243_spill] sm:$0xff] }
 0x6d1   : > { %4054 = vmatpush.bf16.xpose.msrb.mxu2 %v14549_v22  ;;  %v3778_v35 = vpop.f32.mrf.mxu3 }
 0x6d2   : > { %v3805_v31 = vmul.f32 %v10977_v48, %v3778_v35  ;;  %v14560_v35 = vld [vmem:[#allocation99_spill] sm:$0xff]  ;;  %v11055_v48 = vpop.f32.mrf.mxu0 }
 0x6d3   : > { %4224 = vmatpush.bf16.xpose.msra.mxu3 %v11009_v38  ;;  %v14551_v38 = vld [vmem:[#allocation194_spill] sm:$0xff]  ;;  %14563 = vst [vmem:[#allocation114_spill] sm:$0xff] %v11055_v48 }
 0x6d4   : > { %v11026_v53 = vadd.f32 %v3805_v31, %v10873_v28  ;;  %v7240_v28 = vld [vmem:[%s13072_s2 + $0x140] sm:$0xff]  ;;  %v14558_v31 = vld [vmem:[#allocation49_spill] sm:$0xff] }
 0x6d6   : > { %3895 = vmatpush.bf16.xpose.msra.mxu1 %v14550_v0  ;;  %v14557_v0 = vld [vmem:[#allocation179_spill] sm:$0xff] }
 0x6d7   : > { %5302 = vmatpush.bf16.xpose.msrb.mxu0 %v10552_v52 }
 0x6d9   : > { %4055 = vmatpush.bf16.xpose.msrb.mxu2 %v14552_v11 }
 0x6db   : > { %4225 = vmatpush.bf16.xpose.msra.mxu3 %v14551_v38 }
 0x6de   : > { %3896 = vmatpush.bf16.xpose.msra.mxu1 %v14553_v32  ;;  %v14559_v32 = vld [vmem:[#allocation186_spill] sm:$0xff] }
 0x6df   : > { %5303 = vmatpush.bf16.xpose.msrb.mxu0 %v10584_v47  ;;  %v11047_v47 = vld [vmem:[%s13072_s2 + $0xd0] sm:$0xff] }
 0x6e1   : > { %4056 = vmatpush.bf16.xpose.msrb.mxu2 %v14556_v2  ;;  %v11067_v2 = vpop.f32.mrf.mxu1 }
 0x6e2   : > { %14566 = vst [vmem:[#allocation105_spill] sm:$0xff] %v11067_v2  ;;  %v11084_v2 = vperm.slane %v10947_v15, 1 }
 0x6e3   : > { %4226 = vmatpush.bf16.xpose.msra.mxu3 %v14554_v42  ;;  %v5025_v11 = vpop.f32.mrf.mxu0  ;;  %v14571_v42 = vld [vmem:[#allocation161_spill] sm:$0xff] }
 0x6e4   : > { %14572 = vst [vmem:[#allocation228_spill] sm:$0xff] %v11084_v2 }
 0x6e6   : > { %3897 = vmatpush.bf16.xpose.msra.mxu1 %v14558_v31  ;;  %7051 = vmatmul.msk.bf16.vlgmr.msrb.gmra.mxu0 %vm1158_vm5, %v7240_v28  ;;  %v5551_v31 = vsel %vm1158_vm5, %v14562_v17, 0  ;;  %v14564_v28 = vld [vmem:[#allocation171_spill] sm:$0xff]  ;;  %v11069_v17 = vpop.f32.mrf.mxu2 }
 0x6e7   : > { %5604 = vmatpush.bf16.xpose.msra.mxu0 %v5554_v34  ;;  %v4311_v34 = vsel %vm1158_vm5, %v14561_v62, 0  ;;  %14567 = vst [vmem:[#allocation229_spill] sm:$0xff] %v11069_v17  ;;  %v11089_v17 = vpop.f32.mrf.mxu3 }
 0x6e8   : > { %6908 = vmatmul.msk.bf16.vlgmr.msrb.gmra.mxu2 %vm1158_vm5, %v11047_v47  ;;  %14574 = vst [vmem:[#allocation63_spill] sm:$0xff] %v11089_v17 }
 0x6e9   : > { %4201 = vmatpush.bf16.xpose.msra.mxu2 %v14557_v0  ;;  %v14565_v0 = vld [vmem:[#allocation172_spill] sm:$0xff] }
 0x6eb   : > { %4227 = vmatpush.bf16.xpose.msra.mxu3 %v14559_v32  ;;  %v14570_v32 = vld [vmem:[#allocation237_spill] sm:$0xff]  ;;  %v11100_v17 = vpop.f32.mrf.mxu0 }
 0x6ed   : > { %6885 = vmatmul.msk.bf16.vlgmr.msra.gmra.mxu1 %vm1158_vm5, %v10782_v18 }
 0x6ee   : > { %4030 = vmatpush.bf16.xpose.msrb.mxu1 %v14560_v35  ;;  %v7017_v35 = vld [vmem:[%s13073_s3 + $0x42] ss:$8 sm:$0xf]  ;;  %v3754_v15 = vpop.f32.mrf.mxu2 }
 0x6ef   : > { %5605 = vmatpush.bf16.xpose.msra.mxu0 %v5551_v31  ;;  %v11065_v62 = vperm.slane %v7017_v35, 0  ;;  %v14569_v31 = vld [vmem:[#allocation59_spill] sm:$0xff] }
 0x6f1   : > { %4202 = vmatpush.bf16.xpose.msra.mxu2 %v14564_v28  ;;  %v5548_v28 = vsel %vm1158_vm5, %v14569_v31, 0  ;;  %v5103_v18 = vmul.f32 %v11065_v62, %v5025_v11  ;;  %v11087_v31 = vperm.slane %v10974_v33, 2  ;;  %v3574_v11 = vpop.f32.mrf.mxu1 }
 0x6f2   : > { %6931 = vmatmul.msk.bf16.vlgmr.msra.gmra.mxu3 %vm1158_vm5, %v14565_v0  ;;  %v7241_v0 = vld [vmem:[%s13072_s2 + $0x148] sm:$0xff] }
 0x6f3   : > { %4370 = vmatpush.bf16.xpose.msrb.mxu3 %v4311_v34  ;;  %v14568_v34 = vld [vmem:[#allocation90_spill] sm:$0xff]  ;;  %v11081_v35 = vadd.f32 %v5103_v18, %v10937_v45  ;;  %14573 = vst [vmem:[#allocation230_spill] sm:$0xff] %v11087_v31  ;;  %v3634_v18 = vmul.f32 %v11084_v2, %v3574_v11  ;;  %v3796_v22 = vmul.f32 %v11087_v31, %v3754_v15  ;;  %v14582_v15 = vld [vmem:[#allocation47_spill] sm:$0xff]  ;;  %v5030_v40 = vpop.f32.mrf.mxu0 }
 0x6f4   : > { %v5111_v43 = vmul.f32 %v11065_v62, %v5030_v40 }
 0x6f5   : > { %v11107_v38 = vadd.f32 %v3796_v22, %v10969_v24  ;;  %v3937_v24 = vpop.f32.mrf.mxu3 }
 0x6f6   : > { %4031 = vmatpush.bf16.xpose.msrb.mxu1 %v14568_v34  ;;  %7052 = vmatmul.msk.bf16.gmra.mxu0 %vm1158_vm5, %v7241_v0  ;;  %v14577_v34 = vld [vmem:[#allocation240_spill] sm:$0xff]  ;;  %v11103_v0 = vadd.f32 %v3634_v18, %v10966_v9  ;;  %v11122_v9 = vld [vmem:[%s13072_s2 + $0xe8] sm:$0xff]  ;;  %v11132_v52 = vpop.f32.mrf.mxu2 }
 0x6f7   : > { %5606 = vmatpush.bf16.xpose.msra.mxu0 %v5548_v28  ;;  %v14575_v28 = vld [vmem:[#allocation81_spill] sm:$0xff]  ;;  %v14581_v18 = vld [vmem:[#allocation72_spill] sm:$0xff]  ;;  %14583 = vst [vmem:[#allocation57_spill] sm:$0xff] %v11132_v52 }
 0x6f8   : > { %6909 = vmatmul.msk.bf16.gmra.mxu2 %vm1158_vm5, %v10984_v5  ;;  %v14588_v52 = vld [vmem:[#allocation41_spill] sm:$0xff] }
 0x6f9   : > { %4203 = vmatpush.bf16.xpose.msra.mxu2 %v14571_v42  ;;  %v14576_v42 = vld [vmem:[#allocation53_spill] sm:$0xff] }
 0x6fa   : > { %v5545_v45 = vsel %vm1158_vm5, %v14576_v42, 0  ;;  %v11112_v42 = vld [vmem:[%s13073_s3 + $0x24] ss:$8 sm:$0xf] }
 0x6fb   : > { %4371 = vmatpush.bf16.xpose.msrb.mxu3 %v14570_v32  ;;  %v11115_v11 = vperm.slane %v11112_v42, 3 }
 0x6fd   : > { %14579 = vst [vmem:[#allocation36_spill] sm:$0xff] %v11115_v11  ;;  %6886 = vmatmul.msk.bf16.gmra.mxu1 %vm1158_vm5, %v10836_v27  ;;  %v3961_v22 = vmul.f32 %v11115_v11, %v3937_v24  ;;  %v11141_v24 = vadd.f32 %v5111_v43, %v11002_v46  ;;  %v14590_v43 = vld [vmem:[#allocation208_spill] sm:$0xff] }
 0x6fe   : > { %4032 = vmatpush.bf16.xpose.msrb.mxu1 %v14575_v28  ;;  %v14578_v28 = vld [vmem:[#allocation151_spill] sm:$0xff]  ;;  %v3759_v39 = vpop.f32.mrf.mxu2 }
 0x6ff   : > { %5607 = vmatpush.bf16.xpose.msra.mxu0 %v5545_v45  ;;  %v11127_v45 = vpop.f32.mrf.mxu1  ;;  %v11135_v27 = vadd.f32 %v3961_v22, %v10996_v21  ;;  %v5539_v21 = vsel %vm1158_vm5, %v14588_v52, 0  ;;  %v3804_v40 = vmul.f32 %v11087_v31, %v3759_v39  ;;  %v14591_v52 = vld [vmem:[#allocation58_spill] sm:$0xff]  ;;  %v14593_v39 = vld [vmem:[#allocation123_spill] sm:$0xff] }
 0x700   : > { %14580 = vst [vmem:[#allocation97_spill] sm:$0xff] %v11127_v45  ;;  %v11143_v45 = vpop.f32.mrf.mxu3  ;;  %v14597_v31 = vld [vmem:[#allocation251_spill] sm:$0xff] }
 0x701   : > { %4204 = vmatpush.bf16.xpose.msra.mxu2 %v14578_v28  ;;  %v5542_v28 = vsel %vm1158_vm5, %v14582_v15, 0  ;;  %14586 = vst [vmem:[#allocation88_spill] sm:$0xff] %v11143_v45  ;;  %v14587_v15 = vld [vmem:[#allocation64_spill] sm:$0xff]  ;;  %v11156_v46 = vadd.f32 %v3804_v40, %v11020_v63  ;;  %v14596_v63 = vld [vmem:[#allocation29_spill] sm:$0xff] }
 0x702   : > { %6932 = vmatmul.msk.bf16.gmra.mxu3 %vm1158_vm5, %v11122_v9  ;;  %v5533_v40 = vsel %vm1158_vm5, %v14596_v63, 0  ;;  %v14602_v63 = vld [vmem:[#allocation111_spill] sm:$0xff] }
 0x703   : > { %4372 = vmatpush.bf16.xpose.msrb.mxu3 %v14577_v34 }
 0x706   : > { %4033 = vmatpush.bf16.xpose.msrb.mxu1 %v14581_v18  ;;  %v11210_v20 = vpop.f32.mrf.mxu2 }
 0x707   : > { %5608 = vmatpush.bf16.xpose.msra.mxu0 %v5542_v28  ;;  %v3579_v18 = vpop.f32.mrf.mxu1  ;;  %v14589_v28 = vld [vmem:[#allocation247_spill] sm:$0xff]  ;;  %14608 = vst [vmem:[#allocation210_spill] sm:$0xff] %v11210_v20  ;;  %v11226_v20 = vperm.slane %v11112_v42, 2 }
 0x708   : > { %v3642_v22 = vmul.f32 %v11084_v2, %v3579_v18  ;;  %v3942_v45 = vpop.f32.mrf.mxu3  ;;  %v14592_v18 = vld [vmem:[#allocation35_spill] sm:$0xff] }
 0x709   : > { %4205 = vmatpush.bf16.xpose.msra.mxu2 %v14585_v12  ;;  %v3969_v30 = vmul.f32 %v11115_v11, %v3942_v45  ;;  %v5536_v2 = vsel %vm1158_vm5, %v14592_v18, 0  ;;  %v14598_v45 = vld [vmem:[#allocation118_spill] sm:$0xff]  ;;  %v14599_v18 = vld [vmem:[#allocation257_spill] sm:$0xff]  ;;  %v11203_v11 = vld [vmem:[%s13072_s2 + $0xf0] sm:$0xff]  ;;  %14612 = vst [vmem:[#allocation55_spill] sm:$0xff] %v11226_v20 }
 0x70a   : > { %v11152_v12 = vadd.f32 %v3642_v22, %v11017_v23  ;;  %v14594_v23 = vld [vmem:[#allocation125_spill] sm:$0xff]  ;;  %v14595_v22 = vld [vmem:[#allocation52_spill] sm:$0xff] }
 0x70b   : > { %4373 = vmatpush.bf16.xpose.msrb.mxu3 %v14584_v41 }
 0x70e   : > { %4034 = vmatpush.bf16.xpose.msrb.mxu1 %v14587_v15 }
 0x70f   : > { %5609 = vmatpush.bf16.xpose.msra.mxu0 %v5539_v21  ;;  %v11163_v21 = vadd.f32 %v3969_v30, %v11026_v53  ;;  %v7242_v30 = vld [vmem:[%s13072_s2 + $0x150] sm:$0xff]  ;;  %v14600_v53 = vld [vmem:[#allocation46_spill] sm:$0xff] }
 0x711   : > { %4206 = vmatpush.bf16.xpose.msra.mxu2 %v14590_v43  ;;  %v14607_v43 = vld [vmem:[#allocation102_spill] sm:$0xff] }
 0x713   : > { %4374 = vmatpush.bf16.xpose.msrb.mxu3 %v14589_v28 }
 0x716   : > { %4035 = vmatpush.bf16.xpose.msrb.mxu1 %v14591_v52 }
 0x717   : > { %5610 = vmatpush.bf16.xpose.msra.mxu0 %v5536_v2  ;;  %v14601_v2 = vld [vmem:[#allocation254_spill] sm:$0xff] }
 0x719   : > { %4207 = vmatpush.bf16.xpose.msra.mxu2 %v14594_v23  ;;  %v11181_v23 = vpop.f32.mrf.mxu0 }
 0x71a   : > { %14603 = vst [vmem:[#allocation79_spill] sm:$0xff] %v11181_v23 }
 0x71b   : > { %4375 = vmatpush.bf16.xpose.msrb.mxu3 %v14593_v39 }
 0x71e   : > { %4036 = vmatpush.bf16.xpose.msrb.mxu1 %v14595_v22 }
 0x71f   : > { %5611 = vmatpush.bf16.xpose.msra.mxu0 %v5533_v40  ;;  %v14604_v40 = vld [vmem:[#allocation227_spill] sm:$0xff] }
 0x721   : > { %4208 = vmatpush.bf16.xpose.msra.mxu2 %v14598_v45 }
 0x723   : > { %4376 = vmatpush.bf16.xpose.msrb.mxu3 %v14597_v31  ;;  %v5165_v44 = vpop.f32.mrf.mxu0 }
 0x726   : > { %7072 = vmatmul.msk.bf16.vlgmr.msra.gmra.mxu0 %vm1158_vm5, %v7242_v30  ;;  %4037 = vmatpush.bf16.xpose.msrb.mxu1 %v14600_v53  ;;  %v14605_v30 = vld [vmem:[#allocation260_spill] sm:$0xff] }
 0x727   : > { %5744 = vmatpush.bf16.xpose.msrb.mxu0 %v14587_v15  ;;  %v11186_v15 = vld [vmem:[%s13072_s2 + $0xe0] sm:$0xff] }
 0x728   : > { %6929 = vmatmul.msk.bf16.vlgmr.msra.gmra.mxu2 %vm1158_vm5, %v11186_v15 }
 0x729   : > { %4351 = vmatpush.bf16.xpose.msrb.mxu2 %v14599_v18 }
 0x72b   : > { %4377 = vmatpush.bf16.xpose.msrb.mxu3 %v14601_v2  ;;  %v14626_v2 = vld [vmem:[#allocation245_spill] sm:$0xff] }
 0x72d   : > { %6906 = vmatmul.msk.bf16.vlgmr.msrb.gmra.mxu1 %vm1158_vm5, %v11047_v47 }
 0x72e   : > { %4182 = vmatpush.bf16.xpose.msra.mxu1 %v14602_v63  ;;  %v7038_v63 = vld [vmem:[%s13073_s3 + $0x43] ss:$8 sm:$0xf] }
 0x72f   : > { %5745 = vmatpush.bf16.xpose.msrb.mxu0 %v14591_v52  ;;  %v11198_v45 = vperm.slane %v7038_v63, 0  ;;  %v11207_v52 = vpop.f32.mrf.mxu1  ;;  %v14610_v63 = vld [vmem:[#allocation162_spill] sm:$0xff] }
 0x730   : > { %14606 = vst [vmem:[#allocation69_spill] sm:$0xff] %v11207_v52  ;;  %v11223_v52 = vperm.slane %v10974_v33, 1  ;;  %v11236_v33 = vpop.f32.mrf.mxu0 }
 0x731   : > { %4352 = vmatpush.bf16.xpose.msrb.mxu2 %v14605_v30  ;;  %v14609_v30 = vld [vmem:[#allocation233_spill] sm:$0xff]  ;;  %v5243_v47 = vmul.f32 %v11198_v45, %v5165_v44 }
 0x732   : > { %6952 = vmatmul.msk.bf16.vlgmr.msrb.gmra.mxu3 %vm1158_vm5, %v11203_v11  ;;  %14611 = vst [vmem:[#allocation61_spill] sm:$0xff] %v11223_v52  ;;  %v14614_v44 = vld [vmem:[#allocation93_spill] sm:$0xff] }
 0x733   : > { %4510 = vmatpush.bf16.xpose.msra.mxu3 %v14604_v40  ;;  %v7243_v40 = vld [vmem:[%s13072_s2 + $0x158] sm:$0xff]  ;;  %v11220_v23 = vadd.f32 %v5243_v47, %v11081_v35  ;;  %v3918_v47 = vpop.f32.mrf.mxu2 }
 0x736   : > { %4183 = vmatpush.bf16.xpose.msra.mxu1 %v14607_v43  ;;  %v11228_v43 = vpop.f32.mrf.mxu3  ;;  %7073 = vmatmul.msk.bf16.gmra.mxu0 %vm1158_vm5, %v7243_v40 }
 0x737   : > { %5746 = vmatpush.bf16.xpose.msrb.mxu0 %v14595_v22  ;;  %14613 = vst [vmem:[#allocation73_spill] sm:$0xff] %v11228_v43  ;;  %v3735_v22 = vpop.f32.mrf.mxu1  ;;  %v14616_v43 = vld [vmem:[#allocation153_spill] sm:$0xff] }
 0x738   : > { %6930 = vmatmul.msk.bf16.gmra.mxu2 %vm1158_vm5, %v11122_v9  ;;  %v3795_v35 = vmul.f32 %v11223_v52, %v3735_v22 }
 0x739   : > { %4353 = vmatpush.bf16.xpose.msrb.mxu2 %v14610_v63  ;;  %v14615_v63 = vld [vmem:[#allocation239_spill] sm:$0xff] }
 0x73a   : > { %v11242_v40 = vadd.f32 %v3795_v35, %v11103_v0 }
 0x73b   : > { %4511 = vmatpush.bf16.xpose.msra.mxu3 %v14609_v30  ;;  %v3960_v30 = vmul.f32 %v11226_v20, %v3918_v47  ;;  %v14620_v47 = vld [vmem:[#allocation242_spill] sm:$0xff] }
 0x73d   : > { %6907 = vmatmul.msk.bf16.gmra.mxu1 %vm1158_vm5, %v10984_v5  ;;  %v5170_v5 = vpop.f32.mrf.mxu0 }
 0x73e   : > { %4184 = vmatpush.bf16.xpose.msra.mxu1 %v14614_v44  ;;  %v11245_v44 = vadd.f32 %v3960_v30, %v11107_v38  ;;  %v4077_v38 = vpop.f32.mrf.mxu3  ;;  %v14618_v30 = vld [vmem:[#allocation84_spill] sm:$0xff]  ;;  %v5251_v18 = vmul.f32 %v11198_v45, %v5170_v5 }
 0x73f   : > { %5747 = vmatpush.bf16.xpose.msrb.mxu0 %v14600_v53  ;;  %v11260_v53 = vld [vmem:[%s13072_s2 + $0xf8] sm:$0xff]  ;;  %v11266_v35 = vpop.f32.mrf.mxu1 }
 0x740   : > { %14619 = vst [vmem:[#allocation235_spill] sm:$0xff] %v11266_v35  ;;  %v14625_v35 = vld [vmem:[#allocation75_spill] sm:$0xff] }
 0x741   : > { %4354 = vmatpush.bf16.xpose.msrb.mxu2 %v14616_v43  ;;  %v11269_v43 = vpop.f32.mrf.mxu2 }
 0x742   : > { %6953 = vmatmul.msk.bf16.gmra.mxu3 %vm1158_vm5, %v11260_v53  ;;  %14621 = vst [vmem:[#allocation65_spill] sm:$0xff] %v11269_v43 }
 0x743   : > { %4512 = vmatpush.bf16.xpose.msra.mxu3 %v14615_v63  ;;  %v11250_v63 = vld [vmem:[%s13073_s3 + $0x25] ss:$8 sm:$0xf] }
 0x744   : > { %v11253_v22 = vperm.slane %v11250_v63, 3 }
 0x746   : > { %14617 = vst [vmem:[#allocation49_spill] sm:$0xff] %v11253_v22  ;;  %v4101_v0 = vmul.f32 %v11253_v22, %v4077_v38  ;;  %4185 = vmatpush.bf16.xpose.msra.mxu1 %v14618_v30  ;;  %v11278_v38 = vadd.f32 %v5251_v18, %v11141_v24  ;;  %v11280_v30 = vpop.f32.mrf.mxu3 }
 0x747   : > { %5748 = vmatpush.bf16.xpose.msrb.mxu0 %v14622_v61  ;;  %14624 = vst [vmem:[#allocation172_spill] sm:$0xff] %v11280_v30 }
 0x748   : > { %v11272_v48 = vadd.f32 %v4101_v0, %v11135_v27  ;;  %v14627_v0 = vld [vmem:[#allocation37_spill] sm:$0xff] }
 0x749   : > { %4355 = vmatpush.bf16.xpose.msrb.mxu2 %v14623_v58  ;;  %v3923_v27 = vpop.f32.mrf.mxu2  ;;  %v14628_v58 = vld [vmem:[#allocation66_spill] sm:$0xff] }
 0x74a   : > { %v3968_v61 = vmul.f32 %v11226_v20, %v3923_v27  ;;  %v14630_v27 = vld [vmem:[#allocation60_spill] sm:$0xff] }
 0x74b   : > { %4513 = vmatpush.bf16.xpose.msra.mxu3 %v14620_v47  ;;  %v3740_v47 = vpop.f32.mrf.mxu1 }
 0x74c   : > { %v3803_v43 = vmul.f32 %v11223_v52, %v3740_v47  ;;  %v11292_v24 = vadd.f32 %v3968_v61, %v11156_v46  ;;  %v14632_v46 = vld [vmem:[#allocation54_spill] sm:$0xff]  ;;  %v14637_v52 = vld [vmem:[#allocation152_spill] sm:$0xff] }
 0x74d   : > { %v11330_v61 = vld [vmem:[%s13072_s2 + $0x100] sm:$0xff] }
 0x74e   : > { %4186 = vmatpush.bf16.xpose.msra.mxu1 %v14625_v35  ;;  %v11289_v5 = vadd.f32 %v3803_v43, %v11152_v12  ;;  %v4082_v18 = vpop.f32.mrf.mxu3  ;;  %v14631_v12 = vld [vmem:[#allocation12_spill] sm:$0xff]  ;;  %v7244_v43 = vld [vmem:[%s13072_s2 + $0x160] sm:$0xff] }
 0x74f   : > { %5749 = vmatpush.bf16.xpose.msrb.mxu0 %v14627_v0  ;;  %v4109_v30 = vmul.f32 %v11253_v22, %v4082_v18  ;;  %v14629_v0 = vld [vmem:[#allocation32_spill] sm:$0xff] }
 0x751   : > { %4356 = vmatpush.bf16.xpose.msrb.mxu2 %v14261_v7  ;;  %v11298_v47 = vadd.f32 %v4109_v30, %v11163_v21  ;;  %v11317_v21 = vpop.f32.mrf.mxu0  ;;  %v14633_v30 = vld [vmem:[#allocation232_spill] sm:$0xff]  ;;  %v14701_v7 = vld [vmem:[#allocation323_spill] sm:$0xff] }
 0x753   : > { %4514 = vmatpush.bf16.xpose.msra.mxu3 %v14626_v2 }
 0x756   : > { %4187 = vmatpush.bf16.xpose.msra.mxu1 %v14628_v58  ;;  %v11357_v22 = vpop.f32.mrf.mxu3 }
 0x757   : > { %5750 = vmatpush.bf16.xpose.msrb.mxu0 %v14629_v0  ;;  %v11338_v0 = vpop.f32.mrf.mxu2  ;;  %14640 = vst [vmem:[#allocation243_spill] sm:$0xff] %v11357_v22 }
 0x758   : > { %14635 = vst [vmem:[#allocation53_spill] sm:$0xff] %v11338_v0  ;;  %v11355_v0 = vperm.slane %v11250_v63, 2 }
 0x759   : > { %4357 = vmatpush.bf16.xpose.msrb.mxu2 %v14266_v57 }
 0x75a   : > { %14639 = vst [vmem:[#allocation47_spill] sm:$0xff] %v11355_v0 }
 0x75b   : > { %4515 = vmatpush.bf16.xpose.msra.mxu3 %v8800_v60  ;;  %v14711_v60 = vld [vmem:[#allocation86_spill] sm:$0xff] }
 0x75e   : > { %4188 = vmatpush.bf16.xpose.msra.mxu1 %v14630_v27 }
 0x75f   : > { %5751 = vmatpush.bf16.xpose.msrb.mxu0 %v14631_v12  ;;  %v14636_v12 = vld [vmem:[#allocation238_spill] sm:$0xff] }
 0x761   : > { %4358 = vmatpush.bf16.xpose.msrb.mxu2 %v14273_v56 }
 0x763   : > { %4516 = vmatpush.bf16.xpose.msra.mxu3 %v8832_v3 }
 0x766   : > { %4189 = vmatpush.bf16.xpose.msra.mxu1 %v14632_v46  ;;  %7093 = vmatmul.msk.bf16.vlgmr.msrb.gmra.mxu0 %vm1158_vm5, %v7244_v43 }
 0x767   : > { %5893 = vmatpush.bf16.xpose.msra.mxu0 %v14625_v35  ;;  %v7059_v35 = vld [vmem:[%s13073_s3 + $0x44] ss:$8 sm:$0xf] }
 0x768   : > { %6950 = vmatmul.msk.bf16.vlgmr.msrb.gmra.mxu2 %vm1158_vm5, %v11203_v11  ;;  %v11334_v18 = vperm.slane %v7059_v35, 0  ;;  %v7245_v35 = vld [vmem:[%s13072_s2 + $0x168] sm:$0xff] }
 0x769   : > { %4491 = vmatpush.bf16.xpose.msra.mxu2 %v14414_v49  ;;  %v14696_v49 = vld [vmem:[#allocation147_spill] sm:$0xff] }
 0x76a   : > { %v11563_v56 = vsel %vm1158_vm5, %v14696_v49, 0  ;;  %v14702_v49 = vld [vmem:[#allocation313_spill] sm:$0xff] }
 0x76b   : > { %4517 = vmatpush.bf16.xpose.msra.mxu3 %v8850_v1  ;;  %v2900_v2 = vmul.f32 %v14702_v49, %v14701_v7 }
 0x76d   : > { %6927 = vmatmul.msk.bf16.vlgmr.msra.gmra.mxu1 %vm1158_vm5, %v11186_v15  ;;  %v5305_v15 = vpop.f32.mrf.mxu0 }
 0x76e   : > { %4332 = vmatpush.bf16.xpose.msrb.mxu1 %v14412_v59  ;;  %v5383_v43 = vmul.f32 %v11334_v18, %v5305_v15  ;;  %v14641_v15 = vld [vmem:[#allocation160_spill] sm:$0xff]  ;;  %v14651_v59 = vld [vmem:[#allocation169_spill] sm:$0xff] }
 0x76f   : > { %5894 = vmatpush.bf16.xpose.msra.mxu0 %v14628_v58  ;;  %v11336_v58 = vpop.f32.mrf.mxu1 }
 0x770   : > { %14634 = vst [vmem:[#allocation59_spill] sm:$0xff] %v11336_v58  ;;  %v11349_v20 = vadd.f32 %v5383_v43, %v11220_v23  ;;  %v11352_v58 = vperm.slane %v11112_v42, 1  ;;  %v4058_v23 = vpop.f32.mrf.mxu2  ;;  %v14642_v43 = vld [vmem:[#allocation241_spill] sm:$0xff] }
 0x771   : > { %4492 = vmatpush.bf16.xpose.msra.mxu2 %v14298_v8  ;;  %v4100_v42 = vmul.f32 %v11355_v0, %v4058_v23  ;;  %v14646_v23 = vld [vmem:[#allocation163_spill] sm:$0xff] }
 0x772   : > { %6973 = vmatmul.msk.bf16.vlgmr.msra.gmra.mxu3 %vm1158_vm5, %v11330_v61  ;;  %14638 = vst [vmem:[#allocation240_spill] sm:$0xff] %v11352_v58 }
 0x773   : > { %4920 = vmatpush.bf16.xpose.msrb.mxu3 %v14633_v30 }
 0x776   : > { %4333 = vmatpush.bf16.xpose.msrb.mxu1 %v14293_v29  ;;  %7094 = vmatmul.msk.bf16.gmra.mxu0 %vm1158_vm5, %v7245_v35  ;;  %v14643_v35 = vld [vmem:[#allocation142_spill] sm:$0xff]  ;;  %v14649_v29 = vld [vmem:[#allocation48_spill] sm:$0xff] }
 0x777   : > { %5895 = vmatpush.bf16.xpose.msra.mxu0 %v14630_v27  ;;  %v3899_v27 = vpop.f32.mrf.mxu1 }
 0x778   : > { %6951 = vmatmul.msk.bf16.gmra.mxu2 %vm1158_vm5, %v11260_v53 }
 0x779   : > { %4493 = vmatpush.bf16.xpose.msra.mxu2 %v14637_v52  ;;  %v3959_v52 = vmul.f32 %v11352_v58, %v3899_v27  ;;  %v11379_v27 = vld [vmem:[%s13073_s3 + $0x26] ss:$8 sm:$0xf] }
 0x77b   : > { %4921 = vmatpush.bf16.xpose.msrb.mxu3 %v14636_v12  ;;  %v11367_v12 = vpop.f32.mrf.mxu0  ;;  %v11370_v22 = vadd.f32 %v3959_v52, %v11242_v40  ;;  %v11389_v52 = vld [vmem:[%s13072_s2 + $0x108] sm:$0xff] }
 0x77d   : > { %6928 = vmatmul.msk.bf16.gmra.mxu1 %vm1158_vm5, %v11122_v9  ;;  %v14648_v9 = vld [vmem:[#allocation244_spill] sm:$0xff] }
 0x77e   : > { %4334 = vmatpush.bf16.xpose.msrb.mxu1 %v14641_v15  ;;  %v11374_v15 = vadd.f32 %v4100_v42, %v11245_v44  ;;  %v4229_v44 = vpop.f32.mrf.mxu3  ;;  %v11397_v42 = vpop.f32.mrf.mxu2 }
 0x77f   : > { %5896 = vmatpush.bf16.xpose.msra.mxu0 %v14632_v46  ;;  %v11394_v46 = vpop.f32.mrf.mxu1  ;;  %14647 = vst [vmem:[#allocation247_spill] sm:$0xff] %v11397_v42  ;;  %v14652_v42 = vld [vmem:[#allocation248_spill] sm:$0xff] }
 0x780   : > { %14645 = vst [vmem:[#allocation41_spill] sm:$0xff] %v11394_v46 }
 0x781   : > { %4494 = vmatpush.bf16.xpose.msra.mxu2 %v14643_v35 }
 0x782   : > { %6974 = vmatmul.msk.bf16.gmra.mxu3 %vm1158_vm5, %v11389_v52 }
 0x783   : > { %4922 = vmatpush.bf16.xpose.msrb.mxu3 %v14642_v43  ;;  %v11382_v43 = vperm.slane %v11379_v27, 3  ;;  %v5310_v8 = vpop.f32.mrf.mxu0 }
 0x784   : > { %v5391_v30 = vmul.f32 %v11334_v18, %v5310_v8 }
 0x785   : > { %14644 = vst [vmem:[#allocation64_spill] sm:$0xff] %v11382_v43  ;;  %v4253_v40 = vmul.f32 %v11382_v43, %v4229_v44 }
 0x786   : > { %4335 = vmatpush.bf16.xpose.msrb.mxu1 %v14646_v23  ;;  %v11407_v44 = vadd.f32 %v5391_v30, %v11278_v38  ;;  %v11409_v46 = vpop.f32.mrf.mxu3 }
 0x787   : > { %v11400_v35 = vadd.f32 %v4253_v40, %v11272_v48  ;;  %5897 = vmatpush.bf16.xpose.msra.mxu0 %v14649_v29  ;;  %14650 = vst [vmem:[#allocation58_spill] sm:$0xff] %v11409_v46  ;;  %v3904_v23 = vpop.f32.mrf.mxu1  ;;  %v4063_v40 = vpop.f32.mrf.mxu2 }
 0x788   : > { %v3967_v48 = vmul.f32 %v11352_v58, %v3904_v23  ;;  %v4108_v29 = vmul.f32 %v11355_v0, %v4063_v40  ;;  %v14654_v23 = vld [vmem:[#allocation205_spill] sm:$0xff]  ;;  %v14659_v40 = vld [vmem:[#allocation30_spill] sm:$0xff] }
 0x789   : > { %4495 = vmatpush.bf16.xpose.msra.mxu2 %v14306_v19  ;;  %v11427_v58 = vsel %vm1158_vm5, %v14654_v23, 0  ;;  %v14663_v23 = vld [vmem:[#allocation189_spill] sm:$0xff] }
 0x78a   : > { %v11417_v8 = vadd.f32 %v3967_v48, %v11289_v5  ;;  %v11421_v38 = vadd.f32 %v4108_v29, %v11292_v24  ;;  %14655 = vst [vmem:[#allocation35_spill] sm:$0xff] %v11427_v58  ;;  %v14656_v5 = vld [vmem:[#allocation42_spill] sm:$0xff]  ;;  %v14657_v24 = vld [vmem:[#allocation197_spill] sm:$0xff]  ;;  %v7246_v29 = vld [vmem:[%s13072_s2 + $0x170] sm:$0xff] }
 0x78b   : > { %4923 = vmatpush.bf16.xpose.msrb.mxu3 %v14648_v9  ;;  %v14653_v9 = vld [vmem:[#allocation22_spill] sm:$0xff]  ;;  %v11438_v48 = vsel %vm1158_vm5, %v14657_v24, 0  ;;  %v14665_v24 = vld [vmem:[#allocation103_spill] sm:$0xff]  ;;  %v11462_v0 = vpop.f32.mrf.mxu0 }
 0x78c   : > { %14658 = vst [vmem:[#allocation123_spill] sm:$0xff] %v11438_v48 }
 0x78d   : > { %14697 = vst [vmem:[#allocation22_spill] sm:$0xff] %v11563_v56 }
 0x78e   : > { %4336 = vmatpush.bf16.xpose.msrb.mxu1 %v14651_v59  ;;  %v4234_v30 = vpop.f32.mrf.mxu3 }
 0x78f   : > { %5898 = vmatpush.bf16.xpose.msra.mxu0 %v14653_v9  ;;  %v4261_v46 = vmul.f32 %v11382_v43, %v4234_v30  ;;  %v14662_v30 = vld [vmem:[#allocation77_spill] sm:$0xff] }
 0x791   : > { %4496 = vmatpush.bf16.xpose.msra.mxu2 %v14314_v54  ;;  %v11430_v9 = vadd.f32 %v4261_v46, %v11298_v47  ;;  %v14660_v47 = vld [vmem:[#allocation182_spill] sm:$0xff] }
 0x792   : > { %v11446_v46 = vsel %vm1158_vm5, %v14660_v47, 0 }
 0x793   : > { %4924 = vmatpush.bf16.xpose.msrb.mxu3 %v14652_v42  ;;  %14661 = vst [vmem:[#allocation52_spill] sm:$0xff] %v11446_v46 }
 0x796   : > { %4337 = vmatpush.bf16.xpose.msrb.mxu1 %v14316_v14 }
 0x797   : > { %5899 = vmatpush.bf16.xpose.msra.mxu0 %v14656_v5  ;;  %v11456_v5 = vsel %vm1158_vm5, %v14663_v23, 0  ;;  %v7080_v23 = vld [vmem:[%s13073_s3 + $0x45] ss:$8 sm:$0xf] }
 0x798   : > { %14664 = vst [vmem:[#allocation29_spill] sm:$0xff] %v11456_v5 }
 0x799   : > { %4497 = vmatpush.bf16.xpose.msra.mxu2 %v14320_v55  ;;  %v14684_v55 = vld [vmem:[#allocation43_spill] sm:$0xff] }
 0x79b   : > { %4925 = vmatpush.bf16.xpose.msrb.mxu3 %v11427_v58  ;;  %v14694_v58 = vld [vmem:[#allocation231_spill] sm:$0xff] }
 0x79e   : > { %4338 = vmatpush.bf16.xpose.msrb.mxu1 %v14439_v26 }
 0x79f   : > { %5900 = vmatpush.bf16.xpose.msra.mxu0 %v14659_v40  ;;  %v14666_v40 = vld [vmem:[#allocation13_spill] sm:$0xff] }
 0x7a0   : > { %v5014_v47 = vsel %vm1158_vm5, %v14666_v40, 0  ;;  %v11477_v40 = vperm.slane %v7080_v23, 0 }
 0x7a1   : > { %4498 = vmatpush.bf16.xpose.msra.mxu2 %v14442_v6  ;;  %v14674_v6 = vld [vmem:[#allocation166_spill] sm:$0xff] }
 0x7a3   : > { %4926 = vmatpush.bf16.xpose.msrb.mxu3 %v11438_v48  ;;  %v14685_v48 = vld [vmem:[#allocation34_spill] sm:$0xff] }
 0x7a6   : > { %7114 = vmatmul.msk.bf16.vlgmr.msra.gmra.mxu0 %vm1158_vm5, %v7246_v29  ;;  %4339 = vmatpush.bf16.xpose.msrb.mxu1 %v14662_v30  ;;  %v14667_v29 = vld [vmem:[#allocation175_spill] sm:$0xff] }
 0x7a7   : > { %6042 = vmatpush.bf16.xpose.msrb.mxu0 %v14651_v59  ;;  %v11468_v43 = vsel %vm1158_vm5, %v14667_v29, 0  ;;  %v14671_v29 = vld [vmem:[#allocation94_spill] sm:$0xff] }
 0x7a8   : > { %6971 = vmatmul.msk.bf16.vlgmr.msra.gmra.mxu2 %vm1158_vm5, %v11330_v61  ;;  %14668 = vst [vmem:[#allocation251_spill] sm:$0xff] %v11468_v43  ;;  %v14689_v59 = vld [vmem:[#allocation270_spill] sm:$0xff] }
 0x7a9   : > { %4901 = vmatpush.bf16.xpose.msrb.mxu2 %v11446_v46  ;;  %v11484_v46 = vpop.f32.mrf.mxu2 }
 0x7aa   : > { %14672 = vst [vmem:[#allocation44_spill] sm:$0xff] %v11484_v46  ;;  %v11504_v46 = vperm.slane %v11379_v27, 2 }
 0x7ab   : > { %4927 = vmatpush.bf16.xpose.msrb.mxu3 %v11456_v5  ;;  %v11489_v5 = vsel %vm1158_vm5, %v14674_v6, 0  ;;  %v11506_v6 = vpop.f32.mrf.mxu3 }
 0x7ac   : > { %14675 = vst [vmem:[#allocation75_spill] sm:$0xff] %v11489_v5 }
 0x7ad   : > { %6948 = vmatmul.msk.bf16.vlgmr.msrb.gmra.mxu1 %vm1158_vm5, %v11203_v11  ;;  %14677 = vst [vmem:[#allocation66_spill] sm:$0xff] %v11504_v46 }
 0x7ae   : > { %4472 = vmatpush.bf16.xpose.msra.mxu1 %v14665_v24  ;;  %v14669_v24 = vld [vmem:[#allocation17_spill] sm:$0xff]  ;;  %14678 = vst [vmem:[#allocation32_spill] sm:$0xff] %v11506_v6  ;;  %v14683_v6 = vld [vmem:[#allocation38_spill] sm:$0xff] }
 0x7af   : > { %6043 = vmatpush.bf16.xpose.msrb.mxu0 %v14316_v14  ;;  %v14673_v14 = vld [vmem:[#allocation21_spill] sm:$0xff] }
 0x7b1   : > { %4902 = vmatpush.bf16.xpose.msrb.mxu2 %v11468_v43  ;;  %v5613_v43 = vpop.f32.mrf.mxu0 }
 0x7b2   : > { %6994 = vmatmul.msk.bf16.vlgmr.msrb.gmra.mxu3 %vm1158_vm5, %v14669_v24  ;;  %v5691_v11 = vmul.f32 %v11477_v40, %v5613_v43  ;;  %v7247_v24 = vld [vmem:[%s13072_s2 + $0x178] sm:$0xff] }
 0x7b3   : > { %5073 = vmatpush.bf16.xpose.msra.mxu3 %v5014_v47  ;;  %v11481_v47 = vpop.f32.mrf.mxu1 }
 0x7b4   : > { %14670 = vst [vmem:[#allocation46_spill] sm:$0xff] %v11481_v47  ;;  %v11498_v23 = vadd.f32 %v5691_v11, %v11349_v20  ;;  %v11501_v47 = vperm.slane %v11250_v63, 1  ;;  %v4210_v11 = vpop.f32.mrf.mxu2 }
 0x7b5   : > { %v4252_v42 = vmul.f32 %v11504_v46, %v4210_v11 }
 0x7b6   : > { %4473 = vmatpush.bf16.xpose.msra.mxu1 %v14671_v29  ;;  %14676 = vst [vmem:[#allocation37_spill] sm:$0xff] %v11501_v47  ;;  %7115 = vmatmul.msk.bf16.gmra.mxu0 %vm1158_vm5, %v7247_v24  ;;  %v1351_v24 = vmul.f32 %v14684_v55, %v14683_v6 }
 0x7b7   : > { %6044 = vmatpush.bf16.xpose.msrb.mxu0 %v14439_v26  ;;  %v14679_v26 = vld [vmem:[#allocation85_spill] sm:$0xff] }
 0x7b8   : > { %6972 = vmatmul.msk.bf16.gmra.mxu2 %vm1158_vm5, %v11389_v52 }
 0x7b9   : > { %4903 = vmatpush.bf16.xpose.msrb.mxu2 %v11489_v5  ;;  %v11514_v63 = vpop.f32.mrf.mxu0  ;;  %v14681_v5 = vld [vmem:[#allocation157_spill] sm:$0xff] }
 0x7ba   : > { %v11518_v29 = vsel %vm1158_vm5, %v14681_v5, 0  ;;  %v11536_v5 = vld [vmem:[%s13073_s3 + $0x27] ss:$8 sm:$0xf] }
 0x7bb   : > { %5074 = vmatpush.bf16.xpose.msra.mxu3 %v14673_v14  ;;  %v4039_v43 = vpop.f32.mrf.mxu1  ;;  %v14680_v14 = vld [vmem:[#allocation23_spill] sm:$0xff]  ;;  %14682 = vst [vmem:[#allocation60_spill] sm:$0xff] %v11518_v29  ;;  %v11539_v6 = vperm.slane %v11536_v5, 3 }
 0x7bc   : > { %v4099_v20 = vmul.f32 %v11501_v47, %v4039_v43 }
 0x7bd   : > { %14687 = vst [vmem:[#allocation12_spill] sm:$0xff] %v11539_v6  ;;  %6949 = vmatmul.msk.bf16.gmra.mxu1 %vm1158_vm5, %v11260_v53  ;;  %v11559_v53 = vpop.f32.mrf.mxu2 }
 0x7be   : > { %4474 = vmatpush.bf16.xpose.msra.mxu1 %v14679_v26  ;;  %v14686_v26 = vld [vmem:[#allocation269_spill] sm:$0xff]  ;;  %v11528_v43 = vadd.f32 %v4099_v20, %v11370_v22  ;;  %v14691_v20 = vld [vmem:[#allocation308_spill] sm:$0xff]  ;;  %14695 = vst [vmem:[#allocation48_spill] sm:$0xff] %v11559_v53 }
 0x7bf   : > { %v1623_v54 = vmul.f32 %v14686_v26, %v14685_v48  ;;  %6045 = vmatpush.bf16.xpose.msrb.mxu0 %v14662_v30  ;;  %v14688_v30 = vld [vmem:[#allocation28_spill] sm:$0xff]  ;;  %v11548_v22 = vld [vmem:[%s13072_s2 + $0x118] sm:$0xff] }
 0x7c0   : > { %v2011_v11 = vmul.f32 %v14689_v59, %v14688_v30 }
 0x7c1   : > { %4904 = vmatpush.bf16.xpose.msrb.mxu2 %v11518_v29  ;;  %v1639_v48 = vadd.f32 %v1623_v54, %v1351_v24  ;;  %v14692_v24 = vld [vmem:[#allocation76_spill] sm:$0xff]  ;;  %v5618_v19 = vpop.f32.mrf.mxu0 }
 0x7c2   : > { %6995 = vmatmul.msk.bf16.gmra.mxu3 %vm1158_vm5, %v11548_v22 }
 0x7c3   : > { %5075 = vmatpush.bf16.xpose.msra.mxu3 %v14680_v14  ;;  %v11531_v14 = vadd.f32 %v4252_v42, %v11374_v15  ;;  %v4379_v15 = vpop.f32.mrf.mxu3  ;;  %v14690_v42 = vld [vmem:[#allocation318_spill] sm:$0xff]  ;;  %v11556_v30 = vpop.f32.mrf.mxu1  ;;  %v2027_v1 = vadd.f32 %v2011_v11, %v1639_v48  ;;  %v14704_v11 = vld [vmem:[#allocation67_spill] sm:$0xff] }
 0x7c4   : > { %v2355_v29 = vmul.f32 %v14691_v20, %v14690_v42  ;;  %v4403_v54 = vmul.f32 %v11539_v6, %v4379_v15  ;;  %14693 = vst [vmem:[#allocation54_spill] sm:$0xff] %v11556_v30  ;;  %v14698_v42 = vld [vmem:[#allocation83_spill] sm:$0xff]  ;;  %v5699_v15 = vmul.f32 %v11477_v40, %v5618_v19 }
 0x7c6   : > { %4475 = vmatpush.bf16.xpose.msra.mxu1 %v14692_v24  ;;  %v11566_v57 = vadd.f32 %v4403_v54, %v11400_v35  ;;  %v2371_v30 = vadd.f32 %v2355_v29, %v2027_v1  ;;  %v14699_v24 = vld [vmem:[#allocation321_spill] sm:$0xff]  ;;  %v11574_v53 = vadd.f32 %v5699_v15, %v11407_v44  ;;  %v4215_v29 = vpop.f32.mrf.mxu2  ;;  %v14709_v15 = vld [vmem:[#allocation215_spill] sm:$0xff] }
 0x7c7   : > { %6046 = vmatpush.bf16.xpose.msrb.mxu0 %v14698_v42  ;;  %v14705_v42 = vld [vmem:[#allocation271_spill] sm:$0xff] }
 0x7c8   : > { %v1359_v19 = vmul.f32 %v14684_v55, %v14705_v42  ;;  %v4260_v55 = vmul.f32 %v11504_v46, %v4215_v29  ;;  %v14712_v42 = vld [vmem:[#allocation273_spill] sm:$0xff] }
 0x7c9   : > { %4905 = vmatpush.bf16.xpose.msrb.mxu2 %v11563_v56  ;;  %v14706_v56 = vld [vmem:[#allocation272_spill] sm:$0xff] }
 0x7ca   : > { %v1631_v1 = vmul.f32 %v14686_v26, %v14706_v56  ;;  %v11600_v26 = vadd.f32 %v4260_v55, %v11421_v38  ;;  %v14716_v38 = vld [vmem:[#allocation129_spill] sm:$0xff] }
 0x7cb   : > { %5076 = vmatpush.bf16.xpose.msra.mxu3 %v14694_v58  ;;  %v14700_v58 = vld [vmem:[#allocation310_spill] sm:$0xff]  ;;  %v11578_v48 = vpop.f32.mrf.mxu3  ;;  %v4044_v54 = vpop.f32.mrf.mxu1 }
 0x7cc   : > { %v2559_v3 = vmul.f32 %v14700_v58, %v14699_v24  ;;  %14703 = vst [vmem:[#allocation205_spill] sm:$0xff] %v11578_v48  ;;  %v4107_v44 = vmul.f32 %v11501_v47, %v4044_v54  ;;  %v14707_v24 = vld [vmem:[#allocation137_spill] sm:$0xff]  ;;  %v1647_v54 = vadd.f32 %v1631_v1, %v1359_v19  ;;  %v14713_v47 = vld [vmem:[#allocation292_spill] sm:$0xff]  ;;  %v11613_v19 = vsel %vm1158_vm5, %v14716_v38, 0 }
 0x7cd   : > { %v11589_v7 = vsel %vm1158_vm5, %v14707_v24, 0  ;;  %v2019_v24 = vmul.f32 %v14689_v59, %v14712_v42  ;;  %14717 = vst [vmem:[#allocation197_spill] sm:$0xff] %v11613_v19  ;;  %v14718_v59 = vld [vmem:[#allocation296_spill] sm:$0xff]  ;;  %v14719_v1 = vld [vmem:[#allocation317_spill] sm:$0xff] }
 0x7ce   : > { %v2575_v35 = vadd.f32 %v2559_v3, %v2371_v30  ;;  %4476 = vmatpush.bf16.xpose.msra.mxu1 %v14704_v11  ;;  %14708 = vst [vmem:[#allocation42_spill] sm:$0xff] %v11589_v7  ;;  %v14710_v3 = vld [vmem:[#allocation312_spill] sm:$0xff]  ;;  %v11597_v56 = vadd.f32 %v4107_v44, %v11417_v8  ;;  %v3340_v44 = vmul.f32 %v14719_v1, %v14718_v59 }
 0x7cf   : > { %v3053_v30 = vmul.f32 %v14710_v3, %v14709_v15  ;;  %6047 = vmatpush.bf16.xpose.msrb.mxu0 %v14711_v60  ;;  %v2035_v8 = vadd.f32 %v2019_v24, %v1647_v54  ;;  %v14721_v54 = vld [vmem:[#allocation327_spill] sm:$0xff]  ;;  %v14722_v24 = vld [vmem:[#allocation305_spill] sm:$0xff] }
 0x7d0   : > { %v2916_v48 = vadd.f32 %v2900_v2, %v2575_v35  ;;  %v14715_v35 = vld [vmem:[#allocation68_spill] sm:$0xff]  ;;  %v2908_v42 = vmul.f32 %v14702_v49, %v14721_v54  ;;  %v14728_v49 = vld [vmem:[#allocation322_spill] sm:$0xff] }
 0x7d1   : > { %4906 = vmatpush.bf16.xpose.msrb.mxu2 %v11589_v7  ;;  %v2363_v60 = vmul.f32 %v14691_v20, %v14715_v35  ;;  %v14723_v35 = vld [vmem:[#allocation320_spill] sm:$0xff]  ;;  %v7248_v54 = vld [vmem:[%s13072_s2 + $0x180] sm:$0xff] }
 0x7d2   : > { %v3069_v2 = vadd.f32 %v3053_v30, %v2916_v48  ;;  %v14720_v30 = vld [vmem:[#allocation249_spill] sm:$0xff] }
 0x7d3   : > { %5077 = vmatpush.bf16.xpose.msra.mxu3 %v14570_v32  ;;  %v14714_v32 = vld [vmem:[#allocation315_spill] sm:$0xff]  ;;  %v4384_v29 = vpop.f32.mrf.mxu3  ;;  %v2379_v20 = vadd.f32 %v2363_v60, %v2035_v8  ;;  %v2567_v55 = vmul.f32 %v14700_v58, %v14720_v30  ;;  %v14727_v60 = vld [vmem:[#allocation324_spill] sm:$0xff] }
 0x7d4   : > { %v3193_v15 = vmul.f32 %v14714_v32, %v14713_v47  ;;  %v4411_v46 = vmul.f32 %v11539_v6, %v4384_v29  ;;  %v3493_v29 = vmul.f32 %v14723_v35, %v14722_v24  ;;  %v3637_v8 = vmul.f32 %v14728_v49, %v14727_v60  ;;  %v14732_v24 = vld [vmem:[#allocation338_spill] sm:$0xff]  ;;  %v14736_v60 = vld [vmem:[#allocation304_spill] sm:$0xff] }
 0x7d5   : > { %v2583_v59 = vadd.f32 %v2567_v55, %v2379_v20  ;;  %v14731_v20 = vld [vmem:[#allocation294_spill] sm:$0xff] }
 0x7d6   : > { %4477 = vmatpush.bf16.xpose.msra.mxu1 %v14473_v16  ;;  %v3209_v47 = vadd.f32 %v3193_v15, %v3069_v2  ;;  %v11618_v48 = vadd.f32 %v4411_v46, %v11430_v9  ;;  %v14724_v9 = vld [vmem:[#allocation287_spill] sm:$0xff]  ;;  %v14725_v15 = vld [vmem:[#allocation122_spill] sm:$0xff]  ;;  %v3201_v30 = vmul.f32 %v14714_v32, %v14731_v20  ;;  %v11668_v20 = vld [vmem:[%s13072_s2 + $0x110] sm:$0xff] }
 0x7d7   : > { %6048 = vmatpush.bf16.xpose.msrb.mxu0 %v14475_v25  ;;  %v3061_v46 = vmul.f32 %v14710_v3, %v14724_v9  ;;  %v2924_v25 = vadd.f32 %v2908_v42, %v2583_v59  ;;  %v11634_v2 = vsel %vm1158_vm5, %v14725_v15, 0  ;;  %v14729_v3 = vld [vmem:[#allocation329_spill] sm:$0xff]  ;;  %v14734_v59 = vld [vmem:[#allocation62_spill] sm:$0xff]  ;;  %v14735_v9 = vld [vmem:[#allocation96_spill] sm:$0xff] }
 0x7d8   : > { %v3356_v38 = vadd.f32 %v3340_v44, %v3209_v47  ;;  %14726 = vst [vmem:[#allocation30_spill] sm:$0xff] %v11634_v2  ;;  %v14730_v44 = vld [vmem:[#allocation325_spill] sm:$0xff]  ;;  %v4102_v15 = vmul.f32 %v14735_v9, %v14734_v59  ;;  %v14737_v32 = vld [vmem:[#allocation115_spill] sm:$0xff] }
 0x7d9   : > { %4907 = vmatpush.bf16.xpose.msrb.mxu2 %v11613_v19  ;;  %v3798_v47 = vmul.f32 %v14730_v44, %v14729_v3  ;;  %v3077_v55 = vadd.f32 %v3061_v46, %v2924_v25  ;;  %v3348_v3 = vmul.f32 %v14719_v1, %v14736_v60  ;;  %v11660_v46 = vsel %vm1158_vm5, %v14737_v32, 0  ;;  %v11672_v1 = vpop.f32.mrf.mxu0  ;;  %v7101_v60 = vld [vmem:[%s13073_s3 + $0x46] ss:$8 sm:$0xf] }
 0x7da   : > { %v3509_v58 = vadd.f32 %v3493_v29, %v3356_v38  ;;  %14738 = vst [vmem:[#allocation182_spill] sm:$0xff] %v11660_v46 }
 0x7db   : > { %5078 = vmatpush.bf16.xpose.msra.mxu3 %v14577_v34  ;;  %v3217_v6 = vadd.f32 %v3201_v30, %v3077_v55  ;;  %v14741_v30 = vld [vmem:[#allocation101_spill] sm:$0xff] }
 0x7dc   : > { %v3653_v42 = vadd.f32 %v3637_v8, %v3509_v58  ;;  %v14739_v58 = vld [vmem:[#allocation33_spill] sm:$0xff]  ;;  %v14740_v8 = vld [vmem:[#allocation31_spill] sm:$0xff] }
 0x7dd   : > { %v3364_v59 = vadd.f32 %v3348_v3, %v3217_v6  ;;  %v11697_v6 = vperm.slane %v7101_v60, 0 }
 0x7de   : > { %4478 = vmatpush.bf16.xpose.msra.mxu1 %v14477_v50  ;;  %v3814_v38 = vadd.f32 %v3798_v47, %v3653_v42  ;;  %v4254_v47 = vmul.f32 %v14740_v8, %v14739_v58  ;;  %v14743_v42 = vld [vmem:[#allocation11_spill] sm:$0xff]  ;;  %v4544_v58 = vmul.f32 %v10786_v37, %v10819_v36 }
 0x7df   : > { %6049 = vmatpush.bf16.xpose.msrb.mxu0 %v14479_v10  ;;  %v14733_v10 = vld [vmem:[#allocation226_spill] sm:$0xff] }
 0x7e0   : > { %v3962_v29 = vmul.f32 %v14733_v10, %v14732_v24 }
 0x7e1   : > { %4908 = vmatpush.bf16.xpose.msrb.mxu2 %v11634_v2 }
 0x7e2   : > { %v3978_v25 = vadd.f32 %v3962_v29, %v3814_v38  ;;  %v14744_v29 = vld [vmem:[#allocation311_spill] sm:$0xff] }
 0x7e3   : > { %5079 = vmatpush.bf16.xpose.msra.mxu3 %v14584_v41  ;;  %v3501_v38 = vmul.f32 %v14723_v35, %v14744_v29  ;;  %v11693_v35 = vld [vmem:[%s13072_s2 + $0x120] sm:$0xff]  ;;  %v14750_v29 = vld [vmem:[#allocation164_spill] sm:$0xff] }
 0x7e4   : > { %v4118_v55 = vadd.f32 %v4102_v15, %v3978_v25  ;;  %v4954_v15 = vmul.f32 %v10916_v13, %v10960_v4  ;;  %v14745_v25 = vld [vmem:[#allocation211_spill] sm:$0xff] }
 0x7e5   : > { %v3517_v3 = vadd.f32 %v3501_v38, %v3364_v59  ;;  %v3645_v36 = vmul.f32 %v14728_v49, %v14745_v25  ;;  %v3806_v38 = vmul.f32 %v14730_v44, %v14750_v29  ;;  %v14751_v59 = vld [vmem:[#allocation106_spill] sm:$0xff]  ;;  %v5753_v49 = vpop.f32.mrf.mxu0  ;;  %v14753_v25 = vld [vmem:[#allocation104_spill] sm:$0xff]  ;;  %v7249_v44 = vld [vmem:[%s13072_s2 + $0x188] sm:$0xff] }
 0x7e6   : > { %4479 = vmatpush.bf16.xpose.msra.mxu1 %v14481_v51  ;;  %7135 = vmatmul.msk.bf16.vlgmr.msrb.gmra.mxu0 %vm1158_vm5, %v7248_v54  ;;  %v14742_v54 = vld [vmem:[#allocation222_spill] sm:$0xff]  ;;  %v4270_v32 = vadd.f32 %v4254_v47, %v4118_v55  ;;  %v11701_v47 = vpop.f32.mrf.mxu1 }
 0x7e7   : > { %6182 = vmatpush.bf16.xpose.msra.mxu0 %v14704_v11  ;;  %v4404_v24 = vmul.f32 %v14743_v42, %v14742_v54  ;;  %14746 = vst [vmem:[#allocation77_spill] sm:$0xff] %v11701_v47  ;;  %v5107_v54 = vmul.f32 %v11065_v62, %v11100_v17  ;;  %v3661_v17 = vadd.f32 %v3645_v36, %v3517_v3 }
 0x7e8   : > { %6992 = vmatmul.msk.bf16.vlgmr.msrb.gmra.mxu2 %vm1158_vm5, %v11668_v20 }
 0x7e9   : > { %5054 = vmatpush.bf16.xpose.msra.mxu2 %v14593_v39 }
 0x7eb   : > { %5080 = vmatpush.bf16.xpose.msra.mxu3 %v14589_v28 }
 0x7ed   : > { %6969 = vmatmul.msk.bf16.vlgmr.msra.gmra.mxu1 %vm1158_vm5, %v11330_v61  ;;  %v14747_v61 = vld [vmem:[#allocation107_spill] sm:$0xff] }
 0x7ee   : > { %4882 = vmatpush.bf16.xpose.msrb.mxu1 %v11660_v46  ;;  %v11705_v55 = vsel %vm1158_vm5, %v14747_v61, 0  ;;  %v3970_v61 = vmul.f32 %v14733_v10, %v14753_v25  ;;  %v11736_v10 = vperm.slane %v11536_v5, 2 }
 0x7ef   : > { %6183 = vmatpush.bf16.xpose.msra.mxu0 %v14473_v16  ;;  %v4420_v16 = vadd.f32 %v4404_v24, %v4270_v32  ;;  %14748 = vst [vmem:[#allocation189_spill] sm:$0xff] %v11705_v55  ;;  %v11709_v24 = vpop.f32.mrf.mxu2  ;;  %v5247_v32 = vmul.f32 %v11198_v45, %v11236_v33  ;;  %v11731_v33 = vperm.slane %v11379_v27, 1 }
 0x7f0   : > { %14749 = vst [vmem:[#allocation13_spill] sm:$0xff] %v11709_v24  ;;  %v7251_v24 = vld [vmem:[%s13072_s2 + $0x198] sm:$0xff] }
 0x7f1   : > { %5055 = vmatpush.bf16.xpose.msra.mxu2 %v14597_v31  ;;  %v4560_v4 = vadd.f32 %v4544_v58, %v4420_v16  ;;  %v5831_v58 = vmul.f32 %v11697_v6, %v5753_v49  ;;  %v14752_v16 = vld [vmem:[#allocation254_spill] sm:$0xff]  ;;  %14754 = vst [vmem:[#allocation175_spill] sm:$0xff] %v11731_v33  ;;  %v14755_v49 = vld [vmem:[#allocation51_spill] sm:$0xff] }
 0x7f2   : > { %7015 = vmatmul.msk.bf16.vlgmr.msra.gmra.mxu3 %vm1158_vm5, %v11693_v35  ;;  %v4110_v3 = vmul.f32 %v14735_v9, %v14755_v49  ;;  %14756 = vst [vmem:[#allocation17_spill] sm:$0xff] %v11736_v10 }
 0x7f3   : > { %5213 = vmatpush.bf16.xpose.msrb.mxu3 %v14741_v30  ;;  %v4970_v60 = vadd.f32 %v4954_v15, %v4560_v4  ;;  %v11728_v15 = vadd.f32 %v5831_v58, %v11498_v23  ;;  %v3822_v4 = vadd.f32 %v3806_v38, %v3661_v17  ;;  %v14757_v23 = vld [vmem:[#allocation98_spill] sm:$0xff]  ;;  %v4191_v38 = vpop.f32.mrf.mxu1 }
 0x7f4   : > { %v11745_v27 = vsel %vm1158_vm5, %v14757_v23, 0  ;;  %v14759_v58 = vld [vmem:[#allocation74_spill] sm:$0xff]  ;;  %v14762_v23 = vld [vmem:[#allocation257_spill] sm:$0xff] }
 0x7f5   : > { %v5123_v29 = vadd.f32 %v5107_v54, %v4970_v60  ;;  %v5695_v54 = vmul.f32 %v11477_v40, %v11514_v63  ;;  %v11740_v60 = vpop.f32.mrf.mxu3  ;;  %14758 = vst [vmem:[#allocation166_spill] sm:$0xff] %v11745_v27  ;;  %v4262_v9 = vmul.f32 %v14740_v8, %v14759_v58  ;;  %v4251_v63 = vmul.f32 %v11731_v33, %v4191_v38 }
 0x7f6   : > { %4883 = vmatpush.bf16.xpose.msrb.mxu1 %v11705_v55  ;;  %7136 = vmatmul.msk.bf16.gmra.mxu0 %vm1158_vm5, %v7249_v44 }
 0x7f7   : > { %6184 = vmatpush.bf16.xpose.msra.mxu0 %v14477_v50  ;;  %v5387_v50 = vmul.f32 %v11334_v18, %v11367_v12  ;;  %v5263_v36 = vadd.f32 %v5247_v32, %v5123_v29  ;;  %v3986_v12 = vadd.f32 %v3970_v61, %v3822_v4  ;;  %v4360_v32 = vpop.f32.mrf.mxu2  ;;  %v14760_v61 = vld [vmem:[#allocation110_spill] sm:$0xff]  ;;  %v5755_v29 = vpop.f32.mrf.mxu0  ;;  %v14761_v4 = vld [vmem:[#allocation212_spill] sm:$0xff]  ;;  %v11759_v49 = vadd.f32 %v4251_v63, %v11528_v43  ;;  %v11785_v63 = vld [vmem:[%s13072_s2 + $0x128] sm:$0xff] }
 0x7f8   : > { %6993 = vmatmul.msk.bf16.gmra.mxu2 %vm1158_vm5, %v11548_v22  ;;  %v4402_v44 = vmul.f32 %v11736_v10, %v4360_v32  ;;  %v4412_v8 = vmul.f32 %v14743_v42, %v14761_v4  ;;  %v14765_v32 = vld [vmem:[#allocation89_spill] sm:$0xff] }
 0x7f9   : > { %5056 = vmatpush.bf16.xpose.msra.mxu2 %v14752_v16  ;;  %v5403_v17 = vadd.f32 %v5387_v50, %v5263_v36  ;;  %v4126_v25 = vadd.f32 %v4110_v3, %v3986_v12  ;;  %v5835_v36 = vmul.f32 %v11697_v6, %v5755_v29  ;;  %v14768_v29 = vld [vmem:[#allocation79_spill] sm:$0xff] }
 0x7fa   : > { %v11764_v3 = vadd.f32 %v4402_v44, %v11531_v14  ;;  %v14764_v14 = vld [vmem:[#allocation114_spill] sm:$0xff] }
 0x7fb   : > { %5214 = vmatpush.bf16.xpose.msrb.mxu3 %v14751_v59  ;;  %v5711_v50 = vadd.f32 %v5695_v54, %v5403_v17  ;;  %v4278_v42 = vadd.f32 %v4262_v9, %v4126_v25  ;;  %v14763_v54 = vld [vmem:[#allocation187_spill] sm:$0xff]  ;;  %v4962_v17 = vmul.f32 %v10916_v13, %v14764_v14  ;;  %v11792_v25 = vsel %vm1158_vm5, %v14765_v32, 0 }
 0x7fc   : > { %v4552_v43 = vmul.f32 %v10786_v37, %v14763_v54  ;;  %14766 = vst [vmem:[#allocation157_spill] sm:$0xff] %v11792_v25  ;;  %v5115_v13 = vmul.f32 %v11065_v62, %v14768_v29  ;;  %v5255_v14 = vmul.f32 %v11198_v45, %v11317_v21  ;;  %v5703_v32 = vmul.f32 %v11477_v40, %v11672_v1 }
 0x7fd   : > { %v11776_v38 = vadd.f32 %v5835_v36, %v5711_v50  ;;  %6970 = vmatmul.msk.bf16.gmra.mxu1 %vm1158_vm5, %v11389_v52  ;;  %v4428_v58 = vadd.f32 %v4412_v8, %v4278_v42  ;;  %v4519_v9 = vpop.f32.mrf.mxu3  ;;  %v11794_v52 = vpop.f32.mrf.mxu1  ;;  %v14770_v50 = vld [vmem:[#allocation227_spill] sm:$0xff]  ;;  %v14771_v36 = vld [vmem:[#allocation181_spill] sm:$0xff] }
 0x7fe   : > { %4884 = vmatpush.bf16.xpose.msrb.mxu1 %v11745_v27  ;;  %14767 = vst [vmem:[#allocation38_spill] sm:$0xff] %v11794_v52 }
 0x7ff   : > { %6185 = vmatpush.bf16.xpose.msra.mxu0 %v14481_v51  ;;  %v11769_v51 = vld [vmem:[%s13073_s3 + $0x40] ss:$8 sm:$0xf]  ;;  %v4568_v44 = vadd.f32 %v4552_v43, %v4428_v58  ;;  %v11799_v4 = vpop.f32.mrf.mxu2  ;;  %v5758_v42 = vpop.f32.mrf.mxu0 }
 0x800   : > { %v11772_v12 = vperm.slane %v11769_v51, 3  ;;  %14769 = vst [vmem:[#allocation43_spill] sm:$0xff] %v11799_v4  ;;  %v5839_v43 = vmul.f32 %v11697_v6, %v5758_v42  ;;  %v14772_v58 = vld [vmem:[#allocation260_spill] sm:$0xff] }
 0x801   : > { %5057 = vmatpush.bf16.xpose.msra.mxu2 %v14762_v23  ;;  %v4978_v54 = vadd.f32 %v4962_v17, %v4568_v44  ;;  %v14773_v17 = vld [vmem:[#allocation80_spill] sm:$0xff] }
 0x802   : > { %7016 = vmatmul.msk.bf16.gmra.mxu3 %vm1158_vm5, %v11785_v63  ;;  %v4543_v37 = vmul.f32 %v11772_v12, %v4519_v9  ;;  %v5395_v9 = vmul.f32 %v11334_v18, %v11462_v0  ;;  %v11821_v45 = vsel %vm1158_vm5, %v14773_v17, 0  ;;  %v14774_v0 = vld [vmem:[#allocation233_spill] sm:$0xff]  ;;  %v14777_v17 = vld [vmem:[#allocation178_spill] sm:$0xff] }
 0x803   : > { %5215 = vmatpush.bf16.xpose.msrb.mxu3 %v14760_v61  ;;  %v5131_v62 = vadd.f32 %v5115_v13, %v4978_v54 }
 0x804   : > { %v11802_v8 = vadd.f32 %v4543_v37, %v11566_v57  ;;  %v11813_v57 = vadd.f32 %v5839_v43, %v11574_v53  ;;  %v14775_v53 = vld [vmem:[#allocation185_spill] sm:$0xff] }
 0x805   : > { %v5271_v37 = vadd.f32 %v5255_v14, %v5131_v62  ;;  %v11817_v29 = vpop.f32.mrf.mxu3  ;;  %v4196_v21 = vpop.f32.mrf.mxu1  ;;  %v14776_v14 = vld [vmem:[#allocation162_spill] sm:$0xff] }
 0x806   : > { %4885 = vmatpush.bf16.xpose.msrb.mxu1 %v11792_v25  ;;  %v4259_v13 = vmul.f32 %v11731_v33, %v4196_v21  ;;  %v14794_v33 = vld [vmem:[#allocation200_spill] sm:$0xff] }
 0x807   : > { %6186 = vmatpush.bf16.xpose.msra.mxu0 %v14771_v36  ;;  %v5411_v44 = vadd.f32 %v5395_v9, %v5271_v37  ;;  %v4365_v18 = vpop.f32.mrf.mxu2  ;;  %v5760_v40 = vpop.f32.mrf.mxu0 }
 0x808   : > { %v4410_v36 = vmul.f32 %v11736_v10, %v4365_v18  ;;  %v11829_v42 = vadd.f32 %v4259_v13, %v11597_v56  ;;  %v5843_v54 = vmul.f32 %v11697_v6, %v5760_v40  ;;  %v14779_v56 = vld [vmem:[#allocation188_spill] sm:$0xff]  ;;  %v14780_v6 = vld [vmem:[#allocation153_spill] sm:$0xff]  ;;  %v14784_v18 = vld [vmem:[#allocation143_spill] sm:$0xff] }
 0x809   : > { %5058 = vmatpush.bf16.xpose.msra.mxu2 %v14772_v58  ;;  %v5719_v1 = vadd.f32 %v5703_v32, %v5411_v44  ;;  %v14778_v32 = vld [vmem:[#allocation239_spill] sm:$0xff]  ;;  %v14781_v44 = vld [vmem:[#allocation24_spill] sm:$0xff]  ;;  %v14787_v40 = vld [vmem:[#allocation245_spill] sm:$0xff] }
 0x80a   : > { %v11834_v43 = vadd.f32 %v4410_v36, %v11600_v26  ;;  %v14782_v26 = vld [vmem:[#allocation242_spill] sm:$0xff]  ;;  %v14783_v13 = vld [vmem:[#allocation192_spill] sm:$0xff] }
 0x80b   : > { %5216 = vmatpush.bf16.xpose.msrb.mxu3 %v14770_v50  ;;  %v11836_v62 = vadd.f32 %v5843_v54, %v5719_v1  ;;  %v14786_v36 = vld [vmem:[#allocation180_spill] sm:$0xff]  ;;  %v14788_v1 = vld [vmem:[#allocation134_spill] sm:$0xff] }
 0x80c   : > { %v14789_v54 = vld [vmem:[#allocation196_spill] sm:$0xff] }
 0x80d   : > { %v4524_v9 = vpop.f32.mrf.mxu3  ;;  %v14800_v10 = vld [vmem:[#allocation256_spill] sm:$0xff] }
 0x80e   : > { %4886 = vmatpush.bf16.xpose.msrb.mxu1 %v11821_v45  ;;  %v4551_v37 = vmul.f32 %v11772_v12, %v4524_v9  ;;  %v14790_v9 = vld [vmem:[#allocation250_spill] sm:$0xff] }
 0x80f   : > { %6187 = vmatpush.bf16.xpose.msra.mxu0 %v14775_v53  ;;  %v14785_v53 = vld [vmem:[#allocation246_spill] sm:$0xff]  ;;  %v11879_v47 = vpop.f32.mrf.mxu2 }
 0x810   : > { %v11841_v21 = vadd.f32 %v4551_v37, %v11618_v48  ;;  %v7250_v48 = vld [vmem:[%s13072_s2 + $0x190] sm:$0xff]  ;;  %14793 = vst [vmem:[#allocation269_spill] sm:$0xff] %v11879_v47  ;;  %v11894_v47 = vperm.slane %v11769_v51, 2 }
 0x811   : > { %5059 = vmatpush.bf16.xpose.msra.mxu2 %v14776_v14  ;;  %v7122_v37 = vld [vmem:[%s13073_s3 + $0x47] ss:$8 sm:$0xf] }
 0x812   : > { %14797 = vst [vmem:[#allocation270_spill] sm:$0xff] %v11894_v47 }
 0x813   : > { %5217 = vmatpush.bf16.xpose.msrb.mxu3 %v14774_v0 }
 0x816   : > { %4887 = vmatpush.bf16.xpose.msrb.mxu1 %v14777_v17 }
 0x817   : > { %6188 = vmatpush.bf16.xpose.msra.mxu0 %v14779_v56  ;;  %v5972_v56 = vperm.slane %v7122_v37, 0  ;;  %v14795_v37 = vld [vmem:[#allocation253_spill] sm:$0xff] }
 0x819   : > { %5060 = vmatpush.bf16.xpose.msra.mxu2 %v14780_v6  ;;  %v14866_v6 = vld [vmem:[#allocation224_spill] sm:$0xff] }
 0x81b   : > { %5218 = vmatpush.bf16.xpose.msrb.mxu3 %v14778_v32 }
 0x81e   : > { %4888 = vmatpush.bf16.xpose.msrb.mxu1 %v14781_v44 }
 0x81f   : > { %6189 = vmatpush.bf16.xpose.msra.mxu0 %v14783_v13  ;;  %v11872_v13 = vld [vmem:[%s13072_s2 + $0x130] sm:$0xff] }
 0x821   : > { %5061 = vmatpush.bf16.xpose.msra.mxu2 %v14784_v18 }
 0x823   : > { %5219 = vmatpush.bf16.xpose.msrb.mxu3 %v14782_v26  ;;  %v5902_v52 = vpop.f32.mrf.mxu0 }
 0x826   : > { %7156 = vmatmul.msk.bf16.vlgmr.msra.gmra.mxu0 %vm1158_vm5, %v7250_v48  ;;  %4889 = vmatpush.bf16.xpose.msrb.mxu1 %v14786_v36  ;;  %v11876_v48 = vpop.f32.mrf.mxu1 }
 0x827   : > { %6322 = vmatpush.bf16.xpose.msrb.mxu0 %v11821_v45  ;;  %14791 = vst [vmem:[#allocation34_spill] sm:$0xff] %v11876_v48  ;;  %v11891_v48 = vperm.slane %v11536_v5, 1 }
 0x828   : > { %7013 = vmatmul.msk.bf16.vlgmr.msra.gmra.mxu2 %vm1158_vm5, %v11693_v35 }
 0x829   : > { %5194 = vmatpush.bf16.xpose.msrb.mxu2 %v14785_v53  ;;  %14796 = vst [vmem:[#allocation28_spill] sm:$0xff] %v11891_v48 }
 0x82b   : > { %5220 = vmatpush.bf16.xpose.msrb.mxu3 %v14787_v40  ;;  %v5904_v5 = vpop.f32.mrf.mxu0  ;;  %v14843_v40 = vld [vmem:[#allocation85_spill] sm:$0xff] }
 0x82d   : > { %6990 = vmatmul.msk.bf16.vlgmr.msrb.gmra.mxu1 %vm1158_vm5, %v11668_v20  ;;  %v5980_v20 = vmul.f32 %v5972_v56, %v5902_v52  ;;  %v14798_v52 = vld [vmem:[#allocation144_spill] sm:$0xff] }
 0x82e   : > { %5035 = vmatpush.bf16.xpose.msra.mxu1 %v14788_v1  ;;  %v14806_v1 = vld [vmem:[#allocation259_spill] sm:$0xff] }
 0x82f   : > { %6323 = vmatpush.bf16.xpose.msrb.mxu0 %v14777_v17  ;;  %v14792_v17 = vld [vmem:[#allocation140_spill] sm:$0xff] }
 0x831   : > { %5195 = vmatpush.bf16.xpose.msrb.mxu2 %v14790_v9  ;;  %v11888_v9 = vadd.f32 %v5980_v20, %v11728_v15  ;;  %v4500_v20 = vpop.f32.mrf.mxu2 }
 0x832   : > { %7036 = vmatmul.msk.bf16.vlgmr.msrb.gmra.mxu3 %vm1158_vm5, %v11872_v13 }
 0x833   : > { %5353 = vmatpush.bf16.xpose.msra.mxu3 %v14789_v54  ;;  %v5984_v54 = vmul.f32 %v5972_v56, %v5904_v5 }
 0x835   : > { %v11914_v4 = vadd.f32 %v5984_v54, %v11776_v38  ;;  %v14801_v54 = vld [vmem:[#allocation150_spill] sm:$0xff] }
 0x836   : > { %5036 = vmatpush.bf16.xpose.msra.mxu1 %v14792_v17  ;;  %7157 = vmatmul.msk.bf16.gmra.mxu0 %vm1158_vm5, %v7251_v24  ;;  %v4542_v17 = vmul.f32 %v11894_v47, %v4500_v20 }
 0x837   : > { %6324 = vmatpush.bf16.xpose.msrb.mxu0 %v14781_v44  ;;  %v4341_v44 = vpop.f32.mrf.mxu1 }
 0x838   : > { %7014 = vmatmul.msk.bf16.gmra.mxu2 %vm1158_vm5, %v11785_v63  ;;  %v4401_v15 = vmul.f32 %v11891_v48, %v4341_v44  ;;  %v11919_v44 = vld [vmem:[%s13073_s3 + $0x41] ss:$8 sm:$0xf] }
 0x839   : > { %5196 = vmatpush.bf16.xpose.msrb.mxu2 %v14795_v37  ;;  %v14799_v37 = vld [vmem:[#allocation204_spill] sm:$0xff]  ;;  %v11938_v20 = vpop.f32.mrf.mxu2 }
 0x83a   : > { %v11908_v24 = vadd.f32 %v4401_v15, %v11759_v49  ;;  %v11929_v49 = vld [vmem:[%s13072_s2 + $0x138] sm:$0xff]  ;;  %v14803_v15 = vld [vmem:[#allocation232_spill] sm:$0xff]  ;;  %14804 = vst [vmem:[#allocation308_spill] sm:$0xff] %v11938_v20 }
 0x83b   : > { %5354 = vmatpush.bf16.xpose.msra.mxu3 %v14794_v33  ;;  %v11896_v33 = vpop.f32.mrf.mxu3 }
 0x83d   : > { %6991 = vmatmul.msk.bf16.gmra.mxu1 %vm1158_vm5, %v11548_v22  ;;  %v5907_v22 = vpop.f32.mrf.mxu0 }
 0x83e   : > { %5037 = vmatpush.bf16.xpose.msra.mxu1 %v14798_v52  ;;  %v11911_v52 = vadd.f32 %v4542_v17, %v11764_v3 }
 0x83f   : > { %6325 = vmatpush.bf16.xpose.msrb.mxu0 %v14786_v36  ;;  %v11922_v36 = vperm.slane %v11919_v44, 3  ;;  %v11935_v17 = vpop.f32.mrf.mxu1 }
 0x840   : > { %14802 = vst [vmem:[#allocation318_spill] sm:$0xff] %v11935_v17 }
 0x841   : > { %5197 = vmatpush.bf16.xpose.msrb.mxu2 %v14800_v10  ;;  %v14805_v10 = vld [vmem:[#allocation50_spill] sm:$0xff]  ;;  %v4505_v18 = vpop.f32.mrf.mxu2 }
 0x842   : > { %7037 = vmatmul.msk.bf16.gmra.mxu3 %vm1158_vm5, %v11929_v49 }
 0x843   : > { %5355 = vmatpush.bf16.xpose.msra.mxu3 %v14799_v37  ;;  %v4929_v3 = vpop.f32.mrf.mxu3  ;;  %v5988_v37 = vmul.f32 %v5972_v56, %v5907_v22 }
 0x844   : > { %v4953_v38 = vmul.f32 %v11922_v36, %v4929_v3 }
 0x845   : > { %v11946_v53 = vadd.f32 %v5988_v37, %v11813_v57 }
 0x846   : > { %5038 = vmatpush.bf16.xpose.msra.mxu1 %v14801_v54  ;;  %v11941_v5 = vadd.f32 %v4953_v38, %v11802_v8  ;;  %v14807_v54 = vld [vmem:[#allocation154_spill] sm:$0xff]  ;;  %v5909_v8 = vpop.f32.mrf.mxu0  ;;  %v14809_v38 = vld [vmem:[#allocation40_spill] sm:$0xff] }
 0x847   : > { %6326 = vmatpush.bf16.xpose.msrb.mxu0 %v14805_v10  ;;  %v4346_v17 = vpop.f32.mrf.mxu1  ;;  %v4550_v10 = vmul.f32 %v11894_v47, %v4505_v18  ;;  %v5992_v22 = vmul.f32 %v5972_v56, %v5909_v8  ;;  %v14813_v56 = vld [vmem:[#allocation221_spill] sm:$0xff]  ;;  %v14840_v47 = vld [vmem:[#allocation94_spill] sm:$0xff] }
 0x848   : > { %v4409_v20 = vmul.f32 %v11891_v48, %v4346_v17  ;;  %v14811_v48 = vld [vmem:[#allocation160_spill] sm:$0xff]  ;;  %v14818_v8 = vld [vmem:[#allocation133_spill] sm:$0xff] }
 0x849   : > { %5198 = vmatpush.bf16.xpose.msrb.mxu2 %v14806_v1  ;;  %v14810_v1 = vld [vmem:[#allocation152_spill] sm:$0xff]  ;;  %v11960_v37 = vadd.f32 %v4550_v10, %v11834_v43  ;;  %v7252_v10 = vld [vmem:[%s13072_s2 + $0x1a0] sm:$0xff] }
 0x84a   : > { %v11957_v57 = vadd.f32 %v4409_v20, %v11829_v42  ;;  %v14814_v42 = vld [vmem:[#allocation142_spill] sm:$0xff]  ;;  %v14815_v20 = vld [vmem:[#allocation163_spill] sm:$0xff]  ;;  %v14816_v43 = vld [vmem:[#allocation244_spill] sm:$0xff] }
 0x84b   : > { %5356 = vmatpush.bf16.xpose.msra.mxu3 %v14803_v15  ;;  %v11948_v3 = vpop.f32.mrf.mxu3  ;;  %v14808_v15 = vld [vmem:[#allocation238_spill] sm:$0xff] }
 0x84e   : > { %5039 = vmatpush.bf16.xpose.msra.mxu1 %v14807_v54  ;;  %v11963_v54 = vadd.f32 %v5992_v22, %v11836_v62  ;;  %v14817_v62 = vld [vmem:[#allocation216_spill] sm:$0xff] }
 0x84f   : > { %6327 = vmatpush.bf16.xpose.msrb.mxu0 %v14809_v38  ;;  %v14812_v38 = vld [vmem:[#allocation241_spill] sm:$0xff]  ;;  %v14821_v22 = vld [vmem:[#allocation248_spill] sm:$0xff] }
 0x851   : > { %5199 = vmatpush.bf16.xpose.msrb.mxu2 %v14810_v1 }
 0x853   : > { %5357 = vmatpush.bf16.xpose.msra.mxu3 %v14808_v15  ;;  %v4934_v15 = vpop.f32.mrf.mxu3 }
 0x854   : > { %v4961_v17 = vmul.f32 %v11922_v36, %v4934_v15  ;;  %v14819_v15 = vld [vmem:[#allocation35_spill] sm:$0xff] }
 0x856   : > { %5040 = vmatpush.bf16.xpose.msra.mxu1 %v14811_v48  ;;  %v11969_v18 = vadd.f32 %v4961_v17, %v11841_v21  ;;  %v14820_v21 = vld [vmem:[#allocation169_spill] sm:$0xff]  ;;  %v14822_v17 = vld [vmem:[#allocation126_spill] sm:$0xff]  ;;  %v14839_v48 = vld [vmem:[#allocation251_spill] sm:$0xff] }
 0x857   : > { %6328 = vmatpush.bf16.xpose.msrb.mxu0 %v14813_v56  ;;  %v14823_v56 = vld [vmem:[#allocation19_spill] sm:$0xff] }
 0x859   : > { %5200 = vmatpush.bf16.xpose.msrb.mxu2 %v14814_v42  ;;  %v14834_v42 = vld [vmem:[#allocation52_spill] sm:$0xff] }
 0x85b   : > { %5358 = vmatpush.bf16.xpose.msra.mxu3 %v14812_v38 }
 0x85e   : > { %5041 = vmatpush.bf16.xpose.msra.mxu1 %v14815_v20  ;;  %v12014_v20 = vpop.f32.mrf.mxu3 }
 0x85f   : > { %6329 = vmatpush.bf16.xpose.msrb.mxu0 %v14817_v62  ;;  %v14824_v62 = vld [vmem:[#allocation123_spill] sm:$0xff] }
 0x861   : > { %5201 = vmatpush.bf16.xpose.msrb.mxu2 %v14818_v8  ;;  %v12009_v8 = vperm.slane %v11769_v51, 1 }
 0x863   : > { %5359 = vmatpush.bf16.xpose.msra.mxu3 %v14816_v43  ;;  %14830 = vst [vmem:[#allocation321_spill] sm:$0xff] %v12009_v8  ;;  %v12012_v43 = vperm.slane %v11919_v44, 2 }
 0x865   : > { %14831 = vst [vmem:[#allocation310_spill] sm:$0xff] %v12012_v43 }
 0x866   : > { %5042 = vmatpush.bf16.xpose.msra.mxu1 %v14820_v21  ;;  %7177 = vmatmul.msk.bf16.vlgmr.msrb.gmra.mxu0 %vm1158_vm5, %v7252_v10  ;;  %v11994_v21 = vld [vmem:[%s13072_s2 + $0x140] sm:$0xff]  ;;  %v11998_v10 = vpop.f32.mrf.mxu1 }
 0x867   : > { %14825 = vst [vmem:[#allocation147_spill] sm:$0xff] %v11998_v10 }
 0x868   : > { %7034 = vmatmul.msk.bf16.vlgmr.msrb.gmra.mxu2 %vm1158_vm5, %v11872_v13 }
 0x869   : > { %5334 = vmatpush.bf16.xpose.msra.mxu2 %v14819_v15  ;;  %v14827_v15 = vld [vmem:[#allocation119_spill] sm:$0xff] }
 0x86b   : > { %5360 = vmatpush.bf16.xpose.msra.mxu3 %v14821_v22  ;;  %v14833_v22 = vld [vmem:[#allocation6_spill] sm:$0xff] }
 0x86d   : > { %7011 = vmatmul.msk.bf16.vlgmr.msra.gmra.mxu1 %vm1158_vm5, %v11693_v35  ;;  %v7253_v35 = vld [vmem:[%s13072_s2 + $0x1a8] sm:$0xff] }
 0x86e   : > { %5175 = vmatpush.bf16.xpose.msrb.mxu1 %v14822_v17  ;;  %v12000_v17 = vpop.f32.mrf.mxu2  ;;  %v4481_v10 = vpop.f32.mrf.mxu1 }
 0x86f   : > { %14826 = vst [vmem:[#allocation83_spill] sm:$0xff] %v12000_v17 }
 0x871   : > { %5335 = vmatpush.bf16.xpose.msra.mxu2 %v14824_v62  ;;  %v14829_v62 = vld [vmem:[#allocation29_spill] sm:$0xff] }
 0x872   : > { %7057 = vmatmul.msk.bf16.vlgmr.msra.gmra.mxu3 %vm1158_vm5, %v11994_v21 }
 0x873   : > { %5661 = vmatpush.bf16.xpose.msrb.mxu3 %v14823_v56  ;;  %v14828_v56 = vld [vmem:[#allocation10_spill] sm:$0xff] }
 0x876   : > { %5176 = vmatpush.bf16.xpose.msrb.mxu1 %v14827_v15  ;;  %7178 = vmatmul.msk.bf16.gmra.mxu0 %vm1158_vm5, %v7253_v35  ;;  %v14832_v15 = vld [vmem:[#allocation112_spill] sm:$0xff] }
 0x878   : > { %7035 = vmatmul.msk.bf16.gmra.mxu2 %vm1158_vm5, %v11929_v49 }
 0x879   : > { %5336 = vmatpush.bf16.xpose.msra.mxu2 %v14829_v62  ;;  %v4910_v62 = vpop.f32.mrf.mxu2 }
 0x87a   : > { %v4952_v51 = vmul.f32 %v12012_v43, %v4910_v62  ;;  %v12048_v62 = vpop.f32.mrf.mxu1 }
 0x87b   : > { %5662 = vmatpush.bf16.xpose.msrb.mxu3 %v14828_v56  ;;  %v4541_v56 = vmul.f32 %v12009_v8, %v4481_v10  ;;  %14835 = vst [vmem:[#allocation323_spill] sm:$0xff] %v12048_v62  ;;  %v14841_v62 = vld [vmem:[#allocation279_spill] sm:$0xff] }
 0x87c   : > { %v12028_v35 = vadd.f32 %v4952_v51, %v11911_v52  ;;  %v5082_v52 = vpop.f32.mrf.mxu3 }
 0x87d   : > { %v12025_v38 = vadd.f32 %v4541_v56, %v11908_v24  ;;  %7012 = vmatmul.msk.bf16.gmra.mxu1 %vm1158_vm5, %v11785_v63  ;;  %v14836_v56 = vld [vmem:[#allocation103_spill] sm:$0xff] }
 0x87e   : > { %5177 = vmatpush.bf16.xpose.msrb.mxu1 %v14832_v15  ;;  %v12033_v15 = vld [vmem:[%s13073_s3 + $0x42] ss:$8 sm:$0xf] }
 0x87f   : > { %v12036_v10 = vperm.slane %v12033_v15, 3  ;;  %v14838_v63 = vld [vmem:[#allocation3_spill] sm:$0xff] }
 0x881   : > { %5337 = vmatpush.bf16.xpose.msra.mxu2 %v14834_v42  ;;  %v5106_v24 = vmul.f32 %v12036_v10, %v5082_v52  ;;  %v12051_v51 = vpop.f32.mrf.mxu2 }
 0x882   : > { %14837 = vst [vmem:[#allocation313_spill] sm:$0xff] %v12051_v51  ;;  %v4486_v17 = vpop.f32.mrf.mxu1  ;;  %v14842_v51 = vld [vmem:[#allocation75_spill] sm:$0xff] }
 0x883   : > { %5663 = vmatpush.bf16.xpose.msrb.mxu3 %v14833_v22  ;;  %v12043_v22 = vld [vmem:[%s13072_s2 + $0x148] sm:$0xff]  ;;  %v12054_v42 = vadd.f32 %v5106_v24, %v11941_v5  ;;  %v4549_v52 = vmul.f32 %v12009_v8, %v4486_v17 }
 0x884   : > { %7058 = vmatmul.msk.bf16.gmra.mxu3 %vm1158_vm5, %v12043_v22  ;;  %v12058_v1 = vpop.f32.mrf.mxu3 }
 0x885   : > { %v12066_v5 = vadd.f32 %v4549_v52, %v11957_v57  ;;  %v14847_v57 = vld [vmem:[#allocation219_spill] sm:$0xff] }
 0x886   : > { %5178 = vmatpush.bf16.xpose.msrb.mxu1 %v14836_v56 }
 0x889   : > { %5338 = vmatpush.bf16.xpose.msra.mxu2 %v14839_v48  ;;  %v4915_v26 = vpop.f32.mrf.mxu2 }
 0x88a   : > { %v4960_v56 = vmul.f32 %v12012_v43, %v4915_v26  ;;  %v12078_v26 = vpop.f32.mrf.mxu0 }
 0x88b   : > { %5664 = vmatpush.bf16.xpose.msrb.mxu3 %v14838_v63 }
 0x88c   : > { %v12069_v24 = vadd.f32 %v4960_v56, %v11960_v37  ;;  %v5087_v63 = vpop.f32.mrf.mxu3  ;;  %v14848_v37 = vld [vmem:[#allocation22_spill] sm:$0xff]  ;;  %v14849_v56 = vld [vmem:[#allocation209_spill] sm:$0xff] }
 0x88d   : > { %v5114_v48 = vmul.f32 %v12036_v10, %v5087_v63  ;;  %v5602_v52 = vsel %vm1158_vm5, %v14849_v56, 0  ;;  %v12104_v56 = vpop.f32.mrf.mxu1 }
 0x88e   : > { %5179 = vmatpush.bf16.xpose.msrb.mxu1 %v14840_v47  ;;  %v14844_v47 = vld [vmem:[#allocation225_spill] sm:$0xff]  ;;  %14853 = vst [vmem:[#allocation67_spill] sm:$0xff] %v12104_v56 }
 0x88f   : > { %v12074_v17 = vadd.f32 %v5114_v48, %v11969_v18  ;;  %v14851_v48 = vld [vmem:[#allocation199_spill] sm:$0xff] }
 0x890   : > { %v5599_v18 = vsel %vm1158_vm5, %v14851_v48, 0 }
 0x891   : > { %5339 = vmatpush.bf16.xpose.msra.mxu2 %v14842_v51  ;;  %v14846_v51 = vld [vmem:[#allocation76_spill] sm:$0xff]  ;;  %v12109_v48 = vpop.f32.mrf.mxu2 }
 0x892   : > { %v12092_v63 = vpop.f32.mrf.mxu0  ;;  %14855 = vst [vmem:[#allocation271_spill] sm:$0xff] %v12109_v48 }
 0x893   : > { %5665 = vmatpush.bf16.xpose.msrb.mxu3 %v14841_v62  ;;  %v14845_v62 = vld [vmem:[#allocation60_spill] sm:$0xff] }
 0x896   : > { %5180 = vmatpush.bf16.xpose.msrb.mxu1 %v14843_v40 }
 0x899   : > { %5340 = vmatpush.bf16.xpose.msra.mxu2 %v14845_v62 }
 0x89b   : > { %5666 = vmatpush.bf16.xpose.msrb.mxu3 %v14844_v47  ;;  %v14850_v47 = vld [vmem:[#allocation198_spill] sm:$0xff] }
 0x89e   : > { %5181 = vmatpush.bf16.xpose.msrb.mxu1 %v14846_v51 }
 0x8a1   : > { %5341 = vmatpush.bf16.xpose.msra.mxu2 %v14848_v37  ;;  %v12120_v37 = vpop.f32.mrf.mxu3 }
 0x8a3   : > { %5667 = vmatpush.bf16.xpose.msrb.mxu3 %v14847_v57  ;;  %v14852_v57 = vld [vmem:[#allocation26_spill] sm:$0xff] }
 0x8a6   : > { %5182 = vmatpush.bf16.xpose.msrb.mxu1 %v14704_v11  ;;  %v12100_v11 = vld [vmem:[%s13072_s2 + $0x150] sm:$0xff] }
 0x8a8   : > { %7055 = vmatmul.msk.bf16.vlgmr.msra.gmra.mxu2 %vm1158_vm5, %v11994_v21 }
 0x8a9   : > { %5642 = vmatpush.bf16.xpose.msrb.mxu2 %v5602_v52  ;;  %v14854_v52 = vld [vmem:[#allocation191_spill] sm:$0xff] }
 0x8ab   : > { %5668 = vmatpush.bf16.xpose.msrb.mxu3 %v14850_v47  ;;  %v5596_v47 = vsel %vm1158_vm5, %v14854_v52, 0  ;;  %v4891_v52 = vpop.f32.mrf.mxu1 }
 0x8ad   : > { %7032 = vmatmul.msk.bf16.vlgmr.msrb.gmra.mxu1 %vm1158_vm5, %v11872_v13  ;;  %v12112_v13 = vpop.f32.mrf.mxu0 }
 0x8ae   : > { %5315 = vmatpush.bf16.xpose.msra.mxu1 %v11589_v7  ;;  %v12118_v7 = vperm.slane %v12033_v15, 2 }
 0x8b0   : > { %14858 = vst [vmem:[#allocation137_spill] sm:$0xff] %v12118_v7 }
 0x8b1   : > { %5643 = vmatpush.bf16.xpose.msrb.mxu2 %v5599_v18  ;;  %v14856_v18 = vld [vmem:[#allocation8_spill] sm:$0xff] }
 0x8b2   : > { %7078 = vmatmul.msk.bf16.vlgmr.msrb.gmra.mxu3 %vm1158_vm5, %v12100_v11 }
 0x8b3   : > { %5801 = vmatpush.bf16.xpose.msra.mxu3 %v14852_v57  ;;  %v12115_v57 = vperm.slane %v11919_v44, 1  ;;  %v5063_v44 = vpop.f32.mrf.mxu2 }
 0x8b4   : > { %v5105_v62 = vmul.f32 %v12118_v7, %v5063_v44  ;;  %v14863_v44 = vld [vmem:[#allocation2_spill] sm:$0xff] }
 0x8b5   : > { %14857 = vst [vmem:[#allocation272_spill] sm:$0xff] %v12115_v57  ;;  %v4951_v51 = vmul.f32 %v12115_v57, %v4891_v52  ;;  %v14862_v52 = vld [vmem:[#allocation177_spill] sm:$0xff] }
 0x8b6   : > { %5316 = vmatpush.bf16.xpose.msra.mxu1 %v11613_v19  ;;  %v14859_v19 = vld [vmem:[#allocation184_spill] sm:$0xff]  ;;  %v12134_v56 = vadd.f32 %v5105_v62, %v12028_v35  ;;  %v5222_v35 = vpop.f32.mrf.mxu3  ;;  %v12157_v62 = vpop.f32.mrf.mxu1 }
 0x8b7   : > { %v12131_v40 = vadd.f32 %v4951_v51, %v12025_v38  ;;  %v12151_v38 = vld [vmem:[%s13072_s2 + $0x158] sm:$0xff]  ;;  %14861 = vst [vmem:[#allocation215_spill] sm:$0xff] %v12157_v62 }
 0x8b8   : > { %7056 = vmatmul.msk.bf16.gmra.mxu2 %vm1158_vm5, %v12043_v22 }
 0x8b9   : > { %5644 = vmatpush.bf16.xpose.msrb.mxu2 %v5596_v47  ;;  %v14860_v47 = vld [vmem:[#allocation4_spill] sm:$0xff] }
 0x8bb   : > { %5802 = vmatpush.bf16.xpose.msra.mxu3 %v14856_v18  ;;  %v5593_v18 = vsel %vm1158_vm5, %v14859_v19, 0 }
 0x8bd   : > { %7033 = vmatmul.msk.bf16.gmra.mxu1 %vm1158_vm5, %v11929_v49  ;;  %v12162_v49 = vpop.f32.mrf.mxu2 }
 0x8be   : > { %5317 = vmatpush.bf16.xpose.msra.mxu1 %v11634_v2  ;;  %v12139_v2 = vld [vmem:[%s13073_s3 + $0x43] ss:$8 sm:$0xf]  ;;  %14864 = vst [vmem:[#allocation312_spill] sm:$0xff] %v12162_v49  ;;  %v12167_v43 = vpop.f32.mrf.mxu3 }
 0x8bf   : > { %v12142_v19 = vperm.slane %v12139_v2, 3 }
 0x8c1   : > { %5645 = vmatpush.bf16.xpose.msrb.mxu2 %v5593_v18  ;;  %v5246_v51 = vmul.f32 %v12142_v19, %v5222_v35  ;;  %v5590_v18 = vsel %vm1158_vm5, %v14862_v52, 0  ;;  %v4896_v35 = vpop.f32.mrf.mxu1 }
 0x8c2   : > { %7079 = vmatmul.msk.bf16.gmra.mxu3 %vm1158_vm5, %v12151_v38  ;;  %v4959_v52 = vmul.f32 %v12115_v57, %v4896_v35  ;;  %v14868_v35 = vld [vmem:[#allocation218_spill] sm:$0xff] }
 0x8c3   : > { %5803 = vmatpush.bf16.xpose.msra.mxu3 %v14860_v47  ;;  %v12144_v47 = vpop.f32.mrf.mxu0  ;;  %v12165_v8 = vadd.f32 %v5246_v51, %v12054_v42 }
 0x8c4   : > { %v12176_v42 = vadd.f32 %v4959_v52, %v12066_v5  ;;  %v14869_v5 = vld [vmem:[#allocation149_spill] sm:$0xff] }
 0x8c6   : > { %5318 = vmatpush.bf16.xpose.msra.mxu1 %v11660_v46  ;;  %v14865_v46 = vld [vmem:[#allocation168_spill] sm:$0xff] }
 0x8c7   : > { %v5587_v62 = vsel %vm1158_vm5, %v14865_v46, 0  ;;  %v14867_v46 = vld [vmem:[#allocation159_spill] sm:$0xff] }
 0x8c9   : > { %5646 = vmatpush.bf16.xpose.msrb.mxu2 %v5590_v18 }
 0x8cb   : > { %5804 = vmatpush.bf16.xpose.msra.mxu3 %v14863_v44  ;;  %v6191_v48 = vpop.f32.mrf.mxu0  ;;  %v5068_v44 = vpop.f32.mrf.mxu2 }
 0x8cc   : > { %v5113_v18 = vmul.f32 %v12118_v7, %v5068_v44  ;;  %v14870_v44 = vld [vmem:[#allocation213_spill] sm:$0xff] }
 0x8ce   : > { %5319 = vmatpush.bf16.xpose.msra.mxu1 %v11705_v55  ;;  %v12179_v51 = vadd.f32 %v5113_v18, %v12069_v24  ;;  %v5227_v55 = vpop.f32.mrf.mxu3  ;;  %v5581_v24 = vsel %vm1158_vm5, %v14869_v5, 0  ;;  %v7143_v18 = vld [vmem:[%s13073_s3 + $0x60] ss:$8 sm:$0xf] }
 0x8cf   : > { %v5254_v32 = vmul.f32 %v12142_v19, %v5227_v55  ;;  %v14871_v55 = vld [vmem:[#allocation207_spill] sm:$0xff] }
 0x8d1   : > { %5647 = vmatpush.bf16.xpose.msrb.mxu2 %v5587_v62  ;;  %v12187_v62 = vadd.f32 %v5254_v32, %v12074_v17  ;;  %v7164_v17 = vld [vmem:[%s13073_s3 + $0x61] ss:$8 sm:$0xf] }
 0x8d3   : > { %5805 = vmatpush.bf16.xpose.msra.mxu3 %v14866_v6  ;;  %v6193_v49 = vpop.f32.mrf.mxu0  ;;  %v5584_v6 = vsel %vm1158_vm5, %v14867_v46, 0  ;;  %v14872_v46 = vld [vmem:[#allocation139_spill] sm:$0xff] }
 0x8d4   : > { %v5578_v32 = vsel %vm1158_vm5, %v14872_v46, 0  ;;  %v7185_v46 = vld [vmem:[%s13073_s3 + $0x62] ss:$8 sm:$0xf] }
 0x8d6   : > { %5320 = vmatpush.bf16.xpose.msra.mxu1 %v11745_v27 }
 0x8d9   : > { %5648 = vmatpush.bf16.xpose.msrb.mxu2 %v5584_v6  ;;  %v14873_v6 = vld [vmem:[#allocation223_spill] sm:$0xff] }
 0x8db   : > { %5806 = vmatpush.bf16.xpose.msra.mxu3 %v14868_v35  ;;  %v6196_v52 = vpop.f32.mrf.mxu0  ;;  %v14874_v35 = vld [vmem:[#allocation18_spill] sm:$0xff] }
 0x8dc   : > { %v5891_v5 = vsel %vm1158_vm5, %v14874_v35, 0 }
 0x8de   : > { %5321 = vmatpush.bf16.xpose.msra.mxu1 %v11792_v25  ;;  %v14880_v25 = vld [vmem:[#allocation183_spill] sm:$0xff] }
 0x8e1   : > { %5649 = vmatpush.bf16.xpose.msrb.mxu2 %v5581_v24  ;;  %v12208_v24 = vperm.slane %v7143_v18, 0 }
 0x8e3   : > { %5807 = vmatpush.bf16.xpose.msra.mxu3 %v14870_v44  ;;  %v12211_v44 = vpop.f32.mrf.mxu0 }
 0x8e6   : > { %5322 = vmatpush.bf16.xpose.msra.mxu1 %v11821_v45  ;;  %v14875_v45 = vld [vmem:[#allocation206_spill] sm:$0xff] }
 0x8e8   : > { %7076 = vmatmul.msk.bf16.vlgmr.msrb.gmra.mxu2 %vm1158_vm5, %v12100_v11 }
 0x8e9   : > { %5782 = vmatpush.bf16.xpose.msra.mxu2 %v14871_v55  ;;  %v12213_v55 = vperm.slane %v7164_v17, 0  ;;  %v14876_v17 = vld [vmem:[#allocation131_spill] sm:$0xff] }
 0x8ea   : > { %v5575_v35 = vsel %vm1158_vm5, %v14876_v17, 0  ;;  %v12254_v17 = vperm.slane %v12139_v2, 2 }
 0x8eb   : > { %5808 = vmatpush.bf16.xpose.msra.mxu3 %v14873_v6  ;;  %v6129_v6 = vmul.f32 %v12208_v24, %v12078_v26  ;;  %v6269_v18 = vmul.f32 %v12213_v55, %v6191_v48  ;;  %v12234_v26 = vpop.f32.mrf.mxu1  ;;  %v14879_v48 = vld [vmem:[#allocation14_spill] sm:$0xff]  ;;  %v6331_v27 = vpop.f32.mrf.mxu0 }
 0x8ec   : > { %14877 = vst [vmem:[#allocation86_spill] sm:$0xff] %v12234_v26 }
 0x8ed   : > { %7053 = vmatmul.msk.bf16.vlgmr.msra.gmra.mxu1 %vm1158_vm5, %v11994_v21  ;;  %v6145_v21 = vadd.f32 %v6129_v6, %v11888_v9  ;;  %v12251_v6 = vperm.slane %v12033_v15, 1  ;;  %14882 = vst [vmem:[#allocation315_spill] sm:$0xff] %v12254_v17  ;;  %v14884_v15 = vld [vmem:[#allocation9_spill] sm:$0xff] }
 0x8ee   : > { %5623 = vmatpush.bf16.xpose.msrb.mxu1 %v5578_v32  ;;  %v12226_v32 = vld [vmem:[%s13072_s2 + $0x160] sm:$0xff] }
 0x8ef   : > { %v6285_v57 = vadd.f32 %v6269_v18, %v6145_v21  ;;  %14881 = vst [vmem:[#allocation292_spill] sm:$0xff] %v12251_v6  ;;  %v12257_v18 = vpop.f32.mrf.mxu3 }
 0x8f1   : > { %5783 = vmatpush.bf16.xpose.msra.mxu2 %v14875_v45  ;;  %v12237_v45 = vpop.f32.mrf.mxu2 }
 0x8f2   : > { %7099 = vmatmul.msk.bf16.vlgmr.msra.gmra.mxu3 %vm1158_vm5, %v12226_v32  ;;  %14878 = vst [vmem:[#allocation273_spill] sm:$0xff] %v12237_v45 }
 0x8f3   : > { %5950 = vmatpush.bf16.xpose.msrb.mxu3 %v5891_v5  ;;  %v12232_v5 = vperm.slane %v7185_v46, 0  ;;  %v6133_v46 = vmul.f32 %v12208_v24, %v12092_v63  ;;  %v5044_v63 = vpop.f32.mrf.mxu1 }
 0x8f5   : > { %v6409_v7 = vmul.f32 %v12232_v5, %v6331_v27  ;;  %v14883_v27 = vld [vmem:[#allocation124_spill] sm:$0xff] }
 0x8f6   : > { %5624 = vmatpush.bf16.xpose.msrb.mxu1 %v5575_v35  ;;  %v5572_v35 = vsel %vm1158_vm5, %v14883_v27, 0 }
 0x8f7   : > { %v6425_v9 = vadd.f32 %v6409_v7, %v6285_v57  ;;  %v6149_v7 = vadd.f32 %v6133_v46, %v11914_v4  ;;  %v5104_v57 = vmul.f32 %v12251_v6, %v5044_v63  ;;  %v12279_v4 = vld [vmem:[%s13073_s3 + $0x44] ss:$8 sm:$0xf]  ;;  %v6137_v63 = vmul.f32 %v12208_v24, %v12112_v13 }
 0x8f8   : > { %7077 = vmatmul.msk.bf16.gmra.mxu2 %vm1158_vm5, %v12151_v38  ;;  %v12282_v46 = vperm.slane %v12279_v4, 3 }
 0x8f9   : > { %5784 = vmatpush.bf16.xpose.msra.mxu2 %v14880_v25  ;;  %v6273_v25 = vmul.f32 %v12213_v55, %v6193_v49  ;;  %6441 = vst [vmem:[%s12246_s27] sm:$0xff] %v6425_v9  ;;  %v5203_v21 = vpop.f32.mrf.mxu2  ;;  %v14885_v49 = vld [vmem:[#allocation176_spill] sm:$0xff]  ;;  %v6333_v9 = vpop.f32.mrf.mxu0  ;;  %v12270_v27 = vadd.f32 %v5104_v57, %v12131_v40  ;;  %v6277_v40 = vmul.f32 %v12213_v55, %v6196_v52  ;;  %v14888_v57 = vld [vmem:[#allocation5_spill] sm:$0xff] }
 0x8fa   : > { %v6153_v52 = vadd.f32 %v6137_v63, %v11946_v53  ;;  %v6141_v53 = vmul.f32 %v12208_v24, %v12144_v47  ;;  %v14893_v24 = vld [vmem:[#allocation158_spill] sm:$0xff] }
 0x8fb   : > { %5951 = vmatpush.bf16.xpose.msrb.mxu3 %v14879_v48  ;;  %v5245_v48 = vmul.f32 %v12254_v17, %v5203_v21  ;;  %v6289_v26 = vadd.f32 %v6273_v25, %v6149_v7  ;;  %v5362_v7 = vpop.f32.mrf.mxu3 }
 0x8fd   : > { %v12274_v45 = vadd.f32 %v5245_v48, %v12134_v56  ;;  %7054 = vmatmul.msk.bf16.gmra.mxu1 %vm1158_vm5, %v12043_v22  ;;  %v12293_v56 = vld [vmem:[%s13072_s2 + $0x168] sm:$0xff]  ;;  %v12300_v22 = vpop.f32.mrf.mxu1 }
 0x8fe   : > { %5625 = vmatpush.bf16.xpose.msrb.mxu1 %v5572_v35  ;;  %v6413_v35 = vmul.f32 %v12232_v5, %v6333_v9  ;;  %14887 = vst [vmem:[#allocation68_spill] sm:$0xff] %v12300_v22  ;;  %v14931_v22 = vld [vmem:[#allocation278_spill] sm:$0xff] }
 0x900   : > { %v6429_v25 = vadd.f32 %v6413_v35, %v6289_v26  ;;  %v5386_v26 = vmul.f32 %v12282_v46, %v5362_v7  ;;  %v6293_v35 = vadd.f32 %v6277_v40, %v6153_v52  ;;  %v6281_v7 = vmul.f32 %v12213_v55, %v12211_v44  ;;  %v14892_v52 = vld [vmem:[#allocation280_spill] sm:$0xff] }
 0x901   : > { %5785 = vmatpush.bf16.xpose.msra.mxu2 %v14885_v49  ;;  %v12304_v21 = vpop.f32.mrf.mxu2  ;;  %v14890_v49 = vld [vmem:[#allocation167_spill] sm:$0xff]  ;;  %v6336_v9 = vpop.f32.mrf.mxu0 }
 0x902   : > { %6445 = vst [vmem:[%s12246_s27 + $0x20] sm:$0xff] %v6429_v25  ;;  %7100 = vmatmul.msk.bf16.gmra.mxu3 %vm1158_vm5, %v12293_v56  ;;  %v12308_v48 = vadd.f32 %v5386_v26, %v12165_v8  ;;  %v6417_v25 = vmul.f32 %v12232_v5, %v6336_v9  ;;  %v6157_v26 = vadd.f32 %v6141_v53, %v11963_v54 }
 0x903   : > { %5952 = vmatpush.bf16.xpose.msrb.mxu3 %v14884_v15  ;;  %v14886_v15 = vld [vmem:[#allocation117_spill] sm:$0xff]  ;;  %14889 = vst [vmem:[#allocation129_spill] sm:$0xff] %v12304_v21  ;;  %v12322_v8 = vpop.f32.mrf.mxu3  ;;  %v14944_v21 = vld [vmem:[#allocation342_spill] sm:$0xff] }
 0x904   : > { %v5569_v13 = vsel %vm1158_vm5, %v14886_v15, 0  ;;  %v6433_v63 = vadd.f32 %v6417_v25, %v6293_v35  ;;  %v14891_v15 = vld [vmem:[#allocation109_spill] sm:$0xff] }
 0x905   : > { %v5566_v40 = vsel %vm1158_vm5, %v14891_v15, 0 }
 0x906   : > { %5626 = vmatpush.bf16.xpose.msrb.mxu1 %v5569_v13  ;;  %6449 = vst [vmem:[%s12315_s9] sm:$0xff] %v6433_v63  ;;  %v5049_v13 = vpop.f32.mrf.mxu1  ;;  %v14894_v63 = vld [vmem:[#allocation100_spill] sm:$0xff] }
 0x907   : > { %v5563_v15 = vsel %vm1158_vm5, %v14894_v63, 0  ;;  %v14908_v63 = vld [vmem:[#allocation132_spill] sm:$0xff] }
 0x909   : > { %5786 = vmatpush.bf16.xpose.msra.mxu2 %v14890_v49  ;;  %v5208_v47 = vpop.f32.mrf.mxu2  ;;  %v6338_v55 = vpop.f32.mrf.mxu0  ;;  %v6297_v49 = vadd.f32 %v6281_v7, %v6157_v26  ;;  %v14896_v7 = vld [vmem:[#allocation148_spill] sm:$0xff] }
 0x90a   : > { %v5253_v44 = vmul.f32 %v12254_v17, %v5208_v47  ;;  %v6421_v35 = vmul.f32 %v12232_v5, %v6338_v55  ;;  %v14897_v5 = vld [vmem:[#allocation91_spill] sm:$0xff]  ;;  %v14898_v26 = vld [vmem:[#allocation220_spill] sm:$0xff]  ;;  %v14901_v47 = vld [vmem:[#allocation82_spill] sm:$0xff] }
 0x90b   : > { %5953 = vmatpush.bf16.xpose.msrb.mxu3 %v14888_v57  ;;  %v5112_v57 = vmul.f32 %v12251_v6, %v5049_v13  ;;  %v5367_v53 = vpop.f32.mrf.mxu3  ;;  %v14895_v13 = vld [vmem:[#allocation282_spill] sm:$0xff]  ;;  %v14904_v55 = vld [vmem:[#allocation20_spill] sm:$0xff] }
 0x90c   : > { %v12336_v25 = vadd.f32 %v5253_v44, %v12179_v51  ;;  %v6437_v54 = vadd.f32 %v6421_v35, %v6297_v49  ;;  %v5560_v51 = vsel %vm1158_vm5, %v14897_v5, 0  ;;  %v14902_v44 = vld [vmem:[#allocation214_spill] sm:$0xff]  ;;  %v6040_v49 = vsel %vm1158_vm5, %v14904_v55, 0 }
 0x90d   : > { %v12332_v9 = vadd.f32 %v5112_v57, %v12176_v42  ;;  %v14900_v57 = vld [vmem:[#allocation71_spill] sm:$0xff]  ;;  %v14905_v35 = vld [vmem:[#allocation194_spill] sm:$0xff] }
 0x90e   : > { %5627 = vmatpush.bf16.xpose.msrb.mxu1 %v5566_v40  ;;  %6453 = vst [vmem:[%s12315_s9 + $0x20] sm:$0xff] %v6437_v54  ;;  %v5394_v40 = vmul.f32 %v12282_v46, %v5367_v53  ;;  %v12366_v54 = vld [vmem:[%s13072_s2 + $0x170] sm:$0xff]  ;;  %v14930_v6 = vld [vmem:[#allocation274_spill] sm:$0xff] }
 0x90f   : > { %14906 = vst [vmem:[#allocation296_spill] sm:$0xff] %v12366_v54  ;;  %v12401_v55 = vld [vmem:[%s13073_s3 + $0x45] ss:$8 sm:$0xf] }
 0x910   : > { %v12345_v42 = vadd.f32 %v5394_v40, %v12187_v62  ;;  %v14903_v62 = vld [vmem:[#allocation130_spill] sm:$0xff]  ;;  %v14910_v40 = vld [vmem:[#allocation15_spill] sm:$0xff] }
 0x911   : > { %5787 = vmatpush.bf16.xpose.msra.mxu2 %v14893_v24  ;;  %v5557_v24 = vsel %vm1158_vm5, %v14901_v47, 0  ;;  %v12370_v53 = vpop.f32.mrf.mxu2 }
 0x912   : > { %14907 = vst [vmem:[#allocation317_spill] sm:$0xff] %v12370_v53 }
 0x913   : > { %5954 = vmatpush.bf16.xpose.msrb.mxu3 %v14892_v52  ;;  %v14899_v52 = vld [vmem:[#allocation138_spill] sm:$0xff]  ;;  %v12385_v5 = vpop.f32.mrf.mxu3 }
 0x914   : > { %14914 = vst [vmem:[#allocation320_spill] sm:$0xff] %v12385_v5  ;;  %v14946_v5 = vld [vmem:[#allocation72_spill] sm:$0xff] }
 0x916   : > { %5628 = vmatpush.bf16.xpose.msrb.mxu1 %v5563_v15  ;;  %v12373_v15 = vpop.f32.mrf.mxu1 }
 0x917   : > { %14909 = vst [vmem:[#allocation249_spill] sm:$0xff] %v12373_v15 }
 0x919   : > { %5788 = vmatpush.bf16.xpose.msra.mxu2 %v14896_v7  ;;  %v12381_v7 = vperm.slane %v12139_v2, 1 }
 0x91b   : > { %5955 = vmatpush.bf16.xpose.msrb.mxu3 %v14895_v13  ;;  %v14911_v13 = vld [vmem:[#allocation193_spill] sm:$0xff]  ;;  %14913 = vst [vmem:[#allocation305_spill] sm:$0xff] %v12381_v7 }
 0x91e   : > { %5629 = vmatpush.bf16.xpose.msrb.mxu1 %v5560_v51  ;;  %v14915_v51 = vld [vmem:[#allocation116_spill] sm:$0xff] }
 0x921   : > { %5789 = vmatpush.bf16.xpose.msra.mxu2 %v14899_v52  ;;  %v14916_v52 = vld [vmem:[#allocation21_spill] sm:$0xff] }
 0x923   : > { %5956 = vmatpush.bf16.xpose.msrb.mxu3 %v14898_v26 }
 0x926   : > { %5630 = vmatpush.bf16.xpose.msrb.mxu1 %v5557_v24  ;;  %v14917_v24 = vld [vmem:[#allocation186_spill] sm:$0xff] }
 0x928   : > { %7097 = vmatmul.msk.bf16.vlgmr.msra.gmra.mxu2 %vm1158_vm5, %v12226_v32 }
 0x929   : > { %5931 = vmatpush.bf16.xpose.msrb.mxu2 %v14900_v57 }
 0x92a   : > { %v5184_v57 = vpop.f32.mrf.mxu1 }
 0x92b   : > { %5957 = vmatpush.bf16.xpose.msrb.mxu3 %v14902_v44  ;;  %v5343_v26 = vpop.f32.mrf.mxu2  ;;  %v5244_v44 = vmul.f32 %v12381_v7, %v5184_v57  ;;  %v14923_v57 = vld [vmem:[#allocation99_spill] sm:$0xff] }
 0x92d   : > { %7074 = vmatmul.msk.bf16.vlgmr.msrb.gmra.mxu1 %vm1158_vm5, %v12100_v11  ;;  %v12378_v11 = vperm.slane %v12279_v4, 2 }
 0x92e   : > { %5763 = vmatpush.bf16.xpose.msra.mxu1 %v14903_v62  ;;  %v12396_v62 = vadd.f32 %v5244_v44, %v12270_v27  ;;  %v14918_v27 = vld [vmem:[#allocation108_spill] sm:$0xff] }
 0x92f   : > { %14912 = vst [vmem:[#allocation327_spill] sm:$0xff] %v12378_v11  ;;  %v5385_v47 = vmul.f32 %v12378_v11, %v5343_v26 }
 0x931   : > { %5932 = vmatpush.bf16.xpose.msrb.mxu2 %v14905_v35  ;;  %v12393_v2 = vadd.f32 %v5385_v47, %v12274_v45  ;;  %v12411_v35 = vld [vmem:[%s13072_s2 + $0x178] sm:$0xff] }
 0x932   : > { %7120 = vmatmul.msk.bf16.vlgmr.msrb.gmra.mxu3 %vm1158_vm5, %v12366_v54 }
 0x933   : > { %6099 = vmatpush.bf16.xpose.msra.mxu3 %v6040_v49  ;;  %v12404_v49 = vperm.slane %v12401_v55, 3 }
 0x935   : > { %v5670_v45 = vpop.f32.mrf.mxu3 }
 0x936   : > { %5764 = vmatpush.bf16.xpose.msra.mxu1 %v14908_v63  ;;  %v12416_v63 = vpop.f32.mrf.mxu2 }
 0x937   : > { %14919 = vst [vmem:[#allocation287_spill] sm:$0xff] %v12416_v63  ;;  %v14938_v63 = vld [vmem:[#allocation81_spill] sm:$0xff] }
 0x938   : > { %7098 = vmatmul.msk.bf16.gmra.mxu2 %vm1158_vm5, %v12293_v56 }
 0x939   : > { %5933 = vmatpush.bf16.xpose.msrb.mxu2 %v14911_v13  ;;  %v14920_v13 = vld [vmem:[#allocation23_spill] sm:$0xff] }
 0x93b   : > { %6100 = vmatpush.bf16.xpose.msra.mxu3 %v14910_v40  ;;  %v5694_v40 = vmul.f32 %v12404_v49, %v5670_v45  ;;  %v14925_v45 = vld [vmem:[#allocation171_spill] sm:$0xff] }
 0x93d   : > { %7075 = vmatmul.msk.bf16.gmra.mxu1 %vm1158_vm5, %v12151_v38  ;;  %v14922_v38 = vld [vmem:[#allocation179_spill] sm:$0xff]  ;;  %v12424_v26 = vadd.f32 %v5694_v40, %v12308_v48 }
 0x93e   : > { %5765 = vmatpush.bf16.xpose.msra.mxu1 %v14915_v51  ;;  %v12420_v51 = vpop.f32.mrf.mxu1  ;;  %v5348_v47 = vpop.f32.mrf.mxu2 }
 0x93f   : > { %14921 = vst [vmem:[#allocation122_spill] sm:$0xff] %v12420_v51  ;;  %v14927_v51 = vld [vmem:[#allocation237_spill] sm:$0xff] }
 0x941   : > { %5934 = vmatpush.bf16.xpose.msrb.mxu2 %v14917_v24  ;;  %v14924_v24 = vld [vmem:[#allocation231_spill] sm:$0xff] }
 0x942   : > { %7121 = vmatmul.msk.bf16.gmra.mxu3 %vm1158_vm5, %v12411_v35 }
 0x943   : > { %6101 = vmatpush.bf16.xpose.msra.mxu3 %v14916_v52  ;;  %v12426_v52 = vpop.f32.mrf.mxu3 }
 0x946   : > { %5766 = vmatpush.bf16.xpose.msra.mxu1 %v14918_v27  ;;  %v5189_v44 = vpop.f32.mrf.mxu1  ;;  %v5393_v27 = vmul.f32 %v12378_v11, %v5348_v47  ;;  %v14929_v47 = vld [vmem:[#allocation277_spill] sm:$0xff]  ;;  %v14937_v11 = vld [vmem:[#allocation326_spill] sm:$0xff] }
 0x948   : > { %v12434_v15 = vadd.f32 %v5393_v27, %v12336_v25  ;;  %v14934_v27 = vld [vmem:[#allocation281_spill] sm:$0xff] }
 0x949   : > { %5935 = vmatpush.bf16.xpose.msrb.mxu2 %v14922_v38  ;;  %v14926_v38 = vld [vmem:[#allocation90_spill] sm:$0xff] }
 0x94b   : > { %6102 = vmatpush.bf16.xpose.msra.mxu3 %v14920_v13  ;;  %v5252_v13 = vmul.f32 %v12381_v7, %v5189_v44  ;;  %v5675_v40 = vpop.f32.mrf.mxu3  ;;  %v14932_v44 = vld [vmem:[#allocation275_spill] sm:$0xff] }
 0x94c   : > { %v1626_v7 = vmul.f32 %v14932_v44, %v14931_v22 }
 0x94d   : > { %v12437_v48 = vadd.f32 %v5252_v13, %v12332_v9  ;;  %v14935_v13 = vld [vmem:[#allocation276_spill] sm:$0xff] }
 0x94e   : > { %5767 = vmatpush.bf16.xpose.msra.mxu1 %v14923_v57  ;;  %v5702_v57 = vmul.f32 %v12404_v49, %v5675_v40  ;;  %v2014_v53 = vmul.f32 %v14935_v13, %v14934_v27 }
 0x950   : > { %v12448_v25 = vadd.f32 %v5702_v57, %v12345_v42  ;;  %v14941_v42 = vld [vmem:[#allocation328_spill] sm:$0xff] }
 0x951   : > { %5936 = vmatpush.bf16.xpose.msrb.mxu2 %v14925_v45  ;;  %v1354_v45 = vmul.f32 %v14930_v6, %v14929_v47  ;;  %v14940_v47 = vld [vmem:[#allocation16_spill] sm:$0xff] }
 0x952   : > { %14933 = vst [vmem:[#allocation324_spill] sm:$0xff] %v12448_v25  ;;  %v2562_v57 = vmul.f32 %v14941_v42, %v14940_v47  ;;  %v14945_v25 = vld [vmem:[#allocation339_spill] sm:$0xff] }
 0x953   : > { %6103 = vmatpush.bf16.xpose.msra.mxu3 %v14924_v24  ;;  %v14928_v24 = vld [vmem:[#allocation161_spill] sm:$0xff]  ;;  %v1642_v9 = vadd.f32 %v1626_v7, %v1354_v45  ;;  %v14942_v7 = vld [vmem:[#allocation332_spill] sm:$0xff]  ;;  %v14943_v45 = vld [vmem:[#allocation330_spill] sm:$0xff] }
 0x954   : > { %v2903_v17 = vmul.f32 %v14943_v45, %v14942_v7  ;;  %v14953_v47 = vld [vmem:[#allocation351_spill] sm:$0xff] }
 0x956   : > { %5768 = vmatpush.bf16.xpose.msra.mxu1 %v14926_v38  ;;  %v14936_v38 = vld [vmem:[#allocation331_spill] sm:$0xff] }
 0x957   : > { %v2358_v40 = vmul.f32 %v14937_v11, %v14936_v38  ;;  %v3056_v38 = vmul.f32 %v14945_v25, %v14944_v21  ;;  %v14952_v21 = vld [vmem:[#allocation195_spill] sm:$0xff] }
 0x959   : > { %5937 = vmatpush.bf16.xpose.msrb.mxu2 %v14928_v24  ;;  %v2030_v24 = vadd.f32 %v2014_v53, %v1642_v9  ;;  %v14949_v9 = vld [vmem:[#allocation141_spill] sm:$0xff] }
 0x95b   : > { %6104 = vmatpush.bf16.xpose.msra.mxu3 %v14927_v51  ;;  %v14939_v51 = vld [vmem:[#allocation151_spill] sm:$0xff]  ;;  %v2374_v22 = vadd.f32 %v2358_v40, %v2030_v24  ;;  %v14951_v24 = vld [vmem:[#allocation345_spill] sm:$0xff] }
 0x95d   : > { %v2578_v27 = vadd.f32 %v2562_v57, %v2374_v22  ;;  %v14954_v57 = vld [vmem:[#allocation314_spill] sm:$0xff] }
 0x95e   : > { %5769 = vmatpush.bf16.xpose.msra.mxu1 %v14938_v63  ;;  %v3343_v7 = vmul.f32 %v14954_v57, %v14953_v47  ;;  %v12501_v47 = vpop.f32.mrf.mxu1 }
 0x95f   : > { %v2919_v40 = vadd.f32 %v2903_v17, %v2578_v27  ;;  %v14958_v17 = vld [vmem:[#allocation333_spill] sm:$0xff]  ;;  %14965 = vst [vmem:[#allocation329_spill] sm:$0xff] %v12501_v47  ;;  %v12514_v47 = vperm.slane %v12401_v55, 2 }
 0x960   : > { %v2366_v27 = vmul.f32 %v14937_v11, %v14958_v17 }
 0x961   : > { %5938 = vmatpush.bf16.xpose.msrb.mxu2 %v14939_v51  ;;  %v14950_v51 = vld [vmem:[#allocation347_spill] sm:$0xff] }
 0x962   : > { %v3196_v22 = vmul.f32 %v14951_v24, %v14950_v51 }
 0x963   : > { %6105 = vmatpush.bf16.xpose.msra.mxu3 %v14577_v34  ;;  %v14947_v34 = vld [vmem:[#allocation201_spill] sm:$0xff] }
 0x964   : > { %v1362_v53 = vmul.f32 %v14930_v6, %v14947_v34  ;;  %v14955_v34 = vld [vmem:[#allocation284_spill] sm:$0xff] }
 0x966   : > { %5770 = vmatpush.bf16.xpose.msra.mxu1 %v14946_v5  ;;  %v3072_v5 = vadd.f32 %v3056_v38, %v2919_v40  ;;  %v14960_v38 = vld [vmem:[#allocation174_spill] sm:$0xff] }
 0x968   : > { %7118 = vmatmul.msk.bf16.vlgmr.msrb.gmra.mxu2 %vm1158_vm5, %v12366_v54  ;;  %v14957_v54 = vld [vmem:[#allocation155_spill] sm:$0xff] }
 0x969   : > { %6080 = vmatpush.bf16.xpose.msra.mxu2 %v14589_v28  ;;  %v14948_v28 = vld [vmem:[#allocation283_spill] sm:$0xff] }
 0x96a   : > { %v1634_v63 = vmul.f32 %v14932_v44, %v14948_v28  ;;  %v2022_v44 = vmul.f32 %v14935_v13, %v14955_v34  ;;  %v3212_v28 = vadd.f32 %v3196_v22, %v3072_v5  ;;  %v14962_v22 = vld [vmem:[#allocation208_spill] sm:$0xff]  ;;  %v14966_v34 = vld [vmem:[#allocation334_spill] sm:$0xff] }
 0x96b   : > { %6106 = vmatpush.bf16.xpose.msra.mxu3 %v14584_v41  ;;  %v14956_v41 = vld [vmem:[#allocation316_spill] sm:$0xff] }
 0x96c   : > { %v1650_v6 = vadd.f32 %v1634_v63, %v1362_v53  ;;  %v3359_v51 = vadd.f32 %v3343_v7, %v3212_v28  ;;  %v12492_v53 = vld [vmem:[%s13072_s2 + $0x180] sm:$0xff]  ;;  %v12496_v63 = vpop.f32.mrf.mxu2  ;;  %v2570_v28 = vmul.f32 %v14941_v42, %v14966_v34  ;;  %v12519_v42 = vperm.slane %v12279_v4, 1  ;;  %v14978_v4 = vld [vmem:[#allocation12_spill] sm:$0xff] }
 0x96d   : > { %7095 = vmatmul.msk.bf16.vlgmr.msra.gmra.mxu1 %vm1158_vm5, %v12226_v32  ;;  %14961 = vst [vmem:[#allocation322_spill] sm:$0xff] %v12496_v63  ;;  %v14964_v32 = vld [vmem:[#allocation319_spill] sm:$0xff] }
 0x96e   : > { %5912 = vmatpush.bf16.xpose.msrb.mxu1 %v14949_v9  ;;  %v3496_v9 = vmul.f32 %v14957_v54, %v14956_v41  ;;  %v2038_v13 = vadd.f32 %v2022_v44, %v1650_v6  ;;  %v14967_v6 = vld [vmem:[#allocation88_spill] sm:$0xff] }
 0x96f   : > { %v14968_v44 = vld [vmem:[#allocation36_spill] sm:$0xff] }
 0x970   : > { %v3512_v11 = vadd.f32 %v3496_v9, %v3359_v51  ;;  %v2382_v7 = vadd.f32 %v2366_v27, %v2038_v13  ;;  %v3965_v17 = vmul.f32 %v14968_v44, %v14967_v6  ;;  %v14973_v13 = vld [vmem:[#allocation58_spill] sm:$0xff]  ;;  %v12527_v6 = vpop.f32.mrf.mxu3 }
 0x971   : > { %6081 = vmatpush.bf16.xpose.msra.mxu2 %v14593_v39  ;;  %v14959_v39 = vld [vmem:[#allocation120_spill] sm:$0xff] }
 0x972   : > { %v3640_v40 = vmul.f32 %v14960_v38, %v14959_v39  ;;  %7141 = vmatmul.msk.bf16.vlgmr.msra.gmra.mxu3 %vm1158_vm5, %v12492_v53  ;;  %v14969_v39 = vld [vmem:[#allocation336_spill] sm:$0xff] }
 0x973   : > { %6239 = vmatpush.bf16.xpose.msrb.mxu3 %v14952_v21  ;;  %v14963_v21 = vld [vmem:[#allocation121_spill] sm:$0xff]  ;;  %v2911_v9 = vmul.f32 %v14943_v45, %v14969_v39 }
 0x974   : > { %v3801_v5 = vmul.f32 %v14964_v32, %v14963_v21  ;;  %v3656_v41 = vadd.f32 %v3640_v40, %v3512_v11  ;;  %v14971_v21 = vld [vmem:[#allocation49_spill] sm:$0xff]  ;;  %v14974_v11 = vld [vmem:[#allocation64_spill] sm:$0xff] }
 0x975   : > { %v4257_v34 = vmul.f32 %v14974_v11, %v14973_v13  ;;  %v14977_v39 = vld [vmem:[#allocation205_spill] sm:$0xff] }
 0x976   : > { %5913 = vmatpush.bf16.xpose.msrb.mxu1 %v14962_v22  ;;  %v3817_v51 = vadd.f32 %v3801_v5, %v3656_v41  ;;  %v14970_v22 = vld [vmem:[#allocation172_spill] sm:$0xff]  ;;  %v14975_v5 = vld [vmem:[#allocation349_spill] sm:$0xff] }
 0x977   : > { %v4105_v63 = vmul.f32 %v14971_v21, %v14970_v22  ;;  %v3204_v41 = vmul.f32 %v14951_v24, %v14975_v5  ;;  %v4407_v22 = vmul.f32 %v14978_v4, %v14977_v39 }
 0x978   : > { %v3981_v40 = vadd.f32 %v3965_v17, %v3817_v51  ;;  %7119 = vmatmul.msk.bf16.gmra.mxu2 %vm1158_vm5, %v12411_v35  ;;  %v5324_v17 = vpop.f32.mrf.mxu1 }
 0x979   : > { %6082 = vmatpush.bf16.xpose.msra.mxu2 %v14597_v31  ;;  %v14972_v31 = vld [vmem:[#allocation344_spill] sm:$0xff] }
 0x97a   : > { %v3064_v27 = vmul.f32 %v14945_v25, %v14972_v31  ;;  %v4121_v25 = vadd.f32 %v4105_v63, %v3981_v40  ;;  %v5384_v31 = vmul.f32 %v12519_v42, %v5324_v17  ;;  %v4547_v63 = vmul.f32 %v11772_v12, %v11817_v29 }
 0x97b   : > { %6240 = vmatpush.bf16.xpose.msrb.mxu3 %v14741_v30  ;;  %v2586_v30 = vadd.f32 %v2570_v28, %v2382_v7  ;;  %v14976_v7 = vld [vmem:[#allocation125_spill] sm:$0xff]  ;;  %v5651_v28 = vpop.f32.mrf.mxu2 }
 0x97c   : > { %v5693_v51 = vmul.f32 %v12514_v47, %v5651_v28  ;;  %v4273_v13 = vadd.f32 %v4257_v34, %v4121_v25  ;;  %v12546_v28 = vadd.f32 %v5384_v31, %v12396_v62  ;;  %v14981_v34 = vld [vmem:[#allocation146_spill] sm:$0xff]  ;;  %v5110_v62 = vmul.f32 %v12036_v10, %v12058_v1  ;;  %v14982_v25 = vld [vmem:[#allocation63_spill] sm:$0xff] }
 0x97d   : > { %v2927_v45 = vadd.f32 %v2911_v9, %v2586_v30  ;;  %v14979_v30 = vld [vmem:[#allocation236_spill] sm:$0xff]  ;;  %7096 = vmatmul.msk.bf16.gmra.mxu1 %vm1158_vm5, %v12293_v56  ;;  %v3809_v39 = vmul.f32 %v14964_v32, %v14982_v25  ;;  %v5250_v1 = vmul.f32 %v12142_v19, %v12167_v43 }
 0x97e   : > { %5914 = vmatpush.bf16.xpose.msrb.mxu1 %v14976_v7  ;;  %v3351_v24 = vmul.f32 %v14954_v57, %v14979_v30  ;;  %v12541_v40 = vadd.f32 %v5693_v51, %v12393_v2  ;;  %v4957_v57 = vmul.f32 %v11922_v36, %v11948_v3  ;;  %v12567_v3 = vld [vmem:[%s13072_s2 + $0x188] sm:$0xff] }
 0x97f   : > { %v3080_v9 = vadd.f32 %v3064_v27, %v2927_v45  ;;  %v12553_v27 = vld [vmem:[%s13073_s3 + $0x46] ss:$8 sm:$0xf]  ;;  %v3648_v45 = vmul.f32 %v14960_v38, %v14981_v34  ;;  %v5810_v38 = vpop.f32.mrf.mxu3 }
 0x980   : > { %v12556_v29 = vperm.slane %v12553_v27, 3 }
 0x981   : > { %6083 = vmatpush.bf16.xpose.msra.mxu2 %v14752_v16  ;;  %v3220_v5 = vadd.f32 %v3204_v41, %v3080_v9  ;;  %v4423_v16 = vadd.f32 %v4407_v22, %v4273_v13  ;;  %v14983_v22 = vld [vmem:[#allocation118_spill] sm:$0xff]  ;;  %v12580_v9 = vpop.f32.mrf.mxu1  ;;  %v5390_v13 = vmul.f32 %v12282_v46, %v12322_v8  ;;  %v4415_v8 = vmul.f32 %v14978_v4, %v11740_v60 }
 0x982   : > { %7142 = vmatmul.msk.bf16.gmra.mxu3 %vm1158_vm5, %v12567_v3  ;;  %v5834_v51 = vmul.f32 %v12556_v29, %v5810_v38  ;;  %v4555_v4 = vmul.f32 %v11772_v12, %v11896_v33  ;;  %v5118_v12 = vmul.f32 %v12036_v10, %v12120_v37 }
 0x983   : > { %6241 = vmatpush.bf16.xpose.msrb.mxu3 %v14751_v59  ;;  %v14980_v59 = vld [vmem:[#allocation127_spill] sm:$0xff]  ;;  %v3367_v2 = vadd.f32 %v3351_v24, %v3220_v5  ;;  %v12574_v56 = vpop.f32.mrf.mxu2  ;;  %v14984_v24 = vld [vmem:[#allocation73_spill] sm:$0xff] }
 0x984   : > { %v3504_v7 = vmul.f32 %v14957_v54, %v14980_v59  ;;  %v4563_v54 = vadd.f32 %v4547_v63, %v4423_v16  ;;  %v3973_v32 = vmul.f32 %v14968_v44, %v14984_v24  ;;  %v12588_v63 = vadd.f32 %v5834_v51, %v12424_v26  ;;  %v14985_v5 = vld [vmem:[#allocation243_spill] sm:$0xff]  ;;  %v14986_v16 = vld [vmem:[#allocation32_spill] sm:$0xff] }
 0x985   : > { %v4113_v59 = vmul.f32 %v14971_v21, %v14985_v5  ;;  %v14987_v26 = vld [vmem:[#allocation111_spill] sm:$0xff] }
 0x986   : > { %v3520_v41 = vadd.f32 %v3504_v7, %v3367_v2  ;;  %5915 = vmatpush.bf16.xpose.msrb.mxu1 %v14983_v22  ;;  %v4973_v17 = vadd.f32 %v4957_v57, %v4563_v54  ;;  %v5698_v7 = vmul.f32 %v12404_v49, %v12426_v52  ;;  %v4265_v57 = vmul.f32 %v14974_v11, %v14986_v16  ;;  %v14988_v11 = vld [vmem:[#allocation290_spill] sm:$0xff]  ;;  %v14998_v16 = vld [vmem:[#allocation335_spill] sm:$0xff] }
 0x987   : > { %v5812_v34 = vpop.f32.mrf.mxu3 }
 0x988   : > { %v3664_v30 = vadd.f32 %v3648_v45, %v3520_v41  ;;  %v5126_v31 = vadd.f32 %v5110_v62, %v4973_v17  ;;  %v5838_v21 = vmul.f32 %v12556_v29, %v5812_v34  ;;  %v14989_v41 = vld [vmem:[#allocation286_spill] sm:$0xff]  ;;  %v14991_v17 = vld [vmem:[#allocation285_spill] sm:$0xff] }
 0x989   : > { %6084 = vmatpush.bf16.xpose.msra.mxu2 %v14762_v23  ;;  %v5329_v62 = vpop.f32.mrf.mxu1  ;;  %v1625_v25 = vmul.f32 %v14989_v41, %v14988_v11 }
 0x98a   : > { %v3825_v43 = vadd.f32 %v3809_v39, %v3664_v30  ;;  %v5392_v39 = vmul.f32 %v12519_v42, %v5329_v62  ;;  %v4965_v30 = vmul.f32 %v11922_v36, %v12014_v20  ;;  %v15004_v62 = vld [vmem:[#allocation343_spill] sm:$0xff] }
 0x98b   : > { %6242 = vmatpush.bf16.xpose.msrb.mxu3 %v14760_v61  ;;  %v5266_v61 = vadd.f32 %v5250_v1, %v5126_v31  ;;  %v5656_v45 = vpop.f32.mrf.mxu2  ;;  %v14993_v31 = vld [vmem:[#allocation288_spill] sm:$0xff] }
 0x98c   : > { %v3989_v23 = vadd.f32 %v3973_v32, %v3825_v43  ;;  %v5701_v52 = vmul.f32 %v12514_v47, %v5656_v45  ;;  %v12616_v51 = vadd.f32 %v5392_v39, %v12437_v48  ;;  %v14992_v32 = vld [vmem:[#allocation291_spill] sm:$0xff]  ;;  %v14995_v43 = vld [vmem:[#allocation289_spill] sm:$0xff] }
 0x98d   : > { %v5406_v44 = vadd.f32 %v5390_v13, %v5266_v61  ;;  %v2013_v13 = vmul.f32 %v14993_v31, %v14992_v32  ;;  %v14996_v61 = vld [vmem:[#allocation102_spill] sm:$0xff]  ;;  %v15002_v45 = vld [vmem:[#allocation337_spill] sm:$0xff] }
 0x98e   : > { %v4129_v2 = vadd.f32 %v4113_v59, %v3989_v23  ;;  %5916 = vmatpush.bf16.xpose.msrb.mxu1 %v14987_v26  ;;  %v12611_v22 = vadd.f32 %v5701_v52, %v12434_v15  ;;  %v14994_v15 = vld [vmem:[#allocation293_spill] sm:$0xff]  ;;  %v14997_v23 = vld [vmem:[#allocation340_spill] sm:$0xff]  ;;  %v15012_v32 = vld [vmem:[#allocation262_spill] sm:$0xff] }
 0x98f   : > { %v5714_v54 = vadd.f32 %v5698_v7, %v5406_v44  ;;  %v2357_v5 = vmul.f32 %v14995_v43, %v14994_v15  ;;  %v5815_v59 = vpop.f32.mrf.mxu3  ;;  %v5258_v7 = vmul.f32 %v12142_v19, %v12257_v18  ;;  %v2561_v10 = vmul.f32 %v14998_v16, %v14997_v23  ;;  %v15014_v15 = vld [vmem:[#allocation258_spill] sm:$0xff] }
 0x990   : > { %v4281_v60 = vadd.f32 %v4265_v57, %v4129_v2  ;;  %v5842_v36 = vmul.f32 %v12556_v29, %v5815_v59  ;;  %v14999_v57 = vld [vmem:[#allocation320_spill] sm:$0xff]  ;;  %v5706_v19 = vmul.f32 %v12404_v49, %v12527_v6  ;;  %v15008_v49 = vld [vmem:[#allocation153_spill] sm:$0xff]  ;;  %v15015_v59 = vld [vmem:[#allocation295_spill] sm:$0xff] }
 0x991   : > { %6085 = vmatpush.bf16.xpose.msra.mxu2 %v14772_v58  ;;  %v12608_v38 = vadd.f32 %v5838_v21, %v5714_v54  ;;  %v5398_v44 = vmul.f32 %v12282_v46, %v14999_v57  ;;  %v15000_v2 = vld [vmem:[#allocation324_spill] sm:$0xff]  ;;  %v15003_v21 = vld [vmem:[#allocation346_spill] sm:$0xff] }
 0x992   : > { %v4431_v58 = vadd.f32 %v4415_v8, %v4281_v60  ;;  %v12637_v8 = vadd.f32 %v5842_v36, %v15000_v2  ;;  %v3055_v52 = vmul.f32 %v15004_v62, %v15003_v21  ;;  %v15006_v46 = vld [vmem:[#allocation202_spill] sm:$0xff]  ;;  %v15017_v36 = vld [vmem:[#allocation92_spill] sm:$0xff]  ;;  %v15027_v21 = vld [vmem:[#allocation25_spill] sm:$0xff] }
 0x993   : > { %6243 = vmatpush.bf16.xpose.msrb.mxu3 %v14770_v50  ;;  %v14990_v50 = vld [vmem:[#allocation261_spill] sm:$0xff]  ;;  %v1633_v39 = vmul.f32 %v14989_v41, %v15006_v46  ;;  %v15018_v23 = vld [vmem:[#allocation298_spill] sm:$0xff]  ;;  %v15019_v57 = vld [vmem:[#allocation128_spill] sm:$0xff] }
 0x994   : > { %v1353_v1 = vmul.f32 %v14991_v17, %v14990_v50  ;;  %v4571_v33 = vadd.f32 %v4555_v4, %v4431_v58  ;;  %v15007_v50 = vld [vmem:[#allocation239_spill] sm:$0xff]  ;;  %v15010_v58 = vld [vmem:[#allocation348_spill] sm:$0xff]  ;;  %v15013_v41 = vld [vmem:[#allocation145_spill] sm:$0xff] }
 0x995   : > { %v15021_v2 = vld [vmem:[#allocation84_spill] sm:$0xff]  ;;  %v15029_v46 = vld [vmem:[#allocation65_spill] sm:$0xff] }
 0x996   : > { %v1641_v24 = vadd.f32 %v1625_v25, %v1353_v1  ;;  %5917 = vmatpush.bf16.xpose.msrb.mxu1 %v14996_v61  ;;  %v4981_v48 = vadd.f32 %v4965_v30, %v4571_v33  ;;  %v15005_v25 = vld [vmem:[#allocation93_spill] sm:$0xff]  ;;  %v15009_v1 = vld [vmem:[#allocation27_spill] sm:$0xff]  ;;  %v2021_v61 = vmul.f32 %v14993_v31, %v15015_v59  ;;  %v12694_v59 = vld [vmem:[%s13072_s2 + $0x190] sm:$0xff] }
 0x997   : > { %v5817_v11 = vpop.f32.mrf.mxu3  ;;  %v3195_v30 = vmul.f32 %v15010_v58, %v15009_v1  ;;  %v15033_v1 = vld [vmem:[#allocation47_spill] sm:$0xff] }
 0x998   : > { %v2029_v20 = vadd.f32 %v2013_v13, %v1641_v24  ;;  %v5134_v37 = vadd.f32 %v5118_v12, %v4981_v48  ;;  %v5846_v4 = vmul.f32 %v12556_v29, %v5817_v11  ;;  %v15011_v24 = vld [vmem:[#allocation245_spill] sm:$0xff]  ;;  %v1361_v13 = vmul.f32 %v14991_v17, %v15012_v32  ;;  %v15020_v17 = vld [vmem:[#allocation156_spill] sm:$0xff] }
 0x999   : > { %6086 = vmatpush.bf16.xpose.msra.mxu2 %v14776_v14 }
 0x99a   : > { %v2373_v34 = vadd.f32 %v2357_v5, %v2029_v20  ;;  %v5274_v26 = vadd.f32 %v5258_v7, %v5134_v37  ;;  %v3342_v5 = vmul.f32 %v15014_v15, %v15013_v41  ;;  %v1649_v29 = vadd.f32 %v1633_v39, %v1361_v13  ;;  %v15016_v7 = vld [vmem:[#allocation95_spill] sm:$0xff]  ;;  %v15035_v13 = vld [vmem:[#allocation296_spill] sm:$0xff] }
 0x99b   : > { %6244 = vmatpush.bf16.xpose.msrb.mxu3 %v14774_v0  ;;  %v15001_v0 = vld [vmem:[#allocation341_spill] sm:$0xff]  ;;  %v3495_v20 = vmul.f32 %v15017_v36, %v15016_v7  ;;  %v15030_v39 = vld [vmem:[#allocation55_spill] sm:$0xff]  ;;  %v15036_v41 = vld [vmem:[#allocation48_spill] sm:$0xff] }
 0x99c   : > { %v2577_v18 = vadd.f32 %v2561_v10, %v2373_v34  ;;  %v2902_v14 = vmul.f32 %v15002_v45, %v15001_v0  ;;  %v5414_v54 = vadd.f32 %v5398_v44, %v5274_v26  ;;  %v2365_v10 = vmul.f32 %v14995_v43, %v15018_v23  ;;  %v15022_v26 = vld [vmem:[#allocation87_spill] sm:$0xff]  ;;  %v15026_v43 = vld [vmem:[#allocation230_spill] sm:$0xff] }
 0x99d   : > { %v3639_v44 = vmul.f32 %v15020_v17, %v15019_v57  ;;  %v2037_v34 = vadd.f32 %v2021_v61, %v1649_v29  ;;  %v2569_v31 = vmul.f32 %v14998_v16, %v15022_v26  ;;  %v15038_v61 = vld [vmem:[#allocation7_spill] sm:$0xff]  ;;  %v15039_v7 = vld [vmem:[#allocation134_spill] sm:$0xff]  ;;  %v12705_v57 = vpop.f32.mrf.mxu1 }
 0x99e   : > { %5918 = vmatpush.bf16.xpose.msrb.mxu1 %v15005_v25  ;;  %v5722_v60 = vadd.f32 %v5706_v19, %v5414_v54  ;;  %v2918_v6 = vadd.f32 %v2902_v14, %v2577_v18  ;;  %v15023_v19 = vld [vmem:[#allocation242_spill] sm:$0xff]  ;;  %v15024_v18 = vld [vmem:[#allocation143_spill] sm:$0xff]  ;;  %v15025_v14 = vld [vmem:[#allocation57_spill] sm:$0xff] }
 0x99f   : > { %v3800_v54 = vmul.f32 %v15026_v43, %v15025_v14  ;;  %v2381_v11 = vadd.f32 %v2365_v10, %v2037_v34  ;;  %v15040_v23 = vld [vmem:[#allocation43_spill] sm:$0xff]  ;;  %v15041_v10 = vld [vmem:[#allocation17_spill] sm:$0xff]  ;;  %v15044_v26 = vld [vmem:[#allocation170_spill] sm:$0xff] }
 0x9a0   : > { %v12656_v33 = vadd.f32 %v5846_v4, %v5722_v60  ;;  %v3071_v12 = vadd.f32 %v3055_v52, %v2918_v6  ;;  %v15028_v52 = vld [vmem:[#allocation246_spill] sm:$0xff]  ;;  %v3964_v60 = vmul.f32 %v15030_v39, %v15029_v46  ;;  %v15032_v6 = vld [vmem:[#allocation247_spill] sm:$0xff] }
 0x9a1   : > { %6087 = vmatpush.bf16.xpose.msra.mxu2 %v15008_v49  ;;  %v2585_v4 = vadd.f32 %v2569_v31, %v2381_v11  ;;  %v3350_v31 = vmul.f32 %v15014_v15, %v15044_v26  ;;  %v15048_v11 = vld [vmem:[#allocation313_spill] sm:$0xff]  ;;  %v12723_v15 = vperm.slane %v12401_v55, 1  ;;  %v15057_v55 = vld [vmem:[#allocation200_spill] sm:$0xff]  ;;  %v15061_v26 = vld [vmem:[#allocation327_spill] sm:$0xff] }
 0x9a2   : > { %v3211_v48 = vadd.f32 %v3195_v30, %v3071_v12  ;;  %v4104_v30 = vmul.f32 %v15033_v1, %v15032_v6  ;;  %v15051_v6 = vld [vmem:[#allocation312_spill] sm:$0xff] }
 0x9a3   : > { %6245 = vmatpush.bf16.xpose.msrb.mxu3 %v15007_v50  ;;  %v15031_v50 = vld [vmem:[#allocation78_spill] sm:$0xff] }
 0x9a4   : > { %v3358_v37 = vadd.f32 %v3342_v5, %v3211_v48  ;;  %v2910_v16 = vmul.f32 %v15002_v45, %v15031_v50  ;;  %v15037_v5 = vld [vmem:[#allocation66_spill] sm:$0xff]  ;;  %v3203_v48 = vmul.f32 %v15010_v58, %v15038_v61  ;;  %v15045_v58 = vld [vmem:[#allocation308_spill] sm:$0xff]  ;;  %v15050_v50 = vld [vmem:[#allocation229_spill] sm:$0xff] }
 0x9a5   : > { %v4256_v29 = vmul.f32 %v15037_v5, %v15036_v41 }
 0x9a6   : > { %5919 = vmatpush.bf16.xpose.msrb.mxu1 %v15021_v2  ;;  %v3511_v0 = vadd.f32 %v3495_v20, %v3358_v37  ;;  %v2926_v45 = vadd.f32 %v2910_v16, %v2585_v4  ;;  %v4406_v37 = vmul.f32 %v15041_v10, %v15040_v23  ;;  %v15043_v2 = vld [vmem:[#allocation250_spill] sm:$0xff]  ;;  %v3647_v16 = vmul.f32 %v15020_v17, %v15050_v50  ;;  %v15056_v17 = vld [vmem:[#allocation315_spill] sm:$0xff]  ;;  %v15064_v50 = vld [vmem:[#allocation269_spill] sm:$0xff] }
 0x9a8   : > { %7139 = vmatmul.msk.bf16.vlgmr.msra.gmra.mxu2 %vm1158_vm5, %v12492_v53  ;;  %v3655_v25 = vadd.f32 %v3639_v44, %v3511_v0  ;;  %v15042_v44 = vld [vmem:[#allocation196_spill] sm:$0xff] }
 0x9a9   : > { %6220 = vmatpush.bf16.xpose.msrb.mxu2 %v15011_v24  ;;  %v15034_v24 = vld [vmem:[#allocation45_spill] sm:$0xff] }
 0x9aa   : > { %v3816_v49 = vadd.f32 %v3800_v54, %v3655_v25  ;;  %v3063_v32 = vmul.f32 %v15004_v62, %v15034_v24  ;;  %v12700_v62 = vpop.f32.mrf.mxu2  ;;  %v15047_v54 = vld [vmem:[#allocation173_spill] sm:$0xff]  ;;  %v15049_v25 = vld [vmem:[#allocation310_spill] sm:$0xff] }
 0x9ab   : > { %6246 = vmatpush.bf16.xpose.msrb.mxu3 %v15023_v19  ;;  %v4956_v46 = vmul.f32 %v15049_v25, %v15048_v11 }
 0x9ac   : > { %v3980_v12 = vadd.f32 %v3964_v60, %v3816_v49  ;;  %v3079_v34 = vadd.f32 %v3063_v32, %v2926_v45  ;;  %v12718_v60 = vperm.slane %v12553_v27, 2  ;;  %v15053_v32 = vld [vmem:[#allocation210_spill] sm:$0xff]  ;;  %v15055_v45 = vld [vmem:[#allocation129_spill] sm:$0xff] }
 0x9ad   : > { %7116 = vmatmul.msk.bf16.vlgmr.msrb.gmra.mxu1 %vm1158_vm5, %v15035_v13  ;;  %v3808_v13 = vmul.f32 %v15026_v43, %v15053_v32  ;;  %v5249_v61 = vmul.f32 %v15056_v17, %v15055_v45 }
 0x9ae   : > { %6061 = vmatpush.bf16.xpose.msra.mxu1 %v15024_v18  ;;  %v4120_v20 = vadd.f32 %v4104_v30, %v3980_v12  ;;  %v15046_v18 = vld [vmem:[#allocation270_spill] sm:$0xff]  ;;  %v3219_v14 = vadd.f32 %v3203_v48, %v3079_v34  ;;  %v15052_v30 = vld [vmem:[#allocation137_spill] sm:$0xff]  ;;  %v15054_v12 = vld [vmem:[#allocation140_spill] sm:$0xff]  ;;  %v5632_v48 = vpop.f32.mrf.mxu1 }
 0x9af   : > { %v4546_v0 = vmul.f32 %v15046_v18, %v15045_v58  ;;  %v5109_v24 = vmul.f32 %v15052_v30, %v15051_v6  ;;  %v5692_v43 = vmul.f32 %v12723_v15, %v5632_v48  ;;  %v15060_v34 = vld [vmem:[#allocation287_spill] sm:$0xff]  ;;  %v15065_v6 = vld [vmem:[#allocation144_spill] sm:$0xff] }
 0x9b0   : > { %v4272_v19 = vadd.f32 %v4256_v29, %v4120_v20  ;;  %v3366_v4 = vadd.f32 %v3350_v31, %v3219_v14  ;;  %v15058_v20 = vld [vmem:[#allocation253_spill] sm:$0xff]  ;;  %v5389_v31 = vmul.f32 %v15061_v26, %v15060_v34  ;;  %v15069_v48 = vld [vmem:[#allocation271_spill] sm:$0xff] }
 0x9b1   : > { %6221 = vmatpush.bf16.xpose.msrb.mxu2 %v15028_v52 }
 0x9b2   : > { %7162 = vmatmul.msk.bf16.vlgmr.msrb.gmra.mxu3 %vm1158_vm5, %v12694_v59  ;;  %v4422_v52 = vadd.f32 %v4406_v37, %v4272_v19  ;;  %v5791_v41 = vpop.f32.mrf.mxu2  ;;  %v15059_v37 = vld [vmem:[#allocation53_spill] sm:$0xff] }
 0x9b3   : > { %6379 = vmatpush.bf16.xpose.msra.mxu3 %v15027_v21  ;;  %v3503_v21 = vmul.f32 %v15017_v36, %v15047_v54  ;;  %v12748_v54 = vadd.f32 %v5692_v43, %v12546_v28 }
 0x9b4   : > { %v4562_v49 = vadd.f32 %v4546_v0, %v4422_v52  ;;  %v15062_v0 = vld [vmem:[#allocation44_spill] sm:$0xff] }
 0x9b5   : > { %v3519_v36 = vadd.f32 %v3503_v21, %v3366_v4  ;;  %v4112_v14 = vmul.f32 %v15033_v1, %v15062_v0  ;;  %v12755_v52 = vld [vmem:[%s13073_s3 + $0x47] ss:$8 sm:$0xf] }
 0x9b6   : > { %6062 = vmatpush.bf16.xpose.msra.mxu1 %v15039_v7  ;;  %v4972_v29 = vadd.f32 %v4956_v46, %v4562_v49  ;;  %v5833_v7 = vmul.f32 %v12718_v60, %v5791_v41  ;;  %v12758_v11 = vperm.slane %v12755_v52, 3  ;;  %v15063_v46 = vld [vmem:[#allocation13_spill] sm:$0xff]  ;;  %v5959_v49 = vpop.f32.mrf.mxu3  ;;  %v12776_v32 = vpop.f32.mrf.mxu1 }
 0x9b7   : > { %v3663_v23 = vadd.f32 %v3647_v16, %v3519_v36  ;;  %v4264_v4 = vmul.f32 %v15037_v5, %v15063_v46  ;;  %v4414_v16 = vmul.f32 %v15041_v10, %v15064_v50  ;;  %v15066_v36 = vld [vmem:[#allocation204_spill] sm:$0xff]  ;;  %v15078_v50 = vld [vmem:[#allocation266_spill] sm:$0xff] }
 0x9b8   : > { %7140 = vmatmul.msk.bf16.gmra.mxu2 %vm1158_vm5, %v12567_v3  ;;  %v12743_v19 = vadd.f32 %v5833_v7, %v12541_v40  ;;  %v4964_v7 = vmul.f32 %v15049_v25, %v15069_v48  ;;  %v15074_v25 = vld [vmem:[#allocation259_spill] sm:$0xff]  ;;  %v15084_v48 = vld [vmem:[#allocation152_spill] sm:$0xff] }
 0x9b9   : > { %6222 = vmatpush.bf16.xpose.msrb.mxu2 %v15043_v2  ;;  %v5125_v2 = vadd.f32 %v5109_v24, %v4972_v29  ;;  %v3824_v58 = vadd.f32 %v3808_v13, %v3663_v23  ;;  %v15068_v29 = vld [vmem:[#allocation83_spill] sm:$0xff]  ;;  %v15070_v23 = vld [vmem:[#allocation273_spill] sm:$0xff] }
 0x9ba   : > { %v5793_v5 = vpop.f32.mrf.mxu2  ;;  %v4554_v45 = vmul.f32 %v15046_v18, %v15068_v29 }
 0x9bb   : > { %6380 = vmatpush.bf16.xpose.msra.mxu3 %v15042_v44  ;;  %v3972_v44 = vmul.f32 %v15030_v39, %v15059_v37  ;;  %v5265_v21 = vadd.f32 %v5249_v61, %v5125_v2  ;;  %v5697_v39 = vmul.f32 %v12514_v47, %v12574_v56  ;;  %v12767_v56 = vld [vmem:[%s13072_s2 + $0x198] sm:$0xff]  ;;  %v5837_v13 = vmul.f32 %v12718_v60, %v5793_v5  ;;  %v15071_v2 = vld [vmem:[#allocation150_spill] sm:$0xff] }
 0x9bc   : > { %v5117_v37 = vmul.f32 %v15052_v30, %v15070_v23 }
 0x9bd   : > { %v3988_v40 = vadd.f32 %v3972_v44, %v3824_v58  ;;  %7117 = vmatmul.msk.bf16.gmra.mxu1 %vm1158_vm5, %v12411_v35  ;;  %v5405_v28 = vadd.f32 %v5389_v31, %v5265_v21  ;;  %v5983_v35 = vmul.f32 %v12758_v11, %v5959_v49  ;;  %v15072_v31 = vld [vmem:[#allocation317_spill] sm:$0xff]  ;;  %v15073_v58 = vld [vmem:[#allocation232_spill] sm:$0xff] }
 0x9be   : > { %6063 = vmatpush.bf16.xpose.msra.mxu1 %v15054_v12  ;;  %v15067_v12 = vld [vmem:[#allocation256_spill] sm:$0xff]  ;;  %v5961_v43 = vpop.f32.mrf.mxu3  ;;  %v5257_v18 = vmul.f32 %v15056_v17, %v15072_v31  ;;  %v5637_v0 = vpop.f32.mrf.mxu1 }
 0x9bf   : > { %v4128_v1 = vadd.f32 %v4112_v14, %v3988_v40  ;;  %v5713_v24 = vadd.f32 %v5697_v39, %v5405_v28  ;;  %v12783_v10 = vadd.f32 %v5983_v35, %v12588_v63  ;;  %v5987_v63 = vmul.f32 %v12758_v11, %v5961_v43  ;;  %v15075_v39 = vld [vmem:[#allocation322_spill] sm:$0xff]  ;;  %v15077_v28 = vld [vmem:[#allocation263_spill] sm:$0xff]  ;;  %v15081_v35 = vld [vmem:[#allocation297_spill] sm:$0xff] }
 0x9c0   : > { %v5700_v21 = vmul.f32 %v12723_v15, %v5637_v0  ;;  %v5397_v40 = vmul.f32 %v15061_v26, %v15075_v39  ;;  %v15080_v26 = vld [vmem:[#allocation301_spill] sm:$0xff]  ;;  %v15088_v43 = vld [vmem:[#allocation300_spill] sm:$0xff]  ;;  %v15095_v39 = vld [vmem:[#allocation142_spill] sm:$0xff] }
 0x9c1   : > { %6223 = vmatpush.bf16.xpose.msrb.mxu2 %v15058_v20  ;;  %v4280_v41 = vadd.f32 %v4264_v4, %v4128_v1  ;;  %v12785_v61 = vadd.f32 %v5837_v13, %v5713_v24  ;;  %v12802_v46 = vadd.f32 %v5987_v63, %v12608_v38  ;;  %v15076_v4 = vld [vmem:[#allocation265_spill] sm:$0xff]  ;;  %v5705_v24 = vmul.f32 %v12514_v47, %v12700_v62  ;;  %v15085_v47 = vld [vmem:[#allocation302_spill] sm:$0xff]  ;;  %v15086_v62 = vld [vmem:[#allocation299_spill] sm:$0xff] }
 0x9c2   : > { %7163 = vmatmul.msk.bf16.gmra.mxu3 %vm1158_vm5, %v12767_v56  ;;  %v5796_v34 = vpop.f32.mrf.mxu2  ;;  %v1352_v1 = vmul.f32 %v15077_v28, %v15076_v4  ;;  %v2012_v38 = vmul.f32 %v15081_v35, %v15080_v26  ;;  %v15089_v31 = vld [vmem:[#allocation56_spill] sm:$0xff] }
 0x9c3   : > { %6381 = vmatpush.bf16.xpose.msra.mxu3 %v15057_v55  ;;  %v4430_v55 = vadd.f32 %v4414_v16, %v4280_v41  ;;  %v5841_v14 = vmul.f32 %v12718_v60, %v5796_v34  ;;  %v15079_v16 = vld [vmem:[#allocation264_spill] sm:$0xff] }
 0x9c4   : > { %v1624_v49 = vmul.f32 %v15079_v16, %v15078_v50  ;;  %v15098_v50 = vld [vmem:[#allocation255_spill] sm:$0xff] }
 0x9c5   : > { %v4570_v20 = vadd.f32 %v4554_v45, %v4430_v55  ;;  %v12805_v17 = vadd.f32 %v5841_v14, %v12611_v22  ;;  %v15083_v55 = vld [vmem:[#allocation238_spill] sm:$0xff] }
 0x9c6   : > { %6064 = vmatpush.bf16.xpose.msra.mxu1 %v15065_v6  ;;  %v12812_v6 = vadd.f32 %v5700_v21, %v12616_v51  ;;  %v1640_v13 = vadd.f32 %v1624_v49, %v1352_v1  ;;  %v5964_v22 = vpop.f32.mrf.mxu3  ;;  %v15092_v14 = vld [vmem:[#allocation350_spill] sm:$0xff]  ;;  %v15097_v1 = vld [vmem:[#allocation217_spill] sm:$0xff] }
 0x9c7   : > { %v4980_v44 = vadd.f32 %v4964_v7, %v4570_v20  ;;  %v5991_v45 = vmul.f32 %v12758_v11, %v5964_v22  ;;  %v2356_v20 = vmul.f32 %v15086_v62, %v15085_v47  ;;  %v3194_v49 = vmul.f32 %v15098_v50, %v15097_v1  ;;  %v15102_v22 = vld [vmem:[#allocation203_spill] sm:$0xff]  ;;  %v15107_v47 = vld [vmem:[#allocation97_spill] sm:$0xff] }
 0x9c8   : > { %v2028_v7 = vadd.f32 %v2012_v38, %v1640_v13  ;;  %v15100_v38 = vld [vmem:[#allocation268_spill] sm:$0xff]  ;;  %v15101_v13 = vld [vmem:[#allocation190_spill] sm:$0xff] }
 0x9c9   : > { %6224 = vmatpush.bf16.xpose.msrb.mxu2 %v15067_v12  ;;  %v5133_v30 = vadd.f32 %v5117_v37, %v4980_v44  ;;  %v15082_v12 = vld [vmem:[#allocation154_spill] sm:$0xff]  ;;  %v12826_v23 = vadd.f32 %v5991_v45, %v12637_v8  ;;  %v15087_v44 = vld [vmem:[#allocation303_spill] sm:$0xff]  ;;  %v15094_v8 = vld [vmem:[#allocation241_spill] sm:$0xff] }
 0x9ca   : > { %v5798_v41 = vpop.f32.mrf.mxu2  ;;  %v2372_v34 = vadd.f32 %v2356_v20, %v2028_v7 }
 0x9cb   : > { %6382 = vmatpush.bf16.xpose.msra.mxu3 %v15066_v36  ;;  %v5273_v5 = vadd.f32 %v5257_v18, %v5133_v30  ;;  %v5845_v51 = vmul.f32 %v12718_v60, %v5798_v41  ;;  %v15090_v18 = vld [vmem:[#allocation70_spill] sm:$0xff]  ;;  %v15091_v60 = vld [vmem:[#allocation160_spill] sm:$0xff] }
 0x9cc   : > { %v2901_v63 = vmul.f32 %v15090_v18, %v15089_v31  ;;  %v15103_v41 = vld [vmem:[#allocation306_spill] sm:$0xff] }
 0x9cd   : > { %v5413_v36 = vadd.f32 %v5397_v40, %v5273_v5  ;;  %v15096_v40 = vld [vmem:[#allocation248_spill] sm:$0xff] }
 0x9ce   : > { %6065 = vmatpush.bf16.xpose.msra.mxu1 %v15071_v2  ;;  %v2560_v2 = vmul.f32 %v15088_v43, %v15087_v44  ;;  %v15109_v44 = vld [vmem:[#allocation244_spill] sm:$0xff] }
 0x9cf   : > { %v5721_v29 = vadd.f32 %v5705_v24, %v5413_v36  ;;  %v15099_v24 = vld [vmem:[#allocation267_spill] sm:$0xff]  ;;  %v1632_v36 = vmul.f32 %v15079_v16, %v15100_v38  ;;  %v15108_v16 = vld [vmem:[#allocation228_spill] sm:$0xff]  ;;  %v15119_v38 = vld [vmem:[#allocation54_spill] sm:$0xff] }
 0x9d0   : > { %v2576_v0 = vadd.f32 %v2560_v2, %v2372_v34  ;;  %v1360_v26 = vmul.f32 %v15077_v28, %v15099_v24  ;;  %v3638_v20 = vmul.f32 %v15108_v16, %v15107_v47  ;;  %v15110_v2 = vld [vmem:[#allocation133_spill] sm:$0xff]  ;;  %v15127_v47 = vld [vmem:[#allocation318_spill] sm:$0xff] }
 0x9d1   : > { %6225 = vmatpush.bf16.xpose.msrb.mxu2 %v15074_v25  ;;  %v12828_v37 = vadd.f32 %v5845_v51, %v5721_v29  ;;  %v15093_v25 = vld [vmem:[#allocation39_spill] sm:$0xff]  ;;  %v2020_v29 = vmul.f32 %v15081_v35, %v15103_v41  ;;  %v15105_v51 = vld [vmem:[#allocation165_spill] sm:$0xff]  ;;  %v15122_v41 = vld [vmem:[#allocation38_spill] sm:$0xff] }
 0x9d2   : > { %v3054_v21 = vmul.f32 %v15093_v25, %v15092_v14  ;;  %v2917_v4 = vadd.f32 %v2901_v63, %v2576_v0  ;;  %v1648_v7 = vadd.f32 %v1632_v36, %v1360_v26  ;;  %v15111_v35 = vld [vmem:[#allocation307_spill] sm:$0xff]  ;;  %v15114_v0 = vld [vmem:[#allocation61_spill] sm:$0xff] }
 0x9d3   : > { %6383 = vmatpush.bf16.xpose.msra.mxu3 %v15073_v58  ;;  %v5966_v58 = vpop.f32.mrf.mxu3  ;;  %v2364_v31 = vmul.f32 %v15086_v62, %v15111_v35  ;;  %v15112_v63 = vld [vmem:[#allocation35_spill] sm:$0xff]  ;;  %v15120_v62 = vld [vmem:[#allocation37_spill] sm:$0xff] }
 0x9d4   : > { %v5995_v30 = vmul.f32 %v12758_v11, %v5966_v58  ;;  %v3070_v11 = vadd.f32 %v3054_v21, %v2917_v4  ;;  %v2036_v34 = vadd.f32 %v2020_v29, %v1648_v7  ;;  %v15115_v21 = vld [vmem:[#allocation309_spill] sm:$0xff]  ;;  %v4103_v36 = vmul.f32 %v15120_v62, %v15119_v38  ;;  %v15123_v29 = vld [vmem:[#allocation175_spill] sm:$0xff] }
 0x9d6   : > { %6066 = vmatpush.bf16.xpose.msra.mxu1 %v15082_v12  ;;  %v12844_v5 = vadd.f32 %v5995_v30, %v12656_v33  ;;  %v3341_v12 = vmul.f32 %v15102_v22, %v15101_v13  ;;  %v3210_v45 = vadd.f32 %v3194_v49, %v3070_v11  ;;  %v15106_v33 = vld [vmem:[#allocation163_spill] sm:$0xff]  ;;  %v2568_v30 = vmul.f32 %v15088_v43, %v15115_v21  ;;  %v15118_v49 = vld [vmem:[#allocation234_spill] sm:$0xff]  ;;  %v15121_v13 = vld [vmem:[#allocation252_spill] sm:$0xff] }
 0x9d7   : > { %v2380_v1 = vadd.f32 %v2364_v31, %v2036_v34  ;;  %v2909_v24 = vmul.f32 %v15090_v18, %v15118_v49  ;;  %v12883_v43 = vld [vmem:[%s13072_s2 + $0x1a0] sm:$0xff]  ;;  %v15129_v34 = vld [vmem:[#allocation113_spill] sm:$0xff]  ;;  %v12909_v49 = vperm.slane %v12553_v27, 1 }
 0x9d8   : > { %v3357_v28 = vadd.f32 %v3341_v12, %v3210_v45  ;;  %v3062_v12 = vmul.f32 %v15093_v25, %v15121_v13  ;;  %v4255_v45 = vmul.f32 %v15123_v29, %v15122_v41  ;;  %v15126_v25 = vld [vmem:[#allocation123_spill] sm:$0xff]  ;;  %v3349_v35 = vmul.f32 %v15102_v22, %v15129_v34  ;;  %v15132_v21 = vld [vmem:[#allocation105_spill] sm:$0xff] }
 0x9d9   : > { %6226 = vmatpush.bf16.xpose.msrb.mxu2 %v15084_v48  ;;  %v2584_v11 = vadd.f32 %v2568_v30, %v2380_v1  ;;  %v12904_v30 = vperm.slane %v12755_v52, 2  ;;  %v15135_v22 = vld [vmem:[#allocation69_spill] sm:$0xff]  ;;  %v15138_v13 = vld [vmem:[#allocation119_spill] sm:$0xff] }
 0x9da   : > { %v15139_v27 = vld [vmem:[#allocation29_spill] sm:$0xff] }
 0x9db   : > { %6384 = vmatpush.bf16.xpose.msra.mxu3 %v15083_v55  ;;  %v15104_v55 = vld [vmem:[#allocation136_spill] sm:$0xff] }
 0x9dc   : > { %v3494_v48 = vmul.f32 %v15105_v51, %v15104_v55  ;;  %v15124_v55 = vld [vmem:[#allocation126_spill] sm:$0xff] }
 0x9de   : > { %6067 = vmatpush.bf16.xpose.msra.mxu1 %v15091_v60  ;;  %v3510_v58 = vadd.f32 %v3494_v48, %v3357_v28  ;;  %v15113_v60 = vld [vmem:[#allocation235_spill] sm:$0xff]  ;;  %v2925_v48 = vadd.f32 %v2909_v24, %v2584_v11 }
 0x9df   : > { %v3799_v14 = vmul.f32 %v15114_v0, %v15113_v60 }
 0x9e1   : > { %6227 = vmatpush.bf16.xpose.msrb.mxu2 %v15095_v39  ;;  %v15116_v39 = vld [vmem:[#allocation41_spill] sm:$0xff] }
 0x9e3   : > { %6385 = vmatpush.bf16.xpose.msra.mxu3 %v15094_v8  ;;  %v3654_v8 = vadd.f32 %v3638_v20, %v3510_v58  ;;  %v15128_v20 = vld [vmem:[#allocation28_spill] sm:$0xff]  ;;  %v15131_v58 = vld [vmem:[#allocation321_spill] sm:$0xff] }
 0x9e5   : > { %v3815_v26 = vadd.f32 %v3799_v14, %v3654_v8 }
 0x9e6   : > { %6068 = vmatpush.bf16.xpose.msra.mxu1 %v15106_v33  ;;  %v12892_v33 = vpop.f32.mrf.mxu1 }
 0x9e8   : > { %7160 = vmatmul.msk.bf16.vlgmr.msrb.gmra.mxu2 %vm1158_vm5, %v12694_v59 }
 0x9e9   : > { %6360 = vmatpush.bf16.xpose.msra.mxu2 %v15096_v40  ;;  %v15117_v40 = vld [vmem:[#allocation240_spill] sm:$0xff] }
 0x9ea   : > { %v3963_v4 = vmul.f32 %v15117_v40, %v15116_v39  ;;  %v15133_v39 = vld [vmem:[#allocation215_spill] sm:$0xff] }
 0x9eb   : > { %6386 = vmatpush.bf16.xpose.msra.mxu3 %v15109_v44  ;;  %v4405_v44 = vmul.f32 %v15128_v20, %v15127_v47 }
 0x9ec   : > { %v3979_v18 = vadd.f32 %v3963_v4, %v3815_v26  ;;  %v15134_v4 = vld [vmem:[#allocation272_spill] sm:$0xff]  ;;  %v3646_v26 = vmul.f32 %v15108_v16, %v15135_v22  ;;  %v15148_v22 = vld [vmem:[#allocation147_spill] sm:$0xff] }
 0x9ed   : > { %7137 = vmatmul.msk.bf16.vlgmr.msra.gmra.mxu1 %vm1158_vm5, %v12492_v53  ;;  %v15125_v53 = vld [vmem:[#allocation135_spill] sm:$0xff]  ;;  %v4955_v1 = vmul.f32 %v15134_v4, %v15133_v39 }
 0x9ee   : > { %6201 = vmatpush.bf16.xpose.msrb.mxu1 %v15110_v2  ;;  %v3202_v7 = vmul.f32 %v15098_v50, %v15125_v53  ;;  %v4119_v28 = vadd.f32 %v4103_v36, %v3979_v18  ;;  %v3078_v2 = vadd.f32 %v3062_v12, %v2925_v48  ;;  %v3502_v50 = vmul.f32 %v15105_v51, %v15132_v21  ;;  %v15136_v36 = vld [vmem:[#allocation68_spill] sm:$0xff]  ;;  %v5940_v12 = vpop.f32.mrf.mxu2  ;;  %v5772_v41 = vpop.f32.mrf.mxu1  ;;  %v15141_v53 = vld [vmem:[#allocation122_spill] sm:$0xff] }
 0x9ef   : > { %v15137_v51 = vld [vmem:[#allocation292_spill] sm:$0xff] }
 0x9f0   : > { %v4271_v31 = vadd.f32 %v4255_v45, %v4119_v28  ;;  %v3218_v14 = vadd.f32 %v3202_v7, %v3078_v2  ;;  %v5108_v11 = vmul.f32 %v15137_v51, %v15136_v36  ;;  %v5982_v45 = vmul.f32 %v12904_v30, %v5940_v12  ;;  %v15142_v7 = vld [vmem:[#allocation305_spill] sm:$0xff]  ;;  %v15143_v2 = vld [vmem:[#allocation46_spill] sm:$0xff] }
 0x9f1   : > { %6361 = vmatpush.bf16.xpose.msra.mxu2 %v15112_v63  ;;  %v15130_v63 = vld [vmem:[#allocation323_spill] sm:$0xff]  ;;  %v5832_v28 = vmul.f32 %v12909_v49, %v5772_v41  ;;  %v3971_v34 = vmul.f32 %v15117_v40, %v15143_v2  ;;  %v15154_v2 = vld [vmem:[#allocation329_spill] sm:$0xff] }
 0x9f2   : > { %7183 = vmatmul.msk.bf16.vlgmr.msra.gmra.mxu3 %vm1158_vm5, %v12883_v43  ;;  %v4545_v60 = vmul.f32 %v15131_v58, %v15130_v63  ;;  %v4421_v8 = vadd.f32 %v4405_v44, %v4271_v31  ;;  %v3365_v24 = vadd.f32 %v3349_v35, %v3218_v14  ;;  %v12926_v44 = vadd.f32 %v5982_v45, %v12743_v19  ;;  %v12944_v19 = vld [vmem:[%s13072_s2 + $0x1a8] sm:$0xff]  ;;  %v15150_v45 = vld [vmem:[#allocation86_spill] sm:$0xff] }
 0x9f3   : > { %v5388_v31 = vmul.f32 %v12519_v42, %v12580_v9  ;;  %v12933_v63 = vadd.f32 %v5832_v28, %v12748_v54  ;;  %v15145_v54 = vld [vmem:[#allocation34_spill] sm:$0xff]  ;;  %v15153_v28 = vld [vmem:[#allocation251_spill] sm:$0xff] }
 0x9f4   : > { %v4561_v38 = vadd.f32 %v4545_v60, %v4421_v8  ;;  %v3518_v18 = vadd.f32 %v3502_v50, %v3365_v24  ;;  %v15144_v60 = vld [vmem:[#allocation77_spill] sm:$0xff]  ;;  %v5696_v50 = vmul.f32 %v12723_v15, %v12776_v32  ;;  %v4263_v40 = vmul.f32 %v15123_v29, %v15145_v54  ;;  %v15146_v8 = vld [vmem:[#allocation112_spill] sm:$0xff]  ;;  %v15156_v54 = vld [vmem:[#allocation75_spill] sm:$0xff] }
 0x9f5   : > { %v4111_v14 = vmul.f32 %v15120_v62, %v15144_v60  ;;  %v5704_v60 = vmul.f32 %v12723_v15, %v12892_v33  ;;  %v15159_v15 = vld [vmem:[#allocation76_spill] sm:$0xff]  ;;  %v15160_v33 = vld [vmem:[#allocation22_spill] sm:$0xff] }
 0x9f6   : > { %6202 = vmatpush.bf16.xpose.msrb.mxu1 %v15124_v55  ;;  %v15140_v55 = vld [vmem:[#allocation59_spill] sm:$0xff]  ;;  %v4971_v16 = vadd.f32 %v4955_v1, %v4561_v38  ;;  %v3662_v47 = vadd.f32 %v3646_v26, %v3518_v18  ;;  %v5942_v39 = vpop.f32.mrf.mxu2  ;;  %v5774_v32 = vpop.f32.mrf.mxu1  ;;  %v4413_v26 = vmul.f32 %v15128_v20, %v15148_v22 }
 0x9f7   : > { %v3807_v48 = vmul.f32 %v15114_v0, %v15140_v55  ;;  %v5986_v1 = vmul.f32 %v12904_v30, %v5942_v39  ;;  %v5836_v36 = vmul.f32 %v12909_v49, %v5774_v32  ;;  %v15152_v20 = vld [vmem:[#allocation103_spill] sm:$0xff]  ;;  %v15162_v39 = vld [vmem:[#allocation197_spill] sm:$0xff] }
 0x9f8   : > { %7161 = vmatmul.msk.bf16.gmra.mxu2 %vm1158_vm5, %v12767_v56  ;;  %v5124_v35 = vadd.f32 %v5108_v11, %v4971_v16 }
 0x9f9   : > { %6362 = vmatpush.bf16.xpose.msra.mxu2 %v15126_v25  ;;  %v5248_v25 = vmul.f32 %v15142_v7, %v15141_v53  ;;  %v3823_v0 = vadd.f32 %v3807_v48, %v3662_v47  ;;  %v12957_v11 = vadd.f32 %v5986_v1, %v12785_v61  ;;  %v15151_v48 = vld [vmem:[#allocation249_spill] sm:$0xff] }
 0x9fa   : > { %v5116_v16 = vmul.f32 %v15137_v51, %v15151_v48  ;;  %v5396_v51 = vmul.f32 %v12519_v42, %v12705_v57 }
 0x9fb   : > { %v5264_v21 = vadd.f32 %v5248_v25, %v5124_v35  ;;  %v3987_v9 = vadd.f32 %v3971_v34, %v3823_v0 }
 0x9fd   : > { %7138 = vmatmul.msk.bf16.gmra.mxu1 %vm1158_vm5, %v12567_v3  ;;  %v5404_v62 = vadd.f32 %v5388_v31, %v5264_v21  ;;  %v15147_v3 = vld [vmem:[#allocation52_spill] sm:$0xff]  ;;  %v4127_v24 = vadd.f32 %v4111_v14, %v3987_v9  ;;  %v15155_v21 = vld [vmem:[#allocation94_spill] sm:$0xff] }
 0x9fe   : > { %6203 = vmatpush.bf16.xpose.msrb.mxu1 %v15138_v13  ;;  %v15149_v13 = vld [vmem:[#allocation67_spill] sm:$0xff]  ;;  %v5945_v53 = vpop.f32.mrf.mxu2  ;;  %v5777_v25 = vpop.f32.mrf.mxu1 }
 0x9ff   : > { %v5712_v38 = vadd.f32 %v5696_v50, %v5404_v62  ;;  %v4279_v29 = vadd.f32 %v4263_v40, %v4127_v24  ;;  %v4553_v12 = vmul.f32 %v15131_v58, %v15149_v13  ;;  %v5990_v61 = vmul.f32 %v12904_v30, %v5945_v53  ;;  %v15158_v62 = vld [vmem:[#allocation60_spill] sm:$0xff]  ;;  %v15163_v24 = vld [vmem:[#allocation30_spill] sm:$0xff] }
 0xa00   : > { %v5256_v58 = vmul.f32 %v15142_v7, %v15154_v2  ;;  %v5840_v34 = vmul.f32 %v12909_v49, %v5777_v25  ;;  %v13020_v25 = vld [vmem:[%s13073_s3 + $0x60] ss:$8 sm:$0xf] }
 0xa01   : > { %6363 = vmatpush.bf16.xpose.msra.mxu2 %v15139_v27  ;;  %v5852_v18 = vadd.f32 %v5836_v36, %v5712_v38  ;;  %v4429_v41 = vadd.f32 %v4413_v26, %v4279_v29  ;;  %v4963_v27 = vmul.f32 %v15134_v4, %v15150_v45  ;;  %v12972_v4 = vadd.f32 %v5990_v61, %v12805_v17  ;;  %v15164_v38 = vld [vmem:[#allocation182_spill] sm:$0xff] }
 0xa02   : > { %7184 = vmatmul.msk.bf16.gmra.mxu3 %vm1158_vm5, %v12944_v19  ;;  %v5856_v31 = vadd.f32 %v5840_v34, %v12812_v6  ;;  %v15157_v6 = vld [vmem:[#allocation85_spill] sm:$0xff]  ;;  %v6124_v61 = vperm.slane %v13020_v25, 3 }
 0xa03   : > { %v4569_v55 = vadd.f32 %v4553_v12, %v4429_v41  ;;  %v15165_v41 = vld [vmem:[#allocation189_spill] sm:$0xff] }
 0xa05   : > { %v4979_v47 = vadd.f32 %v4963_v27, %v4569_v55  ;;  %v15166_v55 = vld [vmem:[#allocation166_spill] sm:$0xff] }
 0xa06   : > { %6204 = vmatpush.bf16.xpose.msrb.mxu1 %v15146_v8  ;;  %v5947_v50 = vpop.f32.mrf.mxu2  ;;  %v5779_v7 = vpop.f32.mrf.mxu1 }
 0xa07   : > { %v5132_v35 = vadd.f32 %v5116_v16, %v4979_v47  ;;  %v5994_v9 = vmul.f32 %v12904_v30, %v5947_v50  ;;  %v5844_v40 = vmul.f32 %v12909_v49, %v5779_v7  ;;  %v6108_v30 = vpop.f32.mrf.mxu3  ;;  %v15161_v49 = vld [vmem:[#allocation42_spill] sm:$0xff] }
 0xa08   : > { %v13026_v47 = vld [vmem:[%s13073_s3 + $0x61] ss:$8 sm:$0xf]  ;;  %v6132_v34 = vmul.f32 %v6124_v61, %v6108_v30 }
 0xa09   : > { %6364 = vmatpush.bf16.xpose.msra.mxu2 %v15147_v3  ;;  %v5272_v0 = vadd.f32 %v5256_v58, %v5132_v35  ;;  %v12984_v42 = vadd.f32 %v5994_v9, %v12828_v37  ;;  %v5973_v37 = vperm.slane %v12755_v52, 1  ;;  %v6264_v2 = vperm.slane %v13026_v47, 3  ;;  %v13032_v35 = vld [vmem:[%s13073_s3 + $0x62] ss:$8 sm:$0xf] }
 0xa0b   : > { %v5412_v14 = vadd.f32 %v5396_v51, %v5272_v0  ;;  %v6404_v51 = vperm.slane %v13032_v35, 3 }
 0xa0d   : > { %v5720_v17 = vadd.f32 %v5704_v60, %v5412_v14 }
 0xa0e   : > { %6205 = vmatpush.bf16.xpose.msrb.mxu1 %v15152_v20 }
 0xa0f   : > { %v5860_v57 = vadd.f32 %v5844_v40, %v5720_v17  ;;  %v6110_v8 = vpop.f32.mrf.mxu3 }
 0xa11   : > { %6365 = vmatpush.bf16.xpose.msra.mxu2 %v15153_v28 }
 0xa16   : > { %6206 = vmatpush.bf16.xpose.msrb.mxu1 %v15155_v21  ;;  %v6136_v21 = vmul.f32 %v6124_v61, %v6110_v8 }
 0xa19   : > { %6366 = vmatpush.bf16.xpose.msra.mxu2 %v15156_v54  ;;  %v6152_v54 = vadd.f32 %v6136_v21, %v12802_v46 }
 0xa1e   : > { %6207 = vmatpush.bf16.xpose.msrb.mxu1 %v15157_v6 }
 0xa21   : > { %6367 = vmatpush.bf16.xpose.msra.mxu2 %v15158_v62 }
 0xa26   : > { %6208 = vmatpush.bf16.xpose.msrb.mxu1 %v15159_v15 }
 0xa28   : > { %7181 = vmatmul.msk.bf16.vlgmr.msra.gmra.mxu2 %vm1158_vm5, %v12883_v43 }
 0xa2a   : > { %v5921_v32 = vpop.f32.mrf.mxu1 }
 0xa2b   : > { %v5981_v1 = vmul.f32 %v5973_v37, %v5921_v32  ;;  %v6089_v16 = vpop.f32.mrf.mxu2 }
 0xa2d   : > { %7158 = vmatmul.msk.bf16.vlgmr.msrb.gmra.mxu1 %vm1158_vm5, %v12694_v59  ;;  %v13000_v3 = vadd.f32 %v5981_v1, %v12933_v63  ;;  %v6113_v59 = vpop.f32.mrf.mxu3 }
 0xa2e   : > { %6341 = vmatpush.bf16.xpose.msra.mxu1 %v15160_v33  ;;  %v6140_v6 = vmul.f32 %v6124_v61, %v6113_v59 }
 0xa32   : > { %v5923_v22 = vpop.f32.mrf.mxu1 }
 0xa33   : > { %v5985_v26 = vmul.f32 %v5973_v37, %v5923_v22  ;;  %v6091_v53 = vpop.f32.mrf.mxu2 }
 0xa35   : > { %v13005_v52 = vadd.f32 %v5985_v26, %v5852_v18  ;;  %v6115_v13 = vpop.f32.mrf.mxu3  ;;  %v15167_v18 = vld [vmem:[#allocation157_spill] sm:$0xff] }
 0xa36   : > { %6342 = vmatpush.bf16.xpose.msra.mxu1 %v15161_v49 }
 0xa38   : > { %7182 = vmatmul.msk.bf16.gmra.mxu2 %vm1158_vm5, %v12944_v19 }
 0xa3a   : > { %v5926_v36 = vpop.f32.mrf.mxu1 }
 0xa3b   : > { %v5989_v29 = vmul.f32 %v5973_v37, %v5926_v36  ;;  %v6094_v58 = vpop.f32.mrf.mxu2 }
 0xa3d   : > { %7159 = vmatmul.msk.bf16.gmra.mxu1 %vm1158_vm5, %v12767_v56  ;;  %v13008_v12 = vadd.f32 %v5989_v29, %v5856_v31  ;;  %v6248_v27 = vpop.f32.mrf.mxu3  ;;  %v6148_v31 = vadd.f32 %v6132_v34, %v12783_v10  ;;  %v6156_v10 = vadd.f32 %v6140_v6, %v12826_v23  ;;  %v6123_v23 = vperm.slane %v13020_v25, 2 }
 0xa3e   : > { %6343 = vmatpush.bf16.xpose.msra.mxu1 %v15162_v39 }
 0xa42   : > { %v5928_v63 = vpop.f32.mrf.mxu1 }
 0xa43   : > { %v5993_v45 = vmul.f32 %v5973_v37, %v5928_v63  ;;  %v6096_v50 = vpop.f32.mrf.mxu2  ;;  %v6144_v37 = vmul.f32 %v6124_v61, %v6115_v13  ;;  %v6263_v13 = vperm.slane %v13026_v47, 2 }
 0xa45   : > { %v13011_v56 = vadd.f32 %v5993_v45, %v5860_v57  ;;  %v6250_v48 = vpop.f32.mrf.mxu3  ;;  %v6160_v46 = vadd.f32 %v6144_v37, %v12844_v5  ;;  %v6403_v45 = vperm.slane %v13032_v35, 2 }
 0xa46   : > { %6344 = vmatpush.bf16.xpose.msra.mxu1 %v15163_v24  ;;  %v6276_v9 = vmul.f32 %v6264_v2, %v6250_v48 }
 0xa48   : > { %v6292_v40 = vadd.f32 %v6276_v9, %v6152_v54 }
 0xa4d   : > { %v6253_v20 = vpop.f32.mrf.mxu3 }
 0xa4e   : > { %6345 = vmatpush.bf16.xpose.msra.mxu1 %v15164_v38  ;;  %v6280_v15 = vmul.f32 %v6264_v2, %v6253_v20  ;;  %v6135_v20 = vmul.f32 %v6123_v23, %v6091_v53 }
 0xa50   : > { %v6296_v30 = vadd.f32 %v6280_v15, %v6156_v10  ;;  %v6262_v10 = vperm.slane %v13026_v47, 1 }
 0xa55   : > { %v6255_v28 = vpop.f32.mrf.mxu3 }
 0xa56   : > { %6346 = vmatpush.bf16.xpose.msra.mxu1 %v15165_v41  ;;  %v6284_v39 = vmul.f32 %v6264_v2, %v6255_v28  ;;  %v6131_v41 = vmul.f32 %v6123_v23, %v6089_v16 }
 0xa58   : > { %v6300_v24 = vadd.f32 %v6284_v39, %v6160_v46  ;;  %v6147_v5 = vadd.f32 %v6131_v41, %v12926_v44 }
 0xa5e   : > { %6347 = vmatpush.bf16.xpose.msra.mxu1 %v15166_v55 }
 0xa66   : > { %6348 = vmatpush.bf16.xpose.msra.mxu1 %v15167_v18 }
 0xa6a   : > { %v6070_v26 = vpop.f32.mrf.mxu1 }
 0xa6b   : > { %v6229_v62 = vpop.f32.mrf.mxu2 }
 0xa6c   : > { %v6271_v63 = vmul.f32 %v6263_v13, %v6229_v62 }
 0xa6d   : > { %7179 = vmatmul.msk.bf16.vlgmr.msra.gmra.mxu1 %vm1158_vm5, %v12883_v43  ;;  %v6272_v43 = vmul.f32 %v6264_v2, %v6248_v27  ;;  %v6151_v2 = vadd.f32 %v6135_v20, %v12957_v11 }
 0xa6e   : > { %v6287_v55 = vadd.f32 %v6271_v63, %v6147_v5 }
 0xa6f   : > { %v6288_v60 = vadd.f32 %v6272_v43, %v6148_v31 }
 0xa72   : > { %v6072_v36 = vpop.f32.mrf.mxu1 }
 0xa73   : > { %v6231_v32 = vpop.f32.mrf.mxu2 }
 0xa74   : > { %v6275_v28 = vmul.f32 %v6263_v13, %v6231_v32 }
 0xa75   : > { %v6388_v0 = vpop.f32.mrf.mxu3 }
 0xa76   : > { %v6412_v14 = vmul.f32 %v6404_v51, %v6388_v0  ;;  %v6291_v43 = vadd.f32 %v6275_v28, %v6151_v2 }
 0xa78   : > { %v6428_v7 = vadd.f32 %v6412_v14, %v6288_v60 }
 0xa7a   : > { %6444 = vst [vmem:[%s12246_s27 + $0x18] sm:$0xff] %v6428_v7  ;;  %v6075_v18 = vpop.f32.mrf.mxu1  ;;  %v6143_v7 = vmul.f32 %v6123_v23, %v6096_v50 }
 0xa7b   : > { %v6234_v38 = vpop.f32.mrf.mxu2 }
 0xa7c   : > { %v6279_v60 = vmul.f32 %v6263_v13, %v6234_v38  ;;  %v6159_v11 = vadd.f32 %v6143_v7, %v12984_v42 }
 0xa7d   : > { %7180 = vmatmul.msk.bf16.gmra.mxu1 %vm1158_vm5, %v12944_v19  ;;  %v6390_v17 = vpop.f32.mrf.mxu3 }
 0xa7e   : > { %v6416_v57 = vmul.f32 %v6404_v51, %v6390_v17 }
 0xa80   : > { %v6432_v19 = vadd.f32 %v6416_v57, %v6292_v40 }
 0xa82   : > { %6448 = vst [vmem:[%s12246_s27 + $0x38] sm:$0xff] %v6432_v19  ;;  %v6077_v0 = vpop.f32.mrf.mxu1 }
 0xa83   : > { %v6236_v29 = vpop.f32.mrf.mxu2 }
 0xa84   : > { %v6283_v17 = vmul.f32 %v6263_v13, %v6236_v29 }
 0xa85   : > { %v6393_v33 = vpop.f32.mrf.mxu3 }
 0xa86   : > { %v6420_v49 = vmul.f32 %v6404_v51, %v6393_v33  ;;  %v6299_v57 = vadd.f32 %v6283_v17, %v6159_v11 }
 0xa88   : > { %v6436_v8 = vadd.f32 %v6420_v49, %v6296_v30  ;;  %v6402_v30 = vperm.slane %v13032_v35, 1 }
 0xa8a   : > { %6452 = vst [vmem:[%s12315_s9 + $0x18] sm:$0xff] %v6436_v8 }
 0xa8d   : > { %v6395_v1 = vpop.f32.mrf.mxu3 }
 0xa8e   : > { %v6424_v59 = vmul.f32 %v6404_v51, %v6395_v1  ;;  %v6139_v51 = vmul.f32 %v6123_v23, %v6094_v58 }
 0xa90   : > { %v6440_v22 = vadd.f32 %v6424_v59, %v6300_v24  ;;  %v6155_v44 = vadd.f32 %v6139_v51, %v12972_v4  ;;  %v6122_v4 = vperm.slane %v13020_v25, 1 }
 0xa92   : > { %6456 = vst [vmem:[%s12315_s9 + $0x38] sm:$0xff] %v6440_v22  ;;  %v6295_v21 = vadd.f32 %v6279_v60, %v6155_v44  ;;  %v6130_v50 = vmul.f32 %v6122_v4, %v6070_v26  ;;  %v6134_v39 = vmul.f32 %v6122_v4, %v6072_v36  ;;  %v6138_v59 = vmul.f32 %v6122_v4, %v6075_v18 }
 0xa93   : > { %v6142_v36 = vmul.f32 %v6122_v4, %v6077_v0 }
 0xa94   : > { %v6146_v42 = vadd.f32 %v6130_v50, %v13000_v3  ;;  %v6150_v25 = vadd.f32 %v6134_v39, %v13005_v52  ;;  %v6154_v3 = vadd.f32 %v6138_v59, %v13008_v12 }
 0xa95   : > { %v6158_v41 = vadd.f32 %v6142_v36, %v13011_v56 }
 0xaaa   : > { %v6210_v54 = vpop.f32.mrf.mxu1 }
 0xaab   : > { %v6369_v27 = vpop.f32.mrf.mxu2  ;;  %v6270_v33 = vmul.f32 %v6262_v10, %v6210_v54 }
 0xaac   : > { %v6411_v48 = vmul.f32 %v6403_v45, %v6369_v27 }
 0xaad   : > { %v6286_v37 = vadd.f32 %v6270_v33, %v6146_v42 }
 0xaae   : > { %v6427_v61 = vadd.f32 %v6411_v48, %v6287_v55 }
 0xab0   : > { %6443 = vst [vmem:[%s12246_s27 + $0x10] sm:$0xff] %v6427_v61 }
 0xab2   : > { %v6212_v62 = vpop.f32.mrf.mxu1 }
 0xab3   : > { %v6371_v34 = vpop.f32.mrf.mxu2  ;;  %v6274_v46 = vmul.f32 %v6262_v10, %v6212_v62 }
 0xab4   : > { %v6415_v16 = vmul.f32 %v6403_v45, %v6371_v34 }
 0xab5   : > { %v6290_v24 = vadd.f32 %v6274_v46, %v6150_v25 }
 0xab6   : > { %v6431_v31 = vadd.f32 %v6415_v16, %v6291_v43 }
 0xab8   : > { %6447 = vst [vmem:[%s12246_s27 + $0x30] sm:$0xff] %v6431_v31 }
 0xaba   : > { %v6215_v19 = vpop.f32.mrf.mxu1 }
 0xabb   : > { %v6374_v14 = vpop.f32.mrf.mxu2  ;;  %v6278_v35 = vmul.f32 %v6262_v10, %v6215_v19 }
 0xabc   : > { %v6419_v53 = vmul.f32 %v6403_v45, %v6374_v14 }
 0xabd   : > { %v6294_v38 = vadd.f32 %v6278_v35, %v6154_v3 }
 0xabe   : > { %v6435_v9 = vadd.f32 %v6419_v53, %v6295_v21 }
 0xac0   : > { %6451 = vst [vmem:[%s12315_s9 + $0x10] sm:$0xff] %v6435_v9 }
 0xac2   : > { %v6217_v15 = vpop.f32.mrf.mxu1 }
 0xac3   : > { %v6376_v40 = vpop.f32.mrf.mxu2  ;;  %v6282_v13 = vmul.f32 %v6262_v10, %v6217_v15 }
 0xac4   : > { %v6423_v58 = vmul.f32 %v6403_v45, %v6376_v40 }
 0xac5   : > { %v6298_v63 = vadd.f32 %v6282_v13, %v6158_v41 }
 0xac6   : > { %v6439_v6 = vadd.f32 %v6423_v58, %v6299_v57 }
 0xac8   : > { %6455 = vst [vmem:[%s12315_s9 + $0x30] sm:$0xff] %v6439_v6 }
 0xaea   : > { %v6350_v49 = vpop.f32.mrf.mxu1 }
 0xaeb   : > { %v6410_v8 = vmul.f32 %v6402_v30, %v6350_v49 }
 0xaed   : > { %v6426_v32 = vadd.f32 %v6410_v8, %v6286_v37 }
 0xaef   : > { %6442 = vst [vmem:[%s12246_s27 + $0x8] sm:$0xff] %v6426_v32 }
 0xaf2   : > { %v6352_v1 = vpop.f32.mrf.mxu1 }
 0xaf3   : > { %v6414_v47 = vmul.f32 %v6402_v30, %v6352_v1 }
 0xaf5   : > { %v6430_v22 = vadd.f32 %v6414_v47, %v6290_v24 }
 0xaf7   : > { %6446 = vst [vmem:[%s12246_s27 + $0x28] sm:$0xff] %v6430_v22 }
 0xafa   : > { %v6355_v26 = vpop.f32.mrf.mxu1 }
 0xafb   : > { %v6418_v23 = vmul.f32 %v6402_v30, %v6355_v26 }
 0xafd   : > { %v6434_v29 = vadd.f32 %v6418_v23, %v6294_v38 }
 0xaff   : > { %6450 = vst [vmem:[%s12315_s9 + $0x8] sm:$0xff] %v6434_v29 }
 0xb02   : > { %v6357_v52 = vpop.f32.mrf.mxu1 }
 0xb03   : > { %v6422_v45 = vmul.f32 %v6402_v30, %v6357_v52 }
 0xb05   : > { %v6438_v5 = vadd.f32 %v6422_v45, %v6298_v63 }
 0xb07   : > { %6454 = vst [vmem:[%s12315_s9 + $0x28] sm:$0xff] %v6438_v5 }
 0xb08 PF: > { %s16_s18 = sadd.s32 1, %s7329_s18  }
 0xb09   : > { %p13_p4 = scmp.ge.s32.totalorder %s16_s18, 4  }
 0xb0b   :  { %15 = sbr.rel (!%p13_p4) target bundleno = 1 (0x1), region = 130 }

</bundles_post_ra>
